<compile_context>
chip_gen: v6e
topology: v6e:2x2x1
jax: 0.10.0
libtpu: 0.0.40
codegen_flags: <defaults>
</compile_context>

<pallas_src>
import math

import jax
import jax.numpy as jnp
from jax import lax
from jax.experimental import pallas as pl
from jax.experimental.pallas import tpu as pltpu

GROUPS = 8
GN_EPS = 1e-5


# ---------------------------------------------------------------------------
# In-kernel helpers (traced Python; operate on Refs / values).
# ---------------------------------------------------------------------------
def _group_norm(h, gamma_ref, beta_ref, avg_ref):
    """GroupNorm(GROUPS, C) on [TB, P, C] (P = pixels).  avg_ref: [C, C] matrix
    with 1/n inside each group's block (n = P * C/GROUPS), 0 elsewhere."""
    s1 = jnp.sum(h, axis=1)                                           # [TB, C]
    s2 = jnp.sum(h * h, axis=1)                                       # [TB, C]
    mean_c = jnp.dot(s1, avg_ref[...], preferred_element_type=jnp.float32)
    ex2_c = jnp.dot(s2, avg_ref[...], preferred_element_type=jnp.float32)
    var_c = ex2_c - mean_c * mean_c
    inv_c = lax.rsqrt(var_c + GN_EPS)
    return (h - mean_c[:, None, :]) * inv_c[:, None, :] * gamma_ref[...] + beta_ref[...]


def _im2col_s1(pad_ref, im2_ref, h):
    """3x3, stride-1, pad-1 im2col.  h: [TB, H, W, Cin] -> [TB*H*W, 9*Cin].

    Only the 1-pixel border of pad_ref is zeroed (every call, so it stays
    correct if the grid is megacore-partitioned and program_id==0 never runs
    on the second core); the interior is overwritten each call."""
    tb, hh, ww, cin = h.shape
    zrow = jnp.zeros((tb, 1, ww + 2, cin), jnp.float32)
    zcol = jnp.zeros((tb, hh + 2, 1, cin), jnp.float32)
    pad_ref[:, 0:1, :, :] = zrow
    pad_ref[:, hh + 1:hh + 2, :, :] = zrow
    pad_ref[:, :, 0:1, :] = zcol
    pad_ref[:, :, ww + 1:ww + 2, :] = zcol
    pad_ref[:, 1:hh + 1, 1:ww + 1, :] = h
    for kh in range(3):
        for kw in range(3):
            k = kh * 3 + kw
            im2_ref[:, :, :, k * cin:(k + 1) * cin] = \
                pad_ref[:, kh:kh + hh, kw:kw + ww, :]
    return im2_ref[...].reshape(tb * hh * ww, 9 * cin)


def _im2col_s2(pad_e, pad_o, im2_ref, h_even_cols, h_odd_cols):
    """3x3, stride-2, pad-1 im2col.

    h_even_cols / h_odd_cols: [TB, H, W/2, Cin] = input columns of even / odd
    parity (already separated upstream at zero cost).  pad_e holds the padded
    even columns (0,2,...,W), pad_o the padded odd columns (1,3,...,W+1), each
    [TB, H+2, W/2+1, Cin].  Returns [TB*Ho*Wo, 9*Cin]."""
    tb, hh, wo, cin = h_even_cols.shape
    ho = hh // 2
    hp = ho + 1                                    # (H+2)//2 parity rows

    zrow = jnp.zeros((tb, 1, wo + 1, cin), jnp.float32)
    zcol = jnp.zeros((tb, hh + 2, 1, cin), jnp.float32)
    for ref in (pad_e, pad_o):
        ref[:, 0:1, :, :] = zrow
        ref[:, hh + 1:hh + 2, :, :] = zrow
    pad_e[:, :, 0:1, :] = zcol                     # padded column 0
    pad_o[:, :, wo:wo + 1, :] = zcol               # padded column W+1
    # padded even col 2*c2 (c2>=1) = input odd col 2*c2-1 ; padded odd col
    # 2*c2+1 (c2<wo) = input even col 2*c2.
    pad_e[:, 1:hh + 1, 1:wo + 1, :] = h_odd_cols
    pad_o[:, 1:hh + 1, 0:wo, :] = h_even_cols

    # Row-parity split is an outer-dim reshape (tile-aligned -> free).
    ve = pad_e[...].reshape(tb, hp, 2, wo + 1, cin)
    vo = pad_o[...].reshape(tb, hp, 2, wo + 1, cin)
    col_src = ((ve, 0), (vo, 0), (ve, 1))          # kw -> (parity array, col off)
    for kw in range(3):
        v, coff = col_src[kw]
        for kh in range(3):
            k = kh * 3 + kw
            tap = v[:, kh // 2:kh // 2 + ho, kh % 2, coff:coff + wo, :]
            im2_ref[:, :, :, k * cin:(k + 1) * cin] = tap
    return im2_ref[...].reshape(tb * ho * wo, 9 * cin)


def _mnist_cnn_kernel(x_ref, avg64_ref, avg128_ref,
                      w1_ref, b1_ref, g1_ref, be1_ref,
                      w2_ref, b2_ref, g2_ref, be2_ref,
                      w3_ref, b3_ref, g3_ref, be3_ref,
                      w4_ref, b4_ref, g4_ref, be4_ref,
                      o_ref,
                      pad_e, pad_o, im2_a, pad_b, im2_b):
    f32 = jnp.float32
    tb = pad_e.shape[0]
    hh = pad_e.shape[1] - 2
    wo = pad_e.shape[2] - 1
    ww = 2 * wo
    ho = hh // 2

    # ---- layer 1: conv1 as one [TB*H*W, 9*Cin] @ [9*Cin, 64] matmul (im2col on host)
    xc = x_ref[...].astype(f32)                                   # [TB, H*W, 9*Cin]
    y = jnp.dot(xc.reshape(tb * hh * ww, xc.shape[-1]), w1_ref[...],
                preferred_element_type=f32) + b1_ref[...]
    y = jnp.maximum(y, 0.0)
    h = _group_norm(y.reshape(tb, hh * ww, 64), g1_ref, be1_ref, avg64_ref)

    # Host ordered layer-1 pixels as (col_parity, row, col//2): free split.
    hsp = h.reshape(tb, 2, hh, wo, 64)
    h_even_cols, h_odd_cols = hsp[:, 0], hsp[:, 1]

    # ---- layer 2: stride-2 conv as one K=576 matmul
    cols = _im2col_s2(pad_e, pad_o, im2_a, h_even_cols, h_odd_cols)
    y = jnp.dot(cols, w2_ref[...], preferred_element_type=f32) + b2_ref[...]
    y = jnp.maximum(y, 0.0)
    h = _group_norm(y.reshape(tb, ho * wo, 128), g2_ref, be2_ref, avg128_ref)

    # ---- layer 3: stride-1 conv as one K=1152 matmul
    cols = _im2col_s1(pad_b, im2_b, h.reshape(tb, ho, wo, 128))
    y = jnp.dot(cols, w3_ref[...], preferred_element_type=f32) + b3_ref[...]
    y = jnp.maximum(y, 0.0)
    h = _group_norm(y.reshape(tb, ho * wo, 128), g3_ref, be3_ref, avg128_ref)

    # ---- layer 4
    cols = _im2col_s1(pad_b, im2_b, h.reshape(tb, ho, wo, 128))
    y = jnp.dot(cols, w4_ref[...], preferred_element_type=f32) + b4_ref[...]
    y = jnp.maximum(y, 0.0)
    h = _group_norm(y.reshape(tb, ho * wo, 128), g4_ref, be4_ref, avg128_ref)

    # ---- global average pool -> lane-dense [TB, 128] output tile
    o_ref[...] = (jnp.sum(h, axis=1) * (1.0 / (ho * wo))).astype(o_ref.dtype)


# ---------------------------------------------------------------------------
# Host-side wrapper.
# ---------------------------------------------------------------------------
def mnist_cnn_forward(x_nchw, params, *, batch_tile=8):
    """params: list of 4 tuples (w[3,3,Cin,Cout], b[Cout], gamma[Cout], beta[Cout])."""
    b, cin, hh, ww = x_nchw.shape
    assert hh % 2 == 0 and ww % 2 == 0, "even spatial dims required (stride-2 conv)"
    ho, wo = hh // 2, ww // 2

    # Legal batch tile: output tile (tb, 128) needs tb % 8 == 0 or tb == B.
    tb = min(batch_tile, b)
    if b % tb != 0 or (tb % 8 != 0 and tb != b):
        tb = b

    x = jnp.transpose(x_nchw, (0, 2, 3, 1)).astype(jnp.float32)     # NHWC

    # Host-side im2col for layer 1 (tap-major feature order: k*Cin + c), with
    # pixel rows ordered (col_parity, row, col//2) so the in-kernel stride-2
    # column selection is a free outer-dim reshape.
    xp = jnp.pad(x, ((0, 0), (1, 1), (1, 1), (0, 0)))
    x_cols = jnp.concatenate(
        [xp[:, kh:kh + hh, kw:kw + ww, :] for kh in range(3) for kw in range(3)],
        axis=-1)                                                      # [B,H,W,9*Cin]
    x_cols = x_cols.reshape(b, hh, wo, 2, 9 * cin)
    x_cols = jnp.transpose(x_cols, (0, 3, 1, 2, 4)).reshape(b, hh * ww, 9 * cin)

    def group_avg(c, n):
        gi = jnp.arange(c)[:, None] // (c // GROUPS)
        gj = jnp.arange(c)[None, :] // (c // GROUPS)
        return jnp.where(gi == gj, 1.0 / n, 0.0).astype(jnp.float32)

    avg64 = group_avg(64, hh * ww * (64 // GROUPS))        # layer 1 stats
    avg128 = group_avg(128, ho * wo * (128 // GROUPS))     # layers 2-4 stats

    flat_args = [x_cols, avg64, avg128]
    in_specs = [
        pl.BlockSpec((tb, hh * ww, 9 * cin), lambda i: (i, 0, 0)),
        pl.BlockSpec(avg64.shape, lambda i: (0, 0)),        # VMEM-resident
        pl.BlockSpec(avg128.shape, lambda i: (0, 0)),
    ]
    for (w, bias, gamma, beta) in params:
        w_cin, w_cout = w.shape[2], w.shape[3]
        w2d = w.reshape(9 * w_cin, w_cout)                   # tap-major [9*Cin, Cout]
        for arr in (w2d,
                    bias.reshape(1, w_cout),
                    gamma.reshape(1, w_cout),
                    beta.reshape(1, w_cout)):
            flat_args.append(arr.astype(jnp.float32))
            in_specs.append(pl.BlockSpec(arr.shape, lambda i: (0, 0)))  # resident

    out = pl.pallas_call(
        _mnist_cnn_kernel,
        out_shape=jax.ShapeDtypeStruct((b, 128), jnp.float32),
        grid=(b // tb,),
        in_specs=in_specs,
        out_specs=pl.BlockSpec((tb, 128), lambda i: (i, 0)),
        scratch_shapes=[
            pltpu.VMEM((tb, hh + 2, wo + 1, 64), jnp.float32),     # pad_e (even cols)
            pltpu.VMEM((tb, hh + 2, wo + 1, 64), jnp.float32),     # pad_o (odd cols)
            pltpu.VMEM((tb, ho, wo, 9 * 64), jnp.float32),         # im2col layer 2
            pltpu.VMEM((tb, ho + 2, wo + 2, 128), jnp.float32),    # padded h2/h3
            pltpu.VMEM((tb, ho, wo, 9 * 128), jnp.float32),        # im2col layers 3/4
        ],
        compiler_params=pltpu.CompilerParams(
            dimension_semantics=("parallel",)),
    )(*flat_args)
    return out


# ---------------------------------------------------------------------------
# Parameter init + plain-JAX reference.
# ---------------------------------------------------------------------------
def init_params(key, in_channels):
    specs = [(in_channels, 64), (64, 128), (128, 128), (128, 128)]
    params = []
    for cin, cout in specs:
        key, kw, kb, kg, kbe = jax.random.split(key, 5)
        bound = 1.0 / math.sqrt(cin * 9)
        w = jax.random.uniform(kw, (3, 3, cin, cout), jnp.float32, -bound, bound)
        bias = jax.random.uniform(kb, (cout,), jnp.float32, -bound, bound)
        gamma = 1.0 + 0.1 * jax.random.normal(kg, (cout,), jnp.float32)
        beta = 0.1 * jax.random.normal(kbe, (cout,), jnp.float32)
        params.append((w, bias, gamma, beta))
    return params


def _reference_forward(x_nchw, params):
    x = jnp.transpose(x_nchw, (0, 2, 3, 1)).astype(jnp.float32)

    def conv(h, w, bias, stride):
        y = lax.conv_general_dilated(
            h, w, (stride, stride), [(1, 1), (1, 1)],
            dimension_numbers=('NHWC', 'HWIO', 'NHWC'),
            precision=lax.Precision.HIGHEST)
        return y + bias

    def gn(h, gamma, beta):
        bb, hh, ww, c = h.shape
        hg = h.reshape(bb, hh, ww, GROUPS, c // GROUPS)
        mean = jnp.mean(hg, axis=(1, 2, 4), keepdims=True)
        var = jnp.mean((hg - mean) ** 2, axis=(1, 2, 4), keepdims=True)
        hn = ((hg - mean) / jnp.sqrt(var + GN_EPS)).reshape(bb, hh, ww, c)
        return hn * gamma + beta

    strides = (1, 2, 1, 1)
    h = x
    for (w, bias, gamma, beta), s in zip(params, strides):
        h = gn(jax.nn.relu(conv(h, w, bias, s)), gamma, beta)
    return jnp.mean(h, axis=(1, 2))                          # [B, 128]


if __name__ == "__main__":
    # Small shapes consistent with the module: x is [B, C_in, H, W].
    B, C_IN, H, W = 2, 4, 16, 16

    key = jax.random.PRNGKey(0)
    key, kx = jax.random.split(key)
    x = jax.random.normal(kx, (B, C_IN, H, W), jnp.float32)
    params = init_params(key, C_IN)

    y = mnist_cnn_forward(x, params)
    y = jax.block_until_ready(y)

    y_ref = _reference_forward(x, params)
    assert y.shape == (B, 128)
    max_err = float(jnp.max(jnp.abs(y - y_ref)))
    assert jnp.allclose(y, y_ref, atol=1e-2, rtol=1e-2), f"max abs err = {max_err}"

    print("KERNEL_OK")
</pallas_src>

<mosaic_0001>
module attributes {stable_mosaic.version = 11 : i64} {
  func.func @_mnist_cnn_kernel(%arg0: i32, %arg1: memref<2x256x36xf32, #tpu.memory_space<vmem>>, %arg2: memref<64x64xf32, #tpu.memory_space<vmem>>, %arg3: memref<128x128xf32, #tpu.memory_space<vmem>>, %arg4: memref<36x64xf32, #tpu.memory_space<vmem>>, %arg5: memref<1x64xf32, #tpu.memory_space<vmem>>, %arg6: memref<1x64xf32, #tpu.memory_space<vmem>>, %arg7: memref<1x64xf32, #tpu.memory_space<vmem>>, %arg8: memref<576x128xf32, #tpu.memory_space<vmem>>, %arg9: memref<1x128xf32, #tpu.memory_space<vmem>>, %arg10: memref<1x128xf32, #tpu.memory_space<vmem>>, %arg11: memref<1x128xf32, #tpu.memory_space<vmem>>, %arg12: memref<1152x128xf32, #tpu.memory_space<vmem>>, %arg13: memref<1x128xf32, #tpu.memory_space<vmem>>, %arg14: memref<1x128xf32, #tpu.memory_space<vmem>>, %arg15: memref<1x128xf32, #tpu.memory_space<vmem>>, %arg16: memref<1152x128xf32, #tpu.memory_space<vmem>>, %arg17: memref<1x128xf32, #tpu.memory_space<vmem>>, %arg18: memref<1x128xf32, #tpu.memory_space<vmem>>, %arg19: memref<1x128xf32, #tpu.memory_space<vmem>>, %arg20: memref<2x128xf32, #tpu.memory_space<vmem>>, %arg21: memref<2x18x9x64xf32, #tpu.memory_space<vmem>>, %arg22: memref<2x18x9x64xf32, #tpu.memory_space<vmem>>, %arg23: memref<2x8x8x576xf32, #tpu.memory_space<vmem>>, %arg24: memref<2x10x10x128xf32, #tpu.memory_space<vmem>>, %arg25: memref<2x8x8x1152xf32, #tpu.memory_space<vmem>>) attributes {dimension_semantics = [#tpu.dimension_semantics<parallel>], iteration_bounds = array<i64: 1>, scalar_prefetch = 0 : i64, scratch_operands = 5 : i64, tpu.core_type = #tpu.core_type<tc>, window_params = [{transform_indices = @transform_0, window_bounds = array<i64: 2, 256, 36>}, {pipeline_mode = #tpu.pipeline_mode<synchronous>, transform_indices = @transform_1, window_bounds = array<i64: 64, 64>}, {pipeline_mode = #tpu.pipeline_mode<synchronous>, transform_indices = @transform_2, window_bounds = array<i64: 128, 128>}, {pipeline_mode = #tpu.pipeline_mode<synchronous>, transform_indices = @transform_3, window_bounds = array<i64: 36, 64>}, {pipeline_mode = #tpu.pipeline_mode<synchronous>, transform_indices = @transform_4, window_bounds = array<i64: 1, 64>}, {pipeline_mode = #tpu.pipeline_mode<synchronous>, transform_indices = @transform_5, window_bounds = array<i64: 1, 64>}, {pipeline_mode = #tpu.pipeline_mode<synchronous>, transform_indices = @transform_6, window_bounds = array<i64: 1, 64>}, {pipeline_mode = #tpu.pipeline_mode<synchronous>, transform_indices = @transform_7, window_bounds = array<i64: 576, 128>}, {pipeline_mode = #tpu.pipeline_mode<synchronous>, transform_indices = @transform_8, window_bounds = array<i64: 1, 128>}, {pipeline_mode = #tpu.pipeline_mode<synchronous>, transform_indices = @transform_9, window_bounds = array<i64: 1, 128>}, {pipeline_mode = #tpu.pipeline_mode<synchronous>, transform_indices = @transform_10, window_bounds = array<i64: 1, 128>}, {pipeline_mode = #tpu.pipeline_mode<synchronous>, transform_indices = @transform_11, window_bounds = array<i64: 1152, 128>}, {pipeline_mode = #tpu.pipeline_mode<synchronous>, transform_indices = @transform_12, window_bounds = array<i64: 1, 128>}, {pipeline_mode = #tpu.pipeline_mode<synchronous>, transform_indices = @transform_13, window_bounds = array<i64: 1, 128>}, {pipeline_mode = #tpu.pipeline_mode<synchronous>, transform_indices = @transform_14, window_bounds = array<i64: 1, 128>}, {pipeline_mode = #tpu.pipeline_mode<synchronous>, transform_indices = @transform_15, window_bounds = array<i64: 1152, 128>}, {pipeline_mode = #tpu.pipeline_mode<synchronous>, transform_indices = @transform_16, window_bounds = array<i64: 1, 128>}, {pipeline_mode = #tpu.pipeline_mode<synchronous>, transform_indices = @transform_17, window_bounds = array<i64: 1, 128>}, {pipeline_mode = #tpu.pipeline_mode<synchronous>, transform_indices = @transform_18, window_bounds = array<i64: 1, 128>}, {transform_indices = @transform_19, window_bounds = array<i64: 2, 128>}]} {
    %c0 = arith.constant 0 : index
    %c0_0 = arith.constant 0 : index
    %c0_1 = arith.constant 0 : index
    %0 = vector.load %arg1[%c0, %c0_0, %c0_1] : memref<2x256x36xf32, #tpu.memory_space<vmem>>, vector<2x256x36xf32>
    %1 = vector.shape_cast %0 : vector<2x256x36xf32> to vector<512x36xf32>
    %c0_2 = arith.constant 0 : index
    %c0_3 = arith.constant 0 : index
    %2 = vector.load %arg4[%c0_2, %c0_3] : memref<36x64xf32, #tpu.memory_space<vmem>>, vector<36x64xf32>
    %cst = arith.constant dense<0.000000e+00> : vector<512x64xf32>
    %3 = tpu.matmul %1, %2, %cst {dimension_numbers = #tpu.dot_dimension_numbers<[1], [0], [0], [1], [0, 0, 1, 1], [], []>} : vector<512x36xf32>, vector<36x64xf32>, vector<512x64xf32> -> vector<512x64xf32>
    %c0_4 = arith.constant 0 : index
    %c0_5 = arith.constant 0 : index
    %4 = vector.load %arg5[%c0_4, %c0_5] : memref<1x64xf32, #tpu.memory_space<vmem>>, vector<1x64xf32>
    %5 = vector.broadcast %4 : vector<1x64xf32> to vector<512x64xf32>
    %6 = arith.addf %3, %5 : vector<512x64xf32>
    %cst_6 = arith.constant 0.000000e+00 : f32
    %7 = vector.broadcast %cst_6 : f32 to vector<512x64xf32>
    %8 = arith.maximumf %6, %7 : vector<512x64xf32>
    %9 = vector.shape_cast %8 : vector<512x64xf32> to vector<2x256x64xf32>
    %cst_7 = arith.constant dense<0.000000e+00> : vector<2x64xf32>
    %10 = vector.multi_reduction <add>, %9, %cst_7 [1] : vector<2x256x64xf32> to vector<2x64xf32>
    %11 = arith.mulf %9, %9 : vector<2x256x64xf32>
    %cst_8 = arith.constant dense<0.000000e+00> : vector<2x64xf32>
    %12 = vector.multi_reduction <add>, %11, %cst_8 [1] : vector<2x256x64xf32> to vector<2x64xf32>
    %c0_9 = arith.constant 0 : index
    %c0_10 = arith.constant 0 : index
    %13 = vector.load %arg2[%c0_9, %c0_10] : memref<64x64xf32, #tpu.memory_space<vmem>>, vector<64x64xf32>
    %cst_11 = arith.constant dense<0.000000e+00> : vector<2x64xf32>
    %14 = tpu.matmul %10, %13, %cst_11 {dimension_numbers = #tpu.dot_dimension_numbers<[1], [0], [0], [1], [0, 0, 1, 1], [], []>} : vector<2x64xf32>, vector<64x64xf32>, vector<2x64xf32> -> vector<2x64xf32>
    %c0_12 = arith.constant 0 : index
    %c0_13 = arith.constant 0 : index
    %15 = vector.load %arg2[%c0_12, %c0_13] : memref<64x64xf32, #tpu.memory_space<vmem>>, vector<64x64xf32>
    %cst_14 = arith.constant dense<0.000000e+00> : vector<2x64xf32>
    %16 = tpu.matmul %12, %15, %cst_14 {dimension_numbers = #tpu.dot_dimension_numbers<[1], [0], [0], [1], [0, 0, 1, 1], [], []>} : vector<2x64xf32>, vector<64x64xf32>, vector<2x64xf32> -> vector<2x64xf32>
    %17 = arith.mulf %14, %14 : vector<2x64xf32>
    %18 = arith.subf %16, %17 : vector<2x64xf32>
    %cst_15 = arith.constant 9.99999974E-6 : f32
    %19 = vector.broadcast %cst_15 : f32 to vector<2x64xf32>
    %20 = arith.addf %18, %19 : vector<2x64xf32>
    %21 = math.rsqrt %20 : vector<2x64xf32>
    %22 = vector.shape_cast %14 : vector<2x64xf32> to vector<2x1x64xf32>
    %23 = vector.broadcast %22 : vector<2x1x64xf32> to vector<2x256x64xf32>
    %24 = arith.subf %9, %23 : vector<2x256x64xf32>
    %25 = vector.shape_cast %21 : vector<2x64xf32> to vector<2x1x64xf32>
    %26 = vector.broadcast %25 : vector<2x1x64xf32> to vector<2x256x64xf32>
    %27 = arith.mulf %24, %26 : vector<2x256x64xf32>
    %c0_16 = arith.constant 0 : index
    %c0_17 = arith.constant 0 : index
    %28 = vector.load %arg6[%c0_16, %c0_17] : memref<1x64xf32, #tpu.memory_space<vmem>>, vector<1x64xf32>
    %29 = vector.shape_cast %28 : vector<1x64xf32> to vector<1x1x64xf32>
    %30 = vector.broadcast %29 : vector<1x1x64xf32> to vector<2x256x64xf32>
    %31 = arith.mulf %27, %30 : vector<2x256x64xf32>
    %c0_18 = arith.constant 0 : index
    %c0_19 = arith.constant 0 : index
    %32 = vector.load %arg7[%c0_18, %c0_19] : memref<1x64xf32, #tpu.memory_space<vmem>>, vector<1x64xf32>
    %33 = vector.shape_cast %32 : vector<1x64xf32> to vector<1x1x64xf32>
    %34 = vector.broadcast %33 : vector<1x1x64xf32> to vector<2x256x64xf32>
    %35 = arith.addf %31, %34 : vector<2x256x64xf32>
    %36 = vector.shape_cast %35 : vector<2x256x64xf32> to vector<2x2x16x8x64xf32>
    %37 = vector.extract_strided_slice %36 {offsets = [0, 0, 0, 0, 0], sizes = [2, 1, 16, 8, 64], strides = [1, 1, 1, 1, 1]} : vector<2x2x16x8x64xf32> to vector<2x1x16x8x64xf32>
    %38 = vector.shape_cast %37 : vector<2x1x16x8x64xf32> to vector<2x16x8x64xf32>
    %39 = vector.extract_strided_slice %36 {offsets = [0, 1, 0, 0, 0], sizes = [2, 1, 16, 8, 64], strides = [1, 1, 1, 1, 1]} : vector<2x2x16x8x64xf32> to vector<2x1x16x8x64xf32>
    %40 = vector.shape_cast %39 : vector<2x1x16x8x64xf32> to vector<2x16x8x64xf32>
    %cst_20 = arith.constant 0.000000e+00 : f32
    %41 = vector.broadcast %cst_20 : f32 to vector<2x1x9x64xf32>
    %cst_21 = arith.constant 0.000000e+00 : f32
    %42 = vector.broadcast %cst_21 : f32 to vector<2x18x1x64xf32>
    %c0_22 = arith.constant 0 : index
    %c0_23 = arith.constant 0 : index
    %c0_24 = arith.constant 0 : index
    %c0_25 = arith.constant 0 : index
    %43 = vector.load %arg21[%c0_22, %c0_23, %c0_24, %c0_25] : memref<2x18x9x64xf32, #tpu.memory_space<vmem>>, vector<2x1x9x64xf32>
    tpu.vector_store %arg21[%c0_22, %c0_23, %c0_24, %c0_25], %41 {strides = array<i32>} : memref<2x18x9x64xf32, #tpu.memory_space<vmem>>, vector<2x1x9x64xf32>,
    %c0_26 = arith.constant 0 : index
    %c17 = arith.constant 17 : index
    %c0_27 = arith.constant 0 : index
    %c0_28 = arith.constant 0 : index
    %44 = vector.load %arg21[%c0_26, %c17, %c0_27, %c0_28] : memref<2x18x9x64xf32, #tpu.memory_space<vmem>>, vector<2x1x9x64xf32>
    tpu.vector_store %arg21[%c0_26, %c17, %c0_27, %c0_28], %41 {strides = array<i32>} : memref<2x18x9x64xf32, #tpu.memory_space<vmem>>, vector<2x1x9x64xf32>,
    %c0_29 = arith.constant 0 : index
    %c0_30 = arith.constant 0 : index
    %c0_31 = arith.constant 0 : index
    %c0_32 = arith.constant 0 : index
    %45 = vector.load %arg22[%c0_29, %c0_30, %c0_31, %c0_32] : memref<2x18x9x64xf32, #tpu.memory_space<vmem>>, vector<2x1x9x64xf32>
    tpu.vector_store %arg22[%c0_29, %c0_30, %c0_31, %c0_32], %41 {strides = array<i32>} : memref<2x18x9x64xf32, #tpu.memory_space<vmem>>, vector<2x1x9x64xf32>,
    %c0_33 = arith.constant 0 : index
    %c17_34 = arith.constant 17 : index
    %c0_35 = arith.constant 0 : index
    %c0_36 = arith.constant 0 : index
    %46 = vector.load %arg22[%c0_33, %c17_34, %c0_35, %c0_36] : memref<2x18x9x64xf32, #tpu.memory_space<vmem>>, vector<2x1x9x64xf32>
    tpu.vector_store %arg22[%c0_33, %c17_34, %c0_35, %c0_36], %41 {strides = array<i32>} : memref<2x18x9x64xf32, #tpu.memory_space<vmem>>, vector<2x1x9x64xf32>,
    %c0_37 = arith.constant 0 : index
    %c0_38 = arith.constant 0 : index
    %c0_39 = arith.constant 0 : index
    %c0_40 = arith.constant 0 : index
    %47 = vector.load %arg21[%c0_37, %c0_38, %c0_39, %c0_40] : memref<2x18x9x64xf32, #tpu.memory_space<vmem>>, vector<2x18x1x64xf32>
    tpu.vector_store %arg21[%c0_37, %c0_38, %c0_39, %c0_40], %42 {strides = array<i32>} : memref<2x18x9x64xf32, #tpu.memory_space<vmem>>, vector<2x18x1x64xf32>,
    %c0_41 = arith.constant 0 : index
    %c0_42 = arith.constant 0 : index
    %c8 = arith.constant 8 : index
    %c0_43 = arith.constant 0 : index
    %48 = vector.load %arg22[%c0_41, %c0_42, %c8, %c0_43] : memref<2x18x9x64xf32, #tpu.memory_space<vmem>>, vector<2x18x1x64xf32>
    tpu.vector_store %arg22[%c0_41, %c0_42, %c8, %c0_43], %42 {strides = array<i32>} : memref<2x18x9x64xf32, #tpu.memory_space<vmem>>, vector<2x18x1x64xf32>,
    %c0_44 = arith.constant 0 : index
    %c1 = arith.constant 1 : index
    %c1_45 = arith.constant 1 : index
    %c0_46 = arith.constant 0 : index
    %49 = vector.load %arg21[%c0_44, %c1, %c1_45, %c0_46] : memref<2x18x9x64xf32, #tpu.memory_space<vmem>>, vector<2x16x8x64xf32>
    tpu.vector_store %arg21[%c0_44, %c1, %c1_45, %c0_46], %40 {strides = array<i32>} : memref<2x18x9x64xf32, #tpu.memory_space<vmem>>, vector<2x16x8x64xf32>,
    %c0_47 = arith.constant 0 : index
    %c1_48 = arith.constant 1 : index
    %c0_49 = arith.constant 0 : index
    %c0_50 = arith.constant 0 : index
    %50 = vector.load %arg22[%c0_47, %c1_48, %c0_49, %c0_50] : memref<2x18x9x64xf32, #tpu.memory_space<vmem>>, vector<2x16x8x64xf32>
    tpu.vector_store %arg22[%c0_47, %c1_48, %c0_49, %c0_50], %38 {strides = array<i32>} : memref<2x18x9x64xf32, #tpu.memory_space<vmem>>, vector<2x16x8x64xf32>,
    %c0_51 = arith.constant 0 : index
    %c0_52 = arith.constant 0 : index
    %c0_53 = arith.constant 0 : index
    %c0_54 = arith.constant 0 : index
    %51 = vector.load %arg21[%c0_51, %c0_52, %c0_53, %c0_54] : memref<2x18x9x64xf32, #tpu.memory_space<vmem>>, vector<2x18x9x64xf32>
    %52 = vector.shape_cast %51 : vector<2x18x9x64xf32> to vector<2x9x2x9x64xf32>
    %c0_55 = arith.constant 0 : index
    %c0_56 = arith.constant 0 : index
    %c0_57 = arith.constant 0 : index
    %c0_58 = arith.constant 0 : index
    %53 = vector.load %arg22[%c0_55, %c0_56, %c0_57, %c0_58] : memref<2x18x9x64xf32, #tpu.memory_space<vmem>>, vector<2x18x9x64xf32>
    %54 = vector.shape_cast %53 : vector<2x18x9x64xf32> to vector<2x9x2x9x64xf32>
    %55 = vector.extract_strided_slice %52 {offsets = [0, 0, 0, 0, 0], sizes = [2, 8, 1, 8, 64], strides = [1, 1, 1, 1, 1]} : vector<2x9x2x9x64xf32> to vector<2x8x1x8x64xf32>
    %56 = vector.shape_cast %55 : vector<2x8x1x8x64xf32> to vector<2x8x8x64xf32>
    %c0_59 = arith.constant 0 : index
    %c0_60 = arith.constant 0 : index
    %c0_61 = arith.constant 0 : index
    %c0_62 = arith.constant 0 : index
    %57 = vector.load %arg23[%c0_59, %c0_60, %c0_61, %c0_62] : memref<2x8x8x576xf32, #tpu.memory_space<vmem>>, vector<2x8x8x64xf32>
    tpu.vector_store %arg23[%c0_59, %c0_60, %c0_61, %c0_62], %56 {strides = array<i32>} : memref<2x8x8x576xf32, #tpu.memory_space<vmem>>, vector<2x8x8x64xf32>,
    %58 = vector.extract_strided_slice %52 {offsets = [0, 0, 1, 0, 0], sizes = [2, 8, 1, 8, 64], strides = [1, 1, 1, 1, 1]} : vector<2x9x2x9x64xf32> to vector<2x8x1x8x64xf32>
    %59 = vector.shape_cast %58 : vector<2x8x1x8x64xf32> to vector<2x8x8x64xf32>
    %c0_63 = arith.constant 0 : index
    %c0_64 = arith.constant 0 : index
    %c0_65 = arith.constant 0 : index
    %c192 = arith.constant 192 : index
    %60 = vector.load %arg23[%c0_63, %c0_64, %c0_65, %c192] : memref<2x8x8x576xf32, #tpu.memory_space<vmem>>, vector<2x8x8x64xf32>
    tpu.vector_store %arg23[%c0_63, %c0_64, %c0_65, %c192], %59 {strides = array<i32>} : memref<2x8x8x576xf32, #tpu.memory_space<vmem>>, vector<2x8x8x64xf32>,
    %61 = vector.extract_strided_slice %52 {offsets = [0, 1, 0, 0, 0], sizes = [2, 8, 1, 8, 64], strides = [1, 1, 1, 1, 1]} : vector<2x9x2x9x64xf32> to vector<2x8x1x8x64xf32>
    %62 = vector.shape_cast %61 : vector<2x8x1x8x64xf32> to vector<2x8x8x64xf32>
    %c0_66 = arith.constant 0 : index
    %c0_67 = arith.constant 0 : index
    %c0_68 = arith.constant 0 : index
    %c384 = arith.constant 384 : index
    %63 = vector.load %arg23[%c0_66, %c0_67, %c0_68, %c384] : memref<2x8x8x576xf32, #tpu.memory_space<vmem>>, vector<2x8x8x64xf32>
    tpu.vector_store %arg23[%c0_66, %c0_67, %c0_68, %c384], %62 {strides = array<i32>} : memref<2x8x8x576xf32, #tpu.memory_space<vmem>>, vector<2x8x8x64xf32>,
    %64 = vector.extract_strided_slice %54 {offsets = [0, 0, 0, 0, 0], sizes = [2, 8, 1, 8, 64], strides = [1, 1, 1, 1, 1]} : vector<2x9x2x9x64xf32> to vector<2x8x1x8x64xf32>
    %65 = vector.shape_cast %64 : vector<2x8x1x8x64xf32> to vector<2x8x8x64xf32>
    %c0_69 = arith.constant 0 : index
    %c0_70 = arith.constant 0 : index
    %c0_71 = arith.constant 0 : index
    %c64 = arith.constant 64 : index
    %66 = vector.load %arg23[%c0_69, %c0_70, %c0_71, %c64] : memref<2x8x8x576xf32, #tpu.memory_space<vmem>>, vector<2x8x8x64xf32>
    tpu.vector_store %arg23[%c0_69, %c0_70, %c0_71, %c64], %65 {strides = array<i32>} : memref<2x8x8x576xf32, #tpu.memory_space<vmem>>, vector<2x8x8x64xf32>,
    %67 = vector.extract_strided_slice %54 {offsets = [0, 0, 1, 0, 0], sizes = [2, 8, 1, 8, 64], strides = [1, 1, 1, 1, 1]} : vector<2x9x2x9x64xf32> to vector<2x8x1x8x64xf32>
    %68 = vector.shape_cast %67 : vector<2x8x1x8x64xf32> to vector<2x8x8x64xf32>
    %c0_72 = arith.constant 0 : index
    %c0_73 = arith.constant 0 : index
    %c0_74 = arith.constant 0 : index
    %c256 = arith.constant 256 : index
    %69 = vector.load %arg23[%c0_72, %c0_73, %c0_74, %c256] : memref<2x8x8x576xf32, #tpu.memory_space<vmem>>, vector<2x8x8x64xf32>
    tpu.vector_store %arg23[%c0_72, %c0_73, %c0_74, %c256], %68 {strides = array<i32>} : memref<2x8x8x576xf32, #tpu.memory_space<vmem>>, vector<2x8x8x64xf32>,
    %70 = vector.extract_strided_slice %54 {offsets = [0, 1, 0, 0, 0], sizes = [2, 8, 1, 8, 64], strides = [1, 1, 1, 1, 1]} : vector<2x9x2x9x64xf32> to vector<2x8x1x8x64xf32>
    %71 = vector.shape_cast %70 : vector<2x8x1x8x64xf32> to vector<2x8x8x64xf32>
    %c0_75 = arith.constant 0 : index
    %c0_76 = arith.constant 0 : index
    %c0_77 = arith.constant 0 : index
    %c448 = arith.constant 448 : index
    %72 = vector.load %arg23[%c0_75, %c0_76, %c0_77, %c448] : memref<2x8x8x576xf32, #tpu.memory_space<vmem>>, vector<2x8x8x64xf32>
    tpu.vector_store %arg23[%c0_75, %c0_76, %c0_77, %c448], %71 {strides = array<i32>} : memref<2x8x8x576xf32, #tpu.memory_space<vmem>>, vector<2x8x8x64xf32>,
    %73 = vector.extract_strided_slice %52 {offsets = [0, 0, 0, 1, 0], sizes = [2, 8, 1, 8, 64], strides = [1, 1, 1, 1, 1]} : vector<2x9x2x9x64xf32> to vector<2x8x1x8x64xf32>
    %74 = vector.shape_cast %73 : vector<2x8x1x8x64xf32> to vector<2x8x8x64xf32>
    %c0_78 = arith.constant 0 : index
    %c0_79 = arith.constant 0 : index
    %c0_80 = arith.constant 0 : index
    %c128 = arith.constant 128 : index
    %75 = vector.load %arg23[%c0_78, %c0_79, %c0_80, %c128] : memref<2x8x8x576xf32, #tpu.memory_space<vmem>>, vector<2x8x8x64xf32>
    tpu.vector_store %arg23[%c0_78, %c0_79, %c0_80, %c128], %74 {strides = array<i32>} : memref<2x8x8x576xf32, #tpu.memory_space<vmem>>, vector<2x8x8x64xf32>,
    %76 = vector.extract_strided_slice %52 {offsets = [0, 0, 1, 1, 0], sizes = [2, 8, 1, 8, 64], strides = [1, 1, 1, 1, 1]} : vector<2x9x2x9x64xf32> to vector<2x8x1x8x64xf32>
    %77 = vector.shape_cast %76 : vector<2x8x1x8x64xf32> to vector<2x8x8x64xf32>
    %c0_81 = arith.constant 0 : index
    %c0_82 = arith.constant 0 : index
    %c0_83 = arith.constant 0 : index
    %c320 = arith.constant 320 : index
    %78 = vector.load %arg23[%c0_81, %c0_82, %c0_83, %c320] : memref<2x8x8x576xf32, #tpu.memory_space<vmem>>, vector<2x8x8x64xf32>
    tpu.vector_store %arg23[%c0_81, %c0_82, %c0_83, %c320], %77 {strides = array<i32>} : memref<2x8x8x576xf32, #tpu.memory_space<vmem>>, vector<2x8x8x64xf32>,
    %79 = vector.extract_strided_slice %52 {offsets = [0, 1, 0, 1, 0], sizes = [2, 8, 1, 8, 64], strides = [1, 1, 1, 1, 1]} : vector<2x9x2x9x64xf32> to vector<2x8x1x8x64xf32>
    %80 = vector.shape_cast %79 : vector<2x8x1x8x64xf32> to vector<2x8x8x64xf32>
    %c0_84 = arith.constant 0 : index
    %c0_85 = arith.constant 0 : index
    %c0_86 = arith.constant 0 : index
    %c512 = arith.constant 512 : index
    %81 = vector.load %arg23[%c0_84, %c0_85, %c0_86, %c512] : memref<2x8x8x576xf32, #tpu.memory_space<vmem>>, vector<2x8x8x64xf32>
    tpu.vector_store %arg23[%c0_84, %c0_85, %c0_86, %c512], %80 {strides = array<i32>} : memref<2x8x8x576xf32, #tpu.memory_space<vmem>>, vector<2x8x8x64xf32>,
    %c0_87 = arith.constant 0 : index
    %c0_88 = arith.constant 0 : index
    %c0_89 = arith.constant 0 : index
    %c0_90 = arith.constant 0 : index
    %82 = vector.load %arg23[%c0_87, %c0_88, %c0_89, %c0_90] : memref<2x8x8x576xf32, #tpu.memory_space<vmem>>, vector<2x8x8x576xf32>
    %83 = vector.shape_cast %82 : vector<2x8x8x576xf32> to vector<128x576xf32>
    %c0_91 = arith.constant 0 : index
    %c0_92 = arith.constant 0 : index
    %84 = vector.load %arg8[%c0_91, %c0_92] : memref<576x128xf32, #tpu.memory_space<vmem>>, vector<576x128xf32>
    %cst_93 = arith.constant dense<0.000000e+00> : vector<128x128xf32>
    %85 = tpu.matmul %83, %84, %cst_93 {dimension_numbers = #tpu.dot_dimension_numbers<[1], [0], [0], [1], [0, 0, 1, 1], [], []>} : vector<128x576xf32>, vector<576x128xf32>, vector<128x128xf32> -> vector<128x128xf32>
    %c0_94 = arith.constant 0 : index
    %c0_95 = arith.constant 0 : index
    %86 = vector.load %arg9[%c0_94, %c0_95] : memref<1x128xf32, #tpu.memory_space<vmem>>, vector<1x128xf32>
    %87 = vector.broadcast %86 : vector<1x128xf32> to vector<128x128xf32>
    %88 = arith.addf %85, %87 : vector<128x128xf32>
    %cst_96 = arith.constant 0.000000e+00 : f32
    %89 = vector.broadcast %cst_96 : f32 to vector<128x128xf32>
    %90 = arith.maximumf %88, %89 : vector<128x128xf32>
    %91 = vector.shape_cast %90 : vector<128x128xf32> to vector<2x64x128xf32>
    %cst_97 = arith.constant dense<0.000000e+00> : vector<2x128xf32>
    %92 = vector.multi_reduction <add>, %91, %cst_97 [1] : vector<2x64x128xf32> to vector<2x128xf32>
    %93 = arith.mulf %91, %91 : vector<2x64x128xf32>
    %cst_98 = arith.constant dense<0.000000e+00> : vector<2x128xf32>
    %94 = vector.multi_reduction <add>, %93, %cst_98 [1] : vector<2x64x128xf32> to vector<2x128xf32>
    %c0_99 = arith.constant 0 : index
    %c0_100 = arith.constant 0 : index
    %95 = vector.load %arg3[%c0_99, %c0_100] : memref<128x128xf32, #tpu.memory_space<vmem>>, vector<128x128xf32>
    %cst_101 = arith.constant dense<0.000000e+00> : vector<2x128xf32>
    %96 = tpu.matmul %92, %95, %cst_101 {dimension_numbers = #tpu.dot_dimension_numbers<[1], [0], [0], [1], [0, 0, 1, 1], [], []>} : vector<2x128xf32>, vector<128x128xf32>, vector<2x128xf32> -> vector<2x128xf32>
    %c0_102 = arith.constant 0 : index
    %c0_103 = arith.constant 0 : index
    %97 = vector.load %arg3[%c0_102, %c0_103] : memref<128x128xf32, #tpu.memory_space<vmem>>, vector<128x128xf32>
    %cst_104 = arith.constant dense<0.000000e+00> : vector<2x128xf32>
    %98 = tpu.matmul %94, %97, %cst_104 {dimension_numbers = #tpu.dot_dimension_numbers<[1], [0], [0], [1], [0, 0, 1, 1], [], []>} : vector<2x128xf32>, vector<128x128xf32>, vector<2x128xf32> -> vector<2x128xf32>
    %99 = arith.mulf %96, %96 : vector<2x128xf32>
    %100 = arith.subf %98, %99 : vector<2x128xf32>
    %cst_105 = arith.constant 9.99999974E-6 : f32
    %101 = vector.broadcast %cst_105 : f32 to vector<2x128xf32>
    %102 = arith.addf %100, %101 : vector<2x128xf32>
    %103 = math.rsqrt %102 : vector<2x128xf32>
    %104 = vector.shape_cast %96 : vector<2x128xf32> to vector<2x1x128xf32>
    %105 = vector.broadcast %104 : vector<2x1x128xf32> to vector<2x64x128xf32>
    %106 = arith.subf %91, %105 : vector<2x64x128xf32>
    %107 = vector.shape_cast %103 : vector<2x128xf32> to vector<2x1x128xf32>
    %108 = vector.broadcast %107 : vector<2x1x128xf32> to vector<2x64x128xf32>
    %109 = arith.mulf %106, %108 : vector<2x64x128xf32>
    %c0_106 = arith.constant 0 : index
    %c0_107 = arith.constant 0 : index
    %110 = vector.load %arg10[%c0_106, %c0_107] : memref<1x128xf32, #tpu.memory_space<vmem>>, vector<1x128xf32>
    %111 = vector.shape_cast %110 : vector<1x128xf32> to vector<1x1x128xf32>
    %112 = vector.broadcast %111 : vector<1x1x128xf32> to vector<2x64x128xf32>
    %113 = arith.mulf %109, %112 : vector<2x64x128xf32>
    %c0_108 = arith.constant 0 : index
    %c0_109 = arith.constant 0 : index
    %114 = vector.load %arg11[%c0_108, %c0_109] : memref<1x128xf32, #tpu.memory_space<vmem>>, vector<1x128xf32>
    %115 = vector.shape_cast %114 : vector<1x128xf32> to vector<1x1x128xf32>
    %116 = vector.broadcast %115 : vector<1x1x128xf32> to vector<2x64x128xf32>
    %117 = arith.addf %113, %116 : vector<2x64x128xf32>
    %118 = vector.shape_cast %117 : vector<2x64x128xf32> to vector<2x8x8x128xf32>
    %cst_110 = arith.constant 0.000000e+00 : f32
    %119 = vector.broadcast %cst_110 : f32 to vector<2x1x10x128xf32>
    %cst_111 = arith.constant 0.000000e+00 : f32
    %120 = vector.broadcast %cst_111 : f32 to vector<2x10x1x128xf32>
    %c0_112 = arith.constant 0 : index
    %c0_113 = arith.constant 0 : index
    %c0_114 = arith.constant 0 : index
    %c0_115 = arith.constant 0 : index
    %121 = vector.load %arg24[%c0_112, %c0_113, %c0_114, %c0_115] : memref<2x10x10x128xf32, #tpu.memory_space<vmem>>, vector<2x1x10x128xf32>
    tpu.vector_store %arg24[%c0_112, %c0_113, %c0_114, %c0_115], %119 {strides = array<i32>} : memref<2x10x10x128xf32, #tpu.memory_space<vmem>>, vector<2x1x10x128xf32>,
    %c0_116 = arith.constant 0 : index
    %c9 = arith.constant 9 : index
    %c0_117 = arith.constant 0 : index
    %c0_118 = arith.constant 0 : index
    %122 = vector.load %arg24[%c0_116, %c9, %c0_117, %c0_118] : memref<2x10x10x128xf32, #tpu.memory_space<vmem>>, vector<2x1x10x128xf32>
    tpu.vector_store %arg24[%c0_116, %c9, %c0_117, %c0_118], %119 {strides = array<i32>} : memref<2x10x10x128xf32, #tpu.memory_space<vmem>>, vector<2x1x10x128xf32>,
    %c0_119 = arith.constant 0 : index
    %c0_120 = arith.constant 0 : index
    %c0_121 = arith.constant 0 : index
    %c0_122 = arith.constant 0 : index
    %123 = vector.load %arg24[%c0_119, %c0_120, %c0_121, %c0_122] : memref<2x10x10x128xf32, #tpu.memory_space<vmem>>, vector<2x10x1x128xf32>
    tpu.vector_store %arg24[%c0_119, %c0_120, %c0_121, %c0_122], %120 {strides = array<i32>} : memref<2x10x10x128xf32, #tpu.memory_space<vmem>>, vector<2x10x1x128xf32>,
    %c0_123 = arith.constant 0 : index
    %c0_124 = arith.constant 0 : index
    %c9_125 = arith.constant 9 : index
    %c0_126 = arith.constant 0 : index
    %124 = vector.load %arg24[%c0_123, %c0_124, %c9_125, %c0_126] : memref<2x10x10x128xf32, #tpu.memory_space<vmem>>, vector<2x10x1x128xf32>
    tpu.vector_store %arg24[%c0_123, %c0_124, %c9_125, %c0_126], %120 {strides = array<i32>} : memref<2x10x10x128xf32, #tpu.memory_space<vmem>>, vector<2x10x1x128xf32>,
    %c0_127 = arith.constant 0 : index
    %c1_128 = arith.constant 1 : index
    %c1_129 = arith.constant 1 : index
    %c0_130 = arith.constant 0 : index
    %125 = vector.load %arg24[%c0_127, %c1_128, %c1_129, %c0_130] : memref<2x10x10x128xf32, #tpu.memory_space<vmem>>, vector<2x8x8x128xf32>
    tpu.vector_store %arg24[%c0_127, %c1_128, %c1_129, %c0_130], %118 {strides = array<i32>} : memref<2x10x10x128xf32, #tpu.memory_space<vmem>>, vector<2x8x8x128xf32>,
    %c0_131 = arith.constant 0 : index
    %c0_132 = arith.constant 0 : index
    %c0_133 = arith.constant 0 : index
    %c0_134 = arith.constant 0 : index
    %126 = vector.load %arg24[%c0_131, %c0_132, %c0_133, %c0_134] : memref<2x10x10x128xf32, #tpu.memory_space<vmem>>, vector<2x8x8x128xf32>
    %c0_135 = arith.constant 0 : index
    %c0_136 = arith.constant 0 : index
    %c0_137 = arith.constant 0 : index
    %c0_138 = arith.constant 0 : index
    %127 = vector.load %arg25[%c0_135, %c0_136, %c0_137, %c0_138] : memref<2x8x8x1152xf32, #tpu.memory_space<vmem>>, vector<2x8x8x128xf32>
    tpu.vector_store %arg25[%c0_135, %c0_136, %c0_137, %c0_138], %126 {strides = array<i32>} : memref<2x8x8x1152xf32, #tpu.memory_space<vmem>>, vector<2x8x8x128xf32>,
    %c0_139 = arith.constant 0 : index
    %c0_140 = arith.constant 0 : index
    %c1_141 = arith.constant 1 : index
    %c0_142 = arith.constant 0 : index
    %128 = vector.load %arg24[%c0_139, %c0_140, %c1_141, %c0_142] : memref<2x10x10x128xf32, #tpu.memory_space<vmem>>, vector<2x8x8x128xf32>
    %c0_143 = arith.constant 0 : index
    %c0_144 = arith.constant 0 : index
    %c0_145 = arith.constant 0 : index
    %c128_146 = arith.constant 128 : index
    %129 = vector.load %arg25[%c0_143, %c0_144, %c0_145, %c128_146] : memref<2x8x8x1152xf32, #tpu.memory_space<vmem>>, vector<2x8x8x128xf32>
    tpu.vector_store %arg25[%c0_143, %c0_144, %c0_145, %c128_146], %128 {strides = array<i32>} : memref<2x8x8x1152xf32, #tpu.memory_space<vmem>>, vector<2x8x8x128xf32>,
    %c0_147 = arith.constant 0 : index
    %c0_148 = arith.constant 0 : index
    %c2 = arith.constant 2 : index
    %c0_149 = arith.constant 0 : index
    %130 = vector.load %arg24[%c0_147, %c0_148, %c2, %c0_149] : memref<2x10x10x128xf32, #tpu.memory_space<vmem>>, vector<2x8x8x128xf32>
    %c0_150 = arith.constant 0 : index
    %c0_151 = arith.constant 0 : index
    %c0_152 = arith.constant 0 : index
    %c256_153 = arith.constant 256 : index
    %131 = vector.load %arg25[%c0_150, %c0_151, %c0_152, %c256_153] : memref<2x8x8x1152xf32, #tpu.memory_space<vmem>>, vector<2x8x8x128xf32>
    tpu.vector_store %arg25[%c0_150, %c0_151, %c0_152, %c256_153], %130 {strides = array<i32>} : memref<2x8x8x1152xf32, #tpu.memory_space<vmem>>, vector<2x8x8x128xf32>,
    %c0_154 = arith.constant 0 : index
    %c1_155 = arith.constant 1 : index
    %c0_156 = arith.constant 0 : index
    %c0_157 = arith.constant 0 : index
    %132 = vector.load %arg24[%c0_154, %c1_155, %c0_156, %c0_157] : memref<2x10x10x128xf32, #tpu.memory_space<vmem>>, vector<2x8x8x128xf32>
    %c0_158 = arith.constant 0 : index
    %c0_159 = arith.constant 0 : index
    %c0_160 = arith.constant 0 : index
    %c384_161 = arith.constant 384 : index
    %133 = vector.load %arg25[%c0_158, %c0_159, %c0_160, %c384_161] : memref<2x8x8x1152xf32, #tpu.memory_space<vmem>>, vector<2x8x8x128xf32>
    tpu.vector_store %arg25[%c0_158, %c0_159, %c0_160, %c384_161], %132 {strides = array<i32>} : memref<2x8x8x1152xf32, #tpu.memory_space<vmem>>, vector<2x8x8x128xf32>,
    %c0_162 = arith.constant 0 : index
    %c1_163 = arith.constant 1 : index
    %c1_164 = arith.constant 1 : index
    %c0_165 = arith.constant 0 : index
    %134 = vector.load %arg24[%c0_162, %c1_163, %c1_164, %c0_165] : memref<2x10x10x128xf32, #tpu.memory_space<vmem>>, vector<2x8x8x128xf32>
    %c0_166 = arith.constant 0 : index
    %c0_167 = arith.constant 0 : index
    %c0_168 = arith.constant 0 : index
    %c512_169 = arith.constant 512 : index
    %135 = vector.load %arg25[%c0_166, %c0_167, %c0_168, %c512_169] : memref<2x8x8x1152xf32, #tpu.memory_space<vmem>>, vector<2x8x8x128xf32>
    tpu.vector_store %arg25[%c0_166, %c0_167, %c0_168, %c512_169], %134 {strides = array<i32>} : memref<2x8x8x1152xf32, #tpu.memory_space<vmem>>, vector<2x8x8x128xf32>,
    %c0_170 = arith.constant 0 : index
    %c1_171 = arith.constant 1 : index
    %c2_172 = arith.constant 2 : index
    %c0_173 = arith.constant 0 : index
    %136 = vector.load %arg24[%c0_170, %c1_171, %c2_172, %c0_173] : memref<2x10x10x128xf32, #tpu.memory_space<vmem>>, vector<2x8x8x128xf32>
    %c0_174 = arith.constant 0 : index
    %c0_175 = arith.constant 0 : index
    %c0_176 = arith.constant 0 : index
    %c640 = arith.constant 640 : index
    %137 = vector.load %arg25[%c0_174, %c0_175, %c0_176, %c640] : memref<2x8x8x1152xf32, #tpu.memory_space<vmem>>, vector<2x8x8x128xf32>
    tpu.vector_store %arg25[%c0_174, %c0_175, %c0_176, %c640], %136 {strides = array<i32>} : memref<2x8x8x1152xf32, #tpu.memory_space<vmem>>, vector<2x8x8x128xf32>,
    %c0_177 = arith.constant 0 : index
    %c2_178 = arith.constant 2 : index
    %c0_179 = arith.constant 0 : index
    %c0_180 = arith.constant 0 : index
    %138 = vector.load %arg24[%c0_177, %c2_178, %c0_179, %c0_180] : memref<2x10x10x128xf32, #tpu.memory_space<vmem>>, vector<2x8x8x128xf32>
    %c0_181 = arith.constant 0 : index
    %c0_182 = arith.constant 0 : index
    %c0_183 = arith.constant 0 : index
    %c768 = arith.constant 768 : index
    %139 = vector.load %arg25[%c0_181, %c0_182, %c0_183, %c768] : memref<2x8x8x1152xf32, #tpu.memory_space<vmem>>, vector<2x8x8x128xf32>
    tpu.vector_store %arg25[%c0_181, %c0_182, %c0_183, %c768], %138 {strides = array<i32>} : memref<2x8x8x1152xf32, #tpu.memory_space<vmem>>, vector<2x8x8x128xf32>,
    %c0_184 = arith.constant 0 : index
    %c2_185 = arith.constant 2 : index
    %c1_186 = arith.constant 1 : index
    %c0_187 = arith.constant 0 : index
    %140 = vector.load %arg24[%c0_184, %c2_185, %c1_186, %c0_187] : memref<2x10x10x128xf32, #tpu.memory_space<vmem>>, vector<2x8x8x128xf32>
    %c0_188 = arith.constant 0 : index
    %c0_189 = arith.constant 0 : index
    %c0_190 = arith.constant 0 : index
    %c896 = arith.constant 896 : index
    %141 = vector.load %arg25[%c0_188, %c0_189, %c0_190, %c896] : memref<2x8x8x1152xf32, #tpu.memory_space<vmem>>, vector<2x8x8x128xf32>
    tpu.vector_store %arg25[%c0_188, %c0_189, %c0_190, %c896], %140 {strides = array<i32>} : memref<2x8x8x1152xf32, #tpu.memory_space<vmem>>, vector<2x8x8x128xf32>,
    %c0_191 = arith.constant 0 : index
    %c2_192 = arith.constant 2 : index
    %c2_193 = arith.constant 2 : index
    %c0_194 = arith.constant 0 : index
    %142 = vector.load %arg24[%c0_191, %c2_192, %c2_193, %c0_194] : memref<2x10x10x128xf32, #tpu.memory_space<vmem>>, vector<2x8x8x128xf32>
    %c0_195 = arith.constant 0 : index
    %c0_196 = arith.constant 0 : index
    %c0_197 = arith.constant 0 : index
    %c1024 = arith.constant 1024 : index
    %143 = vector.load %arg25[%c0_195, %c0_196, %c0_197, %c1024] : memref<2x8x8x1152xf32, #tpu.memory_space<vmem>>, vector<2x8x8x128xf32>
    tpu.vector_store %arg25[%c0_195, %c0_196, %c0_197, %c1024], %142 {strides = array<i32>} : memref<2x8x8x1152xf32, #tpu.memory_space<vmem>>, vector<2x8x8x128xf32>,
    %c0_198 = arith.constant 0 : index
    %c0_199 = arith.constant 0 : index
    %c0_200 = arith.constant 0 : index
    %c0_201 = arith.constant 0 : index
    %144 = vector.load %arg25[%c0_198, %c0_199, %c0_200, %c0_201] : memref<2x8x8x1152xf32, #tpu.memory_space<vmem>>, vector<2x8x8x1152xf32>
    %145 = vector.shape_cast %144 : vector<2x8x8x1152xf32> to vector<128x1152xf32>
    %c0_202 = arith.constant 0 : index
    %c0_203 = arith.constant 0 : index
    %146 = vector.load %arg12[%c0_202, %c0_203] : memref<1152x128xf32, #tpu.memory_space<vmem>>, vector<1152x128xf32>
    %cst_204 = arith.constant dense<0.000000e+00> : vector<128x128xf32>
    %147 = tpu.matmul %145, %146, %cst_204 {dimension_numbers = #tpu.dot_dimension_numbers<[1], [0], [0], [1], [0, 0, 1, 1], [], []>} : vector<128x1152xf32>, vector<1152x128xf32>, vector<128x128xf32> -> vector<128x128xf32>
    %c0_205 = arith.constant 0 : index
    %c0_206 = arith.constant 0 : index
    %148 = vector.load %arg13[%c0_205, %c0_206] : memref<1x128xf32, #tpu.memory_space<vmem>>, vector<1x128xf32>
    %149 = vector.broadcast %148 : vector<1x128xf32> to vector<128x128xf32>
    %150 = arith.addf %147, %149 : vector<128x128xf32>
    %cst_207 = arith.constant 0.000000e+00 : f32
    %151 = vector.broadcast %cst_207 : f32 to vector<128x128xf32>
    %152 = arith.maximumf %150, %151 : vector<128x128xf32>
    %153 = vector.shape_cast %152 : vector<128x128xf32> to vector<2x64x128xf32>
    %cst_208 = arith.constant dense<0.000000e+00> : vector<2x128xf32>
    %154 = vector.multi_reduction <add>, %153, %cst_208 [1] : vector<2x64x128xf32> to vector<2x128xf32>
    %155 = arith.mulf %153, %153 : vector<2x64x128xf32>
    %cst_209 = arith.constant dense<0.000000e+00> : vector<2x128xf32>
    %156 = vector.multi_reduction <add>, %155, %cst_209 [1] : vector<2x64x128xf32> to vector<2x128xf32>
    %c0_210 = arith.constant 0 : index
    %c0_211 = arith.constant 0 : index
    %157 = vector.load %arg3[%c0_210, %c0_211] : memref<128x128xf32, #tpu.memory_space<vmem>>, vector<128x128xf32>
    %cst_212 = arith.constant dense<0.000000e+00> : vector<2x128xf32>
    %158 = tpu.matmul %154, %157, %cst_212 {dimension_numbers = #tpu.dot_dimension_numbers<[1], [0], [0], [1], [0, 0, 1, 1], [], []>} : vector<2x128xf32>, vector<128x128xf32>, vector<2x128xf32> -> vector<2x128xf32>
    %c0_213 = arith.constant 0 : index
    %c0_214 = arith.constant 0 : index
    %159 = vector.load %arg3[%c0_213, %c0_214] : memref<128x128xf32, #tpu.memory_space<vmem>>, vector<128x128xf32>
    %cst_215 = arith.constant dense<0.000000e+00> : vector<2x128xf32>
    %160 = tpu.matmul %156, %159, %cst_215 {dimension_numbers = #tpu.dot_dimension_numbers<[1], [0], [0], [1], [0, 0, 1, 1], [], []>} : vector<2x128xf32>, vector<128x128xf32>, vector<2x128xf32> -> vector<2x128xf32>
    %161 = arith.mulf %158, %158 : vector<2x128xf32>
    %162 = arith.subf %160, %161 : vector<2x128xf32>
    %cst_216 = arith.constant 9.99999974E-6 : f32
    %163 = vector.broadcast %cst_216 : f32 to vector<2x128xf32>
    %164 = arith.addf %162, %163 : vector<2x128xf32>
    %165 = math.rsqrt %164 : vector<2x128xf32>
    %166 = vector.shape_cast %158 : vector<2x128xf32> to vector<2x1x128xf32>
    %167 = vector.broadcast %166 : vector<2x1x128xf32> to vector<2x64x128xf32>
    %168 = arith.subf %153, %167 : vector<2x64x128xf32>
    %169 = vector.shape_cast %165 : vector<2x128xf32> to vector<2x1x128xf32>
    %170 = vector.broadcast %169 : vector<2x1x128xf32> to vector<2x64x128xf32>
    %171 = arith.mulf %168, %170 : vector<2x64x128xf32>
    %c0_217 = arith.constant 0 : index
    %c0_218 = arith.constant 0 : index
    %172 = vector.load %arg14[%c0_217, %c0_218] : memref<1x128xf32, #tpu.memory_space<vmem>>, vector<1x128xf32>
    %173 = vector.shape_cast %172 : vector<1x128xf32> to vector<1x1x128xf32>
    %174 = vector.broadcast %173 : vector<1x1x128xf32> to vector<2x64x128xf32>
    %175 = arith.mulf %171, %174 : vector<2x64x128xf32>
    %c0_219 = arith.constant 0 : index
    %c0_220 = arith.constant 0 : index
    %176 = vector.load %arg15[%c0_219, %c0_220] : memref<1x128xf32, #tpu.memory_space<vmem>>, vector<1x128xf32>
    %177 = vector.shape_cast %176 : vector<1x128xf32> to vector<1x1x128xf32>
    %178 = vector.broadcast %177 : vector<1x1x128xf32> to vector<2x64x128xf32>
    %179 = arith.addf %175, %178 : vector<2x64x128xf32>
    %180 = vector.shape_cast %179 : vector<2x64x128xf32> to vector<2x8x8x128xf32>
    %cst_221 = arith.constant 0.000000e+00 : f32
    %181 = vector.broadcast %cst_221 : f32 to vector<2x1x10x128xf32>
    %cst_222 = arith.constant 0.000000e+00 : f32
    %182 = vector.broadcast %cst_222 : f32 to vector<2x10x1x128xf32>
    %c0_223 = arith.constant 0 : index
    %c0_224 = arith.constant 0 : index
    %c0_225 = arith.constant 0 : index
    %c0_226 = arith.constant 0 : index
    %183 = vector.load %arg24[%c0_223, %c0_224, %c0_225, %c0_226] : memref<2x10x10x128xf32, #tpu.memory_space<vmem>>, vector<2x1x10x128xf32>
    tpu.vector_store %arg24[%c0_223, %c0_224, %c0_225, %c0_226], %181 {strides = array<i32>} : memref<2x10x10x128xf32, #tpu.memory_space<vmem>>, vector<2x1x10x128xf32>,
    %c0_227 = arith.constant 0 : index
    %c9_228 = arith.constant 9 : index
    %c0_229 = arith.constant 0 : index
    %c0_230 = arith.constant 0 : index
    %184 = vector.load %arg24[%c0_227, %c9_228, %c0_229, %c0_230] : memref<2x10x10x128xf32, #tpu.memory_space<vmem>>, vector<2x1x10x128xf32>
    tpu.vector_store %arg24[%c0_227, %c9_228, %c0_229, %c0_230], %181 {strides = array<i32>} : memref<2x10x10x128xf32, #tpu.memory_space<vmem>>, vector<2x1x10x128xf32>,
    %c0_231 = arith.constant 0 : index
    %c0_232 = arith.constant 0 : index
    %c0_233 = arith.constant 0 : index
    %c0_234 = arith.constant 0 : index
    %185 = vector.load %arg24[%c0_231, %c0_232, %c0_233, %c0_234] : memref<2x10x10x128xf32, #tpu.memory_space<vmem>>, vector<2x10x1x128xf32>
    tpu.vector_store %arg24[%c0_231, %c0_232, %c0_233, %c0_234], %182 {strides = array<i32>} : memref<2x10x10x128xf32, #tpu.memory_space<vmem>>, vector<2x10x1x128xf32>,
    %c0_235 = arith.constant 0 : index
    %c0_236 = arith.constant 0 : index
    %c9_237 = arith.constant 9 : index
    %c0_238 = arith.constant 0 : index
    %186 = vector.load %arg24[%c0_235, %c0_236, %c9_237, %c0_238] : memref<2x10x10x128xf32, #tpu.memory_space<vmem>>, vector<2x10x1x128xf32>
    tpu.vector_store %arg24[%c0_235, %c0_236, %c9_237, %c0_238], %182 {strides = array<i32>} : memref<2x10x10x128xf32, #tpu.memory_space<vmem>>, vector<2x10x1x128xf32>,
    %c0_239 = arith.constant 0 : index
    %c1_240 = arith.constant 1 : index
    %c1_241 = arith.constant 1 : index
    %c0_242 = arith.constant 0 : index
    %187 = vector.load %arg24[%c0_239, %c1_240, %c1_241, %c0_242] : memref<2x10x10x128xf32, #tpu.memory_space<vmem>>, vector<2x8x8x128xf32>
    tpu.vector_store %arg24[%c0_239, %c1_240, %c1_241, %c0_242], %180 {strides = array<i32>} : memref<2x10x10x128xf32, #tpu.memory_space<vmem>>, vector<2x8x8x128xf32>,
    %c0_243 = arith.constant 0 : index
    %c0_244 = arith.constant 0 : index
    %c0_245 = arith.constant 0 : index
    %c0_246 = arith.constant 0 : index
    %188 = vector.load %arg24[%c0_243, %c0_244, %c0_245, %c0_246] : memref<2x10x10x128xf32, #tpu.memory_space<vmem>>, vector<2x8x8x128xf32>
    %c0_247 = arith.constant 0 : index
    %c0_248 = arith.constant 0 : index
    %c0_249 = arith.constant 0 : index
    %c0_250 = arith.constant 0 : index
    %189 = vector.load %arg25[%c0_247, %c0_248, %c0_249, %c0_250] : memref<2x8x8x1152xf32, #tpu.memory_space<vmem>>, vector<2x8x8x128xf32>
    tpu.vector_store %arg25[%c0_247, %c0_248, %c0_249, %c0_250], %188 {strides = array<i32>} : memref<2x8x8x1152xf32, #tpu.memory_space<vmem>>, vector<2x8x8x128xf32>,
    %c0_251 = arith.constant 0 : index
    %c0_252 = arith.constant 0 : index
    %c1_253 = arith.constant 1 : index
    %c0_254 = arith.constant 0 : index
    %190 = vector.load %arg24[%c0_251, %c0_252, %c1_253, %c0_254] : memref<2x10x10x128xf32, #tpu.memory_space<vmem>>, vector<2x8x8x128xf32>
    %c0_255 = arith.constant 0 : index
    %c0_256 = arith.constant 0 : index
    %c0_257 = arith.constant 0 : index
    %c128_258 = arith.constant 128 : index
    %191 = vector.load %arg25[%c0_255, %c0_256, %c0_257, %c128_258] : memref<2x8x8x1152xf32, #tpu.memory_space<vmem>>, vector<2x8x8x128xf32>
    tpu.vector_store %arg25[%c0_255, %c0_256, %c0_257, %c128_258], %190 {strides = array<i32>} : memref<2x8x8x1152xf32, #tpu.memory_space<vmem>>, vector<2x8x8x128xf32>,
    %c0_259 = arith.constant 0 : index
    %c0_260 = arith.constant 0 : index
    %c2_261 = arith.constant 2 : index
    %c0_262 = arith.constant 0 : index
    %192 = vector.load %arg24[%c0_259, %c0_260, %c2_261, %c0_262] : memref<2x10x10x128xf32, #tpu.memory_space<vmem>>, vector<2x8x8x128xf32>
    %c0_263 = arith.constant 0 : index
    %c0_264 = arith.constant 0 : index
    %c0_265 = arith.constant 0 : index
    %c256_266 = arith.constant 256 : index
    %193 = vector.load %arg25[%c0_263, %c0_264, %c0_265, %c256_266] : memref<2x8x8x1152xf32, #tpu.memory_space<vmem>>, vector<2x8x8x128xf32>
    tpu.vector_store %arg25[%c0_263, %c0_264, %c0_265, %c256_266], %192 {strides = array<i32>} : memref<2x8x8x1152xf32, #tpu.memory_space<vmem>>, vector<2x8x8x128xf32>,
    %c0_267 = arith.constant 0 : index
    %c1_268 = arith.constant 1 : index
    %c0_269 = arith.constant 0 : index
    %c0_270 = arith.constant 0 : index
    %194 = vector.load %arg24[%c0_267, %c1_268, %c0_269, %c0_270] : memref<2x10x10x128xf32, #tpu.memory_space<vmem>>, vector<2x8x8x128xf32>
    %c0_271 = arith.constant 0 : index
    %c0_272 = arith.constant 0 : index
    %c0_273 = arith.constant 0 : index
    %c384_274 = arith.constant 384 : index
    %195 = vector.load %arg25[%c0_271, %c0_272, %c0_273, %c384_274] : memref<2x8x8x1152xf32, #tpu.memory_space<vmem>>, vector<2x8x8x128xf32>
    tpu.vector_store %arg25[%c0_271, %c0_272, %c0_273, %c384_274], %194 {strides = array<i32>} : memref<2x8x8x1152xf32, #tpu.memory_space<vmem>>, vector<2x8x8x128xf32>,
    %c0_275 = arith.constant 0 : index
    %c1_276 = arith.constant 1 : index
    %c1_277 = arith.constant 1 : index
    %c0_278 = arith.constant 0 : index
    %196 = vector.load %arg24[%c0_275, %c1_276, %c1_277, %c0_278] : memref<2x10x10x128xf32, #tpu.memory_space<vmem>>, vector<2x8x8x128xf32>
    %c0_279 = arith.constant 0 : index
    %c0_280 = arith.constant 0 : index
    %c0_281 = arith.constant 0 : index
    %c512_282 = arith.constant 512 : index
    %197 = vector.load %arg25[%c0_279, %c0_280, %c0_281, %c512_282] : memref<2x8x8x1152xf32, #tpu.memory_space<vmem>>, vector<2x8x8x128xf32>
    tpu.vector_store %arg25[%c0_279, %c0_280, %c0_281, %c512_282], %196 {strides = array<i32>} : memref<2x8x8x1152xf32, #tpu.memory_space<vmem>>, vector<2x8x8x128xf32>,
    %c0_283 = arith.constant 0 : index
    %c1_284 = arith.constant 1 : index
    %c2_285 = arith.constant 2 : index
    %c0_286 = arith.constant 0 : index
    %198 = vector.load %arg24[%c0_283, %c1_284, %c2_285, %c0_286] : memref<2x10x10x128xf32, #tpu.memory_space<vmem>>, vector<2x8x8x128xf32>
    %c0_287 = arith.constant 0 : index
    %c0_288 = arith.constant 0 : index
    %c0_289 = arith.constant 0 : index
    %c640_290 = arith.constant 640 : index
    %199 = vector.load %arg25[%c0_287, %c0_288, %c0_289, %c640_290] : memref<2x8x8x1152xf32, #tpu.memory_space<vmem>>, vector<2x8x8x128xf32>
    tpu.vector_store %arg25[%c0_287, %c0_288, %c0_289, %c640_290], %198 {strides = array<i32>} : memref<2x8x8x1152xf32, #tpu.memory_space<vmem>>, vector<2x8x8x128xf32>,
    %c0_291 = arith.constant 0 : index
    %c2_292 = arith.constant 2 : index
    %c0_293 = arith.constant 0 : index
    %c0_294 = arith.constant 0 : index
    %200 = vector.load %arg24[%c0_291, %c2_292, %c0_293, %c0_294] : memref<2x10x10x128xf32, #tpu.memory_space<vmem>>, vector<2x8x8x128xf32>
    %c0_295 = arith.constant 0 : index
    %c0_296 = arith.constant 0 : index
    %c0_297 = arith.constant 0 : index
    %c768_298 = arith.constant 768 : index
    %201 = vector.load %arg25[%c0_295, %c0_296, %c0_297, %c768_298] : memref<2x8x8x1152xf32, #tpu.memory_space<vmem>>, vector<2x8x8x128xf32>
    tpu.vector_store %arg25[%c0_295, %c0_296, %c0_297, %c768_298], %200 {strides = array<i32>} : memref<2x8x8x1152xf32, #tpu.memory_space<vmem>>, vector<2x8x8x128xf32>,
    %c0_299 = arith.constant 0 : index
    %c2_300 = arith.constant 2 : index
    %c1_301 = arith.constant 1 : index
    %c0_302 = arith.constant 0 : index
    %202 = vector.load %arg24[%c0_299, %c2_300, %c1_301, %c0_302] : memref<2x10x10x128xf32, #tpu.memory_space<vmem>>, vector<2x8x8x128xf32>
    %c0_303 = arith.constant 0 : index
    %c0_304 = arith.constant 0 : index
    %c0_305 = arith.constant 0 : index
    %c896_306 = arith.constant 896 : index
    %203 = vector.load %arg25[%c0_303, %c0_304, %c0_305, %c896_306] : memref<2x8x8x1152xf32, #tpu.memory_space<vmem>>, vector<2x8x8x128xf32>
    tpu.vector_store %arg25[%c0_303, %c0_304, %c0_305, %c896_306], %202 {strides = array<i32>} : memref<2x8x8x1152xf32, #tpu.memory_space<vmem>>, vector<2x8x8x128xf32>,
    %c0_307 = arith.constant 0 : index
    %c2_308 = arith.constant 2 : index
    %c2_309 = arith.constant 2 : index
    %c0_310 = arith.constant 0 : index
    %204 = vector.load %arg24[%c0_307, %c2_308, %c2_309, %c0_310] : memref<2x10x10x128xf32, #tpu.memory_space<vmem>>, vector<2x8x8x128xf32>
    %c0_311 = arith.constant 0 : index
    %c0_312 = arith.constant 0 : index
    %c0_313 = arith.constant 0 : index
    %c1024_314 = arith.constant 1024 : index
    %205 = vector.load %arg25[%c0_311, %c0_312, %c0_313, %c1024_314] : memref<2x8x8x1152xf32, #tpu.memory_space<vmem>>, vector<2x8x8x128xf32>
    tpu.vector_store %arg25[%c0_311, %c0_312, %c0_313, %c1024_314], %204 {strides = array<i32>} : memref<2x8x8x1152xf32, #tpu.memory_space<vmem>>, vector<2x8x8x128xf32>,
    %c0_315 = arith.constant 0 : index
    %c0_316 = arith.constant 0 : index
    %c0_317 = arith.constant 0 : index
    %c0_318 = arith.constant 0 : index
    %206 = vector.load %arg25[%c0_315, %c0_316, %c0_317, %c0_318] : memref<2x8x8x1152xf32, #tpu.memory_space<vmem>>, vector<2x8x8x1152xf32>
    %207 = vector.shape_cast %206 : vector<2x8x8x1152xf32> to vector<128x1152xf32>
    %c0_319 = arith.constant 0 : index
    %c0_320 = arith.constant 0 : index
    %208 = vector.load %arg16[%c0_319, %c0_320] : memref<1152x128xf32, #tpu.memory_space<vmem>>, vector<1152x128xf32>
    %cst_321 = arith.constant dense<0.000000e+00> : vector<128x128xf32>
    %209 = tpu.matmul %207, %208, %cst_321 {dimension_numbers = #tpu.dot_dimension_numbers<[1], [0], [0], [1], [0, 0, 1, 1], [], []>} : vector<128x1152xf32>, vector<1152x128xf32>, vector<128x128xf32> -> vector<128x128xf32>
    %c0_322 = arith.constant 0 : index
    %c0_323 = arith.constant 0 : index
    %210 = vector.load %arg17[%c0_322, %c0_323] : memref<1x128xf32, #tpu.memory_space<vmem>>, vector<1x128xf32>
    %211 = vector.broadcast %210 : vector<1x128xf32> to vector<128x128xf32>
    %212 = arith.addf %209, %211 : vector<128x128xf32>
    %cst_324 = arith.constant 0.000000e+00 : f32
    %213 = vector.broadcast %cst_324 : f32 to vector<128x128xf32>
    %214 = arith.maximumf %212, %213 : vector<128x128xf32>
    %215 = vector.shape_cast %214 : vector<128x128xf32> to vector<2x64x128xf32>
    %cst_325 = arith.constant dense<0.000000e+00> : vector<2x128xf32>
    %216 = vector.multi_reduction <add>, %215, %cst_325 [1] : vector<2x64x128xf32> to vector<2x128xf32>
    %217 = arith.mulf %215, %215 : vector<2x64x128xf32>
    %cst_326 = arith.constant dense<0.000000e+00> : vector<2x128xf32>
    %218 = vector.multi_reduction <add>, %217, %cst_326 [1] : vector<2x64x128xf32> to vector<2x128xf32>
    %c0_327 = arith.constant 0 : index
    %c0_328 = arith.constant 0 : index
    %219 = vector.load %arg3[%c0_327, %c0_328] : memref<128x128xf32, #tpu.memory_space<vmem>>, vector<128x128xf32>
    %cst_329 = arith.constant dense<0.000000e+00> : vector<2x128xf32>
    %220 = tpu.matmul %216, %219, %cst_329 {dimension_numbers = #tpu.dot_dimension_numbers<[1], [0], [0], [1], [0, 0, 1, 1], [], []>} : vector<2x128xf32>, vector<128x128xf32>, vector<2x128xf32> -> vector<2x128xf32>
    %c0_330 = arith.constant 0 : index
    %c0_331 = arith.constant 0 : index
    %221 = vector.load %arg3[%c0_330, %c0_331] : memref<128x128xf32, #tpu.memory_space<vmem>>, vector<128x128xf32>
    %cst_332 = arith.constant dense<0.000000e+00> : vector<2x128xf32>
    %222 = tpu.matmul %218, %221, %cst_332 {dimension_numbers = #tpu.dot_dimension_numbers<[1], [0], [0], [1], [0, 0, 1, 1], [], []>} : vector<2x128xf32>, vector<128x128xf32>, vector<2x128xf32> -> vector<2x128xf32>
    %223 = arith.mulf %220, %220 : vector<2x128xf32>
    %224 = arith.subf %222, %223 : vector<2x128xf32>
    %cst_333 = arith.constant 9.99999974E-6 : f32
    %225 = vector.broadcast %cst_333 : f32 to vector<2x128xf32>
    %226 = arith.addf %224, %225 : vector<2x128xf32>
    %227 = math.rsqrt %226 : vector<2x128xf32>
    %228 = vector.shape_cast %220 : vector<2x128xf32> to vector<2x1x128xf32>
    %229 = vector.broadcast %228 : vector<2x1x128xf32> to vector<2x64x128xf32>
    %230 = arith.subf %215, %229 : vector<2x64x128xf32>
    %231 = vector.shape_cast %227 : vector<2x128xf32> to vector<2x1x128xf32>
    %232 = vector.broadcast %231 : vector<2x1x128xf32> to vector<2x64x128xf32>
    %233 = arith.mulf %230, %232 : vector<2x64x128xf32>
    %c0_334 = arith.constant 0 : index
    %c0_335 = arith.constant 0 : index
    %234 = vector.load %arg18[%c0_334, %c0_335] : memref<1x128xf32, #tpu.memory_space<vmem>>, vector<1x128xf32>
    %235 = vector.shape_cast %234 : vector<1x128xf32> to vector<1x1x128xf32>
    %236 = vector.broadcast %235 : vector<1x1x128xf32> to vector<2x64x128xf32>
    %237 = arith.mulf %233, %236 : vector<2x64x128xf32>
    %c0_336 = arith.constant 0 : index
    %c0_337 = arith.constant 0 : index
    %238 = vector.load %arg19[%c0_336, %c0_337] : memref<1x128xf32, #tpu.memory_space<vmem>>, vector<1x128xf32>
    %239 = vector.shape_cast %238 : vector<1x128xf32> to vector<1x1x128xf32>
    %240 = vector.broadcast %239 : vector<1x1x128xf32> to vector<2x64x128xf32>
    %241 = arith.addf %237, %240 : vector<2x64x128xf32>
    %cst_338 = arith.constant dense<0.000000e+00> : vector<2x128xf32>
    %242 = vector.multi_reduction <add>, %241, %cst_338 [1] : vector<2x64x128xf32> to vector<2x128xf32>
    %cst_339 = arith.constant 1.562500e-02 : f32
    %243 = vector.broadcast %cst_339 : f32 to vector<2x128xf32>
    %244 = arith.mulf %242, %243 : vector<2x128xf32>
    %c0_340 = arith.constant 0 : index
    %c0_341 = arith.constant 0 : index
    %245 = vector.load %arg20[%c0_340, %c0_341] : memref<2x128xf32, #tpu.memory_space<vmem>>, vector<2x128xf32>
    tpu.vector_store %arg20[%c0_340, %c0_341], %244 {strides = array<i32>} : memref<2x128xf32, #tpu.memory_space<vmem>>, vector<2x128xf32>,
    return
  }
  func.func @transform_0(%arg0: i32) -> (i32, i32, i32) {
    %c0_i32 = arith.constant 0 : i32
    %c0_i32_0 = arith.constant 0 : i32
    %c0_i32_1 = arith.constant 0 : i32
    return %arg0, %c0_i32, %c0_i32_0 : i32, i32, i32
  }
  func.func @transform_1(%arg0: i32) -> (i32, i32) {
    %c0_i32 = arith.constant 0 : i32
    %c0_i32_0 = arith.constant 0 : i32
    %c0_i32_1 = arith.constant 0 : i32
    return %c0_i32, %c0_i32_0 : i32, i32
  }
  func.func @transform_2(%arg0: i32) -> (i32, i32) {
    %c0_i32 = arith.constant 0 : i32
    %c0_i32_0 = arith.constant 0 : i32
    %c0_i32_1 = arith.constant 0 : i32
    return %c0_i32, %c0_i32_0 : i32, i32
  }
  func.func @transform_3(%arg0: i32) -> (i32, i32) {
    %c0_i32 = arith.constant 0 : i32
    %c0_i32_0 = arith.constant 0 : i32
    %c0_i32_1 = arith.constant 0 : i32
    return %c0_i32, %c0_i32_0 : i32, i32
  }
  func.func @transform_4(%arg0: i32) -> (i32, i32) {
    %c0_i32 = arith.constant 0 : i32
    %c0_i32_0 = arith.constant 0 : i32
    %c0_i32_1 = arith.constant 0 : i32
    return %c0_i32, %c0_i32_0 : i32, i32
  }
  func.func @transform_5(%arg0: i32) -> (i32, i32) {
    %c0_i32 = arith.constant 0 : i32
    %c0_i32_0 = arith.constant 0 : i32
    %c0_i32_1 = arith.constant 0 : i32
    return %c0_i32, %c0_i32_0 : i32, i32
  }
  func.func @transform_6(%arg0: i32) -> (i32, i32) {
    %c0_i32 = arith.constant 0 : i32
    %c0_i32_0 = arith.constant 0 : i32
    %c0_i32_1 = arith.constant 0 : i32
    return %c0_i32, %c0_i32_0 : i32, i32
  }
  func.func @transform_7(%arg0: i32) -> (i32, i32) {
    %c0_i32 = arith.constant 0 : i32
    %c0_i32_0 = arith.constant 0 : i32
    %c0_i32_1 = arith.constant 0 : i32
    return %c0_i32, %c0_i32_0 : i32, i32
  }
  func.func @transform_8(%arg0: i32) -> (i32, i32) {
    %c0_i32 = arith.constant 0 : i32
    %c0_i32_0 = arith.constant 0 : i32
    %c0_i32_1 = arith.constant 0 : i32
    return %c0_i32, %c0_i32_0 : i32, i32
  }
  func.func @transform_9(%arg0: i32) -> (i32, i32) {
    %c0_i32 = arith.constant 0 : i32
    %c0_i32_0 = arith.constant 0 : i32
    %c0_i32_1 = arith.constant 0 : i32
    return %c0_i32, %c0_i32_0 : i32, i32
  }
  func.func @transform_10(%arg0: i32) -> (i32, i32) {
    %c0_i32 = arith.constant 0 : i32
    %c0_i32_0 = arith.constant 0 : i32
    %c0_i32_1 = arith.constant 0 : i32
    return %c0_i32, %c0_i32_0 : i32, i32
  }
  func.func @transform_11(%arg0: i32) -> (i32, i32) {
    %c0_i32 = arith.constant 0 : i32
    %c0_i32_0 = arith.constant 0 : i32
    %c0_i32_1 = arith.constant 0 : i32
    return %c0_i32, %c0_i32_0 : i32, i32
  }
  func.func @transform_12(%arg0: i32) -> (i32, i32) {
    %c0_i32 = arith.constant 0 : i32
    %c0_i32_0 = arith.constant 0 : i32
    %c0_i32_1 = arith.constant 0 : i32
    return %c0_i32, %c0_i32_0 : i32, i32
  }
  func.func @transform_13(%arg0: i32) -> (i32, i32) {
    %c0_i32 = arith.constant 0 : i32
    %c0_i32_0 = arith.constant 0 : i32
    %c0_i32_1 = arith.constant 0 : i32
    return %c0_i32, %c0_i32_0 : i32, i32
  }
  func.func @transform_14(%arg0: i32) -> (i32, i32) {
    %c0_i32 = arith.constant 0 : i32
    %c0_i32_0 = arith.constant 0 : i32
    %c0_i32_1 = arith.constant 0 : i32
    return %c0_i32, %c0_i32_0 : i32, i32
  }
  func.func @transform_15(%arg0: i32) -> (i32, i32) {
    %c0_i32 = arith.constant 0 : i32
    %c0_i32_0 = arith.constant 0 : i32
    %c0_i32_1 = arith.constant 0 : i32
    return %c0_i32, %c0_i32_0 : i32, i32
  }
  func.func @transform_16(%arg0: i32) -> (i32, i32) {
    %c0_i32 = arith.constant 0 : i32
    %c0_i32_0 = arith.constant 0 : i32
    %c0_i32_1 = arith.constant 0 : i32
    return %c0_i32, %c0_i32_0 : i32, i32
  }
  func.func @transform_17(%arg0: i32) -> (i32, i32) {
    %c0_i32 = arith.constant 0 : i32
    %c0_i32_0 = arith.constant 0 : i32
    %c0_i32_1 = arith.constant 0 : i32
    return %c0_i32, %c0_i32_0 : i32, i32
  }
  func.func @transform_18(%arg0: i32) -> (i32, i32) {
    %c0_i32 = arith.constant 0 : i32
    %c0_i32_0 = arith.constant 0 : i32
    %c0_i32_1 = arith.constant 0 : i32
    return %c0_i32, %c0_i32_0 : i32, i32
  }
  func.func @transform_19(%arg0: i32) -> (i32, i32) {
    %c0_i32 = arith.constant 0 : i32
    %c0_i32_0 = arith.constant 0 : i32
    return %arg0, %c0_i32 : i32, i32
  }
}

</mosaic_0001>

<bundles_post_ra>
// kernel: tpu_custom_call.1
= control target key start
LH: loop header
LB: loop body
LE: loop exit
PB: predicated region body
PF: predicated region fallthrough
CT: control target
= control target key end

     0   :  { %s13007_s0 = inlined_call_operand.vmem [shape: f32[2,256,36], index: 0, kind: input, shape index: {}]   ;;  %s13008_s1 = inlined_call_operand.vmem [shape: f32[64,64], index: 1, kind: input, shape index: {}]   ;;  %s13009_s2 = inlined_call_operand.hbm [shape: f32[128,128], index: 2, kind: input, shape index: {}]   ;;  %s13010_s3 = inlined_call_operand.hbm [shape: f32[36,64], index: 3, kind: input, shape index: {}]   ;;  %s13011_s4 = inlined_call_operand.vmem [shape: f32[1,64], index: 4, kind: input, shape index: {}]   ;;  %s13012_s5 = inlined_call_operand.vmem [shape: f32[1,64], index: 5, kind: input, shape index: {}]   ;;  %s13013_s6 = inlined_call_operand.vmem [shape: f32[1,64], index: 6, kind: input, shape index: {}]   ;;  %s13014_s7 = inlined_call_operand.vmem [shape: f32[576,128], index: 7, kind: input, shape index: {}]   ;;  %s13015_s8 = inlined_call_operand.vmem [shape: f32[1,128], index: 8, kind: input, shape index: {}]   ;;  %s13016_s9 = inlined_call_operand.vmem [shape: f32[1,128], index: 9, kind: input, shape index: {}]   ;;  %s13017_s10 = inlined_call_operand.vmem [shape: f32[1,128], index: 10, kind: input, shape index: {}]   ;;  %s13018_s11 = inlined_call_operand.hbm [shape: f32[1152,128], index: 11, kind: input, shape index: {}]   ;;  %s13019_s12 = inlined_call_operand.vmem [shape: f32[1,128], index: 12, kind: input, shape index: {}]   ;;  %s13020_s13 = inlined_call_operand.vmem [shape: f32[1,128], index: 13, kind: input, shape index: {}]   ;;  %s13021_s14 = inlined_call_operand.vmem [shape: f32[1,128], index: 14, kind: input, shape index: {}]   ;;  %s13022_s15 = inlined_call_operand.hbm [shape: f32[1152,128], index: 15, kind: input, shape index: {}]   ;;  %s13023_s16 = inlined_call_operand.vmem [shape: f32[1,128], index: 16, kind: input, shape index: {}]   ;;  %s13024_s17 = inlined_call_operand.vmem [shape: f32[1,128], index: 17, kind: input, shape index: {}]   ;;  %s13025_s18 = inlined_call_operand.vmem [shape: f32[1,128], index: 18, kind: input, shape index: {}]   ;;  %s13026_s19 = inlined_call_operand.hbm [shape: f32[2,128], index: 19, kind: output, shape index: {}]  }
   0x1   :  { %13096 = sst [smem:[#allocation51_spill]] %s13007_s0 }
   0x2   :  { %13097 = sst [smem:[#allocation52_spill]] %s13008_s1 }
   0x3   :  { %13098 = sst [smem:[#allocation53_spill]] %s13009_s2 }
   0x4   :  { %13099 = sst [smem:[#allocation54_spill]] %s13010_s3 }
   0x5   :  { %24 = vsyncpa [#allocation8], 0 }
   0x6   :  { %25 = vsyncpa [#allocation11], 0 }
   0x7   :  { %26 = vsyncpa [#allocation14], 0 }
   0x8   :  { %27 = vsyncpa [#allocation9], 0  ;;  %s8873_s0 = smov [#allocation10]   ;;  %s8874_s20 = smov [#allocation7]  }
   0x9   :  { %s49_s30 = sshll.u32 %s8873_s0, 4  ;;  %s37_s21 = sshll.u32 %s8874_s20, 4  ;;  %s50_s30 = int_to_ptr.vmem [resolvable:$true] %s49_s30  ;;  %s38_s21 = int_to_ptr.vmem [resolvable:$true] %s37_s21 }
   0xa   :  { %s8773_s1 = scalar_lea.vmem %s50_s30, 640  ;;  %p8778_p1 = scmp.lt.s32.totalorder %s50_s30, %s50_s30 }
   0xb   :  { %p8774_p0 = scmp.ne.s32.totalorder %s50_s30, %s8773_s1  ;;  %p8779_p2 = scmp.lt.s32.totalorder %s8773_s1, %s8773_s1 }
   0xd   :  { %p8780_p3 = por %p8779_p2, %p8778_p1 }
   0xf   :  { %p8781_p4 = pnand %p8780_p3, %p8774_p0 }
  0x11   :  { %8784 = shalt.err (!%p8781_p4)
}
  0x12   :  { %s8875_s22 = smov 128   ;;  %s8876_s2 = smov 8  }
  0x13   :  { %s13100_s25 = sld [smem:[#allocation54_spill]]  ;;  %s8793_s3 = scalar_lea.vmem %s38_s21, 2048 }
  0x14   :  { %p8794_p5 = scmp.ne.s32.totalorder %s38_s21, %s8793_s3  ;;  %p8798_p6 = scmp.lt.s32.totalorder %s38_s21, %s38_s21 }
  0x15   :  { %p8799_p7 = scmp.lt.s32.totalorder %s8793_s3, %s8793_s3 }
  0x17   :  { %p8800_p8 = por %p8799_p7, %p8798_p6 }
  0x19   :  { %55 = dma.hbm_to_vmem [thread:$0]  %s13100_s25, 640, %s50_s30, [#allocation11], %s8875_s22, %s8875_s22, %s8876_s2  }
  0x1a   :  { %p8801_p9 = pnand %p8800_p8, %p8794_p5 }
  0x1c   :  { %8804 = shalt.err (!%p8801_p9)
}
  0x1d   :  { %s13101_s28 = sld [smem:[#allocation53_spill]]  ;;  %s8877_s29 = smov [#allocation12]  }
  0x1e   :  { %s75_s0 = sshll.u32 %s8877_s29, 4  ;;  %s8878_s20 = smov [#allocation13]   ;;  %s76_s0 = int_to_ptr.vmem [resolvable:$true] %s75_s0 }
  0x1f   :  { %s93_s1 = sshll.u32 %s8878_s20, 4  ;;  %s8813_s30 = scalar_lea.vmem %s76_s0, 18432  ;;  %s94_s1 = int_to_ptr.vmem [resolvable:$true] %s93_s1 }
  0x20   :  { %p8814_p10 = scmp.ne.s32.totalorder %s76_s0, %s8813_s30  ;;  %p8818_p11 = scmp.lt.s32.totalorder %s76_s0, %s76_s0 }
  0x21   :  { %p8819_p12 = scmp.lt.s32.totalorder %s8813_s30, %s8813_s30 }
  0x23   :  { %43 = dma.hbm_to_vmem [thread:$0]  %s13101_s28, 2048, %s38_s21, [#allocation8], %s8875_s22, %s8875_s22, %s8876_s2  }
  0x24   :  { %p8820_p13 = por %p8819_p12, %p8818_p11 }
  0x26   :  { %p8821_p0 = pnand %p8820_p13, %p8814_p10 }
  0x28   :  { %8824 = shalt.err (!%p8821_p0)
}
  0x29   :  { %81 = dma.hbm_to_vmem [thread:$0]  %s13018_s11, 18432, %s76_s0, [#allocation11], %s8875_s22, %s8875_s22, %s8876_s2  }
  0x2a   :  { %s8833_s21 = scalar_lea.vmem %s94_s1, 18432  ;;  %p8838_p2 = scmp.lt.s32.totalorder %s94_s1, %s94_s1 }
  0x2b   :  { %p8834_p1 = scmp.ne.s32.totalorder %s94_s1, %s8833_s21  ;;  %p8839_p3 = scmp.lt.s32.totalorder %s8833_s21, %s8833_s21 }
  0x2d   :  { %p8840_p4 = por %p8839_p3, %p8838_p2 }
  0x2f   :  { %p8841_p5 = pnand %p8840_p4, %p8834_p1 }
  0x31   :  { %8844 = shalt.err (!%p8841_p5)
}
  0x32   :  { %99 = dma.hbm_to_vmem [thread:$0]  %s13022_s15, 18432, %s94_s1, [#allocation14], %s8875_s22, %s8875_s22, %s8876_s2  }
  0x33   :  { %8865 = dma.done.wait [#allocation8], 2048  }
  0x34   :  { %8866 = vsyncadd [#allocation8], 4294965248 }
  0x35   :  { %8867 = dma.done.wait [#allocation11], 19072  }
  0x36   :  { %8868 = vsyncadd [#allocation11], 4294948224 }
  0x37   :  { %8869 = dma.done.wait [#allocation14], 18432  }
  0x38   :  { %8870 = vsyncadd [#allocation14], 4294948864  ;;  %vm840_vm0 = vcmask 523264   ;;  %vm1681_vm1 = vcmask 516096   ;;  %v13029_v0 = vmov 0.0   ;;  %vm387_vm2 = vcmask 1043456  }
  0x39   :  { %1680 = vst.msk [vmem:[#allocation2] sm:$0xff] %vm840_vm0, %v13029_v0  ;;  %1683 = vst.msk [vmem:[#allocation2 + $0x120] sm:$0xff] %vm840_vm0, %v13029_v0  ;;  %8365 = vmatprep.subr.mxu1 %v13029_v0  ;;  %vm194_vm3 = vcmask 293888   ;;  %v186_v1 = vld [vmem:[#allocation10 + $0x20] sm:$0xf]  ;;  %v185_v2 = vld [vmem:[#allocation10 + $0x18] sm:$0xff] }
  0x3a   :  { %1682 = vst.msk [vmem:[#allocation2 + $0x8] sm:$0x1] %vm1681_vm1, %v13029_v0  ;;  %1684 = vst.msk [vmem:[#allocation2 + $0x128] sm:$0x1] %vm1681_vm1, %v13029_v0  ;;  %8240 = vmatprep.subr.msk.mxu0 %vm387_vm2, %v186_v1  ;;  %s13102_s22 = sld [smem:[#allocation51_spill]]  ;;  %v184_v4 = vld [vmem:[#allocation10 + $0x10] sm:$0xff] }
  0x3b   :  { %1690 = vst.msk [vmem:[#allocation3] sm:$0xff] %vm840_vm0, %v13029_v0  ;;  %1692 = vst.msk [vmem:[#allocation3 + $0x120] sm:$0xff] %vm840_vm0, %v13029_v0  ;;  %8241 = vmatpush3.msk.msra.mxu0 %vm387_vm2, %v186_v1  ;;  %v183_v5 = vld [vmem:[#allocation10 + $0x8] sm:$0xff]  ;;  %v182_v6 = vld [vmem:[#allocation10] sm:$0xff]  ;;  %s13103_s27 = sld [smem:[#allocation52_spill]]  ;;  %vm8880_vm4 = vmmov 0  }
  0x3c   :  { %1700 = vst.msk [vmem:[#allocation2 + $0x10] sm:$0x1] %vm1681_vm1, %v13029_v0  ;;  %1701 = vst.msk [vmem:[#allocation2 + $0x20] sm:$0x1] %vm1681_vm1, %v13029_v0  ;;  %8242 = vmatprep.subr.mxu0 %v185_v2  ;;  %8381 = vmatprep.mubr.msk.f32.mxu1 %vm8880_vm4, %v13029_v0  ;;  %vm1191_vm5 = vcmask 1041409   ;;  %s8882_s20 = smov 64  }
  0x3d   :  { %1702 = vst.msk [vmem:[#allocation2 + $0x30] sm:$0x1] %vm1681_vm1, %v13029_v0  ;;  %1703 = vst.msk [vmem:[#allocation2 + $0x40] sm:$0x1] %vm1681_vm1, %v13029_v0  ;;  %8243 = vmatpush3.msra.mxu0 %v185_v2  ;;  %vm2204_vm6 = vcmask 1046528   ;;  %vm2019_vm7 = vcmask 1048064  }
  0x3e   :  { %1704 = vst.msk [vmem:[#allocation2 + $0x50] sm:$0x1] %vm1681_vm1, %v13029_v0  ;;  %1705 = vst.msk [vmem:[#allocation2 + $0x60] sm:$0x1] %vm1681_vm1, %v13029_v0  ;;  %8244 = vmatprep.subr.mxu0 %v184_v4 }
  0x3f   :  { %1706 = vst.msk [vmem:[#allocation2 + $0x70] sm:$0x1] %vm1681_vm1, %v13029_v0  ;;  %1707 = vst.msk [vmem:[#allocation2 + $0x80] sm:$0x1] %vm1681_vm1, %v13029_v0  ;;  %8245 = vmatpush3.msra.mxu0 %v184_v4 }
  0x40   :  { %1708 = vst.msk [vmem:[#allocation2 + $0x90] sm:$0x1] %vm1681_vm1, %v13029_v0  ;;  %1709 = vst.msk [vmem:[#allocation2 + $0xa0] sm:$0x1] %vm1681_vm1, %v13029_v0  ;;  %v118_v3 = vld [vmem:[%s13102_s22] sm:$0xff]  ;;  %8246 = vmatprep.subr.mxu0 %v183_v5  ;;  %v119_v7 = vld [vmem:[%s13102_s22 + $0x8] sm:$0xff] }
  0x41   :  { %1710 = vst.msk [vmem:[#allocation2 + $0xb0] sm:$0x1] %vm1681_vm1, %v13029_v0  ;;  %1711 = vst.msk [vmem:[#allocation2 + $0xc0] sm:$0x1] %vm1681_vm1, %v13029_v0  ;;  %8250 = vmatprep.mubr.msk.f32.mxu0 %vm194_vm3, %v118_v3  ;;  %8247 = vmatpush3.msra.mxu0 %v183_v5  ;;  %v120_v8 = vld [vmem:[%s13102_s22 + $0x10] sm:$0xff]  ;;  %v121_v9 = vld [vmem:[%s13102_s22 + $0x18] sm:$0xff] }
  0x42   :  { %1712 = vst.msk [vmem:[#allocation2 + $0xd0] sm:$0x1] %vm1681_vm1, %v13029_v0  ;;  %1713 = vst.msk [vmem:[#allocation2 + $0xe0] sm:$0x1] %vm1681_vm1, %v13029_v0  ;;  %8248 = vmatprep.subr.mxu0 %v182_v6  ;;  %v122_v10 = vld [vmem:[%s13102_s22 + $0x20] sm:$0xff]  ;;  %v123_v11 = vld [vmem:[%s13102_s22 + $0x28] sm:$0xff] }
  0x43   :  { %1714 = vst.msk [vmem:[#allocation2 + $0xf0] sm:$0x1] %vm1681_vm1, %v13029_v0  ;;  %1715 = vst.msk [vmem:[#allocation2 + $0x100] sm:$0x1] %vm1681_vm1, %v13029_v0  ;;  %8249 = vmatpush3.msra.mxu0 %v182_v6  ;;  %v124_v12 = vld [vmem:[%s13102_s22 + $0x30] sm:$0xff]  ;;  %v125_v13 = vld [vmem:[%s13102_s22 + $0x38] sm:$0xff] }
  0x44   :  { %1718 = vst.msk [vmem:[#allocation2 + $0x130] sm:$0x1] %vm1681_vm1, %v13029_v0  ;;  %1719 = vst.msk [vmem:[#allocation2 + $0x140] sm:$0x1] %vm1681_vm1, %v13029_v0  ;;  %8251 = vmatmul.mubr.msk.f32.vlgmr.msra.gmra.mxu0 %vm194_vm3, %v119_v7  ;;  %8346 = vmatprep.subr.mxu0 %v13029_v0  ;;  %v126_v14 = vld [vmem:[%s13102_s22 + $0x40] sm:$0xff]  ;;  %v127_v15 = vld [vmem:[%s13102_s22 + $0x48] sm:$0xff] }
  0x45   :  { %1720 = vst.msk [vmem:[#allocation2 + $0x150] sm:$0x1] %vm1681_vm1, %v13029_v0  ;;  %1721 = vst.msk [vmem:[#allocation2 + $0x160] sm:$0x1] %vm1681_vm1, %v13029_v0  ;;  %8253 = vmatprep.mubr.msk.f32.mxu0 %vm194_vm3, %v120_v8  ;;  %v128_v16 = vld [vmem:[%s13102_s22 + $0x50] sm:$0xff]  ;;  %v129_v17 = vld [vmem:[%s13102_s22 + $0x58] sm:$0xff] }
  0x46   :  { %1722 = vst.msk [vmem:[#allocation2 + $0x170] sm:$0x1] %vm1681_vm1, %v13029_v0  ;;  %1723 = vst.msk [vmem:[#allocation2 + $0x180] sm:$0x1] %vm1681_vm1, %v13029_v0  ;;  %v130_v18 = vld [vmem:[%s13102_s22 + $0x60] sm:$0xff]  ;;  %v131_v19 = vld [vmem:[%s13102_s22 + $0x68] sm:$0xff] }
  0x47   :  { %1724 = vst.msk [vmem:[#allocation2 + $0x190] sm:$0x1] %vm1681_vm1, %v13029_v0  ;;  %1725 = vst.msk [vmem:[#allocation2 + $0x1a0] sm:$0x1] %vm1681_vm1, %v13029_v0  ;;  %v132_v20 = vld [vmem:[%s13102_s22 + $0x70] sm:$0xff]  ;;  %v133_v21 = vld [vmem:[%s13102_s22 + $0x78] sm:$0xff] }
  0x48   :  { %1726 = vst.msk [vmem:[#allocation2 + $0x1b0] sm:$0x1] %vm1681_vm1, %v13029_v0  ;;  %1727 = vst.msk [vmem:[#allocation2 + $0x1c0] sm:$0x1] %vm1681_vm1, %v13029_v0  ;;  %8254 = vmatmul.mubr.msk.f32.gmra.mxu0 %vm194_vm3, %v121_v9  ;;  %v134_v22 = vld [vmem:[%s13102_s22 + $0x80] sm:$0xff]  ;;  %v135_v23 = vld [vmem:[%s13102_s22 + $0x88] sm:$0xff] }
  0x49   :  { %1728 = vst.msk [vmem:[#allocation2 + $0x1d0] sm:$0x1] %vm1681_vm1, %v13029_v0  ;;  %1729 = vst.msk [vmem:[#allocation2 + $0x1e0] sm:$0x1] %vm1681_vm1, %v13029_v0  ;;  %8256 = vmatprep.mubr.msk.f32.mxu0 %vm194_vm3, %v122_v10  ;;  %v136_v24 = vld [vmem:[%s13102_s22 + $0x90] sm:$0xff]  ;;  %v137_v25 = vld [vmem:[%s13102_s22 + $0x98] sm:$0xff] }
  0x4a   :  { %1730 = vst.msk [vmem:[#allocation2 + $0x1f0] sm:$0x1] %vm1681_vm1, %v13029_v0  ;;  %1731 = vst.msk [vmem:[#allocation2 + $0x200] sm:$0x1] %vm1681_vm1, %v13029_v0  ;;  %v138_v26 = vld [vmem:[%s13102_s22 + $0xa0] sm:$0xff]  ;;  %v139_v27 = vld [vmem:[%s13102_s22 + $0xa8] sm:$0xff] }
  0x4b   :  { %1732 = vst.msk [vmem:[#allocation2 + $0x210] sm:$0x1] %vm1681_vm1, %v13029_v0  ;;  %1733 = vst.msk [vmem:[#allocation2 + $0x220] sm:$0x1] %vm1681_vm1, %v13029_v0  ;;  %v140_v28 = vld [vmem:[%s13102_s22 + $0xb0] sm:$0xff]  ;;  %v141_v29 = vld [vmem:[%s13102_s22 + $0xb8] sm:$0xff] }
  0x4c   :  { %3479 = vst [vmem:[#allocation5] sm:$0xff] %v13029_v0  ;;  %3480 = vst [vmem:[#allocation5 + $0x8] sm:$0x3] %v13029_v0  ;;  %8257 = vmatmul.mubr.msk.f32.gmra.mxu0 %vm194_vm3, %v123_v11  ;;  %v142_v30 = vld [vmem:[%s13102_s22 + $0xc0] sm:$0xff]  ;;  %v143_v31 = vld [vmem:[%s13102_s22 + $0xc8] sm:$0xff] }
  0x4d   :  { %3481 = vst [vmem:[#allocation5 + $0xa0] sm:$0xff] %v13029_v0  ;;  %3482 = vst [vmem:[#allocation5 + $0xa8] sm:$0x3] %v13029_v0  ;;  %8259 = vmatprep.mubr.msk.f32.mxu0 %vm194_vm3, %v124_v12  ;;  %v144_v32 = vld [vmem:[%s13102_s22 + $0xd0] sm:$0xff]  ;;  %v145_v33 = vld [vmem:[%s13102_s22 + $0xd8] sm:$0xff] }
  0x4e   :  { %3484 = vst [vmem:[#allocation5 + $0x90] sm:$0xff] %v13029_v0  ;;  %3485 = vst [vmem:[#allocation5 + $0x98] sm:$0x3] %v13029_v0  ;;  %v146_v34 = vld [vmem:[%s13102_s22 + $0xe0] sm:$0xff]  ;;  %v147_v35 = vld [vmem:[%s13102_s22 + $0xe8] sm:$0xff] }
  0x4f   :  { %3486 = vst [vmem:[#allocation5 + $0x130] sm:$0xff] %v13029_v0  ;;  %3487 = vst [vmem:[#allocation5 + $0x138] sm:$0x3] %v13029_v0  ;;  %v148_v36 = vld [vmem:[%s13102_s22 + $0xf0] sm:$0xff]  ;;  %v149_v37 = vld [vmem:[%s13102_s22 + $0xf8] sm:$0xff] }
  0x50   :  { %3489 = vst [vmem:[#allocation5 + $0x10] sm:$0x1] %v13029_v0  ;;  %3490 = vst [vmem:[#allocation5 + $0x20] sm:$0x1] %v13029_v0  ;;  %8260 = vmatmul.mubr.msk.f32.gmra.mxu0 %vm194_vm3, %v125_v13  ;;  %v150_v38 = vld [vmem:[%s13102_s22 + $0x100] sm:$0xff]  ;;  %v151_v39 = vld [vmem:[%s13102_s22 + $0x108] sm:$0xff] }
  0x51   :  { %3491 = vst [vmem:[#allocation5 + $0x30] sm:$0x1] %v13029_v0  ;;  %3492 = vst [vmem:[#allocation5 + $0x40] sm:$0x1] %v13029_v0  ;;  %8262 = vmatprep.mubr.msk.f32.mxu0 %vm194_vm3, %v126_v14  ;;  %v152_v40 = vld [vmem:[%s13102_s22 + $0x110] sm:$0xff]  ;;  %v153_v41 = vld [vmem:[%s13102_s22 + $0x118] sm:$0xff] }
  0x52   :  { %3493 = vst [vmem:[#allocation5 + $0x50] sm:$0x1] %v13029_v0  ;;  %3494 = vst [vmem:[#allocation5 + $0x60] sm:$0x1] %v13029_v0  ;;  %v154_v42 = vld [vmem:[%s13102_s22 + $0x120] sm:$0xff]  ;;  %v155_v43 = vld [vmem:[%s13102_s22 + $0x128] sm:$0xff] }
  0x53   :  { %3495 = vst [vmem:[#allocation5 + $0x70] sm:$0x1] %v13029_v0  ;;  %3496 = vst [vmem:[#allocation5 + $0x80] sm:$0x1] %v13029_v0  ;;  %v156_v44 = vld [vmem:[%s13102_s22 + $0x130] sm:$0xff]  ;;  %v157_v45 = vld [vmem:[%s13102_s22 + $0x138] sm:$0xff] }
  0x54   :  { %3499 = vst [vmem:[#allocation5 + $0xb0] sm:$0x1] %v13029_v0  ;;  %3500 = vst [vmem:[#allocation5 + $0xc0] sm:$0x1] %v13029_v0  ;;  %8263 = vmatmul.mubr.msk.f32.gmra.mxu0 %vm194_vm3, %v127_v15  ;;  %v158_v46 = vld [vmem:[%s13102_s22 + $0x140] sm:$0xff]  ;;  %v159_v47 = vld [vmem:[%s13102_s22 + $0x148] sm:$0xff] }
  0x55   :  { %3501 = vst [vmem:[#allocation5 + $0xd0] sm:$0x1] %v13029_v0  ;;  %3502 = vst [vmem:[#allocation5 + $0xe0] sm:$0x1] %v13029_v0  ;;  %8265 = vmatprep.mubr.msk.f32.mxu0 %vm194_vm3, %v128_v16  ;;  %v160_v48 = vld [vmem:[%s13102_s22 + $0x150] sm:$0xff]  ;;  %v161_v49 = vld [vmem:[%s13102_s22 + $0x158] sm:$0xff] }
  0x56   :  { %3503 = vst [vmem:[#allocation5 + $0xf0] sm:$0x1] %v13029_v0  ;;  %3504 = vst [vmem:[#allocation5 + $0x100] sm:$0x1] %v13029_v0  ;;  %v162_v50 = vld [vmem:[%s13102_s22 + $0x160] sm:$0xff]  ;;  %v163_v51 = vld [vmem:[%s13102_s22 + $0x168] sm:$0xff] }
  0x57   :  { %3505 = vst [vmem:[#allocation5 + $0x110] sm:$0x1] %v13029_v0  ;;  %3506 = vst [vmem:[#allocation5 + $0x120] sm:$0x1] %v13029_v0  ;;  %v164_v52 = vld [vmem:[%s13102_s22 + $0x170] sm:$0xff]  ;;  %v165_v53 = vld [vmem:[%s13102_s22 + $0x178] sm:$0xff] }
  0x58   :  { %3509 = vst [vmem:[#allocation5 + $0x19] sm:$0x1] %v13029_v0  ;;  %3510 = vst [vmem:[#allocation5 + $0x29] sm:$0x1] %v13029_v0  ;;  %8266 = vmatmul.mubr.msk.f32.gmra.mxu0 %vm194_vm3, %v129_v17  ;;  %v166_v54 = vld [vmem:[%s13102_s22 + $0x180] sm:$0xff]  ;;  %v1188_v55 = vld [vmem:[%s13103_s27 + $0x38] sm:$0xff] }
  0x59   :  { %3511 = vst [vmem:[#allocation5 + $0x39] sm:$0x1] %v13029_v0  ;;  %3512 = vst [vmem:[#allocation5 + $0x49] sm:$0x1] %v13029_v0  ;;  %8268 = vmatprep.mubr.msk.f32.mxu0 %vm194_vm3, %v130_v18  ;;  %v167_v56 = vld [vmem:[%s13102_s22 + $0x188] sm:$0xff]  ;;  %8347 = vmatpush3.msra.mxu0 %v1188_v55  ;;  %v168_v57 = vld [vmem:[%s13102_s22 + $0x190] sm:$0xff] }
  0x5a   :  { %3513 = vst [vmem:[#allocation5 + $0x59] sm:$0x1] %v13029_v0  ;;  %3514 = vst [vmem:[#allocation5 + $0x69] sm:$0x1] %v13029_v0  ;;  %8348 = vmatprep.subr.mxu0 %v13029_v0  ;;  %8366 = vmatpush3.msra.mxu1 %v1188_v55  ;;  %v169_v58 = vld [vmem:[%s13102_s22 + $0x198] sm:$0xff]  ;;  %v170_v59 = vld [vmem:[%s13102_s22 + $0x1a0] sm:$0xff] }
  0x5b   :  { %3515 = vst [vmem:[#allocation5 + $0x79] sm:$0x1] %v13029_v0  ;;  %3516 = vst [vmem:[#allocation5 + $0x89] sm:$0x1] %v13029_v0  ;;  %8367 = vmatprep.subr.mxu1 %v13029_v0  ;;  %v171_v60 = vld [vmem:[%s13102_s22 + $0x1a8] sm:$0xff]  ;;  %v172_v61 = vld [vmem:[%s13102_s22 + $0x1b0] sm:$0xff] }
  0x5c   :  { %3519 = vst [vmem:[#allocation5 + $0xb9] sm:$0x1] %v13029_v0  ;;  %3520 = vst [vmem:[#allocation5 + $0xc9] sm:$0x1] %v13029_v0  ;;  %8269 = vmatmul.mubr.msk.f32.gmra.mxu0 %vm194_vm3, %v131_v19  ;;  %v173_v62 = vld [vmem:[%s13102_s22 + $0x1b8] sm:$0xff]  ;;  %v174_v63 = vld [vmem:[%s13102_s22 + $0x1c0] sm:$0xff] }
  0x5d   :  { %3521 = vst [vmem:[#allocation5 + $0xd9] sm:$0x1] %v13029_v0  ;;  %3522 = vst [vmem:[#allocation5 + $0xe9] sm:$0x1] %v13029_v0  ;;  %8271 = vmatprep.mubr.msk.f32.mxu0 %vm194_vm3, %v132_v20  ;;  %v1187_v1 = vld [vmem:[%s13103_s27 + $0x30] sm:$0xff]  ;;  %v175_v2 = vld [vmem:[%s13102_s22 + $0x1c8] sm:$0xff] }
  0x5e   :  { %3523 = vst [vmem:[#allocation5 + $0xf9] sm:$0x1] %v13029_v0  ;;  %3524 = vst [vmem:[#allocation5 + $0x109] sm:$0x1] %v13029_v0  ;;  %8349 = vmatpush3.msra.mxu0 %v1187_v1  ;;  %v176_v3 = vld [vmem:[%s13102_s22 + $0x1d0] sm:$0xff]  ;;  %8368 = vmatpush3.msra.mxu1 %v1187_v1  ;;  %v177_v4 = vld [vmem:[%s13102_s22 + $0x1d8] sm:$0xff] }
  0x5f   :  { %3525 = vst [vmem:[#allocation5 + $0x119] sm:$0x1] %v13029_v0  ;;  %3526 = vst [vmem:[#allocation5 + $0x129] sm:$0x1] %v13029_v0  ;;  %8350 = vmatprep.subr.mxu0 %v13029_v0  ;;  %8369 = vmatprep.subr.mxu1 %v13029_v0  ;;  %v178_v5 = vld [vmem:[%s13102_s22 + $0x1e0] sm:$0xff]  ;;  %v179_v6 = vld [vmem:[%s13102_s22 + $0x1e8] sm:$0xff] }
  0x60   :  { %1699 = vst.msk [vmem:[#allocation2] sm:$0x1] %vm1681_vm1, %v13029_v0  ;;  %1717 = vst.msk [vmem:[#allocation2 + $0x120] sm:$0x1] %vm1681_vm1, %v13029_v0  ;;  %8272 = vmatmul.mubr.msk.f32.gmra.mxu0 %vm194_vm3, %v133_v21  ;;  %v180_v7 = vld [vmem:[%s13102_s22 + $0x1f0] sm:$0xff]  ;;  %v181_v8 = vld [vmem:[%s13102_s22 + $0x1f8] sm:$0xff] }
  0x61   :  { %3488 = vst [vmem:[#allocation5] sm:$0x1] %v13029_v0  ;;  %3497 = vst [vmem:[#allocation5 + $0x90] sm:$0x1] %v13029_v0  ;;  %8274 = vmatprep.mubr.msk.f32.mxu0 %vm194_vm3, %v134_v22  ;;  %v1186_v9 = vld [vmem:[%s13103_s27 + $0x28] sm:$0xff]  ;;  %v1185_v10 = vld [vmem:[%s13103_s27 + $0x20] sm:$0xff] }
  0x62   :  { %3498 = vst [vmem:[#allocation5 + $0xa0] sm:$0x1] %v13029_v0  ;;  %3507 = vst [vmem:[#allocation5 + $0x130] sm:$0x1] %v13029_v0  ;;  %8370 = vmatpush3.msra.mxu1 %v1186_v9  ;;  %8351 = vmatpush3.msra.mxu0 %v1186_v9  ;;  %v1184_v11 = vld [vmem:[%s13103_s27 + $0x18] sm:$0xff]  ;;  %v1183_v12 = vld [vmem:[%s13103_s27 + $0x10] sm:$0xff] }
  0x63   :  { %3508 = vst [vmem:[#allocation5 + $0x9] sm:$0x1] %v13029_v0  ;;  %3517 = vst [vmem:[#allocation5 + $0x99] sm:$0x1] %v13029_v0  ;;  %8371 = vmatprep.subr.mxu1 %v13029_v0  ;;  %8352 = vmatprep.subr.mxu0 %v13029_v0  ;;  %v1182_v13 = vld [vmem:[%s13103_s27 + $0x8] sm:$0xff] }
  0x64   :  { %3518 = vst [vmem:[#allocation5 + $0xa9] sm:$0x1] %v13029_v0  ;;  %3527 = vst [vmem:[#allocation5 + $0x139] sm:$0x1] %v13029_v0  ;;  %8275 = vmatmul.mubr.msk.f32.gmra.mxu0 %vm194_vm3, %v135_v23  ;;  %8372 = vmatpush3.msra.mxu1 %v1185_v10  ;;  %v9430_v14 = vld [vmem:[%s13011_s4] ss:$0 sm:$0xff] }
  0x65   :  { %8277 = vmatprep.mubr.msk.f32.mxu0 %vm194_vm3, %v136_v24  ;;  %8353 = vmatpush3.msra.mxu0 %v1185_v10 }
  0x66   :  { %8354 = vmatprep.subr.mxu0 %v13029_v0  ;;  %8373 = vmatprep.subr.mxu1 %v13029_v0 }
  0x67   :  { %8355 = vmatpush3.msra.mxu0 %v1184_v11  ;;  %8374 = vmatpush3.msra.mxu1 %v1184_v11 }
  0x68   :  { %8278 = vmatmul.mubr.msk.f32.gmra.mxu0 %vm194_vm3, %v137_v25  ;;  %8356 = vmatprep.subr.mxu0 %v13029_v0 }
  0x69   :  { %8280 = vmatprep.mubr.msk.f32.mxu0 %vm194_vm3, %v138_v26  ;;  %8375 = vmatprep.subr.mxu1 %v13029_v0 }
  0x6a   :  { %8357 = vmatpush3.msra.mxu0 %v1183_v12  ;;  %8376 = vmatpush3.msra.mxu1 %v1183_v12 }
  0x6b   :  { %8358 = vmatprep.subr.mxu0 %v13029_v0  ;;  %8377 = vmatprep.subr.mxu1 %v13029_v0 }
  0x6c   :  { %8281 = vmatmul.mubr.msk.f32.gmra.mxu0 %vm194_vm3, %v139_v27  ;;  %8378 = vmatpush3.msra.mxu1 %v1182_v13 }
  0x6d   :  { %8283 = vmatprep.mubr.msk.f32.mxu0 %vm194_vm3, %v140_v28  ;;  %8359 = vmatpush3.msra.mxu0 %v1182_v13 }
  0x6e   :  { %8360 = vmatprep.subr.mxu0 %v13029_v0  ;;  %8379 = vmatprep.subr.mxu1 %v13029_v0 }
  0x70   :  { %8284 = vmatmul.mubr.msk.f32.gmra.mxu0 %vm194_vm3, %v141_v29 }
  0x71   :  { %8286 = vmatprep.mubr.msk.f32.mxu0 %vm194_vm3, %v142_v30 }
  0x74   :  { %8287 = vmatmul.mubr.msk.f32.gmra.mxu0 %vm194_vm3, %v143_v31 }
  0x75   :  { %8289 = vmatprep.mubr.msk.f32.mxu0 %vm194_vm3, %v144_v32 }
  0x78   :  { %8290 = vmatmul.mubr.msk.f32.gmra.mxu0 %vm194_vm3, %v145_v33 }
  0x79   :  { %8292 = vmatprep.mubr.msk.f32.mxu0 %vm194_vm3, %v146_v34 }
  0x7c   :  { %8293 = vmatmul.mubr.msk.f32.gmra.mxu0 %vm194_vm3, %v147_v35 }
  0x7d   :  { %8295 = vmatprep.mubr.msk.f32.mxu0 %vm194_vm3, %v148_v36 }
  0x80   :  { %8296 = vmatmul.mubr.msk.f32.gmra.mxu0 %vm194_vm3, %v149_v37 }
  0x81   :  { %8298 = vmatprep.mubr.msk.f32.mxu0 %vm194_vm3, %v150_v38 }
  0x84   :  { %8299 = vmatmul.mubr.msk.f32.gmra.mxu0 %vm194_vm3, %v151_v39 }
  0x85   :  { %8301 = vmatprep.mubr.msk.f32.mxu0 %vm194_vm3, %v152_v40 }
  0x88   :  { %8302 = vmatmul.mubr.msk.f32.gmra.mxu0 %vm194_vm3, %v153_v41 }
  0x89   :  { %8304 = vmatprep.mubr.msk.f32.mxu0 %vm194_vm3, %v154_v42 }
  0x8c   :  { %8305 = vmatmul.mubr.msk.f32.gmra.mxu0 %vm194_vm3, %v155_v43 }
  0x8d   :  { %8307 = vmatprep.mubr.msk.f32.mxu0 %vm194_vm3, %v156_v44 }
  0x90   :  { %8308 = vmatmul.mubr.msk.f32.gmra.mxu0 %vm194_vm3, %v157_v45 }
  0x91   :  { %8310 = vmatprep.mubr.msk.f32.mxu0 %vm194_vm3, %v158_v46 }
  0x94   :  { %8311 = vmatmul.mubr.msk.f32.gmra.mxu0 %vm194_vm3, %v159_v47 }
  0x95   :  { %8313 = vmatprep.mubr.msk.f32.mxu0 %vm194_vm3, %v160_v48 }
  0x98   :  { %8314 = vmatmul.mubr.msk.f32.gmra.mxu0 %vm194_vm3, %v161_v49 }
  0x99   :  { %8316 = vmatprep.mubr.msk.f32.mxu0 %vm194_vm3, %v162_v50 }
  0x9c   :  { %8317 = vmatmul.mubr.msk.f32.gmra.mxu0 %vm194_vm3, %v163_v51 }
  0x9d   :  { %8319 = vmatprep.mubr.msk.f32.mxu0 %vm194_vm3, %v164_v52 }
  0xa0   :  { %8320 = vmatmul.mubr.msk.f32.gmra.mxu0 %vm194_vm3, %v165_v53 }
  0xa1   :  { %8322 = vmatprep.mubr.msk.f32.mxu0 %vm194_vm3, %v166_v54 }
  0xa4   :  { %8323 = vmatmul.mubr.msk.f32.gmra.mxu0 %vm194_vm3, %v167_v56 }
  0xa5   :  { %8325 = vmatprep.mubr.msk.f32.mxu0 %vm194_vm3, %v168_v57 }
  0xa8   :  { %8326 = vmatmul.mubr.msk.f32.gmra.mxu0 %vm194_vm3, %v169_v58 }
  0xa9   :  { %8328 = vmatprep.mubr.msk.f32.mxu0 %vm194_vm3, %v170_v59  ;;  %v1181_v59 = vld [vmem:[%s13103_s27] sm:$0xff] }
  0xaa   :  { %8361 = vmatpush3.msra.mxu0 %v1181_v59  ;;  %8380 = vmatpush3.msra.mxu1 %v1181_v59 }
  0xac   :  { %8329 = vmatmul.mubr.msk.f32.gmra.mxu0 %vm194_vm3, %v171_v60 }
  0xad   :  { %8331 = vmatprep.mubr.msk.f32.mxu0 %vm194_vm3, %v172_v61 }
  0xb0   :  { %8332 = vmatmul.mubr.msk.f32.gmra.mxu0 %vm194_vm3, %v173_v62 }
  0xb1   :  { %8334 = vmatprep.mubr.msk.f32.mxu0 %vm194_vm3, %v174_v63 }
  0xb4   :  { %8335 = vmatmul.mubr.msk.f32.gmra.mxu0 %vm194_vm3, %v175_v2 }
  0xb5   :  { %8337 = vmatprep.mubr.msk.f32.mxu0 %vm194_vm3, %v176_v3 }
  0xb8   :  { %8338 = vmatmul.mubr.msk.f32.gmra.mxu0 %vm194_vm3, %v177_v4 }
  0xb9   :  { %8340 = vmatprep.mubr.msk.f32.mxu0 %vm194_vm3, %v178_v5 }
  0xbc   :  { %8341 = vmatmul.mubr.msk.f32.gmra.mxu0 %vm194_vm3, %v179_v6 }
  0xbd   :  { %8343 = vmatprep.mubr.msk.f32.mxu0 %vm194_vm3, %v180_v7 }
  0xc0   :  { %8344 = vmatmul.mubr.msk.f32.gmra.mxu0 %vm194_vm3, %v181_v8 }
  0xc1   :  { %8362 = vmatprep.mubr.msk.f32.mxu0 %vm8880_vm4, %v13029_v0 }
 0x104   :  { %v8252_v15 = vpop.f32.mrf.mxu0 }
 0x105   :  { %v463_v16 = vadd.f32 %v8252_v15, %v9430_v14 }
 0x106   :  { %v457_v17 = vpop.f32.mrf.mxu0 }
 0x107   :  { %v458_v18 = vadd.f32 %v9430_v14, %v457_v17  ;;  %v9436_v19 = vmax.f32 %v463_v16, 0.0 }
 0x108   :  { %v8255_v20 = vpop.f32.mrf.mxu0 }
 0x109   :  { %v9438_v21 = vmax.f32 %v458_v18, 0.0  ;;  %v473_v22 = vadd.f32 %v8255_v20, %v9430_v14  ;;  %v980_v26 = vmul.f32 %v9436_v19, %v9436_v19  ;;  %v842_v31 = vsel %vm840_vm0, %v9436_v19, 0.0 }
 0x10a   :  { %v467_v23 = vpop.f32.mrf.mxu0 }
 0x10b   :  { %v979_v24 = vmul.f32 %v9438_v21, %v9438_v21  ;;  %v9443_v25 = vmax.f32 %v473_v22, 0.0  ;;  %v841_v27 = vsel %vm840_vm0, %v9438_v21, 0.0  ;;  %v468_v28 = vadd.f32 %v9430_v14, %v467_v23 }
 0x10c   :  { %v8258_v29 = vpop.f32.mrf.mxu0  ;;  %v843_v36 = vadd.f32 %v842_v31, %v841_v27  ;;  %v1044_v39 = vsel %vm840_vm0, %v980_v26, 0.0 }
 0x10d   :  { %v483_v30 = vadd.f32 %v8258_v29, %v9430_v14  ;;  %v1043_v32 = vsel %vm840_vm0, %v979_v24, 0.0  ;;  %v982_v33 = vmul.f32 %v9443_v25, %v9443_v25  ;;  %v9456_v34 = vmax.f32 %v468_v28, 0.0 }
 0x10e   :  { %v477_v35 = vpop.f32.mrf.mxu0  ;;  %v1045_v43 = vadd.f32 %v1044_v39, %v1043_v32  ;;  %v846_v46 = vsel %vm840_vm0, %v9443_v25, 0.0 }
 0x10f   :  { %v9458_v37 = vmax.f32 %v483_v30, 0.0  ;;  %v478_v38 = vadd.f32 %v9430_v14, %v477_v35  ;;  %v844_v40 = vsel %vm840_vm0, %v9456_v34, 0.0  ;;  %v981_v41 = vmul.f32 %v9456_v34, %v9456_v34 }
 0x110   :  { %v8261_v42 = vpop.f32.mrf.mxu0  ;;  %v845_v44 = vadd.f32 %v844_v40, %v843_v36  ;;  %v1048_v47 = vsel %vm840_vm0, %v982_v33, 0.0 }
 0x111   :  { %v9466_v45 = vmax.f32 %v478_v38, 0.0  ;;  %v1046_v48 = vsel %vm840_vm0, %v981_v41, 0.0  ;;  %v493_v49 = vadd.f32 %v8261_v42, %v9430_v14  ;;  %v984_v52 = vmul.f32 %v9458_v37, %v9458_v37 }
 0x112   :  { %v487_v50 = vpop.f32.mrf.mxu0  ;;  %v1047_v51 = vadd.f32 %v1046_v48, %v1045_v43  ;;  %v847_v53 = vadd.f32 %v846_v46, %v845_v44  ;;  %v850_v63 = vsel %vm840_vm0, %v9458_v37, 0.0 }
 0x113   :  { %v848_v54 = vsel %vm840_vm0, %v9466_v45, 0.0  ;;  %v983_v55 = vmul.f32 %v9466_v45, %v9466_v45  ;;  %v9479_v56 = vmax.f32 %v493_v49, 0.0  ;;  %v488_v57 = vadd.f32 %v9430_v14, %v487_v50 }
 0x114   :  { %v8264_v58 = vpop.f32.mrf.mxu0  ;;  %v849_v60 = vadd.f32 %v848_v54, %v847_v53  ;;  %v1049_v61 = vadd.f32 %v1048_v47, %v1047_v51  ;;  %v1052_v8 = vsel %vm840_vm0, %v984_v52, 0.0 }
 0x115   :  { %v503_v62 = vadd.f32 %v8264_v58, %v9430_v14  ;;  %v1050_v1 = vsel %vm840_vm0, %v983_v55, 0.0  ;;  %v9491_v2 = vmax.f32 %v488_v57, 0.0  ;;  %v986_v5 = vmul.f32 %v9479_v56, %v9479_v56 }
 0x116   :  { %v497_v3 = vpop.f32.mrf.mxu0  ;;  %v1051_v4 = vadd.f32 %v1050_v1, %v1049_v61  ;;  %v851_v6 = vadd.f32 %v850_v63, %v849_v60  ;;  %v854_v16 = vsel %vm840_vm0, %v9479_v56, 0.0 }
 0x117   :  { %v498_v7 = vadd.f32 %v9430_v14, %v497_v3  ;;  %v852_v9 = vsel %vm840_vm0, %v9491_v2, 0.0  ;;  %v985_v10 = vmul.f32 %v9491_v2, %v9491_v2  ;;  %v9503_v11 = vmax.f32 %v503_v62, 0.0 }
 0x118   :  { %v8267_v12 = vpop.f32.mrf.mxu0  ;;  %v853_v13 = vadd.f32 %v852_v9, %v851_v6  ;;  %v1053_v15 = vadd.f32 %v1052_v8, %v1051_v4  ;;  %v1056_v23 = vsel %vm840_vm0, %v986_v5, 0.0 }
 0x119   :  { %v1054_v17 = vsel %vm840_vm0, %v985_v10, 0.0  ;;  %v9508_v18 = vmax.f32 %v498_v7, 0.0  ;;  %v513_v20 = vadd.f32 %v8267_v12, %v9430_v14  ;;  %v988_v28 = vmul.f32 %v9503_v11, %v9503_v11 }
 0x11a   :  { %v507_v22 = vpop.f32.mrf.mxu0  ;;  %v1055_v24 = vadd.f32 %v1054_v17, %v1053_v15  ;;  %v855_v26 = vadd.f32 %v854_v16, %v853_v13  ;;  %v858_v39 = vsel %vm840_vm0, %v9503_v11, 0.0 }
 0x11b   :  { %v508_v27 = vadd.f32 %v9430_v14, %v507_v22  ;;  %v856_v29 = vsel %vm840_vm0, %v9508_v18, 0.0  ;;  %v987_v30 = vmul.f32 %v9508_v18, %v9508_v18  ;;  %v9519_v31 = vmax.f32 %v513_v20, 0.0 }
 0x11c   :  { %v8270_v32 = vpop.f32.mrf.mxu0  ;;  %v857_v33 = vadd.f32 %v856_v29, %v855_v26  ;;  %v1057_v35 = vadd.f32 %v1056_v23, %v1055_v24  ;;  %v1060_v47 = vsel %vm840_vm0, %v988_v28, 0.0 }
 0x11d   :  { %v9521_v36 = vmax.f32 %v508_v27, 0.0  ;;  %v523_v38 = vadd.f32 %v8270_v32, %v9430_v14  ;;  %v1058_v40 = vsel %vm840_vm0, %v987_v30, 0.0  ;;  %v990_v48 = vmul.f32 %v9519_v31, %v9519_v31 }
 0x11e   :  { %v517_v41 = vpop.f32.mrf.mxu0  ;;  %v1059_v42 = vadd.f32 %v1058_v40, %v1057_v35  ;;  %v859_v43 = vadd.f32 %v858_v39, %v857_v33  ;;  %v862_v57 = vsel %vm840_vm0, %v9519_v31, 0.0 }
 0x11f   :  { %v860_v44 = vsel %vm840_vm0, %v9521_v36, 0.0  ;;  %v989_v46 = vmul.f32 %v9521_v36, %v9521_v36  ;;  %v9534_v49 = vmax.f32 %v523_v38, 0.0  ;;  %v518_v50 = vadd.f32 %v9430_v14, %v517_v41 }
 0x120   :  { %v8273_v51 = vpop.f32.mrf.mxu0  ;;  %v861_v52 = vadd.f32 %v860_v44, %v859_v43  ;;  %v1061_v53 = vadd.f32 %v1060_v47, %v1059_v42  ;;  %v1064_v1 = vsel %vm840_vm0, %v990_v48, 0.0 }
 0x121   :  { %v1062_v54 = vsel %vm840_vm0, %v989_v46, 0.0  ;;  %v533_v55 = vadd.f32 %v8273_v51, %v9430_v14  ;;  %v9541_v58 = vmax.f32 %v518_v50, 0.0  ;;  %v992_v61 = vmul.f32 %v9534_v49, %v9534_v49 }
 0x122   :  { %v527_v59 = vpop.f32.mrf.mxu0  ;;  %v1063_v60 = vadd.f32 %v1062_v54, %v1061_v53  ;;  %v863_v62 = vadd.f32 %v862_v57, %v861_v52  ;;  %v866_v9 = vsel %vm840_vm0, %v9534_v49, 0.0 }
 0x123   :  { %v528_v63 = vadd.f32 %v9430_v14, %v527_v59  ;;  %v864_v3 = vsel %vm840_vm0, %v9541_v58, 0.0  ;;  %v991_v4 = vmul.f32 %v9541_v58, %v9541_v58  ;;  %v9551_v5 = vmax.f32 %v533_v55, 0.0 }
 0x124   :  { %v8276_v6 = vpop.f32.mrf.mxu0  ;;  %v865_v7 = vadd.f32 %v864_v3, %v863_v62  ;;  %v1065_v8 = vadd.f32 %v1064_v1, %v1063_v60  ;;  %v1068_v16 = vsel %vm840_vm0, %v992_v61, 0.0 }
 0x125   :  { %v1066_v10 = vsel %vm840_vm0, %v991_v4, 0.0  ;;  %v9556_v12 = vmax.f32 %v528_v63, 0.0  ;;  %v543_v13 = vadd.f32 %v8276_v6, %v9430_v14  ;;  %v994_v23 = vmul.f32 %v9551_v5, %v9551_v5 }
 0x126   :  { %v537_v15 = vpop.f32.mrf.mxu0  ;;  %v1067_v17 = vadd.f32 %v1066_v10, %v1065_v8  ;;  %v867_v20 = vadd.f32 %v866_v9, %v865_v7  ;;  %v870_v35 = vsel %vm840_vm0, %v9551_v5, 0.0 }
 0x127   :  { %v538_v22 = vadd.f32 %v9430_v14, %v537_v15  ;;  %v868_v24 = vsel %vm840_vm0, %v9556_v12, 0.0  ;;  %v993_v26 = vmul.f32 %v9556_v12, %v9556_v12  ;;  %v9567_v27 = vmax.f32 %v543_v13, 0.0 }
 0x128   :  { %v8279_v28 = vpop.f32.mrf.mxu0  ;;  %v869_v29 = vadd.f32 %v868_v24, %v867_v20  ;;  %v1069_v30 = vadd.f32 %v1068_v16, %v1067_v17  ;;  %v1072_v44 = vsel %vm840_vm0, %v994_v23, 0.0 }
 0x129   :  { %v9569_v32 = vmax.f32 %v538_v22, 0.0  ;;  %v553_v33 = vadd.f32 %v8279_v28, %v9430_v14  ;;  %v1070_v38 = vsel %vm840_vm0, %v993_v26, 0.0  ;;  %v996_v46 = vmul.f32 %v9567_v27, %v9567_v27 }
 0x12a   :  { %v547_v39 = vpop.f32.mrf.mxu0  ;;  %v1071_v40 = vadd.f32 %v1070_v38, %v1069_v30  ;;  %v871_v41 = vadd.f32 %v870_v35, %v869_v29  ;;  %v874_v54 = vsel %vm840_vm0, %v9567_v27, 0.0 }
 0x12b   :  { %v872_v42 = vsel %vm840_vm0, %v9569_v32, 0.0  ;;  %v995_v43 = vmul.f32 %v9569_v32, %v9569_v32  ;;  %v548_v47 = vadd.f32 %v9430_v14, %v547_v39  ;;  %v9584_v53 = vmax.f32 %v553_v33, 0.0 }
 0x12c   :  { %v8282_v48 = vpop.f32.mrf.mxu0  ;;  %v873_v50 = vadd.f32 %v872_v42, %v871_v41  ;;  %v1073_v51 = vadd.f32 %v1072_v44, %v1071_v40  ;;  %v1076_v62 = vsel %vm840_vm0, %v996_v46, 0.0 }
 0x12d   :  { %v1074_v52 = vsel %vm840_vm0, %v995_v43, 0.0  ;;  %v9588_v55 = vmax.f32 %v548_v47, 0.0  ;;  %v998_v4 = vmul.f32 %v9584_v53, %v9584_v53  ;;  %v563_v8 = vadd.f32 %v8282_v48, %v9430_v14 }
 0x12e   :  { %v557_v57 = vpop.f32.mrf.mxu0  ;;  %v1075_v59 = vadd.f32 %v1074_v52, %v1073_v51  ;;  %v875_v60 = vadd.f32 %v874_v54, %v873_v50  ;;  %v878_v9 = vsel %vm840_vm0, %v9584_v53, 0.0 }
 0x12f   :  { %v558_v61 = vadd.f32 %v9430_v14, %v557_v57  ;;  %v876_v63 = vsel %vm840_vm0, %v9588_v55, 0.0  ;;  %v997_v1 = vmul.f32 %v9588_v55, %v9588_v55  ;;  %v1080_v26 = vsel %vm840_vm0, %v998_v4, 0.0 }
 0x130   :  { %v8285_v3 = vpop.f32.mrf.mxu0  ;;  %v877_v6 = vadd.f32 %v876_v63, %v875_v60  ;;  %v1077_v7 = vadd.f32 %v1076_v62, %v1075_v59  ;;  %v9610_v28 = vmax.f32 %v563_v8, 0.0 }
 0x131   :  { %v1078_v10 = vsel %vm840_vm0, %v997_v1, 0.0  ;;  %v9602_v13 = vmax.f32 %v558_v61, 0.0  ;;  %v573_v42 = vadd.f32 %v8285_v3, %v9430_v14 }
 0x132   :  { %v567_v15 = vpop.f32.mrf.mxu0  ;;  %v1079_v16 = vadd.f32 %v1078_v10, %v1077_v7  ;;  %v879_v17 = vadd.f32 %v878_v9, %v877_v6  ;;  %v882_v40 = vsel %vm840_vm0, %v9610_v28, 0.0  ;;  %v1000_v41 = vmul.f32 %v9610_v28, %v9610_v28 }
 0x133   :  { %v568_v20 = vadd.f32 %v9430_v14, %v567_v15  ;;  %v880_v22 = vsel %vm840_vm0, %v9602_v13, 0.0  ;;  %v999_v23 = vmul.f32 %v9602_v13, %v9602_v13  ;;  %v9626_v54 = vmax.f32 %v573_v42, 0.0 }
 0x134   :  { %v8288_v24 = vpop.f32.mrf.mxu0  ;;  %v881_v29 = vadd.f32 %v880_v22, %v879_v17  ;;  %v1081_v30 = vadd.f32 %v1080_v26, %v1079_v16  ;;  %v1084_v52 = vsel %vm840_vm0, %v1000_v41, 0.0 }
 0x135   :  { %v1082_v35 = vsel %vm840_vm0, %v999_v23, 0.0  ;;  %v9613_v38 = vmax.f32 %v568_v20, 0.0  ;;  %v583_v57 = vadd.f32 %v8288_v24, %v9430_v14  ;;  %v886_v4 = vsel %vm840_vm0, %v9626_v54, 0.0 }
 0x136   :  { %v577_v33 = vpop.f32.mrf.mxu0  ;;  %v1083_v43 = vadd.f32 %v1082_v35, %v1081_v30  ;;  %v883_v44 = vadd.f32 %v882_v40, %v881_v29  ;;  %v1002_v6 = vmul.f32 %v9626_v54, %v9626_v54 }
 0x137   :  { %v884_v47 = vsel %vm840_vm0, %v9613_v38, 0.0  ;;  %v1001_v48 = vmul.f32 %v9613_v38, %v9613_v38  ;;  %v578_v50 = vadd.f32 %v9430_v14, %v577_v33  ;;  %v9639_v7 = vmax.f32 %v583_v57, 0.0 }
 0x138   :  { %v8291_v39 = vpop.f32.mrf.mxu0  ;;  %v885_v59 = vadd.f32 %v884_v47, %v883_v44  ;;  %v1085_v60 = vadd.f32 %v1084_v52, %v1083_v43  ;;  %v1088_v23 = vsel %vm840_vm0, %v1002_v6, 0.0 }
 0x139   :  { %v1086_v62 = vsel %vm840_vm0, %v1001_v48, 0.0  ;;  %v9630_v63 = vmax.f32 %v578_v50, 0.0  ;;  %v593_v1 = vadd.f32 %v8291_v39, %v9430_v14  ;;  %v1004_v24 = vmul.f32 %v9639_v7, %v9639_v7 }
 0x13a   :  { %v587_v46 = vpop.f32.mrf.mxu0  ;;  %v1087_v8 = vadd.f32 %v1086_v62, %v1085_v60  ;;  %v887_v9 = vadd.f32 %v886_v4, %v885_v59  ;;  %v890_v44 = vsel %vm840_vm0, %v9639_v7, 0.0 }
 0x13b   :  { %v888_v15 = vsel %vm840_vm0, %v9630_v63, 0.0  ;;  %v1003_v16 = vmul.f32 %v9630_v63, %v9630_v63  ;;  %v588_v17 = vadd.f32 %v9430_v14, %v587_v46  ;;  %v9648_v20 = vmax.f32 %v593_v1, 0.0 }
 0x13c   :  { %v8294_v51 = vpop.f32.mrf.mxu0  ;;  %v889_v29 = vadd.f32 %v888_v15, %v887_v9  ;;  %v1089_v30 = vadd.f32 %v1088_v23, %v1087_v8  ;;  %v1092_v46 = vsel %vm840_vm0, %v1004_v24, 0.0 }
 0x13d   :  { %v1090_v35 = vsel %vm840_vm0, %v1003_v16, 0.0  ;;  %v9655_v39 = vmax.f32 %v588_v17, 0.0  ;;  %v1006_v42 = vmul.f32 %v9648_v20, %v9648_v20  ;;  %v894_v47 = vsel %vm840_vm0, %v9648_v20, 0.0 }
 0x13e   :  { %v597_v61 = vpop.f32.mrf.mxu0  ;;  %v603_v48 = vadd.f32 %v8294_v51, %v9430_v14  ;;  %v1091_v50 = vadd.f32 %v1090_v35, %v1089_v30  ;;  %v891_v52 = vadd.f32 %v890_v44, %v889_v29 }
 0x13f   :  { %v892_v62 = vsel %vm840_vm0, %v9655_v39, 0.0  ;;  %v598_v1 = vadd.f32 %v9430_v14, %v597_v61  ;;  %v9678_v8 = vsel %vm840_vm0, %v1006_v42, 0.0  ;;  %v1005_v61 = vmul.f32 %v9655_v39, %v9655_v39 }
 0x140   :  { %v9633_v3 = vpop.f32.mrf.mxu0  ;;  %v9688_v17 = vmax.f32 %v603_v48, 0.0  ;;  %v893_v24 = vadd.f32 %v892_v62, %v891_v52  ;;  %v1093_v35 = vadd.f32 %v1092_v46, %v1091_v50 }
 0x142   :  { %v9641_v10 = vpop.f32.mrf.mxu0 }
 0x144   :  { %v8300_v22 = vpop.f32.mrf.mxu0 }
 0x145   :  { %v623_v26 = vadd.f32 %v8300_v22, %v9430_v14 }
 0x146   :  { %v617_v33 = vpop.f32.mrf.mxu0 }
 0x147   :  { %v9657_v40 = vmax.f32 %v623_v26, 0.0  ;;  %v618_v41 = vadd.f32 %v9430_v14, %v617_v33 }
 0x148   :  { %v8303_v43 = vpop.f32.mrf.mxu0 }
 0x149   :  { %v9668_v57 = vmax.f32 %v618_v41, 0.0  ;;  %v633_v59 = vadd.f32 %v8303_v43, %v9430_v14  ;;  %v1012_v4 = vmul.f32 %v9657_v40, %v9657_v40  ;;  %v911_v22 = vsel %vm840_vm0, %v9657_v40, 0.0 }
 0x14a   :  { %v627_v60 = vpop.f32.mrf.mxu0  ;;  %v9696_v41 = vmax.f32 %v598_v1, 0.0 }
 0x14b   :  { %v628_v6 = vadd.f32 %v9430_v14, %v627_v60  ;;  %v910_v51 = vsel %vm840_vm0, %v9668_v57, 0.0  ;;  %v1011_v9 = vmul.f32 %v9668_v57, %v9668_v57  ;;  %v9684_v15 = vmax.f32 %v633_v59, 0.0 }
 0x14c   :  { %v8306_v16 = vpop.f32.mrf.mxu0  ;;  %v912_v26 = vadd.f32 %v911_v22, %v910_v51  ;;  %v1113_v42 = vsel %vm840_vm0, %v1012_v4, 0.0  ;;  %v1094_v4 = vsel %vm840_vm0, %v1005_v61, 0.0  ;;  %v9717_v22 = vsel %vm840_vm0, %v9688_v17, 0.0 }
 0x14d   :  { %13104 = vst [vmem:[#allocation20_spill] sm:$0xff] %v9684_v15  ;;  %v9692_v23 = vmax.f32 %v628_v6, 0.0  ;;  %v1112_v29 = vsel %vm840_vm0, %v1011_v9, 0.0  ;;  %v643_v30 = vadd.f32 %v8306_v16, %v9430_v14  ;;  %v1014_v44 = vmul.f32 %v9684_v15, %v9684_v15 }
 0x14e   :  { %v637_v33 = vpop.f32.mrf.mxu0  ;;  %v1114_v62 = vadd.f32 %v1113_v42, %v1112_v29  ;;  %v915_v46 = vsel %vm840_vm0, %v9684_v15, 0.0  ;;  %v613_v6 = vadd.f32 %v9633_v3, %v9430_v14  ;;  %v1008_v61 = vmul.f32 %v9688_v17, %v9688_v17 }
 0x14f   :  { %13105 = vst [vmem:[#allocation21_spill] sm:$0xff] %v9692_v23  ;;  %v913_v43 = vsel %vm840_vm0, %v9692_v23, 0.0  ;;  %v1013_v52 = vmul.f32 %v9692_v23, %v9692_v23  ;;  %v9705_v59 = vmax.f32 %v643_v30, 0.0  ;;  %v638_v50 = vadd.f32 %v9430_v14, %v637_v33 }
 0x150   :  { %v914_v48 = vadd.f32 %v913_v43, %v912_v26  ;;  %v8309_v60 = vpop.f32.mrf.mxu0  ;;  %v1117_v33 = vsel %vm840_vm0, %v1014_v44, 0.0 }
 0x151   :  { %13106 = vst [vmem:[#allocation22_spill] sm:$0xff] %v9705_v59  ;;  %v653_v1 = vadd.f32 %v8309_v60, %v9430_v14  ;;  %v1115_v51 = vsel %vm840_vm0, %v1013_v52, 0.0  ;;  %v1016_v29 = vmul.f32 %v9705_v59, %v9705_v59  ;;  %v9721_v30 = vmax.f32 %v638_v50, 0.0 }
 0x152   :  { %v916_v9 = vadd.f32 %v915_v46, %v914_v48  ;;  %v647_v16 = vpop.f32.mrf.mxu0  ;;  %v1116_v26 = vadd.f32 %v1115_v51, %v1114_v62  ;;  %v9729_v48 = vadd.f32 %v1094_v4, %v1093_v35  ;;  %v895_v46 = vadd.f32 %v894_v47, %v893_v24 }
 0x153   :  { %13107 = vst [vmem:[#allocation23_spill] sm:$0xff] %v9721_v30  ;;  %v9726_v3 = vmax.f32 %v653_v1, 0.0  ;;  %v648_v42 = vadd.f32 %v9430_v14, %v647_v16  ;;  %v917_v52 = vsel %vm840_vm0, %v9721_v30, 0.0  ;;  %v1015_v60 = vmul.f32 %v9721_v30, %v9721_v30 }
 0x154   :  { %v8312_v43 = vpop.f32.mrf.mxu0  ;;  %v1118_v62 = vadd.f32 %v1117_v33, %v1116_v26  ;;  %v918_v50 = vadd.f32 %v917_v52, %v916_v9  ;;  %v919_v16 = vsel %vm840_vm0, %v9705_v59, 0.0  ;;  %v1121_v35 = vsel %vm840_vm0, %v1016_v29, 0.0 }
 0x155   :  { %13108 = vst [vmem:[#allocation24_spill] sm:$0xff] %v9726_v3  ;;  %v9735_v51 = vmax.f32 %v648_v42, 0.0  ;;  %v663_v44 = vadd.f32 %v8312_v43, %v9430_v14  ;;  %v1119_v4 = vsel %vm840_vm0, %v1015_v60, 0.0  ;;  %v1018_v26 = vmul.f32 %v9726_v3, %v9726_v3 }
 0x156   :  { %v657_v1 = vpop.f32.mrf.mxu0  ;;  %v1120_v15 = vadd.f32 %v1119_v4, %v1118_v62  ;;  %v920_v47 = vadd.f32 %v919_v16, %v918_v50  ;;  %v896_v52 = vsel %vm840_vm0, %v9696_v41, 0.0  ;;  %v1007_v60 = vmul.f32 %v9696_v41, %v9696_v41 }
 0x157   :  { %13109 = vst [vmem:[#allocation25_spill] sm:$0xff] %v9735_v51  ;;  %v658_v0 = vadd.f32 %v9430_v14, %v657_v1  ;;  %v921_v24 = vsel %vm840_vm0, %v9735_v51, 0.0  ;;  %v1017_v33 = vmul.f32 %v9735_v51, %v9735_v51  ;;  %v9749_v42 = vmax.f32 %v663_v44, 0.0 }
 0x158   :  { %v8315_v9 = vpop.f32.mrf.mxu0  ;;  %v922_v62 = vadd.f32 %v921_v24, %v920_v47  ;;  %v1122_v50 = vadd.f32 %v1121_v35, %v1120_v15  ;;  %v9759_v16 = vsel %vm840_vm0, %v1008_v61, 0.0  ;;  %v923_v44 = vsel %vm840_vm0, %v9726_v3, 0.0 }
 0x159   :  { %13110 = vst [vmem:[#allocation26_spill] sm:$0xff] %v9749_v42  ;;  %v9751_v43 = vmax.f32 %v658_v0, 0.0  ;;  %v673_v29 = vadd.f32 %v8315_v9, %v9430_v14  ;;  %v1123_v0 = vsel %vm840_vm0, %v1017_v33, 0.0  ;;  %v1125_v35 = vsel %vm840_vm0, %v1018_v26, 0.0 }
 0x15a   :  { %v667_v1 = vpop.f32.mrf.mxu0  ;;  %v1124_v9 = vadd.f32 %v1123_v0, %v1122_v50  ;;  %v924_v51 = vadd.f32 %v923_v44, %v922_v62  ;;  %v1020_v61 = vmul.f32 %v9749_v42, %v9749_v42  ;;  %v9775_v33 = vmax.f32 %v613_v6, 0.0 }
 0x15b   :  { %13111 = vst [vmem:[#allocation27_spill] sm:$0xff] %v9751_v43  ;;  %v925_v4 = vsel %vm840_vm0, %v9751_v43, 0.0  ;;  %v1019_v59 = vmul.f32 %v9751_v43, %v9751_v43  ;;  %v9768_v30 = vmax.f32 %v673_v29, 0.0  ;;  %v668_v47 = vadd.f32 %v9430_v14, %v667_v1 }
 0x15c   :  { %v8318_v15 = vpop.f32.mrf.mxu0  ;;  %v926_v3 = vadd.f32 %v925_v4, %v924_v51  ;;  %v1126_v50 = vadd.f32 %v1125_v35, %v1124_v9  ;;  %v927_v29 = vsel %vm840_vm0, %v9749_v42, 0.0  ;;  %v608_v1 = vadd.f32 %v9430_v14, %v9641_v10 }
 0x15d   :  { %13112 = vst [vmem:[#allocation28_spill] sm:$0xff] %v9768_v30  ;;  %v683_v24 = vadd.f32 %v8318_v15, %v9430_v14  ;;  %v1127_v62 = vsel %vm840_vm0, %v1019_v59, 0.0  ;;  %v1022_v26 = vmul.f32 %v9768_v30, %v9768_v30  ;;  %v9782_v0 = vmax.f32 %v668_v47, 0.0 }
 0x15e   :  { %v677_v44 = vpop.f32.mrf.mxu0  ;;  %v1128_v6 = vadd.f32 %v1127_v62, %v1126_v50  ;;  %v928_v15 = vadd.f32 %v927_v29, %v926_v3  ;;  %v9789_v59 = vadd.f32 %v896_v52, %v895_v46  ;;  %v1129_v9 = vsel %vm840_vm0, %v1020_v61, 0.0 }
 0x15f   :  { %13113 = vst [vmem:[#allocation29_spill] sm:$0xff] %v9782_v0  ;;  %v678_v43 = vadd.f32 %v9430_v14, %v677_v44  ;;  %v9787_v51 = vmax.f32 %v683_v24, 0.0  ;;  %v929_v35 = vsel %vm840_vm0, %v9782_v0, 0.0  ;;  %v1021_v47 = vmul.f32 %v9782_v0, %v9782_v0 }
 0x160   :  { %v8321_v4 = vpop.f32.mrf.mxu0  ;;  %v931_v44 = vsel %vm840_vm0, %v9768_v30, 0.0  ;;  %v930_v42 = vadd.f32 %v929_v35, %v928_v15  ;;  %v1130_v10 = vadd.f32 %v1129_v9, %v1128_v6  ;;  %v1133_v24 = vsel %vm840_vm0, %v1022_v26, 0.0 }
 0x161   :  { %13114 = vst [vmem:[#allocation30_spill] sm:$0xff] %v9787_v51  ;;  %v9798_v50 = vmax.f32 %v678_v43, 0.0  ;;  %v1131_v46 = vsel %vm840_vm0, %v1021_v47, 0.0  ;;  %v693_v52 = vadd.f32 %v8321_v4, %v9430_v14  ;;  %v1024_v29 = vmul.f32 %v9787_v51, %v9787_v51 }
 0x162   :  { %v687_v3 = vpop.f32.mrf.mxu0  ;;  %v1132_v62 = vadd.f32 %v1131_v46, %v1130_v10  ;;  %v932_v0 = vadd.f32 %v931_v44, %v930_v42  ;;  %v1097_v35 = vadd.f32 %v9678_v8, %v9729_v48  ;;  %v1098_v47 = vsel %vm840_vm0, %v1007_v60, 0.0 }
 0x163   :  { %13115 = vst [vmem:[#allocation31_spill] sm:$0xff] %v9798_v50  ;;  %v688_v61 = vadd.f32 %v9430_v14, %v687_v3  ;;  %v933_v15 = vsel %vm840_vm0, %v9798_v50, 0.0  ;;  %v1023_v43 = vmul.f32 %v9798_v50, %v9798_v50  ;;  %v9810_v9 = vmax.f32 %v693_v52, 0.0 }
 0x164   :  { %v8324_v6 = vpop.f32.mrf.mxu0  ;;  %v934_v10 = vadd.f32 %v933_v15, %v932_v0  ;;  %v1134_v42 = vadd.f32 %v1133_v24, %v1132_v62  ;;  %v9820_v3 = vsel %vm840_vm0, %v9775_v33, 0.0  ;;  %v935_v46 = vsel %vm840_vm0, %v9787_v51, 0.0 }
 0x165   :  { %13116 = vst [vmem:[#allocation32_spill] sm:$0xff] %v9810_v9  ;;  %v9812_v26 = vmax.f32 %v688_v61, 0.0  ;;  %v703_v4 = vadd.f32 %v8324_v6, %v9430_v14  ;;  %v1135_v52 = vsel %vm840_vm0, %v1023_v43, 0.0  ;;  %v1137_v0 = vsel %vm840_vm0, %v1024_v29, 0.0 }
 0x166   :  { %v697_v44 = vpop.f32.mrf.mxu0  ;;  %v1136_v6 = vadd.f32 %v1135_v52, %v1134_v42  ;;  %v936_v50 = vadd.f32 %v935_v46, %v934_v10  ;;  %v1026_v24 = vmul.f32 %v9810_v9, %v9810_v9  ;;  %v9838_v43 = vmul.f32 %v9775_v33, %v9775_v33 }
 0x167   :  { %13117 = vst [vmem:[#allocation33_spill] sm:$0xff] %v9812_v26  ;;  %v937_v61 = vsel %vm840_vm0, %v9812_v26, 0.0  ;;  %v1025_v8 = vmul.f32 %v9812_v26, %v9812_v26  ;;  %v9829_v48 = vmax.f32 %v703_v4, 0.0  ;;  %v698_v62 = vadd.f32 %v9430_v14, %v697_v44 }
 0x168   :  { %v8327_v60 = vpop.f32.mrf.mxu0  ;;  %v938_v10 = vadd.f32 %v937_v61, %v936_v50  ;;  %v1138_v42 = vadd.f32 %v1137_v0, %v1136_v6  ;;  %v939_v52 = vsel %vm840_vm0, %v9810_v9, 0.0  ;;  %v1099_v61 = vadd.f32 %v1098_v47, %v1097_v35 }
 0x169   :  { %13118 = vst [vmem:[#allocation34_spill] sm:$0xff] %v9829_v48  ;;  %v713_v15 = vadd.f32 %v8327_v60, %v9430_v14  ;;  %v1139_v46 = vsel %vm840_vm0, %v1025_v8, 0.0  ;;  %v1028_v29 = vmul.f32 %v9829_v48, %v9829_v48  ;;  %v9845_v26 = vmax.f32 %v698_v62, 0.0 }
 0x16a   :  { %v707_v4 = vpop.f32.mrf.mxu0  ;;  %v9848_v60 = vmax.f32 %v608_v1, 0.0  ;;  %v1140_v51 = vadd.f32 %v1139_v46, %v1138_v42  ;;  %v940_v30 = vadd.f32 %v939_v52, %v938_v10  ;;  %v1141_v6 = vsel %vm840_vm0, %v1026_v24, 0.0 }
 0x16b   :  { %13119 = vst [vmem:[#allocation35_spill] sm:$0xff] %v9845_v26  ;;  %v708_v44 = vadd.f32 %v9430_v14, %v707_v4  ;;  %v9850_v23 = vmax.f32 %v713_v15, 0.0  ;;  %v941_v8 = vsel %vm840_vm0, %v9845_v26, 0.0  ;;  %v1027_v0 = vmul.f32 %v9845_v26, %v9845_v26 }
 0x16c   :  { %v8330_v50 = vpop.f32.mrf.mxu0  ;;  %v943_v62 = vsel %vm840_vm0, %v9829_v48, 0.0  ;;  %v942_v4 = vadd.f32 %v941_v8, %v940_v30  ;;  %v1142_v1 = vadd.f32 %v1141_v6, %v1140_v51  ;;  %v1145_v15 = vsel %vm840_vm0, %v1028_v29, 0.0 }
 0x16d   :  { %13120 = vst [vmem:[#allocation36_spill] sm:$0xff] %v9850_v23  ;;  %v9859_v9 = vmax.f32 %v708_v44, 0.0  ;;  %v1143_v35 = vsel %vm840_vm0, %v1027_v0, 0.0  ;;  %v723_v47 = vadd.f32 %v8330_v50, %v9430_v14  ;;  %v1030_v46 = vmul.f32 %v9850_v23, %v9850_v23 }
 0x16e   :  { %v717_v10 = vpop.f32.mrf.mxu0  ;;  %v1144_v42 = vadd.f32 %v1143_v35, %v1142_v1  ;;  %v944_v52 = vadd.f32 %v943_v62, %v942_v4  ;;  %v899_v8 = vadd.f32 %v9717_v22, %v9789_v59  ;;  %v900_v0 = vsel %vm840_vm0, %v9848_v60, 0.0 }
 0x16f   :  { %13121 = vst [vmem:[#allocation37_spill] sm:$0xff] %v9859_v9  ;;  %v718_v24 = vadd.f32 %v9430_v14, %v717_v10  ;;  %v945_v30 = vsel %vm840_vm0, %v9859_v9, 0.0  ;;  %v1029_v44 = vmul.f32 %v9859_v9, %v9859_v9  ;;  %v9871_v6 = vmax.f32 %v723_v47, 0.0 }
 0x170   :  { %v8333_v51 = vpop.f32.mrf.mxu0  ;;  %v946_v62 = vadd.f32 %v945_v30, %v944_v52  ;;  %v1146_v4 = vadd.f32 %v1145_v15, %v1144_v42  ;;  %v1009_v10 = vmul.f32 %v9848_v60, %v9848_v60  ;;  %v947_v35 = vsel %vm840_vm0, %v9850_v23, 0.0 }
 0x171   :  { %13122 = vst [vmem:[#allocation38_spill] sm:$0xff] %v9871_v6  ;;  %v9873_v29 = vmax.f32 %v718_v24, 0.0  ;;  %v733_v50 = vadd.f32 %v8333_v51, %v9430_v14  ;;  %v1147_v47 = vsel %vm840_vm0, %v1029_v44, 0.0  ;;  %v1149_v42 = vsel %vm840_vm0, %v1030_v46, 0.0 }
 0x172   :  { %v727_v1 = vpop.f32.mrf.mxu0  ;;  %v1148_v51 = vadd.f32 %v1147_v47, %v1146_v4  ;;  %v948_v9 = vadd.f32 %v947_v35, %v946_v62  ;;  %v1032_v52 = vmul.f32 %v9871_v6, %v9871_v6  ;;  %v901_v23 = vadd.f32 %v900_v0, %v899_v8 }
 0x173   :  { %13123 = vst [vmem:[#allocation39_spill] sm:$0xff] %v9873_v29  ;;  %v949_v24 = vsel %vm840_vm0, %v9873_v29, 0.0  ;;  %v1031_v22 = vmul.f32 %v9873_v29, %v9873_v29  ;;  %v9889_v59 = vmax.f32 %v733_v50, 0.0  ;;  %v728_v30 = vadd.f32 %v9430_v14, %v727_v1 }
 0x174   :  { %v8336_v15 = vpop.f32.mrf.mxu0  ;;  %v950_v48 = vadd.f32 %v949_v24, %v948_v9  ;;  %v1150_v26 = vadd.f32 %v1149_v42, %v1148_v51  ;;  %v951_v50 = vsel %vm840_vm0, %v9871_v6, 0.0  ;;  %v1101_v1 = vadd.f32 %v9759_v16, %v1099_v61 }
 0x175   :  { %13124 = vst [vmem:[#allocation40_spill] sm:$0xff] %v9889_v59  ;;  %v743_v44 = vadd.f32 %v8336_v15, %v9430_v14  ;;  %v1151_v62 = vsel %vm840_vm0, %v1031_v22, 0.0  ;;  %v1034_v35 = vmul.f32 %v9889_v59, %v9889_v59  ;;  %v9901_v46 = vmax.f32 %v728_v30, 0.0 }
 0x176   :  { %v737_v4 = vpop.f32.mrf.mxu0  ;;  %v1152_v29 = vadd.f32 %v1151_v62, %v1150_v26  ;;  %v952_v15 = vadd.f32 %v951_v50, %v950_v48  ;;  %v1102_v0 = vsel %vm840_vm0, %v1009_v10, 0.0  ;;  %v1153_v24 = vsel %vm840_vm0, %v1032_v52, 0.0 }
 0x177   :  { %13125 = vst [vmem:[#allocation41_spill] sm:$0xff] %v9901_v46  ;;  %v738_v47 = vadd.f32 %v9430_v14, %v737_v4  ;;  %v9905_v8 = vmax.f32 %v743_v44, 0.0  ;;  %v953_v51 = vsel %vm840_vm0, %v9901_v46, 0.0  ;;  %v1033_v22 = vmul.f32 %v9901_v46, %v9901_v46 }
 0x178   :  { %v8339_v9 = vpop.f32.mrf.mxu0  ;;  %v955_v42 = vsel %vm840_vm0, %v9889_v59, 0.0  ;;  %v954_v30 = vadd.f32 %v953_v51, %v952_v15  ;;  %v1154_v16 = vadd.f32 %v1153_v24, %v1152_v29  ;;  %v1157_v61 = vsel %vm840_vm0, %v1034_v35, 0.0 }
 0x179   :  { %13126 = vst [vmem:[#allocation42_spill] sm:$0xff] %v9905_v8  ;;  %v9915_v26 = vmax.f32 %v738_v47, 0.0  ;;  %v1155_v10 = vsel %vm840_vm0, %v1033_v22, 0.0  ;;  %v753_v52 = vadd.f32 %v8339_v9, %v9430_v14  ;;  %v1036_v4 = vmul.f32 %v9905_v8, %v9905_v8 }
 0x17a   :  { %v747_v48 = vpop.f32.mrf.mxu0  ;;  %v1156_v62 = vadd.f32 %v1155_v10, %v1154_v16  ;;  %v956_v50 = vadd.f32 %v955_v42, %v954_v30  ;;  %v1104_v51 = vsel %vm840_vm0, %v9838_v43, 0.0  ;;  %v1103_v22 = vadd.f32 %v1102_v0, %v1101_v1 }
 0x17b   :  { %13127 = vst [vmem:[#allocation43_spill] sm:$0xff] %v9915_v26  ;;  %v748_v44 = vadd.f32 %v9430_v14, %v747_v48  ;;  %v957_v15 = vsel %vm840_vm0, %v9915_v26, 0.0  ;;  %v1035_v47 = vmul.f32 %v9915_v26, %v9915_v26  ;;  %v9927_v24 = vmax.f32 %v753_v52, 0.0 }
 0x17c   :  { %v8342_v29 = vpop.f32.mrf.mxu0  ;;  %v958_v16 = vadd.f32 %v957_v15, %v956_v50  ;;  %v1158_v48 = vadd.f32 %v1157_v61, %v1156_v62  ;;  %v903_v30 = vadd.f32 %v9820_v3, %v901_v23  ;;  %v959_v10 = vsel %vm840_vm0, %v9905_v8, 0.0 }
 0x17d   :  { %v9929_v35 = vmax.f32 %v748_v44, 0.0  ;;  %v763_v9 = vadd.f32 %v8342_v29, %v9430_v14  ;;  %v1159_v26 = vsel %vm840_vm0, %v1035_v47, 0.0  ;;  %v1038_v29 = vmul.f32 %v9927_v24, %v9927_v24 }
 0x17e   :  { %v757_v42 = vpop.f32.mrf.mxu0  ;;  %v1160_v44 = vadd.f32 %v1159_v26, %v1158_v48  ;;  %v960_v59 = vadd.f32 %v959_v10, %v958_v16  ;;  %v1161_v0 = vsel %vm840_vm0, %v1036_v4, 0.0  ;;  %v1105_v62 = vadd.f32 %v1104_v51, %v1103_v22 }
 0x17f   :  { %13128 = vst [vmem:[#allocation44_spill] sm:$0xff] %v9929_v35  ;;  %v961_v52 = vsel %vm840_vm0, %v9929_v35, 0.0  ;;  %v1037_v43 = vmul.f32 %v9929_v35, %v9929_v35  ;;  %v9945_v23 = vmax.f32 %v763_v9, 0.0  ;;  %v758_v3 = vadd.f32 %v9430_v14, %v757_v42 }
 0x180   :  { %v8345_v1 = vpop.f32.mrf.mxu0  ;;  %v962_v50 = vadd.f32 %v961_v52, %v960_v59  ;;  %v1162_v15 = vadd.f32 %v1161_v0, %v1160_v44  ;;  %v963_v16 = vsel %vm840_vm0, %v9927_v24, 0.0  ;;  %v904_v4 = vrot.slane %v903_v30, 4 }
 0x181   :  { %13129 = vst [vmem:[#allocation45_spill] sm:$0xff] %v9945_v23  ;;  %v773_v61 = vadd.f32 %v8345_v1, %v9430_v14  ;;  %v1163_v26 = vsel %vm840_vm0, %v1037_v43, 0.0  ;;  %v9952_v48 = vmax.f32 %v758_v3, 0.0  ;;  %v1165_v9 = vsel %vm840_vm0, %v1038_v29, 0.0 }
 0x182   :  { %v767_v47 = vpop.f32.mrf.mxu0  ;;  %v1164_v35 = vadd.f32 %v1163_v26, %v1162_v15  ;;  %v964_v42 = vadd.f32 %v963_v16, %v962_v50  ;;  %v1040_v51 = vmul.f32 %v9945_v23, %v9945_v23  ;;  %v1106_v44 = vrot.slane %v1105_v62, 4 }
 0x183   :  { %13130 = vst [vmem:[#allocation46_spill] sm:$0xff] %v9952_v48  ;;  %v768_v10 = vadd.f32 %v9430_v14, %v767_v47  ;;  %v965_v59 = vsel %vm840_vm0, %v9952_v48, 0.0  ;;  %v1039_v22 = vmul.f32 %v9952_v48, %v9952_v48  ;;  %v9962_v52 = vmax.f32 %v773_v61, 0.0 }
 0x184   :  { %v966_v43 = vadd.f32 %v965_v59, %v964_v42  ;;  %v1166_v1 = vadd.f32 %v1165_v9, %v1164_v35  ;;  %v967_v29 = vsel %vm840_vm0, %v9945_v23, 0.0  ;;  %v905_v3 = vadd.f32 %v904_v4, %v903_v30 }
 0x185   :  { %13131 = vst [vmem:[#allocation47_spill] sm:$0xff] %v9962_v52  ;;  %v9964_v14 = vmax.f32 %v768_v10, 0.0  ;;  %v1167_v0 = vsel %vm840_vm0, %v1039_v22, 0.0  ;;  %v1169_v47 = vsel %vm840_vm0, %v1040_v51, 0.0  ;;  %v1042_v61 = vmul.f32 %v9962_v52, %v9962_v52 }
 0x186   :  { %v1168_v50 = vadd.f32 %v1167_v0, %v1166_v1  ;;  %v968_v15 = vadd.f32 %v967_v29, %v966_v43  ;;  %v1107_v9 = vadd.f32 %v1106_v44, %v1105_v62  ;;  %v971_v42 = vsel %vm840_vm0, %v9962_v52, 0.0 }
 0x187   :  { %13132 = vst [vmem:[#allocation48_spill] sm:$0xff] %v9964_v14  ;;  %v969_v26 = vsel %vm840_vm0, %v9964_v14, 0.0  ;;  %v1041_v35 = vmul.f32 %v9964_v14, %v9964_v14  ;;  %v906_v4 = vrot.slane %v905_v3, 2  ;;  %v1173_v43 = vsel %vm840_vm0, %v1042_v61, 0.0 }
 0x188   :  { %v970_v16 = vadd.f32 %v969_v26, %v968_v15  ;;  %v1170_v10 = vadd.f32 %v1169_v47, %v1168_v50  ;;  %v1108_v29 = vrot.slane %v1107_v9, 2 }
 0x189   :  { %v1171_v30 = vsel %vm840_vm0, %v1041_v35, 0.0  ;;  %v907_v0 = vadd.f32 %v906_v4, %v905_v3  ;;  %v2587_v4 = vld [vmem:[%s13014_s7 + $0x210] sm:$0xff] }
 0x18a   :  { %v972_v59 = vadd.f32 %v971_v42, %v970_v16  ;;  %v1172_v22 = vadd.f32 %v1171_v30, %v1170_v10  ;;  %v1109_v15 = vadd.f32 %v1108_v29, %v1107_v9  ;;  %v2588_v9 = vld [vmem:[%s13014_s7 + $0x218] sm:$0xff]  ;;  %v8881_v29 = vmov 1966171168  }
 0x18b   :  { %v908_v44 = vrot.slane %v907_v0, 1 }
 0x18c   :  { %v973_v51 = vrot.slane %v972_v59, 4  ;;  %v1174_v1 = vadd.f32 %v1173_v43, %v1172_v22  ;;  %v1110_v52 = vrot.slane %v1109_v15, 1  ;;  %v2585_v43 = vld [vmem:[%s13014_s7 + $0x200] sm:$0xff] }
 0x18d   :  { %v909_v16 = vadd.f32 %v908_v44, %v907_v0  ;;  %v1346_v0 = vunpack.c.l.s4 %v8881_v29 }
 0x18e   :  { %v974_v23 = vadd.f32 %v973_v51, %v972_v59  ;;  %v1175_v48 = vrot.slane %v1174_v1, 4  ;;  %v1111_v30 = vadd.f32 %v1110_v52, %v1109_v15  ;;  %v2590_v52 = vld [vmem:[%s13014_s7 + $0x228] sm:$0xff]  ;;  %v13133_v51 = vmov 0.0  }
 0x18f   :  { %v2586_v59 = vld [vmem:[%s13014_s7 + $0x208] sm:$0xff]  ;;  %v1348_v15 = vlaneseq }
 0x190   :  { %v975_v14 = vrot.slane %v974_v23, 2  ;;  %v1176_v50 = vadd.f32 %v1175_v48, %v1174_v1  ;;  %v2591_v48 = vld [vmem:[%s13014_s7 + $0x230] sm:$0xff] }
 0x192   :  { %v976_v62 = vadd.f32 %v975_v14, %v974_v23  ;;  %v1177_v26 = vrot.slane %v1176_v50, 2  ;;  %v2592_v23 = vld [vmem:[%s13014_s7 + $0x238] sm:$0xff]  ;;  %v2589_v14 = vld [vmem:[%s13014_s7 + $0x220] sm:$0xff] }
 0x193   :  { %8384 = vmatprep.subr.mxu0 %v2592_v23 }
 0x194   :  { %v977_v47 = vrot.slane %v976_v62, 1  ;;  %v1178_v35 = vadd.f32 %v1177_v26, %v1176_v50  ;;  %v1347_v26 = vunpack.c.0.s8 %v1346_v0 }
 0x196   :  { %v978_v10 = vadd.f32 %v977_v47, %v976_v62  ;;  %v1179_v42 = vrot.slane %v1178_v35, 1  ;;  %v1349_v47 = vshrl.u32 %v1348_v15, 7  ;;  %v13148_v15 = vld [vmem:[#allocation33_spill] sm:$0xff] }
 0x198   :  { %v1192_v61 = vsel %vm1191_vm5, %v978_v10, %v909_v16  ;;  %v1180_v22 = vadd.f32 %v1179_v42, %v1178_v35  ;;  %v10009_v35 = vsub.s32 %v1347_v26, %v1349_v47  ;;  %v13159_v26 = vld [vmem:[#allocation45_spill] sm:$0xff] }
 0x199   :  { %8363 = vmatmul.mubr.msk.f32.vlgmr.msra.gmra.mxu0 %vm840_vm0, %v1192_v61 }
 0x19a   :  { %v1267_v3 = vsel %vm1191_vm5, %v1180_v22, %v1111_v30  ;;  %8385 = vmatpush3.msra.mxu0 %v2592_v23  ;;  %13134 = vst [vmem:[#allocation49_spill] sm:$0xff] %v10009_v35  ;;  %v10013_v22 = vsub.s32 0, %v1349_v47  ;;  %v13150_v47 = vld [vmem:[#allocation35_spill] sm:$0xff] }
 0x19b   :  { %8382 = vmatmul.mubr.msk.f32.vlgmr.msra.gmra.mxu1 %vm840_vm0, %v1267_v3  ;;  %8386 = vmatprep.subr.mxu0 %v2591_v48 }
 0x19c   :  { %8387 = vmatpush3.msra.mxu0 %v2591_v48  ;;  %13135 = vst [vmem:[#allocation50_spill] sm:$0xff] %v10013_v22 }
 0x19d   :  { %8388 = vmatprep.subr.mxu0 %v2590_v52 }
 0x19e   :  { %8389 = vmatpush3.msra.mxu0 %v2590_v52 }
 0x19f   :  { %8390 = vmatprep.subr.mxu0 %v2589_v14 }
 0x1a0   :  { %8391 = vmatpush3.msra.mxu0 %v2589_v14  ;;  %v13157_v14 = vld [vmem:[#allocation44_spill] sm:$0xff] }
 0x1a1   :  { %8392 = vmatprep.subr.mxu0 %v2588_v9 }
 0x1a2   :  { %8393 = vmatpush3.msra.mxu0 %v2588_v9  ;;  %v13161_v9 = vld [vmem:[#allocation47_spill] sm:$0xff] }
 0x1a3   :  { %8394 = vmatprep.subr.mxu0 %v2587_v4 }
 0x1a4   :  { %8395 = vmatpush3.msra.mxu0 %v2587_v4 }
 0x1a5   :  { %8396 = vmatprep.subr.mxu0 %v2586_v59 }
 0x1a6   :  { %8397 = vmatpush3.msra.mxu0 %v2586_v59 }
 0x1a7   :  { %8398 = vmatprep.subr.mxu0 %v2585_v43 }
 0x1a8   :  { %8399 = vmatpush3.msra.mxu0 %v2585_v43  ;;  %v13158_v43 = vld [vmem:[#allocation46_spill] sm:$0xff] }
 0x1a9   :  { %8424 = vmatprep.subr.mxu0 %v13133_v51 }
 0x259   :  { %v1261_v1 = vpop.f32.mrf.mxu0 }
 0x25a   :  { %v1340_v16 = vmul.f32 %v1261_v1, %v1261_v1  ;;  %v1351_v10 = vrot.slane %v1261_v1, %v10009_v35 }
 0x25b   :  { %v8364_v50 = vpop.f32.mrf.mxu0  ;;  %v1336_v62 = vpop.f32.mrf.mxu1 }
 0x25c   :  { %v1341_v42 = vsub.f32 %v1336_v62, %v1340_v16  ;;  %v1352_v61 = vcombine.high %v1351_v10, %v1351_v10  ;;  %v1359_v30 = vrot.slane %v1351_v10, %v10009_v35  ;;  %v13137_v16 = vld [vmem:[#allocation20_spill] sm:$0xff]  ;;  %v13138_v10 = vld [vmem:[#allocation23_spill] sm:$0xff] }
 0x25d   :  { %v8383_v44 = vpop.f32.mrf.mxu1  ;;  %v13153_v62 = vld [vmem:[#allocation36_spill] sm:$0xff] }
 0x25e   :  { %v1342_v3 = vadd.f32 1e-05, %v1341_v42  ;;  %v1366_v23 = vrot.slane %v1352_v61, %v10009_v35  ;;  %v10017_v48 = vrot.slane %v1359_v30, %v10013_v22  ;;  %v13139_v42 = vld [vmem:[#allocation22_spill] sm:$0xff]  ;;  %v13140_v61 = vld [vmem:[#allocation25_spill] sm:$0xff]  ;;  %v13141_v30 = vld [vmem:[#allocation24_spill] sm:$0xff] }
 0x25f   :  { %v13160_v44 = vld [vmem:[#allocation48_spill] sm:$0xff] }
 0x260   :  { %8757 = vrsqrt.f32 %v1342_v3  ;;  %v10020_v52 = vrot.slane %v1366_v23, %v10013_v22  ;;  %v13136_v23 = vld [vmem:[#allocation21_spill] sm:$0xff]  ;;  %v13142_v3 = vld [vmem:[#allocation27_spill] sm:$0xff]  ;;  %v13164_v59 = vsub.f32 %v9456_v34, %v10017_v48  ;;  %v13165_v8 = vsub.f32 %v9443_v25, %v10017_v48 }
 0x261   :  { %v13168_v34 = vsub.f32 %v9491_v2, %v10017_v48  ;;  %v13169_v25 = vsub.f32 %v9479_v56, %v10017_v48  ;;  %v13172_v2 = vsub.f32 %v9521_v36, %v10017_v48  ;;  %v13173_v56 = vsub.f32 %v9519_v31, %v10017_v48 }
 0x262   :  { %v13176_v36 = vsub.f32 %v9556_v12, %v10017_v48  ;;  %v13177_v31 = vsub.f32 %v9551_v5, %v10017_v48  ;;  %v13180_v12 = vsub.f32 %v9588_v55, %v10017_v48  ;;  %v13181_v5 = vsub.f32 %v9584_v53, %v10017_v48 }
 0x263   :  { %v13184_v55 = vsub.f32 %v9613_v38, %v10017_v48  ;;  %v13185_v53 = vsub.f32 %v9626_v54, %v10017_v48  ;;  %v13188_v38 = vsub.f32 %v9655_v39, %v10017_v48  ;;  %v13189_v54 = vsub.f32 %v9648_v20, %v10017_v48 }
 0x264   :  { %v13192_v39 = vsub.f32 %v9848_v60, %v10017_v48  ;;  %v13193_v20 = vsub.f32 %v9775_v33, %v10017_v48  ;;  %v13196_v60 = vsub.f32 %v13136_v23, %v10020_v52  ;;  %v13197_v33 = vsub.f32 %v13137_v16, %v10020_v52 }
 0x26d   :  { %v8758_v29 = vpop.eup %8757 }
 0x26e   :  { %v1448_v1 = vrot.slane %v8758_v29, %v10009_v35 }
 0x270   :  { %v1449_v0 = vcombine.high %v1448_v1, %v1448_v1  ;;  %v1456_v29 = vrot.slane %v1448_v1, %v10009_v35 }
 0x272   :  { %v1463_v1 = vrot.slane %v1449_v0, %v10009_v35  ;;  %v1467_v6 = vrot.slane %v1456_v29, %v10013_v22  ;;  %v13162_v0 = vsub.f32 %v9438_v21, %v10017_v48  ;;  %v13163_v29 = vsub.f32 %v9436_v19, %v10017_v48 }
 0x273   :  { %v13166_v21 = vsub.f32 %v9466_v45, %v10017_v48  ;;  %v13167_v19 = vsub.f32 %v9458_v37, %v10017_v48  ;;  %v13170_v45 = vsub.f32 %v9508_v18, %v10017_v48  ;;  %v13171_v37 = vsub.f32 %v9503_v11, %v10017_v48 }
 0x274   :  { %v10155_v50 = vrot.slane %v1463_v1, %v10013_v22  ;;  %v10160_v51 = vmul.f32 %v1467_v6, %v13162_v0  ;;  %v10165_v46 = vmul.f32 %v1467_v6, %v13163_v29  ;;  %v10170_v4 = vmul.f32 %v1467_v6, %v13164_v59 }
 0x275   :  { %v10175_v1 = vmul.f32 %v1467_v6, %v13165_v8  ;;  %v10180_v0 = vmul.f32 %v1467_v6, %v13166_v21  ;;  %v10185_v29 = vmul.f32 %v1467_v6, %v13167_v19  ;;  %v10190_v59 = vmul.f32 %v1467_v6, %v13168_v34 }
 0x276   :  { %v10195_v8 = vmul.f32 %v1467_v6, %v13169_v25  ;;  %v10200_v21 = vmul.f32 %v1467_v6, %v13170_v45  ;;  %v10205_v19 = vmul.f32 %v1467_v6, %v13171_v37  ;;  %v10210_v34 = vmul.f32 %v1467_v6, %v13172_v2 }
 0x277   :  { %v10215_v25 = vmul.f32 %v1467_v6, %v13173_v56  ;;  %v13174_v18 = vsub.f32 %v9541_v58, %v10017_v48  ;;  %v13175_v11 = vsub.f32 %v9534_v49, %v10017_v48  ;;  %v10230_v2 = vmul.f32 %v1467_v6, %v13176_v36 }
 0x278   :  { %v10235_v56 = vmul.f32 %v1467_v6, %v13177_v31  ;;  %v13178_v58 = vsub.f32 %v9569_v32, %v10017_v48  ;;  %v13179_v49 = vsub.f32 %v9567_v27, %v10017_v48  ;;  %v10250_v36 = vmul.f32 %v1467_v6, %v13180_v12 }
 0x279   :  { %v10220_v45 = vmul.f32 %v1467_v6, %v13174_v18  ;;  %v10225_v37 = vmul.f32 %v1467_v6, %v13175_v11  ;;  %v10255_v31 = vmul.f32 %v1467_v6, %v13181_v5  ;;  %v13182_v32 = vsub.f32 %v9602_v13, %v10017_v48 }
 0x27a   :  { %v10240_v18 = vmul.f32 %v1467_v6, %v13178_v58  ;;  %v10245_v11 = vmul.f32 %v1467_v6, %v13179_v49  ;;  %v13183_v27 = vsub.f32 %v9610_v28, %v10017_v48  ;;  %v10270_v12 = vmul.f32 %v1467_v6, %v13184_v55 }
 0x27b   :  { %v10260_v58 = vmul.f32 %v1467_v6, %v13182_v32  ;;  %v10275_v5 = vmul.f32 %v1467_v6, %v13185_v53  ;;  %v13186_v13 = vsub.f32 %v9630_v63, %v10017_v48  ;;  %v13187_v28 = vsub.f32 %v9639_v7, %v10017_v48 }
 0x27c   :  { %v10265_v49 = vmul.f32 %v1467_v6, %v13183_v27  ;;  %v10290_v55 = vmul.f32 %v1467_v6, %v13188_v38  ;;  %v10295_v53 = vmul.f32 %v1467_v6, %v13189_v54  ;;  %v13190_v63 = vsub.f32 %v9696_v41, %v10017_v48 }
 0x27d   :  { %v10280_v32 = vmul.f32 %v1467_v6, %v13186_v13  ;;  %v10285_v27 = vmul.f32 %v1467_v6, %v13187_v28  ;;  %v13191_v7 = vsub.f32 %v9688_v17, %v10017_v48  ;;  %v10310_v38 = vmul.f32 %v1467_v6, %v13192_v39 }
 0x27e   :  { %v10300_v13 = vmul.f32 %v1467_v6, %v13190_v63  ;;  %v10315_v54 = vmul.f32 %v1467_v6, %v13193_v20  ;;  %v13194_v41 = vsub.f32 %v9668_v57, %v10020_v52  ;;  %v13195_v17 = vsub.f32 %v9657_v40, %v10020_v52 }
 0x27f   :  { %v10305_v28 = vmul.f32 %v1467_v6, %v13191_v7  ;;  %v10333_v39 = vmul.f32 %v10155_v50, %v13196_v60  ;;  %v10339_v57 = vmul.f32 %v10155_v50, %v13197_v33  ;;  %v13198_v6 = vsub.f32 %v13138_v10, %v10020_v52  ;;  %v13203_v60 = vld [vmem:[#allocation26_spill] sm:$0xff] }
 0x280   :  { %v10321_v63 = vmul.f32 %v10155_v50, %v13194_v41  ;;  %v10327_v7 = vmul.f32 %v10155_v50, %v13195_v17  ;;  %v13199_v48 = vsub.f32 %v13139_v42, %v10020_v52  ;;  %v13200_v20 = vsub.f32 %v13140_v61, %v10020_v52 }
 0x281   :  { %v10345_v40 = vmul.f32 %v10155_v50, %v13198_v6  ;;  %v13201_v41 = vsub.f32 %v13141_v30, %v10020_v52  ;;  %v13202_v17 = vsub.f32 %v13142_v3, %v10020_v52  ;;  %v13204_v33 = vsub.f32 %v13203_v60, %v10020_v52  ;;  %v13206_v6 = vld [vmem:[#allocation29_spill] sm:$0xff] }
 0x282   :  { %v10351_v23 = vmul.f32 %v10155_v50, %v13199_v48  ;;  %v10357_v16 = vmul.f32 %v10155_v50, %v13200_v20  ;;  %v13207_v48 = vsub.f32 %v13206_v6, %v10020_v52  ;;  %v13209_v20 = vld [vmem:[#allocation28_spill] sm:$0xff] }
 0x283   :  { %v10363_v10 = vmul.f32 %v10155_v50, %v13201_v41  ;;  %v10369_v42 = vmul.f32 %v10155_v50, %v13202_v17  ;;  %v10375_v61 = vmul.f32 %v10155_v50, %v13204_v33  ;;  %v13210_v41 = vsub.f32 %v13209_v20, %v10020_v52  ;;  %v13212_v17 = vld [vmem:[#allocation31_spill] sm:$0xff]  ;;  %v13215_v33 = vld [vmem:[#allocation30_spill] sm:$0xff] }
 0x284   :  { %v10381_v30 = vmul.f32 %v10155_v50, %v13207_v48  ;;  %v13213_v22 = vsub.f32 %v13212_v17, %v10020_v52  ;;  %v13216_v35 = vsub.f32 %v13215_v33, %v10020_v52  ;;  %v13218_v48 = vsub.f32 %v13148_v15, %v10020_v52  ;;  %v2551_v17 = vld [vmem:[%s13014_s7 + $0xf0] sm:$0xff] }
 0x285   :  { %13205 = vst [vmem:[#allocation21_spill] sm:$0xff] %v10375_v61  ;;  %v10387_v3 = vmul.f32 %v10155_v50, %v13210_v41  ;;  %v2552_v41 = vld [vmem:[%s13014_s7 + $0xf8] sm:$0xff] }
 0x286   :  { %13208 = vst [vmem:[#allocation20_spill] sm:$0xff] %v10381_v30  ;;  %v10393_v60 = vmul.f32 %v10155_v50, %v13213_v22  ;;  %v10399_v6 = vmul.f32 %v10155_v50, %v13216_v35  ;;  %v10405_v20 = vmul.f32 %v10155_v50, %v13218_v48  ;;  %v2536_v22 = vld [vmem:[%s13014_s7 + $0x78] sm:$0xff]  ;;  %v13220_v35 = vld [vmem:[#allocation32_spill] sm:$0xff]  ;;  %v13222_v48 = vsub.f32 %v13150_v47, %v10020_v52  ;;  %v10443_v47 = vld [vmem:[%s13012_s5] ss:$0 sm:$0xff] }
 0x287   :  { %13211 = vst [vmem:[#allocation23_spill] sm:$0xff] %v10387_v3  ;;  %v13221_v33 = vsub.f32 %v13220_v35, %v10020_v52  ;;  %v13227_v30 = vld [vmem:[#allocation37_spill] sm:$0xff]  ;;  %7250 = vmatprep.subr.mxu1 %v2552_v41 }
 0x288   :  { %13214 = vst [vmem:[#allocation22_spill] sm:$0xff] %v10393_v60  ;;  %13217 = vst [vmem:[#allocation25_spill] sm:$0xff] %v10399_v6  ;;  %v13224_v6 = vld [vmem:[#allocation34_spill] sm:$0xff]  ;;  %v13228_v61 = vsub.f32 %v13227_v30, %v10020_v52  ;;  %7251 = vmatpush3.msra.mxu1 %v2536_v22 }
 0x289   :  { %13219 = vst [vmem:[#allocation24_spill] sm:$0xff] %v10405_v20  ;;  %v10420_v15 = vmul.f32 %v10155_v50, %v13221_v33  ;;  %v10426_v20 = vmul.f32 %v10155_v50, %v13222_v48  ;;  %v13225_v60 = vsub.f32 %v13224_v6, %v10020_v52  ;;  %v13230_v33 = vsub.f32 %v13153_v62, %v10020_v52 }
 0x28a   :  { %v10438_v35 = vmul.f32 %v10155_v50, %v13228_v61  ;;  %v13235_v61 = vld [vmem:[#allocation38_spill] sm:$0xff]  ;;  %7252 = vmatprep.subr.mxu1 %v2551_v17  ;;  %v13250_v17 = vsub.f32 %v13160_v44, %v10020_v52 }
 0x28b   :  { %13223 = vst [vmem:[#allocation27_spill] sm:$0xff] %v10426_v20  ;;  %v10432_v3 = vmul.f32 %v10155_v50, %v13225_v60  ;;  %v10449_v6 = vmul.f32 %v10155_v50, %v13230_v33  ;;  %v13232_v60 = vld [vmem:[#allocation39_spill] sm:$0xff]  ;;  %v13236_v41 = vsub.f32 %v13235_v61, %v10020_v52  ;;  %v13240_v33 = vld [vmem:[#allocation40_spill] sm:$0xff] }
 0x28c   :  { %13229 = vst [vmem:[#allocation35_spill] sm:$0xff] %v10438_v35  ;;  %v13233_v48 = vsub.f32 %v13232_v60, %v10020_v52 }
 0x28d   :  { %13226 = vst [vmem:[#allocation33_spill] sm:$0xff] %v10432_v3  ;;  %13231 = vst [vmem:[#allocation36_spill] sm:$0xff] %v10449_v6  ;;  %v10461_v35 = vmul.f32 %v10155_v50, %v13236_v41  ;;  %v13238_v3 = vld [vmem:[#allocation41_spill] sm:$0xff]  ;;  %v13241_v6 = vsub.f32 %v13240_v33, %v10020_v52  ;;  %v13244_v41 = vld [vmem:[#allocation42_spill] sm:$0xff] }
 0x28e   :  { %v10455_v30 = vmul.f32 %v10155_v50, %v13233_v48  ;;  %v13239_v20 = vsub.f32 %v13238_v3, %v10020_v52  ;;  %v13242_v48 = vld [vmem:[#allocation43_spill] sm:$0xff] }
 0x28f   :  { %13237 = vst [vmem:[#allocation46_spill] sm:$0xff] %v10461_v35  ;;  %v10473_v60 = vmul.f32 %v10155_v50, %v13241_v6  ;;  %v13245_v35 = vsub.f32 %v13244_v41, %v10020_v52  ;;  %v13247_v6 = vsub.f32 %v9927_v24, %v10020_v52  ;;  %v10515_v24 = vmul.f32 %v10155_v50, %v13250_v17  ;;  %v2535_v41 = vld [vmem:[%s13014_s7 + $0x70] sm:$0xff]  ;;  %v2548_v17 = vld [vmem:[%s13014_s7 + $0xd8] sm:$0xff] }
 0x290   :  { %13234 = vst [vmem:[#allocation44_spill] sm:$0xff] %v10455_v30  ;;  %v10467_v62 = vmul.f32 %v10155_v50, %v13239_v20  ;;  %v13243_v30 = vsub.f32 %v13242_v48, %v10020_v52  ;;  %v13246_v20 = vsub.f32 %v13157_v14, %v10020_v52  ;;  %7253 = vmatpush3.msra.mxu1 %v2535_v41  ;;  %v2532_v41 = vld [vmem:[%s13014_s7 + $0x58] sm:$0xff] }
 0x291   :  { %v10485_v3 = vmul.f32 %v10155_v50, %v13245_v35  ;;  %v10497_v33 = vmul.f32 %v10155_v50, %v13247_v6  ;;  %v13249_v35 = vsub.f32 %v13159_v26, %v10020_v52  ;;  %v2534_v26 = vld [vmem:[%s13014_s7 + $0x68] sm:$0xff]  ;;  %v10534_v6 = vmul.f32 %v10443_v47, %v10160_v51 }
 0x292   :  { %v10479_v61 = vmul.f32 %v10155_v50, %v13243_v30  ;;  %v10491_v22 = vmul.f32 %v10155_v50, %v13246_v20  ;;  %v13248_v30 = vsub.f32 %v13158_v43, %v10020_v52  ;;  %v2550_v43 = vld [vmem:[%s13014_s7 + $0xe8] sm:$0xff]  ;;  %v13251_v20 = vsub.f32 %v13161_v9, %v10020_v52  ;;  %v2549_v52 = vld [vmem:[%s13014_s7 + $0xe0] sm:$0xff] }
 0x293   :  { %v10509_v14 = vmul.f32 %v10155_v50, %v13249_v35  ;;  %v10542_v35 = vmul.f32 %v10443_v47, %v10170_v4  ;;  %v10549_v9 = vmul.f32 %v10443_v47, %v10175_v1  ;;  %v10553_v51 = vmul.f32 %v10443_v47, %v10180_v0  ;;  %7254 = vmatprep.subr.mxu1 %v2550_v43  ;;  %v2547_v43 = vld [vmem:[%s13014_s7 + $0xd0] sm:$0xff] }
 0x294   :  { %v10503_v48 = vmul.f32 %v10155_v50, %v13248_v30  ;;  %v10530_v44 = vmul.f32 %v10155_v50, %v13251_v20  ;;  %v10538_v30 = vmul.f32 %v10443_v47, %v10165_v46  ;;  %v10557_v46 = vmul.f32 %v10443_v47, %v10185_v29  ;;  %v2533_v50 = vld [vmem:[%s13014_s7 + $0x60] sm:$0xff]  ;;  %7255 = vmatpush3.msra.mxu1 %v2534_v26  ;;  %v2531_v26 = vld [vmem:[%s13014_s7 + $0x50] sm:$0xff]  ;;  %v2546_v20 = vld [vmem:[%s13014_s7 + $0xc8] sm:$0xff] }
 0x295   :  { %v10561_v4 = vmul.f32 %v10443_v47, %v10190_v59  ;;  %v10568_v1 = vmul.f32 %v10443_v47, %v10195_v8  ;;  %v10572_v0 = vmul.f32 %v10443_v47, %v10200_v21  ;;  %v10576_v29 = vmul.f32 %v10443_v47, %v10205_v19  ;;  %7256 = vmatprep.subr.mxu1 %v2549_v52  ;;  %v2530_v52 = vld [vmem:[%s13014_s7 + $0x48] sm:$0xff] }
 0x296   :  { %v10580_v59 = vmul.f32 %v10443_v47, %v10210_v34  ;;  %v10587_v8 = vmul.f32 %v10443_v47, %v10215_v25  ;;  %v10591_v21 = vmul.f32 %v10443_v47, %v10220_v45  ;;  %v10595_v19 = vmul.f32 %v10443_v47, %v10225_v37  ;;  %7257 = vmatpush3.msra.mxu1 %v2533_v50  ;;  %v2545_v50 = vld [vmem:[%s13014_s7 + $0xc0] sm:$0xff] }
 0x297   :  { %v10599_v34 = vmul.f32 %v10443_v47, %v10230_v2  ;;  %v10606_v25 = vmul.f32 %v10443_v47, %v10235_v56  ;;  %v10610_v45 = vmul.f32 %v10443_v47, %v10240_v18  ;;  %v10614_v37 = vmul.f32 %v10443_v47, %v10245_v11  ;;  %7258 = vmatprep.subr.mxu1 %v2548_v17  ;;  %v2529_v17 = vld [vmem:[%s13014_s7 + $0x40] sm:$0xff] }
 0x298   :  { %v10618_v2 = vmul.f32 %v10443_v47, %v10250_v36  ;;  %v10625_v56 = vmul.f32 %v10443_v47, %v10255_v31  ;;  %v10629_v18 = vmul.f32 %v10443_v47, %v10260_v58  ;;  %v10633_v11 = vmul.f32 %v10443_v47, %v10265_v49  ;;  %7259 = vmatpush3.msra.mxu1 %v2532_v41  ;;  %v13254_v41 = vld [vmem:[#allocation21_spill] sm:$0xff] }
 0x299   :  { %v10637_v36 = vmul.f32 %v10443_v47, %v10270_v12  ;;  %v10644_v31 = vmul.f32 %v10443_v47, %v10275_v5  ;;  %v10648_v58 = vmul.f32 %v10443_v47, %v10280_v32  ;;  %v10652_v49 = vmul.f32 %v10443_v47, %v10285_v27  ;;  %7260 = vmatprep.subr.mxu1 %v2547_v43  ;;  %v13256_v43 = vld [vmem:[#allocation20_spill] sm:$0xff] }
 0x29a   :  { %v10656_v12 = vmul.f32 %v10443_v47, %v10290_v55  ;;  %v10663_v5 = vmul.f32 %v10443_v47, %v10295_v53  ;;  %v10667_v32 = vmul.f32 %v10443_v47, %v10300_v13  ;;  %v10671_v27 = vmul.f32 %v10443_v47, %v10305_v28  ;;  %7261 = vmatpush3.msra.mxu1 %v2531_v26  ;;  %v2544_v26 = vld [vmem:[%s13014_s7 + $0xb8] sm:$0xff] }
 0x29b   :  { %v10675_v55 = vmul.f32 %v10443_v47, %v10310_v38  ;;  %v10682_v53 = vmul.f32 %v10443_v47, %v10315_v54  ;;  %v10686_v13 = vmul.f32 %v10443_v47, %v10321_v63  ;;  %v10690_v28 = vmul.f32 %v10443_v47, %v10327_v7  ;;  %7262 = vmatprep.subr.mxu1 %v2546_v20  ;;  %v13257_v20 = vld [vmem:[#allocation23_spill] sm:$0xff] }
 0x29c   :  { %v10694_v38 = vmul.f32 %v10443_v47, %v10333_v39  ;;  %v10701_v54 = vmul.f32 %v10443_v47, %v10339_v57  ;;  %v10705_v63 = vmul.f32 %v10443_v47, %v10345_v40  ;;  %v10709_v7 = vmul.f32 %v10443_v47, %v10351_v23  ;;  %7263 = vmatpush3.msra.mxu1 %v2530_v52  ;;  %v2528_v52 = vld [vmem:[%s13014_s7 + $0x38] sm:$0xff] }
 0x29d   :  { %v10713_v39 = vmul.f32 %v10443_v47, %v10357_v16  ;;  %v10720_v57 = vmul.f32 %v10443_v47, %v10363_v10  ;;  %v10724_v40 = vmul.f32 %v10443_v47, %v10369_v42  ;;  %v10728_v23 = vmul.f32 %v10443_v47, %v13254_v41  ;;  %7264 = vmatprep.subr.mxu1 %v2545_v50  ;;  %v2543_v50 = vld [vmem:[%s13014_s7 + $0xb0] sm:$0xff] }
 0x29e   :  { %v10732_v16 = vmul.f32 %v10443_v47, %v13256_v43  ;;  %v10739_v10 = vmul.f32 %v10443_v47, %v13257_v20  ;;  %v10758_v20 = vmul.f32 %v10443_v47, %v10420_v15  ;;  %7265 = vmatpush3.msra.mxu1 %v2529_v17  ;;  %v10778_v15 = vld [vmem:[%s13013_s6] ss:$0 sm:$0xff] }
 0x29f   :  { %13252 = vst [vmem:[#allocation45_spill] sm:$0xff] %v10720_v57  ;;  %13253 = vst [vmem:[#allocation48_spill] sm:$0xff] %v10724_v40  ;;  %v13259_v57 = vld [vmem:[#allocation22_spill] sm:$0xff]  ;;  %v13261_v40 = vld [vmem:[#allocation25_spill] sm:$0xff]  ;;  %7266 = vmatprep.subr.mxu1 %v2544_v26 }
 0x2a0   :  { %13255 = vst [vmem:[#allocation47_spill] sm:$0xff] %v10728_v23  ;;  %13258 = vst [vmem:[#allocation26_spill] sm:$0xff] %v10739_v10  ;;  %v10743_v42 = vmul.f32 %v10443_v47, %v13259_v57  ;;  %v10747_v41 = vmul.f32 %v10443_v47, %v13261_v40  ;;  %v13263_v23 = vld [vmem:[#allocation24_spill] sm:$0xff]  ;;  %v13265_v10 = vld [vmem:[#allocation27_spill] sm:$0xff]  ;;  %7267 = vmatpush3.msra.mxu1 %v2528_v52  ;;  %v10836_v52 = vmul.f32 %v10443_v47, %v10530_v44 }
 0x2a1   :  { %v10751_v43 = vmul.f32 %v10443_v47, %v13263_v23  ;;  %13264 = vst [vmem:[#allocation31_spill] sm:$0xff] %v10758_v20  ;;  %v10762_v57 = vmul.f32 %v10443_v47, %v13265_v10  ;;  %v13271_v10 = vld [vmem:[#allocation36_spill] sm:$0xff]  ;;  %7268 = vmatprep.subr.mxu1 %v2543_v50  ;;  %v1622_v44 = vadd.f32 %v10778_v15, %v10561_v4 }
 0x2a2   :  { %13260 = vst [vmem:[#allocation29_spill] sm:$0xff] %v10743_v42  ;;  %13262 = vst [vmem:[#allocation28_spill] sm:$0xff] %v10747_v41  ;;  %v13267_v42 = vld [vmem:[#allocation33_spill] sm:$0xff]  ;;  %v13269_v41 = vld [vmem:[#allocation35_spill] sm:$0xff]  ;;  %v1628_v4 = vadd.f32 %v10778_v15, %v10591_v21  ;;  %v1631_v21 = vadd.f32 %v10778_v15, %v10606_v25  ;;  %v1638_v50 = vadd.f32 %v10778_v15, %v10637_v36 }
 0x2a3   :  { %13266 = vst [vmem:[#allocation30_spill] sm:$0xff] %v10762_v57  ;;  %v10766_v40 = vmul.f32 %v10443_v47, %v13267_v42  ;;  %v10770_v23 = vmul.f32 %v10443_v47, %v13269_v41  ;;  %v10782_v57 = vmul.f32 %v10443_v47, %v13271_v10  ;;  %v13272_v42 = vld [vmem:[#allocation44_spill] sm:$0xff]  ;;  %v13273_v41 = vld [vmem:[#allocation46_spill] sm:$0xff]  ;;  %v10801_v10 = vmul.f32 %v10443_v47, %v10473_v60 }
 0x2a4   :  { %v10790_v17 = vmul.f32 %v10443_v47, %v13273_v41  ;;  %v2527_v20 = vld [vmem:[%s13014_s7 + $0x30] sm:$0xff]  ;;  %v10809_v41 = vmul.f32 %v10443_v47, %v10485_v3  ;;  %v2542_v26 = vld [vmem:[%s13014_s7 + $0xa8] sm:$0xff]  ;;  %v10820_v60 = vmul.f32 %v10443_v47, %v10497_v33  ;;  %v10828_v3 = vmul.f32 %v10443_v47, %v10509_v14  ;;  %1811 = vst.msk [vmem:[#allocation3 + $0x70] sm:$0xff] %vm840_vm0, %v1622_v44  ;;  %v2540_v25 = vld [vmem:[%s13014_s7 + $0x98] sm:$0xff] }
 0x2a5   :  { %13268 = vst [vmem:[#allocation32_spill] sm:$0xff] %v10766_v40  ;;  %13270 = vst [vmem:[#allocation34_spill] sm:$0xff] %v10770_v23  ;;  %v10786_v40 = vmul.f32 %v10443_v47, %v13272_v42  ;;  %v10794_v23 = vmul.f32 %v10443_v47, %v10467_v62  ;;  %v10805_v42 = vmul.f32 %v10443_v47, %v10479_v61  ;;  %7269 = vmatpush3.msra.mxu1 %v2527_v20 }
 0x2a6   :  { %v10813_v62 = vmul.f32 %v10443_v47, %v10491_v22  ;;  %v10824_v61 = vmul.f32 %v10443_v47, %v10503_v48  ;;  %v10832_v22 = vmul.f32 %v10443_v47, %v10515_v24  ;;  %v1616_v33 = vadd.f32 %v10778_v15, %v10534_v6  ;;  %7270 = vmatprep.subr.mxu1 %v2542_v26 }
 0x2a7   :  { %v1617_v48 = vadd.f32 %v10778_v15, %v10538_v30  ;;  %v1619_v14 = vadd.f32 %v10778_v15, %v10549_v9  ;;  %v1620_v24 = vadd.f32 %v10778_v15, %v10553_v51  ;;  %v1621_v47 = vadd.f32 %v10778_v15, %v10557_v46  ;;  %v10863_v51 = vld [vmem:[#allocation2] sm:$0xff]  ;;  %1817 = vst.msk [vmem:[#allocation3 + $0xd0] sm:$0xff] %vm840_vm0, %v1628_v4 }
 0x2a8   :  { %13274 = vst [vmem:[#allocation37_spill] sm:$0xff] %v10824_v61  ;;  %v1618_v61 = vadd.f32 %v10778_v15, %v10542_v35  ;;  %v1623_v6 = vadd.f32 %v10778_v15, %v10568_v1  ;;  %v1624_v30 = vadd.f32 %v10778_v15, %v10572_v0  ;;  %v1625_v35 = vadd.f32 %v10778_v15, %v10576_v29  ;;  %v2526_v29 = vld [vmem:[%s13014_s7 + $0x28] sm:$0xff] }
 0x2a9   :  { %v1626_v9 = vadd.f32 %v10778_v15, %v10580_v59  ;;  %1805 = vst.msk [vmem:[#allocation3 + $0x10] sm:$0xff] %vm840_vm0, %v1616_v33  ;;  %1806 = vst.msk [vmem:[#allocation3 + $0x20] sm:$0xff] %vm840_vm0, %v1617_v48  ;;  %v1627_v46 = vadd.f32 %v10778_v15, %v10587_v8  ;;  %v1629_v1 = vadd.f32 %v10778_v15, %v10595_v19  ;;  %v2541_v59 = vld [vmem:[%s13014_s7 + $0xa0] sm:$0xff]  ;;  %7271 = vmatpush3.msra.mxu1 %v2526_v29  ;;  %v13280_v4 = vld [vmem:[#allocation28_spill] sm:$0xff] }
 0x2aa   :  { %1807 = vst.msk [vmem:[#allocation3 + $0x30] sm:$0xff] %vm840_vm0, %v1618_v61  ;;  %v1630_v0 = vadd.f32 %v10778_v15, %v10599_v34  ;;  %1808 = vst.msk [vmem:[#allocation3 + $0x40] sm:$0xff] %vm840_vm0, %v1619_v14  ;;  %v2525_v8 = vld [vmem:[%s13014_s7 + $0x20] sm:$0xff]  ;;  %v1632_v19 = vadd.f32 %v10778_v15, %v10610_v45  ;;  %v1633_v34 = vadd.f32 %v10778_v15, %v10614_v37  ;;  %7272 = vmatprep.subr.mxu1 %v2541_v59  ;;  %v2522_v29 = vld [vmem:[%s13014_s7 + $0x8] sm:$0xff] }
 0x2ab   :  { %1809 = vst.msk [vmem:[#allocation3 + $0x50] sm:$0xff] %vm840_vm0, %v1620_v24  ;;  %1810 = vst.msk [vmem:[#allocation3 + $0x60] sm:$0xff] %vm840_vm0, %v1621_v47  ;;  %v1634_v20 = vadd.f32 %v10778_v15, %v10618_v2  ;;  %v1635_v45 = vadd.f32 %v10778_v15, %v10625_v56  ;;  %v1636_v37 = vadd.f32 %v10778_v15, %v10629_v18  ;;  %7273 = vmatpush3.msra.mxu1 %v2525_v8  ;;  %v13275_v24 = vld [vmem:[#allocation45_spill] sm:$0xff]  ;;  %v13276_v47 = vld [vmem:[#allocation48_spill] sm:$0xff] }
 0x2ac   :  { %1939 = vst.msk [vmem:[#allocation4] sm:$0xff] %vm840_vm0, %v10863_v51  ;;  %1812 = vst.msk [vmem:[#allocation3 + $0x80] sm:$0xff] %vm840_vm0, %v1623_v6  ;;  %v1637_v2 = vadd.f32 %v10778_v15, %v10633_v11  ;;  %v1639_v56 = vadd.f32 %v10778_v15, %v10644_v31  ;;  %v1640_v18 = vadd.f32 %v10778_v15, %v10648_v58  ;;  %v2524_v31 = vld [vmem:[%s13014_s7 + $0x18] sm:$0xff]  ;;  %v2539_v58 = vld [vmem:[%s13014_s7 + $0x90] sm:$0xff]  ;;  %7274 = vmatprep.subr.mxu1 %v2540_v25 }
 0x2ad   :  { %1813 = vst.msk [vmem:[#allocation3 + $0x90] sm:$0xff] %vm840_vm0, %v1624_v30  ;;  %1814 = vst.msk [vmem:[#allocation3 + $0xa0] sm:$0xff] %vm840_vm0, %v1625_v35  ;;  %v1641_v11 = vadd.f32 %v10778_v15, %v10652_v49  ;;  %v1642_v36 = vadd.f32 %v10778_v15, %v10656_v12  ;;  %v1643_v49 = vadd.f32 %v10778_v15, %v10663_v5  ;;  %v2523_v5 = vld [vmem:[%s13014_s7 + $0x10] sm:$0xff]  ;;  %7275 = vmatpush3.msra.mxu1 %v2524_v31  ;;  %v13277_v44 = vld [vmem:[#allocation47_spill] sm:$0xff] }
 0x2ae   :  { %1815 = vst.msk [vmem:[#allocation3 + $0xb0] sm:$0xff] %vm840_vm0, %v1626_v9  ;;  %1816 = vst.msk [vmem:[#allocation3 + $0xc0] sm:$0xff] %vm840_vm0, %v1627_v46  ;;  %v1644_v12 = vadd.f32 %v10778_v15, %v10667_v32  ;;  %v1645_v26 = vadd.f32 %v10778_v15, %v10671_v27  ;;  %v1646_v61 = vadd.f32 %v10778_v15, %v10675_v55  ;;  %7276 = vmatprep.subr.mxu1 %v2539_v58  ;;  %v13278_v35 = vld [vmem:[#allocation26_spill] sm:$0xff]  ;;  %v13279_v46 = vld [vmem:[#allocation29_spill] sm:$0xff] }
 0x2af   :  { %1818 = vst.msk [vmem:[#allocation3 + $0xe0] sm:$0xff] %vm840_vm0, %v1629_v1  ;;  %1819 = vst.msk [vmem:[#allocation3 + $0xf0] sm:$0xff] %vm840_vm0, %v1630_v0  ;;  %v1647_v32 = vadd.f32 %v10778_v15, %v10682_v53  ;;  %v1648_v27 = vadd.f32 %v10778_v15, %v10686_v13  ;;  %v1649_v55 = vadd.f32 %v10778_v15, %v10690_v28  ;;  %v2538_v53 = vld [vmem:[%s13014_s7 + $0x88] sm:$0xff]  ;;  %7277 = vmatpush3.msra.mxu1 %v2523_v5 }
 0x2b0   :  { %1772 = vst.msk [vmem:[#allocation2 + $0x11] sm:$0xff] %vm840_vm0, %v1632_v19  ;;  %1773 = vst.msk [vmem:[#allocation2 + $0x21] sm:$0xff] %vm840_vm0, %v1633_v34  ;;  %v1650_v33 = vadd.f32 %v10778_v15, %v10694_v38  ;;  %v1651_v13 = vadd.f32 %v10778_v15, %v10701_v54  ;;  %v1652_v28 = vadd.f32 %v10778_v15, %v10705_v63  ;;  %v1906_v14 = vld [vmem:[#allocation3 + $0x10] sm:$0xff]  ;;  %7278 = vmatprep.subr.mxu1 %v2538_v53  ;;  %v13281_v59 = vld [vmem:[#allocation31_spill] sm:$0xff] }
 0x2b1   :  { %1774 = vst.msk [vmem:[#allocation2 + $0x31] sm:$0xff] %vm840_vm0, %v1634_v20  ;;  %1820 = vst.msk [vmem:[#allocation3 + $0x100] sm:$0xff] %vm840_vm0, %v1631_v21  ;;  %v1653_v38 = vadd.f32 %v10778_v15, %v10709_v7  ;;  %v1654_v48 = vadd.f32 %v10778_v15, %v10713_v39  ;;  %v1908_v54 = vld [vmem:[#allocation3 + $0x30] sm:$0xff]  ;;  %v1655_v63 = vadd.f32 %v10778_v15, %v13275_v24  ;;  %v13282_v21 = vld [vmem:[#allocation30_spill] sm:$0xff]  ;;  %7279 = vmatpush3.msra.mxu1 %v2522_v29 }
 0x2b2   :  { %1775 = vst.msk [vmem:[#allocation2 + $0x41] sm:$0xff] %vm840_vm0, %v1635_v45  ;;  %1776 = vst.msk [vmem:[#allocation2 + $0x51] sm:$0xff] %vm840_vm0, %v1636_v37  ;;  %v1656_v7 = vadd.f32 %v10778_v15, %v13276_v47  ;;  %v1657_v39 = vadd.f32 %v10778_v15, %v13277_v44  ;;  %v1658_v6 = vadd.f32 %v10778_v15, %v10732_v16  ;;  %v1910_v30 = vld [vmem:[#allocation3 + $0x50] sm:$0xff]  ;;  %v13284_v20 = vld [vmem:[#allocation34_spill] sm:$0xff] }
 0x2b3   :  { %1777 = vst.msk [vmem:[#allocation2 + $0x61] sm:$0xff] %vm840_vm0, %v1637_v2  ;;  %1778 = vst.msk [vmem:[#allocation2 + $0x71] sm:$0xff] %vm840_vm0, %v1638_v50  ;;  %v1659_v9 = vadd.f32 %v10778_v15, %v13278_v35  ;;  %v1660_v16 = vadd.f32 %v10778_v15, %v13279_v46  ;;  %v1661_v1 = vadd.f32 %v10778_v15, %v13280_v4  ;;  %v13283_v19 = vld [vmem:[#allocation32_spill] sm:$0xff]  ;;  %v2537_v45 = vld [vmem:[%s13014_s7 + $0x80] sm:$0xff] }
 0x2b4   :  { %1779 = vst.msk [vmem:[#allocation2 + $0x81] sm:$0xff] %vm840_vm0, %v1639_v56  ;;  %1780 = vst.msk [vmem:[#allocation2 + $0x91] sm:$0xff] %vm840_vm0, %v1640_v18  ;;  %v1662_v0 = vadd.f32 %v10778_v15, %v10751_v43  ;;  %v1663_v8 = vadd.f32 %v10778_v15, %v13281_v59  ;;  %v1664_v43 = vadd.f32 %v10778_v15, %v13282_v21  ;;  %7280 = vmatprep.subr.mxu1 %v2537_v45 }
 0x2b5   :  { %1781 = vst.msk [vmem:[#allocation2 + $0xa1] sm:$0xff] %vm840_vm0, %v1641_v11  ;;  %1782 = vst.msk [vmem:[#allocation2 + $0xb1] sm:$0xff] %vm840_vm0, %v1642_v36  ;;  %v1665_v34 = vadd.f32 %v10778_v15, %v13283_v19  ;;  %v1666_v25 = vadd.f32 %v10778_v15, %v13284_v20  ;;  %v1667_v37 = vadd.f32 %v10778_v15, %v10782_v57 }
 0x2b6   :  { %1783 = vst.msk [vmem:[#allocation2 + $0xc1] sm:$0xff] %vm840_vm0, %v1643_v49  ;;  %1784 = vst.msk [vmem:[#allocation2 + $0xd1] sm:$0xff] %vm840_vm0, %v1644_v12  ;;  %v1668_v2 = vadd.f32 %v10778_v15, %v10786_v40  ;;  %v1669_v50 = vadd.f32 %v10778_v15, %v10790_v17  ;;  %v1670_v56 = vadd.f32 %v10778_v15, %v10794_v23 }
 0x2b7   :  { %1785 = vst.msk [vmem:[#allocation2 + $0xe1] sm:$0xff] %vm840_vm0, %v1645_v26  ;;  %1786 = vst.msk [vmem:[#allocation2 + $0xf1] sm:$0xff] %vm840_vm0, %v1646_v61  ;;  %v11034_v57 = vld [vmem:[#allocation2 + $0x10] sm:$0xff]  ;;  %v1841_v11 = vld [vmem:[#allocation2 + $0x20] sm:$0xff]  ;;  %v1671_v40 = vadd.f32 %v10778_v15, %v10801_v10  ;;  %v1672_v23 = vadd.f32 %v10778_v15, %v10805_v42  ;;  %v1673_v17 = vadd.f32 %v10778_v15, %v10809_v41 }
 0x2b8   :  { %1787 = vst.msk [vmem:[#allocation2 + $0x101] sm:$0xff] %vm840_vm0, %v1647_v32  ;;  %1821 = vst.msk [vmem:[#allocation3 + $0x130] sm:$0xff] %vm840_vm0, %v1648_v27  ;;  %v11032_v18 = vld [vmem:[#allocation2 + $0x30] sm:$0xff]  ;;  %v1674_v36 = vadd.f32 %v10778_v15, %v10813_v62  ;;  %v1842_v10 = vld [vmem:[#allocation2 + $0x28] sm:$0x1]  ;;  %v1675_v41 = vadd.f32 %v10778_v15, %v10820_v60  ;;  %v1677_v58 = vadd.f32 %v10778_v15, %v10828_v3  ;;  %1971 = vrot.lane.b32.xlu0 %v11034_v57, %s8882_s20 }
 0x2b9   :  { %1822 = vst.msk [vmem:[#allocation3 + $0x140] sm:$0xff] %vm840_vm0, %v1649_v55  ;;  %1823 = vst.msk [vmem:[#allocation3 + $0x150] sm:$0xff] %vm840_vm0, %v1650_v33  ;;  %1973 = vrot.lane.b32.xlu1 %v11032_v18, %s8882_s20  ;;  %v1845_v42 = vld [vmem:[#allocation2 + $0x40] sm:$0xff]  ;;  %v13285_v62 = vld [vmem:[#allocation37_spill] sm:$0xff]  ;;  %v1678_v49 = vadd.f32 %v10778_v15, %v10832_v22  ;;  %v1679_v22 = vadd.f32 %v10778_v15, %v10836_v52  ;;  %v2209_v52 = vrot.slane %v1842_v10, 1 }
 0x2ba   :  { %2132 = vst.msk [vmem:[#allocation4 + $0x10] sm:$0xff] %vm840_vm0, %v1906_v14  ;;  %2133 = vst.msk [vmem:[#allocation4 + $0x38] sm:$0xff] %vm840_vm0, %v1908_v54  ;;  %v1676_v31 = vadd.f32 %v10778_v15, %v13285_v62  ;;  %v1905_v60 = vld [vmem:[#allocation3] sm:$0xff]  ;;  %v1846_v12 = vld [vmem:[#allocation2 + $0x48] sm:$0x1]  ;;  %v2208_v15 = vrot.slane %v1841_v11, 1 }
 0x2bb   :  { %1824 = vst.msk [vmem:[#allocation3 + $0x160] sm:$0xff] %vm840_vm0, %v1651_v13  ;;  %1825 = vst.msk [vmem:[#allocation3 + $0x170] sm:$0xff] %vm840_vm0, %v1652_v28  ;;  %v1849_v3 = vld [vmem:[#allocation2 + $0x60] sm:$0xff]  ;;  %v1850_v61 = vld [vmem:[#allocation2 + $0x68] sm:$0x1]  ;;  %v2211_v32 = vrot.slane %v1845_v42, 1 }
 0x2bc   :  { %1826 = vst.msk [vmem:[#allocation3 + $0x180] sm:$0xff] %vm840_vm0, %v1653_v38  ;;  %1827 = vst.msk [vmem:[#allocation3 + $0x190] sm:$0xff] %vm840_vm0, %v1654_v48  ;;  %v1907_v26 = vld [vmem:[#allocation3 + $0x20] sm:$0xff]  ;;  %v2212_v27 = vrot.slane %v1846_v12, 1  ;;  %v1854_v55 = vld [vmem:[#allocation2 + $0x88] sm:$0x1]  ;;  %2068 = vrot.lane.b32.xlu0 %v1905_v60, %s8882_s20  ;;  %v11086_v38 = vsel %vm2204_vm6, %v2208_v15, %v2209_v52 }
 0x2bd   :  { %2134 = vst.msk [vmem:[#allocation4 + $0x60] sm:$0xff] %vm840_vm0, %v1910_v30  ;;  %1828 = vst.msk [vmem:[#allocation3 + $0x1a0] sm:$0xff] %vm840_vm0, %v1655_v63  ;;  %v1853_v5 = vld [vmem:[#allocation2 + $0x80] sm:$0xff]  ;;  %2070 = vrot.lane.b32.xlu1 %v1907_v26, %s8882_s20  ;;  %v2214_v33 = vrot.slane %v1849_v3, 1  ;;  %v2215_v53 = vrot.slane %v1850_v61, 1  ;;  %v2218_v14 = vrot.slane %v1854_v55, 1 }
 0x2be   :  { %1829 = vst.msk [vmem:[#allocation3 + $0x1b0] sm:$0xff] %vm840_vm0, %v1656_v7  ;;  %1830 = vst.msk [vmem:[#allocation3 + $0x1c0] sm:$0xff] %vm840_vm0, %v1657_v39  ;;  %v2217_v13 = vrot.slane %v1853_v5, 1  ;;  %v1857_v28 = vld [vmem:[#allocation2 + $0xa0] sm:$0xff]  ;;  %v11089_v48 = vsel %vm2204_vm6, %v2211_v32, %v2212_v27  ;;  %v1858_v54 = vld [vmem:[#allocation2 + $0xa8] sm:$0x1] }
 0x2bf   :  { %1831 = vst.msk [vmem:[#allocation3 + $0x1d0] sm:$0xff] %vm840_vm0, %v1658_v6  ;;  %1832 = vst.msk [vmem:[#allocation3 + $0x1e0] sm:$0xff] %vm840_vm0, %v1659_v9  ;;  %v1861_v24 = vld [vmem:[#allocation2 + $0xc0] sm:$0xff]  ;;  %v11098_v63 = vsel %vm2204_vm6, %v2214_v33, %v2215_v53  ;;  %v2220_v47 = vrot.slane %v1857_v28, 1  ;;  %v2221_v7 = vrot.slane %v1858_v54, 1 }
 0x2c0   :  { %1833 = vst.msk [vmem:[#allocation3 + $0x1f0] sm:$0xff] %vm840_vm0, %v1660_v16  ;;  %1834 = vst.msk [vmem:[#allocation3 + $0x200] sm:$0xff] %vm840_vm0, %v1661_v1  ;;  %v1862_v44 = vld [vmem:[#allocation2 + $0xc8] sm:$0x1]  ;;  %v2223_v39 = vrot.slane %v1861_v24, 1  ;;  %v1865_v6 = vld [vmem:[#allocation2 + $0xe0] sm:$0xff]  ;;  %v11105_v35 = vsel %vm2204_vm6, %v2217_v13, %v2218_v14 }
 0x2c1   :  { %1835 = vst.msk [vmem:[#allocation3 + $0x210] sm:$0xff] %vm840_vm0, %v1662_v0  ;;  %1788 = vst.msk [vmem:[#allocation2 + $0x131] sm:$0xff] %vm840_vm0, %v1664_v43  ;;  %v1909_v30 = vld [vmem:[#allocation3 + $0x40] sm:$0xff]  ;;  %v2224_v9 = vrot.slane %v1862_v44, 1  ;;  %v1866_v46 = vld [vmem:[#allocation2 + $0xe8] sm:$0x1]  ;;  %v11115_v0 = vsel %vm2204_vm6, %v2220_v47, %v2221_v7 }
 0x2c2   :  { %1789 = vst.msk [vmem:[#allocation2 + $0x141] sm:$0xff] %vm840_vm0, %v1665_v34  ;;  %1790 = vst.msk [vmem:[#allocation2 + $0x151] sm:$0xff] %vm840_vm0, %v1666_v25  ;;  %v2226_v16 = vrot.slane %v1865_v6, 1  ;;  %v1869_v4 = vld [vmem:[#allocation2 + $0x100] sm:$0xff]  ;;  %v11109_v1 = vld [vmem:[#allocation2 + $0x50] sm:$0xff]  ;;  %2072 = vrot.lane.b32.xlu1 %v1909_v30, %s8882_s20  ;;  %v2227_v29 = vrot.slane %v1866_v46, 1 }
 0x2c3   :  { %1836 = vst.msk [vmem:[#allocation3 + $0x220] sm:$0xff] %vm840_vm0, %v1663_v8  ;;  %1940 = vst.msk [vmem:[#allocation4 + $0x28] sm:$0xff] %vm840_vm0, %v1841_v11  ;;  %v1870_v59 = vld [vmem:[#allocation2 + $0x108] sm:$0x1]  ;;  %v2417_v8 = vrot.slane %v1869_v4, 1  ;;  %1975 = vrot.lane.b32.xlu0 %v11109_v1, %s8882_s20  ;;  %v1911_v43 = vld [vmem:[#allocation3 + $0x60] sm:$0xff]  ;;  %v11123_v19 = vsel %vm2204_vm6, %v2223_v39, %v2224_v9 }
 0x2c4   :  { %2036 = vst.msk [vmem:[#allocation4 + $0x18] sm:$0xff] %vm840_vm0, %v1841_v11  ;;  %1791 = vst.msk [vmem:[#allocation2 + $0x161] sm:$0xff] %vm840_vm0, %v1667_v37  ;;  %v2418_v34 = vrot.slane %v1870_v59, 1  ;;  %v11130_v45 = vsel %vm2204_vm6, %v2226_v16, %v2227_v29  ;;  %v1913_v55 = vld [vmem:[#allocation3 + $0x80] sm:$0xff]  ;;  %v11172_v14 = vld [vmem:[#allocation2 + $0x90] sm:$0xff]  ;;  %v2205_v7 = vrot.slane %v10863_v51, 1 }
 0x2c5   :  { %1792 = vst.msk [vmem:[#allocation2 + $0x171] sm:$0xff] %vm840_vm0, %v1668_v2  ;;  %1793 = vst.msk [vmem:[#allocation2 + $0x181] sm:$0xff] %vm840_vm0, %v1669_v50  ;;  %v1915_v59 = vld [vmem:[#allocation3 + $0xa0] sm:$0xff] }
 0x2c6   :  { %1794 = vst.msk [vmem:[#allocation2 + $0x191] sm:$0xff] %vm840_vm0, %v1670_v56  ;;  %1941 = vst.msk [vmem:[#allocation4 + $0x50] sm:$0xff] %vm840_vm0, %v1845_v42  ;;  %v2419_v11 = vsel %vm2204_vm6, %v2417_v8, %v2418_v34  ;;  %2074 = vrot.lane.b32.xlu1 %v1911_v43, %s8882_s20 }
 0x2c7   :  { %2037 = vst.msk [vmem:[#allocation4 + $0x40] sm:$0xff] %vm840_vm0, %v1845_v42  ;;  %1795 = vst.msk [vmem:[#allocation2 + $0x1a1] sm:$0xff] %vm840_vm0, %v1671_v40  ;;  %v11139_v42 = vld [vmem:[#allocation2 + $0x70] sm:$0xff] }
 0x2c8   :  { %1796 = vst.msk [vmem:[#allocation2 + $0x1b1] sm:$0xff] %vm840_vm0, %v1672_v23  ;;  %1797 = vst.msk [vmem:[#allocation2 + $0x1c1] sm:$0xff] %vm840_vm0, %v1673_v17  ;;  %1977 = vrot.lane.b32.xlu0 %v11139_v42, %s8882_s20 }
 0x2c9   :  { %1798 = vst.msk [vmem:[#allocation2 + $0x1d1] sm:$0xff] %vm840_vm0, %v1674_v36  ;;  %1942 = vst.msk [vmem:[#allocation4 + $0x78] sm:$0xff] %vm840_vm0, %v1849_v3  ;;  %v1875_v21 = vld [vmem:[#allocation2 + $0x140] sm:$0xff]  ;;  %v1876_v20 = vld [vmem:[#allocation2 + $0x148] sm:$0x1] }
 0x2ca   :  { %2038 = vst.msk [vmem:[#allocation4 + $0x68] sm:$0xff] %vm840_vm0, %v1849_v3  ;;  %1799 = vst.msk [vmem:[#allocation2 + $0x1e1] sm:$0xff] %vm840_vm0, %v1675_v41  ;;  %v2232_v25 = vrot.slane %v1875_v21, 1  ;;  %v2233_v37 = vrot.slane %v1876_v20, 1  ;;  %2076 = vrot.lane.b32.xlu1 %v1913_v55, %s8882_s20 }
 0x2cb   :  { %1800 = vst.msk [vmem:[#allocation2 + $0x1f1] sm:$0xff] %vm840_vm0, %v1676_v31  ;;  %1801 = vst.msk [vmem:[#allocation2 + $0x201] sm:$0xff] %vm840_vm0, %v1677_v58  ;;  %v1879_v2 = vld [vmem:[#allocation2 + $0x160] sm:$0xff]  ;;  %v1880_v50 = vld [vmem:[#allocation2 + $0x168] sm:$0x1] }
 0x2cc   :  { %1802 = vst.msk [vmem:[#allocation2 + $0x211] sm:$0xff] %vm840_vm0, %v1678_v49  ;;  %1943 = vst.msk [vmem:[#allocation4 + $0xa0] sm:$0xff] %vm840_vm0, %v1853_v5  ;;  %v1883_v56 = vld [vmem:[#allocation2 + $0x180] sm:$0xff]  ;;  %v2235_v40 = vrot.slane %v1879_v2, 1  ;;  %v2236_v23 = vrot.slane %v1880_v50, 1  ;;  %v11144_v41 = vsel %vm2204_vm6, %v2232_v25, %v2233_v37  ;;  %1979 = vrot.lane.b32.xlu0 %v11172_v14, %s8882_s20  ;;  %v11247_v55 = vld [vmem:[#allocation2 + $0x170] sm:$0xff] }
 0x2cd   :  { %2039 = vst.msk [vmem:[#allocation4 + $0x90] sm:$0xff] %vm840_vm0, %v1853_v5  ;;  %1803 = vst.msk [vmem:[#allocation2 + $0x221] sm:$0xff] %vm840_vm0, %v1679_v22  ;;  %v1884_v17 = vld [vmem:[#allocation2 + $0x188] sm:$0x1]  ;;  %v2238_v36 = vrot.slane %v1883_v56, 1  ;;  %v1917_v37 = vld [vmem:[#allocation3 + $0xc0] sm:$0xff] }
 0x2ce   :  { %1944 = vst.msk [vmem:[#allocation4 + $0xc8] sm:$0xff] %vm840_vm0, %v1857_v28  ;;  %2040 = vst.msk [vmem:[#allocation4 + $0xb8] sm:$0xff] %vm840_vm0, %v1857_v28  ;;  %v1887_v10 = vld [vmem:[#allocation2 + $0x1a0] sm:$0xff]  ;;  %v2239_v62 = vrot.slane %v1884_v17, 1  ;;  %v1888_v31 = vld [vmem:[#allocation2 + $0x1a8] sm:$0x1]  ;;  %v11153_v3 = vsel %vm2204_vm6, %v2235_v40, %v2236_v23  ;;  %2078 = vrot.lane.b32.xlu1 %v1915_v59, %s8882_s20 }
 0x2cf   :  { %2425 = vst.msk [vmem:[#allocation4 + $0x20] sm:$0xff] %vm840_vm0, %v11086_v38  ;;  %2426 = vst.msk [vmem:[#allocation4 + $0x48] sm:$0xff] %vm840_vm0, %v11089_v48  ;;  %v2241_v58 = vrot.slane %v1887_v10, 1  ;;  %v1891_v49 = vld [vmem:[#allocation2 + $0x1c0] sm:$0xff]  ;;  %v2242_v22 = vrot.slane %v1888_v31, 1  ;;  %v11222_v23 = vld [vmem:[#allocation2 + $0xf0] sm:$0xff] }
 0x2d0   :  { %1945 = vst.msk [vmem:[#allocation4 + $0xf0] sm:$0xff] %vm840_vm0, %v1861_v24  ;;  %2041 = vst.msk [vmem:[#allocation4 + $0xe0] sm:$0xff] %vm840_vm0, %v1861_v24  ;;  %v1892_v26 = vld [vmem:[#allocation2 + $0x1c8] sm:$0x1]  ;;  %v11161_v61 = vsel %vm2204_vm6, %v2238_v36, %v2239_v62  ;;  %v2244_v5 = vrot.slane %v1891_v49, 1  ;;  %v2521_v40 = vld [vmem:[%s13014_s7] sm:$0xff] }
 0x2d1   :  { %2427 = vst.msk [vmem:[#allocation4 + $0x70] sm:$0xff] %vm840_vm0, %v11098_v63  ;;  %1946 = vst.msk [vmem:[#allocation4 + $0x118] sm:$0xff] %vm840_vm0, %v1865_v6  ;;  %v2245_v15 = vrot.slane %v1892_v26, 1  ;;  %v1895_v52 = vld [vmem:[#allocation2 + $0x1e0] sm:$0xff]  ;;  %v1896_v32 = vld [vmem:[#allocation2 + $0x1e8] sm:$0x1]  ;;  %v11167_v33 = vsel %vm2204_vm6, %v2241_v58, %v2242_v22  ;;  %7281 = vmatpush3.msra.mxu1 %v2521_v40 }
 0x2d2   :  { %2042 = vst.msk [vmem:[#allocation4 + $0x108] sm:$0xff] %vm840_vm0, %v1865_v6  ;;  %2428 = vst.msk [vmem:[#allocation4 + $0x98] sm:$0xff] %vm840_vm0, %v11105_v35  ;;  %v2247_v53 = vrot.slane %v1895_v52, 1  ;;  %v2248_v13 = vrot.slane %v1896_v32, 1  ;;  %v1838_v28 = vld [vmem:[#allocation2 + $0x8] sm:$0x1]  ;;  %2080 = vrot.lane.b32.xlu1 %v1917_v37, %s8882_s20 }
 0x2d3   :  { %2043 = vst.msk [vmem:[#allocation4 + $0x130] sm:$0xff] %vm840_vm0, %v1869_v4  ;;  %2429 = vst.msk [vmem:[#allocation4 + $0xc0] sm:$0xff] %vm840_vm0, %v11115_v0  ;;  %v11178_v54 = vsel %vm2204_vm6, %v2244_v5, %v2245_v15  ;;  %v1899_v24 = vld [vmem:[#allocation2 + $0x200] sm:$0xff]  ;;  %v1900_v47 = vld [vmem:[#allocation2 + $0x208] sm:$0x1]  ;;  %v2206_v4 = vrot.slane %v1838_v28, 1 }
 0x2d4   :  { %1948 = vst.msk [vmem:[#allocation4 + $0x168] sm:$0xff] %vm840_vm0, %v1875_v21  ;;  %2044 = vst.msk [vmem:[#allocation4 + $0x158] sm:$0xff] %vm840_vm0, %v1875_v21  ;;  %v11186_v44 = vsel %vm2204_vm6, %v2247_v53, %v2248_v13  ;;  %v2250_v39 = vrot.slane %v1899_v24, 1  ;;  %v2251_v6 = vrot.slane %v1900_v47, 1  ;;  %v1903_v30 = vld [vmem:[#allocation2 + $0x220] sm:$0xff]  ;;  %v11198_v21 = vld [vmem:[#allocation2 + $0xb0] sm:$0xff] }
 0x2d5   :  { %2430 = vst.msk [vmem:[#allocation4 + $0xe8] sm:$0xff] %vm840_vm0, %v11123_v19  ;;  %2431 = vst.msk [vmem:[#allocation4 + $0x110] sm:$0xff] %vm840_vm0, %v11130_v45  ;;  %v1904_v9 = vld [vmem:[#allocation2 + $0x228] sm:$0x1]  ;;  %v2420_v51 = vrot.slane %v1903_v30, 1  ;;  %v11205_v34 = vsel %vm2204_vm6, %v2205_v7, %v2206_v4  ;;  %1981 = vrot.lane.b32.xlu0 %v11198_v21, %s8882_s20  ;;  %v1922_v17 = vld [vmem:[#allocation3 + $0x120] sm:$0xff] }
 0x2d6   :  { %1949 = vst.msk [vmem:[#allocation4 + $0x190] sm:$0xff] %vm840_vm0, %v1879_v2  ;;  %2045 = vst.msk [vmem:[#allocation4 + $0x180] sm:$0xff] %vm840_vm0, %v1879_v2  ;;  %v2445_v60 = vld [vmem:[#allocation4 + $0x20] sm:$0xff]  ;;  %v2450_v12 = vld [vmem:[#allocation4 + $0x48] sm:$0xff]  ;;  %v2421_v16 = vrot.slane %v1904_v9, 1  ;;  %v11195_v8 = vsel %vm2204_vm6, %v2250_v39, %v2251_v6  ;;  %v13286_v59 = vmov 0.0  }
 0x2d7   :  { %1950 = vst.msk [vmem:[#allocation4 + $0x1b8] sm:$0xff] %vm840_vm0, %v1883_v56  ;;  %2046 = vst.msk [vmem:[#allocation4 + $0x1a8] sm:$0xff] %vm840_vm0, %v1883_v56  ;;  %8400 = vmatprep.mubr.msk.f32.mxu0 %vm840_vm0, %v2445_v60  ;;  %v11212_v2 = vld [vmem:[#allocation2 + $0xd0] sm:$0xff]  ;;  %v2584_v31 = vld [vmem:[%s13014_s7 + $0x1f8] sm:$0xff] }
 0x2d8   :  { %2432 = vst.msk [vmem:[#allocation4 + $0x138] sm:$0xff] %vm840_vm0, %v2419_v11  ;;  %1951 = vst.msk [vmem:[#allocation4 + $0x1e0] sm:$0xff] %vm840_vm0, %v1887_v10  ;;  %8401 = vmatmul.mubr.msk.f32.vlgmr.msra.gmra.mxu0 %vm840_vm0, %v2450_v12  ;;  %v2455_v27 = vld [vmem:[#allocation4 + $0x70] sm:$0xff]  ;;  %v2422_v43 = vsel %vm2204_vm6, %v2420_v51, %v2421_v16  ;;  %v1919_v11 = vld [vmem:[#allocation3 + $0xe0] sm:$0xff]  ;;  %7330 = vmatprep.subr.mxu1 %v2584_v31 }
 0x2d9   :  { %2047 = vst.msk [vmem:[#allocation4 + $0x1d0] sm:$0xff] %vm840_vm0, %v1887_v10  ;;  %2433 = vst.msk [vmem:[#allocation4 + $0x160] sm:$0xff] %vm840_vm0, %v11144_v41  ;;  %8403 = vmatprep.mubr.msk.f32.mxu0 %vm840_vm0, %v2455_v27  ;;  %v2460_v46 = vld [vmem:[#allocation4 + $0x98] sm:$0xff]  ;;  %1983 = vrot.lane.b32.xlu0 %v11212_v2, %s8882_s20  ;;  %v11230_v62 = vld [vmem:[#allocation2 + $0x130] sm:$0xff] }
 0x2da   :  { %1952 = vst.msk [vmem:[#allocation4 + $0x208] sm:$0xff] %vm840_vm0, %v1891_v49  ;;  %2048 = vst.msk [vmem:[#allocation4 + $0x1f8] sm:$0xff] %vm840_vm0, %v1891_v49  ;;  %v2465_v29 = vld [vmem:[#allocation4 + $0xc0] sm:$0xff]  ;;  %2082 = vrot.lane.b32.xlu1 %v1919_v11, %s8882_s20  ;;  %v11239_v12 = vld [vmem:[#allocation2 + $0x150] sm:$0xff] }
 0x2db   :  { %2434 = vst.msk [vmem:[#allocation4 + $0x188] sm:$0xff] %vm840_vm0, %v11153_v3  ;;  %2435 = vst.msk [vmem:[#allocation4 + $0x1b0] sm:$0xff] %vm840_vm0, %v11161_v61  ;;  %v1924_v60 = vld [vmem:[#allocation3 + $0x140] sm:$0xff]  ;;  %v1872_v5 = vld [vmem:[#allocation2 + $0x128] sm:$0x1] }
 0x2dc   :  { %1953 = vst.msk [vmem:[#allocation4 + $0x230] sm:$0xff] %vm840_vm0, %v1895_v52  ;;  %2049 = vst.msk [vmem:[#allocation4 + $0x220] sm:$0xff] %vm840_vm0, %v1895_v52  ;;  %8404 = vmatmul.mubr.msk.f32.gmra.mxu0 %vm840_vm0, %v2460_v46  ;;  %v2470_v20 = vld [vmem:[#allocation4 + $0xe8] sm:$0xff]  ;;  %v2475_v25 = vld [vmem:[#allocation4 + $0x110] sm:$0xff]  ;;  %v2230_v52 = vrot.slane %v1872_v5, 1 }
 0x2dd   :  { %2436 = vst.msk [vmem:[#allocation4 + $0x1d8] sm:$0xff] %vm840_vm0, %v11167_v33  ;;  %2437 = vst.msk [vmem:[#allocation4 + $0x200] sm:$0xff] %vm840_vm0, %v11178_v54  ;;  %8406 = vmatprep.mubr.msk.f32.mxu0 %vm840_vm0, %v2465_v29  ;;  %1985 = vrot.lane.b32.xlu0 %v11222_v23, %s8882_s20  ;;  %v1871_v22 = vld [vmem:[#allocation2 + $0x120] sm:$0xff]  ;;  %v1912_v13 = vld [vmem:[#allocation3 + $0x70] sm:$0xff] }
 0x2de   :  { %1954 = vst.msk [vmem:[#allocation4 + $0x258] sm:$0xff] %vm840_vm0, %v1899_v24  ;;  %2050 = vst.msk [vmem:[#allocation4 + $0x248] sm:$0xff] %vm840_vm0, %v1899_v24  ;;  %2084 = vrot.lane.b32.xlu1 %v1922_v17, %s8882_s20  ;;  %v2229_v26 = vrot.slane %v1871_v22, 1  ;;  %v1926_v27 = vld [vmem:[#allocation3 + $0x160] sm:$0xff]  ;;  %v1914_v47 = vld [vmem:[#allocation3 + $0x90] sm:$0xff] }
 0x2df   :  { %2438 = vst.msk [vmem:[#allocation4 + $0x228] sm:$0xff] %vm840_vm0, %v11186_v44  ;;  %2051 = vst.msk [vmem:[#allocation4 + $0x270] sm:$0xff] %vm840_vm0, %v1903_v30  ;;  %v2480_v50 = vld [vmem:[#allocation4 + $0x138] sm:$0xff]  ;;  %v1928_v24 = vld [vmem:[#allocation3 + $0x180] sm:$0xff] }
 0x2e0   :  { %2439 = vst.msk [vmem:[#allocation4 + $0x250] sm:$0xff] %vm840_vm0, %v11195_v8  ;;  %2440 = vst.msk [vmem:[#allocation4 + $0x278] sm:$0xff] %vm840_vm0, %v2422_v43  ;;  %8407 = vmatmul.mubr.msk.f32.gmra.mxu0 %vm840_vm0, %v2470_v20  ;;  %v2485_v56 = vld [vmem:[#allocation4 + $0x160] sm:$0xff]  ;;  %v11251_v53 = vsel %vm2204_vm6, %v2229_v26, %v2230_v52  ;;  %v11256_v7 = vld [vmem:[#allocation2 + $0x190] sm:$0xff] }
 0x2e1   :  { %8409 = vmatprep.mubr.msk.f32.mxu0 %vm840_vm0, %v2475_v25  ;;  %1987 = vrot.lane.b32.xlu0 %v11230_v62, %s8882_s20  ;;  %1947 = vst.msk [vmem:[#allocation4 + $0x140] sm:$0xff] %vm840_vm0, %v1871_v22  ;;  %2135 = vst.msk [vmem:[#allocation4 + $0x88] sm:$0xff] %vm840_vm0, %v1912_v13  ;;  %v1916_v39 = vld [vmem:[#allocation3 + $0xb0] sm:$0xff]  ;;  %v1930_v25 = vld [vmem:[#allocation3 + $0x1a0] sm:$0xff] }
 0x2e2   :  { %v2490_v36 = vld [vmem:[#allocation4 + $0x188] sm:$0xff]  ;;  %v2495_v10 = vld [vmem:[#allocation4 + $0x1b0] sm:$0xff]  ;;  %2086 = vrot.lane.b32.xlu1 %v1924_v60, %s8882_s20  ;;  %2136 = vst.msk [vmem:[#allocation4 + $0xb0] sm:$0xff] %vm840_vm0, %v1914_v47  ;;  %2137 = vst.msk [vmem:[#allocation4 + $0xd8] sm:$0xff] %vm840_vm0, %v1916_v39 }
 0x2e3   :  { %v1918_v6 = vld [vmem:[#allocation3 + $0xd0] sm:$0xff]  ;;  %v1934_v11 = vld [vmem:[#allocation3 + $0x1e0] sm:$0xff]  ;;  %v1844_v17 = vld [vmem:[#allocation2 + $0x38] sm:$0x1] }
 0x2e4   :  { %8410 = vmatmul.mubr.msk.f32.gmra.mxu0 %vm840_vm0, %v2480_v50  ;;  %v2500_v58 = vld [vmem:[#allocation4 + $0x1d8] sm:$0xff]  ;;  %v2505_v49 = vld [vmem:[#allocation4 + $0x200] sm:$0xff]  ;;  %v1920_v30 = vld [vmem:[#allocation3 + $0xf0] sm:$0xff]  ;;  %2138 = vst.msk [vmem:[#allocation4 + $0x100] sm:$0xff] %vm840_vm0, %v1918_v6 }
 0x2e5   :  { %8412 = vmatprep.mubr.msk.f32.mxu0 %vm840_vm0, %v2485_v56  ;;  %1989 = vrot.lane.b32.xlu0 %v11239_v12, %s8882_s20  ;;  %2139 = vst.msk [vmem:[#allocation4 + $0x128] sm:$0xff] %vm840_vm0, %v1920_v30  ;;  %v1923_v9 = vld [vmem:[#allocation3 + $0x130] sm:$0xff]  ;;  %v1932_v50 = vld [vmem:[#allocation3 + $0x1c0] sm:$0xff]  ;;  %v1852_v26 = vld [vmem:[#allocation2 + $0x78] sm:$0x1] }
 0x2e6   :  { %v2510_v15 = vld [vmem:[#allocation4 + $0x228] sm:$0xff]  ;;  %2088 = vrot.lane.b32.xlu1 %v1926_v27, %s8882_s20  ;;  %v1925_v46 = vld [vmem:[#allocation3 + $0x150] sm:$0xff]  ;;  %2140 = vst.msk [vmem:[#allocation4 + $0x150] sm:$0xff] %vm840_vm0, %v1923_v9  ;;  %v1936_v31 = vld [vmem:[#allocation3 + $0x200] sm:$0xff] }
 0x2e7   :  { %v2515_v32 = vld [vmem:[#allocation4 + $0x250] sm:$0xff]  ;;  %v2520_v28 = vld [vmem:[#allocation4 + $0x278] sm:$0xff]  ;;  %2141 = vst.msk [vmem:[#allocation4 + $0x178] sm:$0xff] %vm840_vm0, %v1925_v46  ;;  %v2319_v46 = vrot.slane %v11212_v2, 1 }
 0x2e8   :  { %8413 = vmatmul.mubr.msk.f32.gmra.mxu0 %vm840_vm0, %v2490_v36  ;;  %v1927_v51 = vld [vmem:[#allocation3 + $0x170] sm:$0xff]  ;;  %v1840_v36 = vld [vmem:[#allocation2 + $0x18] sm:$0x1] }
 0x2e9   :  { %8415 = vmatprep.mubr.msk.f32.mxu0 %vm840_vm0, %v2495_v10  ;;  %1991 = vrot.lane.b32.xlu0 %v11247_v55, %s8882_s20  ;;  %2142 = vst.msk [vmem:[#allocation4 + $0x1a0] sm:$0xff] %vm840_vm0, %v1927_v51  ;;  %v1929_v16 = vld [vmem:[#allocation3 + $0x190] sm:$0xff]  ;;  %v2304_v10 = vrot.slane %v11032_v18, 1  ;;  %v2302_v22 = vrot.slane %v1840_v36, 1  ;;  %v1848_v5 = vld [vmem:[#allocation2 + $0x58] sm:$0x1] }
 0x2ea   :  { %2090 = vrot.lane.b32.xlu1 %v1928_v24, %s8882_s20  ;;  %v1931_v4 = vld [vmem:[#allocation3 + $0x1b0] sm:$0xff]  ;;  %2143 = vst.msk [vmem:[#allocation4 + $0x1c8] sm:$0xff] %vm840_vm0, %v1929_v16  ;;  %v2307_v18 = vrot.slane %v11109_v1, 1  ;;  %v1860_v13 = vld [vmem:[#allocation2 + $0xb8] sm:$0x1]  ;;  %v2316_v24 = vrot.slane %v11198_v21, 1 }
 0x2eb   :  { %v1933_v29 = vld [vmem:[#allocation3 + $0x1d0] sm:$0xff]  ;;  %2144 = vst.msk [vmem:[#allocation4 + $0x1f0] sm:$0xff] %vm840_vm0, %v1931_v4  ;;  %v2317_v39 = vrot.slane %v1860_v13, 1  ;;  %v1864_v30 = vld [vmem:[#allocation2 + $0xd8] sm:$0x1]  ;;  %v2325_v4 = vrot.slane %v11230_v62, 1 }
 0x2ec   :  { %8416 = vmatmul.mubr.msk.f32.gmra.mxu0 %vm840_vm0, %v2500_v58  ;;  %2145 = vst.msk [vmem:[#allocation4 + $0x218] sm:$0xff] %vm840_vm0, %v1933_v29  ;;  %v1935_v43 = vld [vmem:[#allocation3 + $0x1f0] sm:$0xff]  ;;  %v2305_v58 = vrot.slane %v1844_v17, 1  ;;  %v2320_v21 = vrot.slane %v1864_v30, 1  ;;  %v1874_v16 = vld [vmem:[#allocation2 + $0x138] sm:$0x1] }
 0x2ed   :  { %8418 = vmatprep.mubr.msk.f32.mxu0 %vm840_vm0, %v2505_v49  ;;  %1993 = vrot.lane.b32.xlu0 %v11256_v7, %s8882_s20  ;;  %2146 = vst.msk [vmem:[#allocation4 + $0x240] sm:$0xff] %vm840_vm0, %v1935_v43  ;;  %v1937_v20 = vld [vmem:[#allocation3 + $0x210] sm:$0xff]  ;;  %v2301_v49 = vrot.slane %v11034_v57, 1  ;;  %v2308_v57 = vrot.slane %v1848_v5, 1  ;;  %v2318_v9 = vsel %vm2204_vm6, %v2316_v24, %v2317_v39  ;;  %v1921_v29 = vld [vmem:[#allocation3 + $0x100] sm:$0xff]  ;;  %v2326_v43 = vrot.slane %v1874_v16, 1 }
 0x2ee   :  { %2147 = vst.msk [vmem:[#allocation4 + $0x268] sm:$0xff] %vm840_vm0, %v1937_v20  ;;  %v11276_v37 = vld [vmem:[#allocation2 + $0x1b0] sm:$0xff]  ;;  %2092 = vrot.lane.b32.xlu1 %v1930_v25, %s8882_s20  ;;  %v2306_v52 = vsel %vm2204_vm6, %v2304_v10, %v2305_v58  ;;  %v2322_v20 = vrot.slane %v11222_v23, 1  ;;  %v2321_v25 = vsel %vm2204_vm6, %v2319_v46, %v2320_v21  ;;  %v2331_v17 = vrot.slane %v11247_v55, 1  ;;  %v1890_v58 = vld [vmem:[#allocation2 + $0x1b8] sm:$0x1] }
 0x2ef   :  { %v11281_v56 = vld [vmem:[#allocation2 + $0x1d0] sm:$0xff]  ;;  %v2303_v27 = vsel %vm2204_vm6, %v2301_v49, %v2302_v22  ;;  %v2309_v6 = vsel %vm2204_vm6, %v2307_v18, %v2308_v57  ;;  %v2327_v36 = vsel %vm2204_vm6, %v2325_v4, %v2326_v43  ;;  %v2328_v62 = vrot.slane %v11239_v12, 1  ;;  %v1886_v49 = vld [vmem:[#allocation2 + $0x198] sm:$0x1] }
 0x2f0   :  { %8419 = vmatmul.mubr.msk.f32.gmra.mxu0 %vm840_vm0, %v2510_v15  ;;  %v11286_v40 = vld [vmem:[#allocation2 + $0x1f0] sm:$0xff]  ;;  %v2310_v15 = vrot.slane %v11139_v42, 1  ;;  %v2313_v42 = vrot.slane %v11172_v14, 1  ;;  %v1868_v14 = vld [vmem:[#allocation2 + $0xf8] sm:$0x1]  ;;  %v2337_v22 = vrot.slane %v11276_v37, 1 }
 0x2f1   :  { %8421 = vmatprep.mubr.msk.f32.mxu0 %vm840_vm0, %v2515_v32  ;;  %1995 = vrot.lane.b32.xlu0 %v11276_v37, %s8882_s20  ;;  %v11293_v60 = vld [vmem:[#allocation2 + $0x210] sm:$0xff]  ;;  %v2311_v32 = vrot.slane %v1852_v26, 1  ;;  %v2323_v2 = vrot.slane %v1868_v14, 1  ;;  %v2338_v5 = vrot.slane %v1890_v58, 1  ;;  %v2334_v55 = vrot.slane %v11256_v7, 1 }
 0x2f2   :  { %2094 = vrot.lane.b32.xlu1 %v1932_v50, %s8882_s20  ;;  %v1882_v50 = vld [vmem:[#allocation2 + $0x178] sm:$0x1]  ;;  %v2335_v12 = vrot.slane %v1886_v49, 1  ;;  %v2343_v18 = vrot.slane %v11286_v40, 1  ;;  %v2340_v37 = vrot.slane %v11281_v56, 1  ;;  %v2346_v24 = vrot.slane %v11293_v60, 1 }
 0x2f3   :  { %v2312_v47 = vsel %vm2204_vm6, %v2310_v15, %v2311_v32  ;;  %v2332_v10 = vrot.slane %v1882_v50, 1  ;;  %v1894_v32 = vld [vmem:[#allocation2 + $0x1d8] sm:$0x1]  ;;  %v2583_v14 = vld [vmem:[%s13014_s7 + $0x1f0] sm:$0xff]  ;;  %v2578_v49 = vld [vmem:[%s13014_s7 + $0x1c8] sm:$0xff] }
 0x2f4   :  { %8422 = vmatmul.mubr.msk.f32.gmra.mxu0 %vm840_vm0, %v2520_v28  ;;  %v1856_v28 = vld [vmem:[#allocation2 + $0x98] sm:$0x1]  ;;  %v2336_v13 = vsel %vm2204_vm6, %v2334_v55, %v2335_v12  ;;  %v2341_v7 = vrot.slane %v1894_v32, 1  ;;  %v2567_v4 = vld [vmem:[%s13014_s7 + $0x170] sm:$0xff]  ;;  %v2561_v12 = vld [vmem:[%s13014_s7 + $0x140] sm:$0xff] }
 0x2f5   :  { %8456 = vmatprep.mubr.msk.f32.mxu0 %vm8880_vm4, %v13286_v59  ;;  %1997 = vrot.lane.b32.xlu0 %v11281_v56, %s8882_s20  ;;  %v2314_v1 = vrot.slane %v1856_v28, 1  ;;  %v2333_v26 = vsel %vm2204_vm6, %v2331_v17, %v2332_v10  ;;  %v1902_v28 = vld [vmem:[#allocation2 + $0x218] sm:$0x1]  ;;  %v2563_v58 = vld [vmem:[%s13014_s7 + $0x150] sm:$0xff] }
 0x2f6   :  { %2096 = vrot.lane.b32.xlu1 %v1934_v11, %s8882_s20  ;;  %v1878_v11 = vld [vmem:[#allocation2 + $0x158] sm:$0x1]  ;;  %v2347_v39 = vrot.slane %v1902_v28, 1 }
 0x2f7   :  { %v2315_v51 = vsel %vm2204_vm6, %v2313_v42, %v2314_v1  ;;  %v2329_v23 = vrot.slane %v1878_v11, 1  ;;  %v1938_v42 = vld [vmem:[#allocation3 + $0x220] sm:$0xff]  ;;  %v2580_v17 = vld [vmem:[%s13014_s7 + $0x1d8] sm:$0xff] }
 0x2f8   :  { %v2348_v56 = vsel %vm2204_vm6, %v2346_v24, %v2347_v39  ;;  %v2565_v11 = vld [vmem:[%s13014_s7 + $0x160] sm:$0xff]  ;;  %v2564_v10 = vld [vmem:[%s13014_s7 + $0x158] sm:$0xff]  ;;  %v2558_v24 = vld [vmem:[%s13014_s7 + $0x128] sm:$0xff] }
 0x2f9   :  { %1999 = vrot.lane.b32.xlu0 %v11286_v40, %s8882_s20  ;;  %v2330_v15 = vsel %vm2204_vm6, %v2328_v62, %v2329_v23  ;;  %v2342_v40 = vsel %vm2204_vm6, %v2340_v37, %v2341_v7  ;;  %v2574_v7 = vld [vmem:[%s13014_s7 + $0x1a8] sm:$0xff] }
 0x2fa   :  { %2098 = vrot.lane.b32.xlu1 %v1936_v31, %s8882_s20  ;;  %v2324_v31 = vsel %vm2204_vm6, %v2322_v20, %v2323_v2  ;;  %v2566_v20 = vld [vmem:[%s13014_s7 + $0x168] sm:$0xff] }
 0x2fd   :  { %2001 = vrot.lane.b32.xlu0 %v11293_v60, %s8882_s20 }
 0x2fe   :  { %2351 = vrot.lane.b32.xlu1 %v2306_v52, %s8882_s20  ;;  %v1898_v52 = vld [vmem:[#allocation2 + $0x1f8] sm:$0x1] }
 0x2ff   :  { %v2344_v57 = vrot.slane %v1898_v52, 1  ;;  %v2576_v52 = vld [vmem:[%s13014_s7 + $0x1b8] sm:$0xff] }
 0x301   :  { %2349 = vrot.lane.b32.xlu0 %v2303_v27, %s8882_s20  ;;  %v2339_v27 = vsel %vm2204_vm6, %v2337_v22, %v2338_v5 }
 0x302   :  { %2355 = vrot.lane.b32.xlu1 %v2312_v47, %s8882_s20  ;;  %v2345_v47 = vsel %vm2204_vm6, %v2343_v18, %v2344_v57  ;;  %v2560_v18 = vld [vmem:[%s13014_s7 + $0x138] sm:$0xff] }
 0x305   :  { %2353 = vrot.lane.b32.xlu0 %v2309_v6, %s8882_s20 }
 0x306   :  { %2359 = vrot.lane.b32.xlu1 %v2318_v9, %s8882_s20 }
 0x309   :  { %2357 = vrot.lane.b32.xlu0 %v2315_v51, %s8882_s20  ;;  %v2568_v51 = vld [vmem:[%s13014_s7 + $0x178] sm:$0xff] }
 0x30a   :  { %2150 = vrot.lane.b32.xlu1 %v1921_v29, %s8882_s20  ;;  %v2582_v29 = vld [vmem:[%s13014_s7 + $0x1e8] sm:$0xff] }
 0x30d   :  { %2361 = vrot.lane.b32.xlu0 %v2321_v25, %s8882_s20 }
 0x30e   :  { %2365 = vrot.lane.b32.xlu1 %v2327_v36, %s8882_s20 }
 0x311   :  { %2363 = vrot.lane.b32.xlu0 %v2324_v31, %s8882_s20 }
 0x312   :  { %2369 = vrot.lane.b32.xlu1 %v2333_v26, %s8882_s20  ;;  %v2562_v26 = vld [vmem:[%s13014_s7 + $0x148] sm:$0xff] }
 0x315   :  { %2367 = vrot.lane.b32.xlu0 %v2330_v15, %s8882_s20 }
 0x316   :  { %2373 = vrot.lane.b32.xlu1 %v2339_v27, %s8882_s20 }
 0x319   :  { %2371 = vrot.lane.b32.xlu0 %v2336_v13, %s8882_s20  ;;  %v2559_v13 = vld [vmem:[%s13014_s7 + $0x130] sm:$0xff] }
 0x31a   :  { %2377 = vrot.lane.b32.xlu1 %v2345_v47, %s8882_s20 }
 0x31d   :  { %2375 = vrot.lane.b32.xlu0 %v2342_v40, %s8882_s20 }
 0x31e   :  { %2379 = vrot.lane.b32.xlu1 %v2348_v56, %s8882_s20  ;;  %v2557_v56 = vld [vmem:[%s13014_s7 + $0x120] sm:$0xff] }
 0x321   :  { %2152 = vrot.lane.b32.xlu0 %v1938_v42, %s8882_s20  ;;  %v2572_v42 = vld [vmem:[%s13014_s7 + $0x198] sm:$0xff] }
 0x32a   :  { %v1972_v60 = vpop.permute.xlu0 %1971 }
 0x32b   :  { %v1974_v6 = vpop.permute.xlu1 %1973  ;;  %2020 = vst.msk [vmem:[#allocation4 + $0x8] sm:$0xff] %vm2019_vm7, %v1972_v60  ;;  %v2556_v60 = vld [vmem:[%s13014_s7 + $0x118] sm:$0xff] }
 0x32c   :  { %2021 = vst.msk [vmem:[#allocation4 + $0x30] sm:$0xff] %vm2019_vm7, %v1974_v6 }
 0x32d   :  { %2270 = vst.msk [vmem:[#allocation4 + $0x30] sm:$0xff] %vm840_vm0, %v11086_v38  ;;  %2269 = vst.msk [vmem:[#allocation4 + $0x8] sm:$0xff] %vm840_vm0, %v11205_v34 }
 0x32e   :  { %v2069_v30 = vpop.permute.xlu0 %2068 }
 0x32f   :  { %v2071_v1 = vpop.permute.xlu1 %2070  ;;  %2116 = vst.msk [vmem:[#allocation4] sm:$0xff] %vm2019_vm7, %v2069_v30 }
 0x330   :  { %2117 = vst.msk [vmem:[#allocation4 + $0x28] sm:$0xff] %vm2019_vm7, %v2071_v1  ;;  %2156 = vst.msk [vmem:[#allocation4 + $0x18] sm:$0xff] %vm2019_vm7, %v2071_v1 }
 0x334   :  { %v2073_v9 = vpop.permute.xlu1 %2072  ;;  %v2442_v38 = vld [vmem:[#allocation4 + $0x8] sm:$0xff] }
 0x335   :  { %v1976_v46 = vpop.permute.xlu0 %1975  ;;  %2118 = vst.msk [vmem:[#allocation4 + $0x50] sm:$0xff] %vm2019_vm7, %v2073_v9  ;;  %2157 = vst.msk [vmem:[#allocation4 + $0x40] sm:$0xff] %vm2019_vm7, %v2073_v9  ;;  %2712 = vmatprep.mubr.f32.mxu1 %v2442_v38  ;;  %v2570_v38 = vld [vmem:[%s13014_s7 + $0x188] sm:$0xff] }
 0x336   :  { %2022 = vst.msk [vmem:[#allocation4 + $0x58] sm:$0xff] %vm2019_vm7, %v1976_v46  ;;  %v2441_v16 = vld [vmem:[#allocation4] sm:$0xff]  ;;  %v2555_v46 = vld [vmem:[%s13014_s7 + $0x110] sm:$0xff] }
 0x337   :  { %2271 = vst.msk [vmem:[#allocation4 + $0x58] sm:$0xff] %vm840_vm0, %v11089_v48  ;;  %2713 = vmatmul.mubr.f32.vlgmr.msra.gmra.mxu1 %v2441_v16  ;;  %v2447_v48 = vld [vmem:[#allocation4 + $0x30] sm:$0xff]  ;;  %v2446_v2 = vld [vmem:[#allocation4 + $0x28] sm:$0xff] }
 0x338   :  { %v2075_v34 = vpop.permute.xlu1 %2074  ;;  %7331 = vmatpush3.msra.mxu1 %v2568_v51  ;;  %2717 = vmatprep.mubr.f32.mxu1 %v2447_v48  ;;  %v2554_v51 = vld [vmem:[%s13014_s7 + $0x108] sm:$0xff]  ;;  %v2553_v48 = vld [vmem:[%s13014_s7 + $0x100] sm:$0xff] }
 0x339   :  { %2119 = vst.msk [vmem:[#allocation4 + $0x78] sm:$0xff] %vm2019_vm7, %v2075_v34  ;;  %2158 = vst.msk [vmem:[#allocation4 + $0x68] sm:$0xff] %vm2019_vm7, %v2075_v34  ;;  %7332 = vmatprep.subr.mxu1 %v2583_v14 }
 0x33a   :  { %v1978_v21 = vpop.permute.xlu0 %1977  ;;  %7333 = vmatpush3.msra.mxu1 %v2567_v4 }
 0x33b   :  { %2023 = vst.msk [vmem:[#allocation4 + $0x80] sm:$0xff] %vm2019_vm7, %v1978_v21  ;;  %2718 = vmatmul.mubr.f32.gmra.mxu1 %v2446_v2  ;;  %7334 = vmatprep.subr.mxu1 %v2582_v29 }
 0x33c   :  { %2272 = vst.msk [vmem:[#allocation4 + $0x80] sm:$0xff] %vm840_vm0, %v11098_v63  ;;  %v2077_v43 = vpop.permute.xlu1 %2076  ;;  %v2581_v63 = vld [vmem:[%s13014_s7 + $0x1e0] sm:$0xff]  ;;  %7335 = vmatpush3.msra.mxu1 %v2566_v20  ;;  %v2451_v31 = vld [vmem:[#allocation4 + $0x50] sm:$0xff] }
 0x33d   :  { %2120 = vst.msk [vmem:[#allocation4 + $0xa0] sm:$0xff] %vm2019_vm7, %v2077_v43  ;;  %2159 = vst.msk [vmem:[#allocation4 + $0x90] sm:$0xff] %vm2019_vm7, %v2077_v43  ;;  %7336 = vmatprep.subr.mxu1 %v2581_v63 }
 0x33e   :  { %v1980_v25 = vpop.permute.xlu0 %1979  ;;  %v2452_v50 = vld [vmem:[#allocation4 + $0x58] sm:$0xff]  ;;  %7337 = vmatpush3.msra.mxu1 %v2565_v11 }
 0x33f   :  { %2024 = vst.msk [vmem:[#allocation4 + $0xa8] sm:$0xff] %vm2019_vm7, %v1980_v25  ;;  %2722 = vmatprep.mubr.f32.mxu1 %v2452_v50  ;;  %7338 = vmatprep.subr.mxu1 %v2580_v17 }
 0x340   :  { %2273 = vst.msk [vmem:[#allocation4 + $0xa8] sm:$0xff] %vm840_vm0, %v11105_v35  ;;  %v2079_v36 = vpop.permute.xlu1 %2078  ;;  %v2579_v35 = vld [vmem:[%s13014_s7 + $0x1d0] sm:$0xff]  ;;  %2723 = vmatmul.mubr.f32.gmra.mxu1 %v2451_v31  ;;  %v2456_v55 = vld [vmem:[#allocation4 + $0x78] sm:$0xff] }
 0x341   :  { %2121 = vst.msk [vmem:[#allocation4 + $0xc8] sm:$0xff] %vm2019_vm7, %v2079_v36  ;;  %2160 = vst.msk [vmem:[#allocation4 + $0xb8] sm:$0xff] %vm2019_vm7, %v2079_v36  ;;  %7339 = vmatpush3.msra.mxu1 %v2564_v10 }
 0x342   :  { %7340 = vmatprep.subr.mxu1 %v2579_v35 }
 0x343   :  { %v2457_v23 = vld [vmem:[#allocation4 + $0x80] sm:$0xff]  ;;  %7341 = vmatpush3.msra.mxu1 %v2563_v58 }
 0x344   :  { %2727 = vmatprep.mubr.f32.mxu1 %v2457_v23  ;;  %v2081_v22 = vpop.permute.xlu1 %2080  ;;  %7342 = vmatprep.subr.mxu1 %v2578_v49  ;;  %v2461_v57 = vld [vmem:[#allocation4 + $0xa0] sm:$0xff] }
 0x345   :  { %2122 = vst.msk [vmem:[#allocation4 + $0xf0] sm:$0xff] %vm2019_vm7, %v2081_v22  ;;  %2161 = vst.msk [vmem:[#allocation4 + $0xe0] sm:$0xff] %vm2019_vm7, %v2081_v22  ;;  %2728 = vmatmul.mubr.f32.gmra.mxu1 %v2456_v55 }
 0x346   :  { %7343 = vmatpush3.msra.mxu1 %v2562_v26 }
 0x347   :  { %v1982_v62 = vpop.permute.xlu0 %1981  ;;  %v2462_v15 = vld [vmem:[#allocation4 + $0xa8] sm:$0xff] }
 0x348   :  { %2025 = vst.msk [vmem:[#allocation4 + $0xd0] sm:$0xff] %vm2019_vm7, %v1982_v62  ;;  %2732 = vmatprep.mubr.f32.mxu1 %v2462_v15  ;;  %v2466_v39 = vld [vmem:[#allocation4 + $0xc8] sm:$0xff] }
 0x349   :  { %2274 = vst.msk [vmem:[#allocation4 + $0xd0] sm:$0xff] %vm840_vm0, %v11115_v0  ;;  %v2577_v0 = vld [vmem:[%s13014_s7 + $0x1c0] sm:$0xff]  ;;  %2733 = vmatmul.mubr.f32.gmra.mxu1 %v2461_v57 }
 0x34a   :  { %7344 = vmatprep.subr.mxu1 %v2577_v0  ;;  %v2449_v57 = vld [vmem:[#allocation4 + $0x40] sm:$0xff] }
 0x34b   :  { %v1984_v5 = vpop.permute.xlu0 %1983  ;;  %7345 = vmatpush3.msra.mxu1 %v2561_v12 }
 0x34c   :  { %2026 = vst.msk [vmem:[#allocation4 + $0xf8] sm:$0xff] %vm2019_vm7, %v1984_v5  ;;  %v2083_v32 = vpop.permute.xlu1 %2082  ;;  %7346 = vmatprep.subr.mxu1 %v2576_v52  ;;  %v2471_v30 = vld [vmem:[#allocation4 + $0xf0] sm:$0xff]  ;;  %v2444_v52 = vld [vmem:[#allocation4 + $0x18] sm:$0xff] }
 0x34d   :  { %2275 = vst.msk [vmem:[#allocation4 + $0xf8] sm:$0xff] %vm840_vm0, %v11123_v19  ;;  %v2575_v19 = vld [vmem:[%s13014_s7 + $0x1b0] sm:$0xff]  ;;  %7347 = vmatpush3.msra.mxu1 %v2560_v18 }
 0x34e   :  { %2123 = vst.msk [vmem:[#allocation4 + $0x118] sm:$0xff] %vm2019_vm7, %v2083_v32  ;;  %2162 = vst.msk [vmem:[#allocation4 + $0x108] sm:$0xff] %vm2019_vm7, %v2083_v32  ;;  %7348 = vmatprep.subr.mxu1 %v2575_v19 }
 0x34f   :  { %v1986_v27 = vpop.permute.xlu0 %1985  ;;  %7349 = vmatpush3.msra.mxu1 %v2559_v13 }
 0x350   :  { %2027 = vst.msk [vmem:[#allocation4 + $0x120] sm:$0xff] %vm2019_vm7, %v1986_v27  ;;  %v2467_v37 = vld [vmem:[#allocation4 + $0xd0] sm:$0xff]  ;;  %v2085_v28 = vpop.permute.xlu1 %2084  ;;  %7350 = vmatprep.subr.mxu1 %v2574_v7  ;;  %v2454_v7 = vld [vmem:[#allocation4 + $0x68] sm:$0xff] }
 0x351   :  { %2276 = vst.msk [vmem:[#allocation4 + $0x120] sm:$0xff] %vm840_vm0, %v11130_v45  ;;  %2737 = vmatprep.mubr.f32.mxu1 %v2467_v37  ;;  %v2573_v45 = vld [vmem:[%s13014_s7 + $0x1a0] sm:$0xff]  ;;  %7351 = vmatpush3.msra.mxu1 %v2558_v24 }
 0x352   :  { %2124 = vst.msk [vmem:[#allocation4 + $0x140] sm:$0xff] %vm2019_vm7, %v2085_v28  ;;  %2738 = vmatmul.mubr.f32.gmra.mxu1 %v2466_v39  ;;  %7352 = vmatprep.subr.mxu1 %v2573_v45  ;;  %v2459_v39 = vld [vmem:[#allocation4 + $0x90] sm:$0xff] }
 0x353   :  { %v1988_v47 = vpop.permute.xlu0 %1987  ;;  %7353 = vmatpush3.msra.mxu1 %v2557_v56 }
 0x354   :  { %2028 = vst.msk [vmem:[#allocation4 + $0x148] sm:$0xff] %vm2019_vm7, %v1988_v47  ;;  %v2472_v40 = vld [vmem:[#allocation4 + $0xf8] sm:$0xff]  ;;  %v2087_v6 = vpop.permute.xlu1 %2086  ;;  %7354 = vmatprep.subr.mxu1 %v2572_v42 }
 0x355   :  { %2277 = vst.msk [vmem:[#allocation4 + $0x148] sm:$0xff] %vm840_vm0, %v11251_v53  ;;  %2742 = vmatprep.mubr.f32.mxu1 %v2472_v40  ;;  %v2571_v53 = vld [vmem:[%s13014_s7 + $0x190] sm:$0xff]  ;;  %7355 = vmatpush3.msra.mxu1 %v2556_v60  ;;  %v2476_v16 = vld [vmem:[#allocation4 + $0x118] sm:$0xff] }
 0x356   :  { %2125 = vst.msk [vmem:[#allocation4 + $0x168] sm:$0xff] %vm2019_vm7, %v2087_v6  ;;  %2164 = vst.msk [vmem:[#allocation4 + $0x158] sm:$0xff] %vm2019_vm7, %v2087_v6  ;;  %2743 = vmatmul.mubr.f32.gmra.mxu1 %v2471_v30  ;;  %7356 = vmatprep.subr.mxu1 %v2571_v53  ;;  %v2464_v42 = vld [vmem:[#allocation4 + $0xb8] sm:$0xff]  ;;  %v2469_v30 = vld [vmem:[#allocation4 + $0xe0] sm:$0xff] }
 0x357   :  { %v1990_v1 = vpop.permute.xlu0 %1989  ;;  %7357 = vmatpush3.msra.mxu1 %v2555_v46 }
 0x358   :  { %2029 = vst.msk [vmem:[#allocation4 + $0x170] sm:$0xff] %vm2019_vm7, %v1990_v1  ;;  %v2477_v9 = vld [vmem:[#allocation4 + $0x120] sm:$0xff]  ;;  %v2089_v34 = vpop.permute.xlu1 %2088  ;;  %7358 = vmatprep.subr.mxu1 %v2570_v38  ;;  %v2474_v38 = vld [vmem:[#allocation4 + $0x108] sm:$0xff] }
 0x359   :  { %2278 = vst.msk [vmem:[#allocation4 + $0x170] sm:$0xff] %vm840_vm0, %v11144_v41  ;;  %2747 = vmatprep.mubr.f32.mxu1 %v2477_v9  ;;  %v2569_v41 = vld [vmem:[%s13014_s7 + $0x180] sm:$0xff]  ;;  %7359 = vmatpush3.msra.mxu1 %v2554_v51 }
 0x35a   :  { %2126 = vst.msk [vmem:[#allocation4 + $0x190] sm:$0xff] %vm2019_vm7, %v2089_v34  ;;  %2165 = vst.msk [vmem:[#allocation4 + $0x180] sm:$0xff] %vm2019_vm7, %v2089_v34  ;;  %2748 = vmatmul.mubr.f32.gmra.mxu1 %v2476_v16  ;;  %v2481_v4 = vld [vmem:[#allocation4 + $0x140] sm:$0xff]  ;;  %7360 = vmatprep.subr.mxu1 %v2569_v41 }
 0x35b   :  { %v1992_v21 = vpop.permute.xlu0 %1991  ;;  %7361 = vmatpush3.msra.mxu1 %v2553_v48 }
 0x35c   :  { %2030 = vst.msk [vmem:[#allocation4 + $0x198] sm:$0xff] %vm2019_vm7, %v1992_v21  ;;  %v2482_v14 = vld [vmem:[#allocation4 + $0x148] sm:$0xff]  ;;  %v2091_v29 = vpop.permute.xlu1 %2090  ;;  %8459 = vmatprep.subr.mxu1 %v13286_v59 }
 0x35d   :  { %2279 = vst.msk [vmem:[#allocation4 + $0x198] sm:$0xff] %vm840_vm0, %v11153_v3  ;;  %2752 = vmatprep.mubr.f32.mxu1 %v2482_v14  ;;  %v2486_v2 = vld [vmem:[#allocation4 + $0x168] sm:$0xff]  ;;  %v2484_v16 = vld [vmem:[#allocation4 + $0x158] sm:$0xff] }
 0x35e   :  { %2127 = vst.msk [vmem:[#allocation4 + $0x1b8] sm:$0xff] %vm2019_vm7, %v2091_v29  ;;  %2166 = vst.msk [vmem:[#allocation4 + $0x1a8] sm:$0xff] %vm2019_vm7, %v2091_v29  ;;  %2753 = vmatmul.mubr.f32.gmra.mxu1 %v2481_v4 }
 0x35f   :  { %v1994_v43 = vpop.permute.xlu0 %1993 }
 0x360   :  { %2031 = vst.msk [vmem:[#allocation4 + $0x1c0] sm:$0xff] %vm2019_vm7, %v1994_v43  ;;  %v2487_v20 = vld [vmem:[#allocation4 + $0x170] sm:$0xff]  ;;  %v2093_v3 = vpop.permute.xlu1 %2092 }
 0x361   :  { %2280 = vst.msk [vmem:[#allocation4 + $0x1c0] sm:$0xff] %vm840_vm0, %v11161_v61  ;;  %2757 = vmatprep.mubr.f32.mxu1 %v2487_v20  ;;  %v2491_v61 = vld [vmem:[#allocation4 + $0x190] sm:$0xff]  ;;  %v2489_v14 = vld [vmem:[#allocation4 + $0x180] sm:$0xff] }
 0x362   :  { %2128 = vst.msk [vmem:[#allocation4 + $0x1e0] sm:$0xff] %vm2019_vm7, %v2093_v3  ;;  %2167 = vst.msk [vmem:[#allocation4 + $0x1d0] sm:$0xff] %vm2019_vm7, %v2093_v3  ;;  %2758 = vmatmul.mubr.f32.gmra.mxu1 %v2486_v2 }
 0x363   :  { %v1996_v25 = vpop.permute.xlu0 %1995 }
 0x364   :  { %2032 = vst.msk [vmem:[#allocation4 + $0x1e8] sm:$0xff] %vm2019_vm7, %v1996_v25  ;;  %v2492_v63 = vld [vmem:[#allocation4 + $0x198] sm:$0xff]  ;;  %v2095_v50 = vpop.permute.xlu1 %2094 }
 0x365   :  { %2281 = vst.msk [vmem:[#allocation4 + $0x1e8] sm:$0xff] %vm840_vm0, %v11167_v33  ;;  %2762 = vmatprep.mubr.f32.mxu1 %v2492_v63  ;;  %v2496_v33 = vld [vmem:[#allocation4 + $0x1b8] sm:$0xff]  ;;  %v2494_v4 = vld [vmem:[#allocation4 + $0x1a8] sm:$0xff] }
 0x366   :  { %2129 = vst.msk [vmem:[#allocation4 + $0x208] sm:$0xff] %vm2019_vm7, %v2095_v50  ;;  %2168 = vst.msk [vmem:[#allocation4 + $0x1f8] sm:$0xff] %vm2019_vm7, %v2095_v50  ;;  %2763 = vmatmul.mubr.f32.gmra.mxu1 %v2491_v61 }
 0x367   :  { %v1998_v11 = vpop.permute.xlu0 %1997 }
 0x368   :  { %2033 = vst.msk [vmem:[#allocation4 + $0x210] sm:$0xff] %vm2019_vm7, %v1998_v11  ;;  %v2497_v17 = vld [vmem:[#allocation4 + $0x1c0] sm:$0xff]  ;;  %v2097_v36 = vpop.permute.xlu1 %2096 }
 0x369   :  { %2282 = vst.msk [vmem:[#allocation4 + $0x210] sm:$0xff] %vm840_vm0, %v11178_v54  ;;  %2767 = vmatprep.mubr.f32.mxu1 %v2497_v17  ;;  %v2501_v54 = vld [vmem:[#allocation4 + $0x1e0] sm:$0xff]  ;;  %v2499_v43 = vld [vmem:[#allocation4 + $0x1d0] sm:$0xff] }
 0x36a   :  { %2130 = vst.msk [vmem:[#allocation4 + $0x230] sm:$0xff] %vm2019_vm7, %v2097_v36  ;;  %2169 = vst.msk [vmem:[#allocation4 + $0x220] sm:$0xff] %vm2019_vm7, %v2097_v36  ;;  %2768 = vmatmul.mubr.f32.gmra.mxu1 %v2496_v33  ;;  %v3182_v36 = vld [vmem:[#allocation7 + $0x78] sm:$0xff]  ;;  %v3180_v33 = vld [vmem:[#allocation7 + $0x68] sm:$0xff] }
 0x36b   :  { %v2000_v10 = vpop.permute.xlu0 %1999  ;;  %8425 = vmatpush3.msra.mxu0 %v3182_v36 }
 0x36c   :  { %2034 = vst.msk [vmem:[#allocation4 + $0x238] sm:$0xff] %vm2019_vm7, %v2000_v10  ;;  %v2502_v62 = vld [vmem:[#allocation4 + $0x1e8] sm:$0xff]  ;;  %v2099_v31 = vpop.permute.xlu1 %2098  ;;  %8426 = vmatprep.subr.mxu0 %v13286_v59  ;;  %v3181_v10 = vld [vmem:[#allocation7 + $0x70] sm:$0xff] }
 0x36d   :  { %2283 = vst.msk [vmem:[#allocation4 + $0x238] sm:$0xff] %vm840_vm0, %v11186_v44  ;;  %2772 = vmatprep.mubr.f32.mxu1 %v2502_v62  ;;  %v2506_v44 = vld [vmem:[#allocation4 + $0x208] sm:$0xff]  ;;  %v2504_v3 = vld [vmem:[#allocation4 + $0x1f8] sm:$0xff]  ;;  %8427 = vmatpush3.msra.mxu0 %v3181_v10  ;;  %v3179_v62 = vld [vmem:[#allocation7 + $0x60] sm:$0xff] }
 0x36e   :  { %2131 = vst.msk [vmem:[#allocation4 + $0x258] sm:$0xff] %vm2019_vm7, %v2099_v31  ;;  %2170 = vst.msk [vmem:[#allocation4 + $0x248] sm:$0xff] %vm2019_vm7, %v2099_v31  ;;  %2773 = vmatmul.mubr.f32.gmra.mxu1 %v2501_v54  ;;  %8428 = vmatprep.subr.mxu0 %v13286_v59  ;;  %v3178_v31 = vld [vmem:[#allocation7 + $0x58] sm:$0xff]  ;;  %v3176_v54 = vld [vmem:[#allocation7 + $0x48] sm:$0xff] }
 0x36f   :  { %v2002_v35 = vpop.permute.xlu0 %2001  ;;  %8429 = vmatpush3.msra.mxu0 %v3180_v33 }
 0x370   :  { %2035 = vst.msk [vmem:[#allocation4 + $0x260] sm:$0xff] %vm2019_vm7, %v2002_v35  ;;  %v2507_v23 = vld [vmem:[#allocation4 + $0x210] sm:$0xff]  ;;  %v2352_v58 = vpop.permute.xlu1 %2351  ;;  %8430 = vmatprep.subr.mxu0 %v13286_v59 }
 0x371   :  { %2284 = vst.msk [vmem:[#allocation4 + $0x260] sm:$0xff] %vm840_vm0, %v11195_v8  ;;  %2777 = vmatprep.mubr.f32.mxu1 %v2507_v23  ;;  %v2511_v55 = vld [vmem:[#allocation4 + $0x230] sm:$0xff]  ;;  %v2509_v2 = vld [vmem:[#allocation4 + $0x220] sm:$0xff]  ;;  %8431 = vmatpush3.msra.mxu0 %v3179_v62 }
 0x372   :  { %2398 = vst.msk [vmem:[#allocation4 + $0x38] sm:$0xff] %vm2019_vm7, %v2352_v58  ;;  %2778 = vmatmul.mubr.f32.gmra.mxu1 %v2506_v44  ;;  %8432 = vmatprep.subr.mxu0 %v13286_v59  ;;  %v3177_v35 = vld [vmem:[#allocation7 + $0x50] sm:$0xff]  ;;  %v3175_v23 = vld [vmem:[#allocation7 + $0x40] sm:$0xff] }
 0x373   :  { %v2350_v49 = vpop.permute.xlu0 %2349  ;;  %8433 = vmatpush3.msra.mxu0 %v3178_v31 }
 0x374   :  { %2397 = vst.msk [vmem:[#allocation4 + $0x10] sm:$0xff] %vm2019_vm7, %v2350_v49  ;;  %v2512_v22 = vld [vmem:[#allocation4 + $0x238] sm:$0xff]  ;;  %v2356_v26 = vpop.permute.xlu1 %2355  ;;  %8434 = vmatprep.subr.mxu0 %v13286_v59 }
 0x375   :  { %2782 = vmatprep.mubr.f32.mxu1 %v2512_v22  ;;  %2400 = vst.msk [vmem:[#allocation4 + $0x88] sm:$0xff] %vm2019_vm7, %v2356_v26  ;;  %v2516_v12 = vld [vmem:[#allocation4 + $0x258] sm:$0xff]  ;;  %v2514_v50 = vld [vmem:[#allocation4 + $0x248] sm:$0xff]  ;;  %8435 = vmatpush3.msra.mxu0 %v3177_v35  ;;  %v3173_v26 = vld [vmem:[#allocation7 + $0x30] sm:$0xff] }
 0x376   :  { %2783 = vmatmul.mubr.f32.gmra.mxu1 %v2511_v55  ;;  %8436 = vmatprep.subr.mxu0 %v13286_v59  ;;  %v3174_v49 = vld [vmem:[#allocation7 + $0x38] sm:$0xff] }
 0x377   :  { %v2354_v5 = vpop.permute.xlu0 %2353  ;;  %8437 = vmatpush3.msra.mxu0 %v3176_v54 }
 0x378   :  { %2399 = vst.msk [vmem:[#allocation4 + $0x60] sm:$0xff] %vm2019_vm7, %v2354_v5  ;;  %v2517_v8 = vld [vmem:[#allocation4 + $0x260] sm:$0xff]  ;;  %v2360_v0 = vpop.permute.xlu1 %2359  ;;  %8438 = vmatprep.subr.mxu0 %v13286_v59 }
 0x379   :  { %2787 = vmatprep.mubr.f32.mxu1 %v2517_v8  ;;  %2402 = vst.msk [vmem:[#allocation4 + $0xd8] sm:$0xff] %vm2019_vm7, %v2360_v0  ;;  %v2448_v13 = vld [vmem:[#allocation4 + $0x38] sm:$0xff]  ;;  %8439 = vmatpush3.msra.mxu0 %v3175_v23  ;;  %v3172_v0 = vld [vmem:[#allocation7 + $0x28] sm:$0xff] }
 0x37a   :  { %2788 = vmatmul.mubr.f32.gmra.mxu1 %v2516_v12  ;;  %8440 = vmatprep.subr.mxu0 %v13286_v59 }
 0x37b   :  { %v2358_v15 = vpop.permute.xlu0 %2357  ;;  %2857 = vmatprep.mubr.f32.mxu1 %v2444_v52  ;;  %v2443_v27 = vld [vmem:[#allocation4 + $0x10] sm:$0xff]  ;;  %8441 = vmatpush3.msra.mxu0 %v3174_v49  ;;  %v3170_v52 = vld [vmem:[#allocation7 + $0x18] sm:$0xff] }
 0x37c   :  { %2401 = vst.msk [vmem:[#allocation4 + $0xb0] sm:$0xff] %vm2019_vm7, %v2358_v15  ;;  %v2151_v32 = vpop.permute.xlu1 %2150  ;;  %v2458_v56 = vld [vmem:[#allocation4 + $0x88] sm:$0xff]  ;;  %8442 = vmatprep.subr.mxu0 %v13286_v59  ;;  %v3171_v15 = vld [vmem:[#allocation7 + $0x20] sm:$0xff] }
 0x37d   :  { %2163 = vst.msk [vmem:[#allocation4 + $0x130] sm:$0xff] %vm2019_vm7, %v2151_v32  ;;  %8443 = vmatpush3.msra.mxu0 %v3173_v26 }
 0x37e   :  { %2858 = vmatmul.mubr.f32.vlgmr.msra.gmra.mxu1 %v2443_v27  ;;  %8444 = vmatprep.subr.mxu0 %v13286_v59 }
 0x37f   :  { %v2362_v18 = vpop.permute.xlu0 %2361  ;;  %2862 = vmatprep.mubr.f32.mxu1 %v2449_v57  ;;  %v2453_v47 = vld [vmem:[#allocation4 + $0x60] sm:$0xff]  ;;  %8460 = vmatpush3.msra.mxu1 %v3182_v36  ;;  %v3168_v57 = vld [vmem:[#allocation7 + $0x8] sm:$0xff] }
 0x380   :  { %2403 = vst.msk [vmem:[#allocation4 + $0x100] sm:$0xff] %vm2019_vm7, %v2362_v18  ;;  %v2366_v19 = vpop.permute.xlu1 %2365  ;;  %v2468_v46 = vld [vmem:[#allocation4 + $0xd8] sm:$0xff]  ;;  %8461 = vmatprep.subr.mxu1 %v13286_v59  ;;  %8445 = vmatpush3.msra.mxu0 %v3172_v0  ;;  %v3169_v18 = vld [vmem:[#allocation7 + $0x10] sm:$0xff] }
 0x381   :  { %2405 = vst.msk [vmem:[#allocation4 + $0x150] sm:$0xff] %vm2019_vm7, %v2366_v19  ;;  %8462 = vmatpush3.msra.mxu1 %v3181_v10  ;;  %8446 = vmatprep.subr.mxu0 %v13286_v59 }
 0x382   :  { %2863 = vmatmul.mubr.f32.gmra.mxu1 %v2448_v13  ;;  %8463 = vmatprep.subr.mxu1 %v13286_v59 }
 0x383   :  { %v2364_v37 = vpop.permute.xlu0 %2363  ;;  %2867 = vmatprep.mubr.f32.mxu1 %v2454_v7  ;;  %v2463_v1 = vld [vmem:[#allocation4 + $0xb0] sm:$0xff]  ;;  %8464 = vmatpush3.msra.mxu1 %v3180_v33 }
 0x384   :  { %2404 = vst.msk [vmem:[#allocation4 + $0x128] sm:$0xff] %vm2019_vm7, %v2364_v37  ;;  %v2370_v28 = vpop.permute.xlu1 %2369  ;;  %v2479_v51 = vld [vmem:[#allocation4 + $0x130] sm:$0xff]  ;;  %8465 = vmatprep.subr.mxu1 %v13286_v59  ;;  %8447 = vmatpush3.msra.mxu0 %v3171_v15  ;;  %v3167_v37 = vld [vmem:[#allocation7] sm:$0xff] }
 0x385   :  { %2407 = vst.msk [vmem:[#allocation4 + $0x1a0] sm:$0xff] %vm2019_vm7, %v2370_v28  ;;  %8466 = vmatpush3.msra.mxu1 %v3179_v62  ;;  %8448 = vmatprep.subr.mxu0 %v13286_v59 }
 0x386   :  { %2868 = vmatmul.mubr.f32.gmra.mxu1 %v2453_v47  ;;  %8467 = vmatprep.subr.mxu1 %v13286_v59 }
 0x387   :  { %v2368_v24 = vpop.permute.xlu0 %2367  ;;  %2872 = vmatprep.mubr.f32.mxu1 %v2459_v39  ;;  %v2473_v34 = vld [vmem:[#allocation4 + $0x100] sm:$0xff]  ;;  %8468 = vmatpush3.msra.mxu1 %v3178_v31 }
 0x388   :  { %2406 = vst.msk [vmem:[#allocation4 + $0x178] sm:$0xff] %vm2019_vm7, %v2368_v24  ;;  %v2374_v45 = vpop.permute.xlu1 %2373  ;;  %v2483_v41 = vld [vmem:[#allocation4 + $0x150] sm:$0xff]  ;;  %8469 = vmatprep.subr.mxu1 %v13286_v59  ;;  %8449 = vmatpush3.msra.mxu0 %v3170_v52 }
 0x389   :  { %2409 = vst.msk [vmem:[#allocation4 + $0x1f0] sm:$0xff] %vm2019_vm7, %v2374_v45  ;;  %8470 = vmatpush3.msra.mxu1 %v3177_v35  ;;  %8450 = vmatprep.subr.mxu0 %v13286_v59 }
 0x38a   :  { %2873 = vmatmul.mubr.f32.gmra.mxu1 %v2458_v56  ;;  %8471 = vmatprep.subr.mxu1 %v13286_v59 }
 0x38b   :  { %v2372_v40 = vpop.permute.xlu0 %2371  ;;  %2877 = vmatprep.mubr.f32.mxu1 %v2464_v42  ;;  %v2478_v21 = vld [vmem:[#allocation4 + $0x128] sm:$0xff]  ;;  %8472 = vmatpush3.msra.mxu1 %v3176_v54 }
 0x38c   :  { %2408 = vst.msk [vmem:[#allocation4 + $0x1c8] sm:$0xff] %vm2019_vm7, %v2372_v40  ;;  %v2378_v6 = vpop.permute.xlu1 %2377  ;;  %v2493_v29 = vld [vmem:[#allocation4 + $0x1a0] sm:$0xff]  ;;  %8473 = vmatprep.subr.mxu1 %v13286_v59  ;;  %8451 = vmatpush3.msra.mxu0 %v3169_v18 }
 0x38d   :  { %2411 = vst.msk [vmem:[#allocation4 + $0x240] sm:$0xff] %vm2019_vm7, %v2378_v6  ;;  %8474 = vmatpush3.msra.mxu1 %v3175_v23  ;;  %8452 = vmatprep.subr.mxu0 %v13286_v59 }
 0x38e   :  { %2878 = vmatmul.mubr.f32.gmra.mxu1 %v2463_v1  ;;  %8475 = vmatprep.subr.mxu1 %v13286_v59 }
 0x38f   :  { %v2376_v60 = vpop.permute.xlu0 %2375  ;;  %2882 = vmatprep.mubr.f32.mxu1 %v2469_v30  ;;  %v2488_v48 = vld [vmem:[#allocation4 + $0x178] sm:$0xff]  ;;  %8476 = vmatpush3.msra.mxu1 %v3174_v49  ;;  %v11641_v49 = vld [vmem:[%s13015_s8] ss:$0 sm:$0xff] }
 0x390   :  { %2410 = vst.msk [vmem:[#allocation4 + $0x218] sm:$0xff] %vm2019_vm7, %v2376_v60  ;;  %v2380_v53 = vpop.permute.xlu1 %2379  ;;  %v2503_v25 = vld [vmem:[#allocation4 + $0x1f0] sm:$0xff]  ;;  %8477 = vmatprep.subr.mxu1 %v13286_v59  ;;  %8453 = vmatpush3.msra.mxu0 %v3168_v57 }
 0x391   :  { %2412 = vst.msk [vmem:[#allocation4 + $0x268] sm:$0xff] %vm2019_vm7, %v2380_v53  ;;  %8478 = vmatpush3.msra.mxu1 %v3173_v26  ;;  %8454 = vmatprep.subr.mxu0 %v13286_v59 }
 0x392   :  { %2883 = vmatmul.mubr.f32.gmra.mxu1 %v2468_v46  ;;  %8479 = vmatprep.subr.mxu1 %v13286_v59 }
 0x393   :  { %v2153_v9 = vpop.permute.xlu0 %2152  ;;  %2887 = vmatprep.mubr.f32.mxu1 %v2474_v38  ;;  %v2498_v20 = vld [vmem:[#allocation4 + $0x1c8] sm:$0xff]  ;;  %8480 = vmatpush3.msra.mxu1 %v3172_v0 }
 0x394   :  { %2171 = vst.msk [vmem:[#allocation4 + $0x270] sm:$0xff] %vm2019_vm7, %v2153_v9  ;;  %v2513_v11 = vld [vmem:[#allocation4 + $0x240] sm:$0xff]  ;;  %8481 = vmatprep.subr.mxu1 %v13286_v59  ;;  %8455 = vmatpush3.msra.mxu0 %v3167_v37 }
 0x395   :  { %8482 = vmatpush3.msra.mxu1 %v3171_v15 }
 0x396   :  { %2888 = vmatmul.mubr.f32.gmra.mxu1 %v2473_v34  ;;  %8483 = vmatprep.subr.mxu1 %v13286_v59 }
 0x397   :  { %2892 = vmatprep.mubr.f32.mxu1 %v2479_v51  ;;  %v2508_v63 = vld [vmem:[#allocation4 + $0x218] sm:$0xff]  ;;  %8484 = vmatpush3.msra.mxu1 %v3170_v52 }
 0x398   :  { %v2518_v17 = vld [vmem:[#allocation4 + $0x268] sm:$0xff]  ;;  %8485 = vmatprep.subr.mxu1 %v13286_v59 }
 0x399   :  { %8486 = vmatpush3.msra.mxu1 %v3169_v18 }
 0x39a   :  { %2893 = vmatmul.mubr.f32.gmra.mxu1 %v2478_v21  ;;  %8487 = vmatprep.subr.mxu1 %v13286_v59 }
 0x39b   :  { %2897 = vmatprep.mubr.f32.mxu1 %v2484_v16  ;;  %v2519_v61 = vld [vmem:[#allocation4 + $0x270] sm:$0xff]  ;;  %8488 = vmatpush3.msra.mxu1 %v3168_v57 }
 0x39c   :  { %8489 = vmatprep.subr.mxu1 %v13286_v59 }
 0x39d   :  { %8490 = vmatpush3.msra.mxu1 %v3167_v37 }
 0x39e   :  { %2898 = vmatmul.mubr.f32.gmra.mxu1 %v2483_v41 }
 0x39f   :  { %2902 = vmatprep.mubr.f32.mxu1 %v2489_v14  ;;  %v8402_v14 = vpop.f32.mrf.mxu0 }
 0x3a2   :  { %2903 = vmatmul.mubr.f32.gmra.mxu1 %v2488_v48 }
 0x3a3   :  { %2907 = vmatprep.mubr.f32.mxu1 %v2494_v4 }
 0x3a6   :  { %2908 = vmatmul.mubr.f32.gmra.mxu1 %v2493_v29  ;;  %v3004_v29 = vpop.f32.mrf.mxu0 }
 0x3a7   :  { %2912 = vmatprep.mubr.f32.mxu1 %v2499_v43 }
 0x3aa   :  { %2913 = vmatmul.mubr.f32.gmra.mxu1 %v2498_v20 }
 0x3ab   :  { %2917 = vmatprep.mubr.f32.mxu1 %v2504_v3  ;;  %v8405_v3 = vpop.f32.mrf.mxu0 }
 0x3ae   :  { %2918 = vmatmul.mubr.f32.gmra.mxu1 %v2503_v25 }
 0x3af   :  { %2922 = vmatprep.mubr.f32.mxu1 %v2509_v2 }
 0x3b2   :  { %2923 = vmatmul.mubr.f32.gmra.mxu1 %v2508_v63  ;;  %v3014_v63 = vpop.f32.mrf.mxu0 }
 0x3b3   :  { %2927 = vmatprep.mubr.f32.mxu1 %v2514_v50 }
 0x3b6   :  { %2928 = vmatmul.mubr.f32.gmra.mxu1 %v2513_v11 }
 0x3b7   :  { %2932 = vmatprep.mubr.f32.mxu1 %v2519_v61  ;;  %v11630_v61 = vpop.f32.mrf.mxu0 }
 0x3b9   :  { %v3024_v10 = vpop.f32.mrf.mxu0 }
 0x3ba   :  { %2933 = vmatmul.mubr.f32.gmra.mxu1 %v2518_v17 }
 0x3bb   :  { %8491 = vmatprep.mubr.msk.f32.mxu1 %vm8880_vm4, %v13286_v59  ;;  %v11634_v35 = vpop.f32.mrf.mxu0 }
 0x3bd   :  { %v11648_v57 = vpop.f32.mrf.mxu0 }
 0x3f7   :  { %v11554_v58 = vpop.f32.mrf.mxu1 }
 0x3f9   :  { %v11556_v44 = vpop.f32.mrf.mxu1 }
 0x3fa   :  { %v7284_v54 = vadd.f32 %v11556_v44, %v11554_v58 }
 0x3fb   :  { %v11560_v22 = vpop.f32.mrf.mxu1 }
 0x3fc   :  { %v2715_v58 = vadd.f32 %v7284_v54, %v11641_v49 }
 0x3fd   :  { %v11562_v5 = vpop.f32.mrf.mxu1 }
 0x3fe   :  { %v7287_v31 = vadd.f32 %v11562_v5, %v11560_v22 }
 0x400   :  { %v11566_v55 = vpop.f32.mrf.mxu1  ;;  %v2720_v52 = vadd.f32 %v7287_v31, %v11641_v49 }
 0x402   :  { %v11568_v8 = vpop.f32.mrf.mxu1 }
 0x403   :  { %v7290_v26 = vadd.f32 %v11568_v8, %v11566_v55 }
 0x405   :  { %v11570_v12 = vpop.f32.mrf.mxu1  ;;  %v2725_v37 = vadd.f32 %v7290_v26, %v11641_v49 }
 0x407   :  { %v11574_v32 = vpop.f32.mrf.mxu1 }
 0x408   :  { %v7293_v22 = vadd.f32 %v11574_v32, %v11570_v12 }
 0x409   :  { %v11578_v27 = vpop.f32.mrf.mxu1 }
 0x40a   :  { %v2730_v31 = vadd.f32 %v7293_v22, %v11641_v49 }
 0x40b   :  { %v11582_v19 = vpop.f32.mrf.mxu1 }
 0x40c   :  { %v7296_v59 = vadd.f32 %v11582_v19, %v11578_v27 }
 0x412   :  { %v11586_v13 = vpop.f32.mrf.mxu1 }
 0x414   :  { %v7298_v7 = vpop.f32.mrf.mxu1 }
 0x416   :  { %v11590_v28 = vpop.f32.mrf.mxu1 }
 0x418   :  { %v11592_v24 = vpop.f32.mrf.mxu1 }
 0x419   :  { %v7302_v27 = vadd.f32 %v11592_v24, %v11590_v28 }
 0x41a   :  { %v11594_v47 = vpop.f32.mrf.mxu1 }
 0x41c   :  { %v11596_v39 = vpop.f32.mrf.mxu1 }
 0x41e   :  { %v11598_v45 = vpop.f32.mrf.mxu1 }
 0x420   :  { %v11600_v40 = vpop.f32.mrf.mxu1 }
 0x422   :  { %v11602_v56 = vpop.f32.mrf.mxu1 }
 0x424   :  { %v11604_v42 = vpop.f32.mrf.mxu1 }
 0x426   :  { %v11606_v6 = vpop.f32.mrf.mxu1 }
 0x428   :  { %v11608_v60 = vpop.f32.mrf.mxu1 }
 0x42a   :  { %v11610_v1 = vpop.f32.mrf.mxu1 }
 0x42c   :  { %v11612_v30 = vpop.f32.mrf.mxu1 }
 0x42e   :  { %v11614_v53 = vpop.f32.mrf.mxu1 }
 0x430   :  { %v11616_v9 = vpop.f32.mrf.mxu1 }
 0x432   :  { %v11618_v46 = vpop.f32.mrf.mxu1 }
 0x434   :  { %v11620_v38 = vpop.f32.mrf.mxu1 }
 0x436   :  { %v11622_v34 = vpop.f32.mrf.mxu1 }
 0x438   :  { %v11624_v51 = vpop.f32.mrf.mxu1 }
 0x43a   :  { %v11626_v21 = vpop.f32.mrf.mxu1 }
 0x43b   :  { %13287 = vst [vmem:[#allocation39_spill] sm:$0xff] %v11626_v21 }
 0x43c   :  { %v11628_v16 = vpop.f32.mrf.mxu1 }
 0x43d   :  { %13288 = vst [vmem:[#allocation38_spill] sm:$0xff] %v11628_v16 }
 0x43e   :  { %v7362_v41 = vpop.f32.mrf.mxu1 }
 0x440   :  { %v7363_v48 = vpop.f32.mrf.mxu1 }
 0x441   :  { %v7364_v5 = vadd.f32 %v7363_v48, %v7362_v41  ;;  %v8414_v48 = vpop.f32.mrf.mxu0 }
 0x442   :  { %v7365_v4 = vpop.f32.mrf.mxu1 }
 0x443   :  { %v2860_v12 = vadd.f32 %v7364_v5, %v2715_v58 }
 0x444   :  { %v7366_v43 = vpop.f32.mrf.mxu1 }
 0x445   :  { %v7367_v0 = vadd.f32 %v7366_v43, %v7365_v4  ;;  %v7299_v4 = vadd.f32 %v7298_v7, %v11586_v13  ;;  %v7305_v13 = vadd.f32 %v11596_v39, %v11594_v47  ;;  %v3005_v7 = vadd.f32 %v3004_v29, %v2860_v12 }
 0x446   :  { %v7368_v20 = vpop.f32.mrf.mxu1  ;;  %v2745_v47 = vadd.f32 %v7302_v27, %v11641_v49  ;;  %v7317_v39 = vadd.f32 %v11612_v30, %v11610_v1 }
 0x447   :  { %v2865_v55 = vadd.f32 %v7367_v0, %v2720_v52  ;;  %v2740_v21 = vadd.f32 %v7299_v4, %v11641_v49 }
 0x448   :  { %v7369_v25 = vpop.f32.mrf.mxu1  ;;  %v2770_v22 = vadd.f32 %v7317_v39, %v11641_v49 }
 0x449   :  { %v7370_v18 = vadd.f32 %v7369_v25, %v7368_v20  ;;  %v2735_v25 = vadd.f32 %v7296_v59, %v11641_v49  ;;  %v3010_v54 = vadd.f32 %v8402_v14, %v2865_v55  ;;  %v7311_v59 = vadd.f32 %v11604_v42, %v11602_v56 }
 0x44a   :  { %v7371_v2 = vpop.f32.mrf.mxu1  ;;  %v11674_v56 = vmax.f32 %v3005_v7, 0.0 }
 0x44b   :  { %v2870_v32 = vadd.f32 %v7370_v18, %v2725_v37  ;;  %v11668_v28 = vmax.f32 %v3010_v54, 0.0 }
 0x44c   :  { %v7372_v50 = vpop.f32.mrf.mxu1  ;;  %v3125_v37 = vmul.f32 %v11674_v56, %v11674_v56 }
 0x44d   :  { %v7373_v8 = vadd.f32 %v7372_v50, %v7371_v2  ;;  %v3015_v2 = vadd.f32 %v3014_v63, %v2870_v32  ;;  %v3126_v30 = vmul.f32 %v11668_v28, %v11668_v28 }
 0x44e   :  { %v7374_v11 = vpop.f32.mrf.mxu1 }
 0x44f   :  { %v2875_v16 = vadd.f32 %v7373_v8, %v2730_v31  ;;  %v11676_v42 = vmax.f32 %v3015_v2, 0.0 }
 0x450   :  { %v7375_v17 = vpop.f32.mrf.mxu1 }
 0x451   :  { %v7376_v41 = vadd.f32 %v7375_v17, %v7374_v11  ;;  %v3044_v11 = vpop.f32.mrf.mxu0  ;;  %v7308_v17 = vadd.f32 %v11600_v40, %v11598_v45  ;;  %v3020_v24 = vadd.f32 %v8405_v3, %v2875_v16  ;;  %v2750_v40 = vadd.f32 %v7305_v13, %v11641_v49 }
 0x452   :  { %v7377_v36 = vpop.f32.mrf.mxu1  ;;  %v3127_v55 = vmul.f32 %v11676_v42, %v11676_v42 }
 0x453   :  { %v2880_v50 = vadd.f32 %v7376_v41, %v2735_v25  ;;  %v3141_v41 = vadd.f32 %v3126_v30, %v3125_v37 }
 0x454   :  { %v7378_v33 = vpop.f32.mrf.mxu1 }
 0x455   :  { %v7379_v26 = vadd.f32 %v7378_v33, %v7377_v36  ;;  %v7314_v33 = vadd.f32 %v11608_v60, %v11606_v6  ;;  %v8417_v6 = vpop.f32.mrf.mxu0  ;;  %v2755_v60 = vadd.f32 %v7308_v17, %v11641_v49  ;;  %v3142_v13 = vadd.f32 %v3141_v41, %v3127_v55 }
 0x456   :  { %v7380_v62 = vpop.f32.mrf.mxu1 }
 0x457   :  { %v2885_v0 = vadd.f32 %v7379_v26, %v2740_v21  ;;  %v2760_v21 = vadd.f32 %v7311_v59, %v11641_v49  ;;  %v2765_v1 = vadd.f32 %v7314_v33, %v11641_v49  ;;  %v3054_v4 = vpop.f32.mrf.mxu0 }
 0x458   :  { %v7381_v23 = vpop.f32.mrf.mxu1 }
 0x459   :  { %v7382_v14 = vadd.f32 %v7381_v23, %v7380_v62  ;;  %v3025_v62 = vadd.f32 %v3024_v10, %v2880_v50  ;;  %v3030_v52 = vadd.f32 %v11630_v61, %v2885_v0  ;;  %v3099_v61 = vadd.f32 %v11668_v28, %v11674_v56  ;;  %v8420_v2 = vpop.f32.mrf.mxu0 }
 0x45a   :  { %v7383_v15 = vpop.f32.mrf.mxu1 }
 0x45b   :  { %v2890_v16 = vadd.f32 %v7382_v14, %v2745_v47  ;;  %v11693_v8 = vmax.f32 %v3025_v62, 0.0  ;;  %v3100_v25 = vadd.f32 %v3099_v61, %v11676_v42  ;;  %v3064_v62 = vpop.f32.mrf.mxu0 }
 0x45c   :  { %v7384_v44 = vpop.f32.mrf.mxu1 }
 0x45d   :  { %v7385_v29 = vadd.f32 %v7384_v44, %v7383_v15  ;;  %v11683_v15 = vmax.f32 %v3020_v24, 0.0  ;;  %v7320_v44 = vadd.f32 %v11616_v9, %v11614_v53  ;;  %v11700_v9 = vmax.f32 %v3030_v52, 0.0  ;;  %v8423_v37 = vpop.f32.mrf.mxu0 }
 0x45e   :  { %v7386_v43 = vpop.f32.mrf.mxu1 }
 0x45f   :  { %v2895_v10 = vadd.f32 %v7385_v29, %v2750_v40  ;;  %v3128_v53 = vmul.f32 %v11683_v15, %v11683_v15  ;;  %v3101_v50 = vadd.f32 %v3100_v25, %v11683_v15  ;;  %v3130_v33 = vmul.f32 %v11700_v9, %v11700_v9 }
 0x460   :  { %v7387_v20 = vpop.f32.mrf.mxu1 }
 0x461   :  { %v7388_v3 = vadd.f32 %v7387_v20, %v7386_v43  ;;  %v3035_v43 = vadd.f32 %v11648_v57, %v2890_v16  ;;  %v3040_v54 = vadd.f32 %v11634_v35, %v2895_v10  ;;  %v3129_v57 = vmul.f32 %v11693_v8, %v11693_v8 }
 0x462   :  { %v7389_v19 = vpop.f32.mrf.mxu1  ;;  %v7323_v35 = vadd.f32 %v11620_v38, %v11618_v46  ;;  %v3102_v0 = vadd.f32 %v3101_v50, %v11693_v8 }
 0x463   :  { %v2900_v31 = vadd.f32 %v7388_v3, %v2755_v60  ;;  %v11708_v17 = vmax.f32 %v3035_v43, 0.0  ;;  %v11715_v47 = vmax.f32 %v3040_v54, 0.0 }
 0x464   :  { %v7390_v36 = vpop.f32.mrf.mxu1  ;;  %v3103_v46 = vadd.f32 %v3102_v0, %v11700_v9  ;;  %v2780_v3 = vadd.f32 %v7323_v35, %v11641_v49 }
 0x465   :  { %v7391_v63 = vadd.f32 %v7390_v36, %v7389_v19  ;;  %v2775_v19 = vadd.f32 %v7320_v44, %v11641_v49  ;;  %v3045_v59 = vadd.f32 %v3044_v11, %v2900_v31  ;;  %v7326_v11 = vadd.f32 %v11624_v51, %v11622_v34 }
 0x466   :  { %v7392_v45 = vpop.f32.mrf.mxu1  ;;  %v3131_v38 = vmul.f32 %v11708_v17, %v11708_v17  ;;  %v3104_v34 = vadd.f32 %v3103_v46, %v11708_v17  ;;  %v3132_v51 = vmul.f32 %v11715_v47, %v11715_v47 }
 0x467   :  { %v2905_v5 = vadd.f32 %v7391_v63, %v2760_v21  ;;  %v11724_v60 = vmax.f32 %v3045_v59, 0.0  ;;  %v2785_v10 = vadd.f32 %v7326_v11, %v11641_v49 }
 0x468   :  { %v7393_v23 = vpop.f32.mrf.mxu1 }
 0x469   :  { %v7394_v18 = vadd.f32 %v7393_v23, %v7392_v45  ;;  %v3050_v26 = vadd.f32 %v8414_v48, %v2905_v5  ;;  %v3143_v48 = vadd.f32 %v3142_v13, %v3128_v53  ;;  %v13289_v5 = vld [vmem:[#allocation39_spill] sm:$0xff]  ;;  %v3133_v61 = vmul.f32 %v11724_v60, %v11724_v60 }
 0x46a   :  { %v7395_v58 = vpop.f32.mrf.mxu1 }
 0x46b   :  { %v2910_v12 = vadd.f32 %v7394_v18, %v2765_v1  ;;  %v11717_v39 = vmax.f32 %v3050_v26, 0.0  ;;  %v3144_v45 = vadd.f32 %v3143_v48, %v3129_v57  ;;  %v13290_v18 = vld [vmem:[#allocation38_spill] sm:$0xff]  ;;  %v3074_v57 = vpop.f32.mrf.mxu0 }
 0x46c   :  { %v7396_v32 = vpop.f32.mrf.mxu1 }
 0x46d   :  { %v7397_v20 = vadd.f32 %v7396_v32, %v7395_v58  ;;  %v3055_v14 = vadd.f32 %v3054_v4, %v2910_v12  ;;  %v3134_v30 = vmul.f32 %v11717_v39, %v11717_v39  ;;  %v7329_v58 = vadd.f32 %v13290_v18, %v13289_v5 }
 0x46e   :  { %v7398_v27 = vpop.f32.mrf.mxu1  ;;  %v3105_v4 = vadd.f32 %v3104_v34, %v11715_v47  ;;  %v3112_v12 = vadd.f32 %v11717_v39, %v11724_v60 }
 0x46f   :  { %v2915_v7 = vadd.f32 %v7397_v20, %v2770_v22  ;;  %v11726_v21 = vmax.f32 %v3055_v14, 0.0  ;;  %v3154_v25 = vadd.f32 %v3134_v30, %v3133_v61 }
 0x470   :  { %v7399_v36 = vpop.f32.mrf.mxu1  ;;  %v3106_v50 = vrot.slane %v3105_v4, 4 }
 0x471   :  { %v7400_v24 = vadd.f32 %v7399_v36, %v7398_v27  ;;  %v3060_v29 = vadd.f32 %v8417_v6, %v2915_v7  ;;  %v3145_v6 = vadd.f32 %v3144_v45, %v3130_v33  ;;  %v3135_v43 = vmul.f32 %v11726_v21, %v11726_v21 }
 0x472   :  { %v7401_v63 = vpop.f32.mrf.mxu1  ;;  %v3113_v27 = vadd.f32 %v3112_v12, %v11726_v21  ;;  %v2790_v7 = vadd.f32 %v7329_v58, %v11641_v49  ;;  %v3107_v11 = vadd.f32 %v3106_v50, %v3105_v4  ;;  %v4008_v50 = vld [vmem:[#allocation12 + $0xf0] sm:$0xff] }
 0x473   :  { %v2920_v40 = vadd.f32 %v7400_v24, %v2775_v19  ;;  %v11734_v52 = vmax.f32 %v3060_v29, 0.0  ;;  %v3146_v55 = vadd.f32 %v3145_v6, %v3131_v38  ;;  %v3155_v59 = vadd.f32 %v3154_v25, %v3135_v43 }
 0x474   :  { %v7402_v16 = vpop.f32.mrf.mxu1 }
 0x475   :  { %v3065_v23 = vadd.f32 %v3064_v62, %v2920_v40  ;;  %v7403_v1 = vadd.f32 %v7402_v16, %v7401_v63  ;;  %v3147_v20 = vadd.f32 %v3146_v55, %v3132_v51  ;;  %v3136_v54 = vmul.f32 %v11734_v52, %v11734_v52 }
 0x476   :  { %v7404_v22 = vpop.f32.mrf.mxu1  ;;  %v3108_v51 = vrot.slane %v3107_v11, 2 }
 0x477   :  { %v2925_v44 = vadd.f32 %v7403_v1, %v2780_v3  ;;  %v11746_v32 = vmax.f32 %v3065_v23, 0.0  ;;  %v3148_v33 = vrot.slane %v3147_v20, 4  ;;  %v3156_v24 = vadd.f32 %v3155_v59, %v3136_v54  ;;  %v3992_v59 = vld [vmem:[#allocation12 + $0x70] sm:$0xff] }
 0x478   :  { %v7405_v31 = vpop.f32.mrf.mxu1  ;;  %v3109_v58 = vadd.f32 %v3108_v51, %v3107_v11  ;;  %v4005_v11 = vld [vmem:[#allocation12 + $0xd8] sm:$0xff]  ;;  %v4020_v51 = vld [vmem:[#allocation12 + $0x150] sm:$0xff] }
 0x479   :  { %v3070_v41 = vadd.f32 %v8420_v2, %v2925_v44  ;;  %v7406_v53 = vadd.f32 %v7405_v31, %v7404_v22  ;;  %v3114_v2 = vadd.f32 %v3113_v27, %v11734_v52  ;;  %v3137_v36 = vmul.f32 %v11746_v32, %v11746_v32 }
 0x47a   :  { %v7407_v26 = vpop.f32.mrf.mxu1  ;;  %v3149_v6 = vadd.f32 %v3148_v33, %v3147_v20  ;;  %v3110_v4 = vrot.slane %v3109_v58, 1  ;;  %v4006_v33 = vld [vmem:[#allocation12 + $0xe0] sm:$0xff] }
 0x47b   :  { %v11751_v19 = vmax.f32 %v3070_v41, 0.0  ;;  %v2930_v13 = vadd.f32 %v7406_v53, %v2785_v10  ;;  %v3115_v0 = vadd.f32 %v3114_v2, %v11746_v32  ;;  %v3157_v45 = vadd.f32 %v3156_v24, %v3137_v36  ;;  %v4041_v2 = vld [vmem:[#allocation12 + $0x1f8] sm:$0xff]  ;;  %v3991_v36 = vld [vmem:[#allocation12 + $0x68] sm:$0xff]  ;;  %v4024_v24 = vld [vmem:[#allocation12 + $0x170] sm:$0xff] }
 0x47c   :  { %v7408_v14 = vpop.f32.mrf.mxu1  ;;  %v3150_v10 = vrot.slane %v3149_v6, 2  ;;  %v3111_v53 = vadd.f32 %v3110_v4, %v3109_v58  ;;  %7548 = vmatprep.subr.mxu1 %v4041_v2  ;;  %v4034_v58 = vld [vmem:[#allocation12 + $0x1c0] sm:$0xff]  ;;  %v4033_v4 = vld [vmem:[#allocation12 + $0x1b8] sm:$0xff]  ;;  %v3996_v2 = vld [vmem:[#allocation12 + $0x90] sm:$0xff] }
 0x47d   :  { %v3075_v35 = vadd.f32 %v3074_v57, %v2930_v13  ;;  %v7409_v48 = vadd.f32 %v7408_v14, %v7407_v26  ;;  %v3138_v29 = vmul.f32 %v11751_v19, %v11751_v19  ;;  %v3116_v40 = vadd.f32 %v3115_v0, %v11751_v19  ;;  %v4009_v57 = vld [vmem:[#allocation12 + $0xf8] sm:$0xff]  ;;  %v4007_v14 = vld [vmem:[#allocation12 + $0xe8] sm:$0xff]  ;;  %v3990_v0 = vld [vmem:[#allocation12 + $0x60] sm:$0xff] }
 0x47e   :  { %7468 = vmatprep.subr.mxu0 %v4009_v57  ;;  %v4030_v57 = vld [vmem:[#allocation12 + $0x1a0] sm:$0xff] }
 0x47f   :  { %v11760_v63 = vmax.f32 %v3075_v35, 0.0  ;;  %v2935_v49 = vadd.f32 %v7409_v48, %v2790_v7  ;;  %v3158_v38 = vadd.f32 %v3157_v45, %v3138_v29  ;;  %v3993_v7 = vld [vmem:[#allocation12 + $0x78] sm:$0xff]  ;;  %v4040_v48 = vld [vmem:[#allocation12 + $0x1f0] sm:$0xff]  ;;  %v4039_v29 = vld [vmem:[#allocation12 + $0x1e8] sm:$0xff] }
 0x480   :  { %v4025_v35 = vld [vmem:[#allocation12 + $0x178] sm:$0xff]  ;;  %v4038_v45 = vld [vmem:[#allocation12 + $0x1e0] sm:$0xff] }
 0x481   :  { %v3139_v62 = vmul.f32 %v11760_v63, %v11760_v63  ;;  %v3080_v46 = vadd.f32 %v8423_v37, %v2935_v49  ;;  %v3117_v16 = vadd.f32 %v3116_v40, %v11760_v63  ;;  %v3151_v37 = vadd.f32 %v3150_v10, %v3149_v6  ;;  %v4023_v49 = vld [vmem:[#allocation12 + $0x168] sm:$0xff]  ;;  %v3989_v40 = vld [vmem:[#allocation12 + $0x58] sm:$0xff]  ;;  %v3986_v10 = vld [vmem:[#allocation12 + $0x40] sm:$0xff] }
 0x482   :  { %v4021_v6 = vld [vmem:[#allocation12 + $0x158] sm:$0xff] }
 0x483   :  { %v11766_v3 = vmax.f32 %v3080_v46, 0.0  ;;  %v3159_v23 = vadd.f32 %v3158_v38, %v3139_v62  ;;  %v3152_v12 = vrot.slane %v3151_v37, 1  ;;  %v4022_v62 = vld [vmem:[#allocation12 + $0x160] sm:$0xff]  ;;  %v4004_v46 = vld [vmem:[#allocation12 + $0xd0] sm:$0xff]  ;;  %v4037_v38 = vld [vmem:[#allocation12 + $0x1d8] sm:$0xff] }
 0x485   :  { %v3118_v1 = vadd.f32 %v3117_v16, %v11766_v3  ;;  %v3140_v34 = vmul.f32 %v11766_v3, %v11766_v3  ;;  %v3153_v26 = vadd.f32 %v3152_v12, %v3151_v37  ;;  %v3988_v16 = vld [vmem:[#allocation12 + $0x50] sm:$0xff]  ;;  %v4018_v37 = vld [vmem:[#allocation12 + $0x140] sm:$0xff] }
 0x486   :  { %v4032_v12 = vld [vmem:[#allocation12 + $0x1b0] sm:$0xff] }
 0x487   :  { %v3119_v30 = vrot.slane %v3118_v1, 4  ;;  %v3160_v22 = vadd.f32 %v3159_v23, %v3140_v34  ;;  %v4003_v23 = vld [vmem:[#allocation12 + $0xc8] sm:$0xff] }
 0x488   :  { %v3987_v34 = vld [vmem:[#allocation12 + $0x48] sm:$0xff] }
 0x489   :  { %v3120_v5 = vadd.f32 %v3119_v30, %v3118_v1  ;;  %v3161_v18 = vrot.slane %v3160_v22, 4  ;;  %v4036_v1 = vld [vmem:[#allocation12 + $0x1d0] sm:$0xff]  ;;  %v4002_v30 = vld [vmem:[#allocation12 + $0xc0] sm:$0xff] }
 0x48b   :  { %v3121_v44 = vrot.slane %v3120_v5, 2  ;;  %v3162_v55 = vadd.f32 %v3161_v18, %v3160_v22  ;;  %v4035_v22 = vld [vmem:[#allocation12 + $0x1c8] sm:$0xff]  ;;  %v4001_v18 = vld [vmem:[#allocation12 + $0xb8] sm:$0xff] }
 0x48d   :  { %v3122_v61 = vadd.f32 %v3121_v44, %v3120_v5  ;;  %v3163_v43 = vrot.slane %v3162_v55, 2  ;;  %v4019_v5 = vld [vmem:[#allocation12 + $0x148] sm:$0xff]  ;;  %v3985_v44 = vld [vmem:[#allocation12 + $0x38] sm:$0xff] }
 0x48f   :  { %v3123_v31 = vrot.slane %v3122_v61, 1  ;;  %v3164_v41 = vadd.f32 %v3163_v43, %v3162_v55  ;;  %v4000_v55 = vld [vmem:[#allocation12 + $0xb0] sm:$0xff]  ;;  %v4017_v43 = vld [vmem:[#allocation12 + $0x138] sm:$0xff] }
 0x491   :  { %v3124_v20 = vadd.f32 %v3123_v31, %v3122_v61  ;;  %v3165_v25 = vrot.slane %v3164_v41, 1  ;;  %v3984_v61 = vld [vmem:[#allocation12 + $0x30] sm:$0xff]  ;;  %v3999_v31 = vld [vmem:[#allocation12 + $0xa8] sm:$0xff] }
 0x493   :  { %v3185_v54 = vsel %vm1191_vm5, %v3124_v20, %v3111_v53  ;;  %v3166_v27 = vadd.f32 %v3165_v25, %v3164_v41  ;;  %v3983_v41 = vld [vmem:[#allocation12 + $0x28] sm:$0xff]  ;;  %v4016_v53 = vld [vmem:[#allocation12 + $0x130] sm:$0xff]  ;;  %v3998_v20 = vld [vmem:[#allocation12 + $0xa0] sm:$0xff] }
 0x494   :  { %8457 = vmatmul.mubr.f32.vlgmr.msra.gmra.mxu0 %v3185_v54  ;;  %v4031_v25 = vld [vmem:[#allocation12 + $0x1a8] sm:$0xff]  ;;  %v3982_v54 = vld [vmem:[#allocation12 + $0x20] sm:$0xff] }
 0x495   :  { %v3259_v13 = vsel %vm1191_vm5, %v3166_v27, %v3153_v26  ;;  %7469 = vmatpush3.msra.mxu0 %v3993_v7  ;;  %v3997_v26 = vld [vmem:[#allocation12 + $0x98] sm:$0xff]  ;;  %v4015_v27 = vld [vmem:[#allocation12 + $0x128] sm:$0xff]  ;;  %v4014_v7 = vld [vmem:[#allocation12 + $0x120] sm:$0xff] }
 0x496   :  { %8492 = vmatmul.mubr.f32.vlgmr.msra.gmra.mxu1 %v3259_v13  ;;  %7470 = vmatprep.subr.mxu0 %v4008_v50  ;;  %v3981_v13 = vld [vmem:[#allocation12 + $0x18] sm:$0xff] }
 0x497   :  { %7471 = vmatpush3.msra.mxu0 %v3992_v59  ;;  %7549 = vmatpush3.msra.mxu1 %v4025_v35  ;;  %v3577_v50 = vld [vmem:[#allocation5 + $0x1] sm:$0xff]  ;;  %v13291_v35 = vmov 0.0  }
 0x498   :  { %7472 = vmatprep.subr.mxu0 %v4007_v14  ;;  %7550 = vmatprep.subr.mxu1 %v4040_v48  ;;  %v3545_v59 = vld [vmem:[#allocation5] sm:$0xff]  ;;  %v3980_v48 = vld [vmem:[#allocation12 + $0x10] sm:$0xff] }
 0x499   :  { %7473 = vmatpush3.msra.mxu0 %v3991_v36  ;;  %7551 = vmatpush3.msra.mxu1 %v4024_v24  ;;  %v11773_v14 = vld [vmem:[#allocation5 + $0x2] sm:$0xff] }
 0x49a   :  { %7474 = vmatprep.subr.mxu0 %v4006_v33  ;;  %7552 = vmatprep.subr.mxu1 %v4039_v29  ;;  %v4029_v36 = vld [vmem:[#allocation12 + $0x198] sm:$0xff]  ;;  %5250 = vst [vmem:[#allocation5] sm:$0xff] %v13291_v35  ;;  %5251 = vst [vmem:[#allocation5 + $0x8] sm:$0x3] %v13291_v35  ;;  %v3995_v33 = vld [vmem:[#allocation12 + $0x88] sm:$0xff] }
 0x49b   :  { %7475 = vmatpush3.msra.mxu0 %v3990_v0  ;;  %7553 = vmatpush3.msra.mxu1 %v4023_v49  ;;  %5258 = vst [vmem:[#allocation5] sm:$0x1] %v13291_v35  ;;  %5278 = vst [vmem:[#allocation5 + $0x9] sm:$0x1] %v13291_v35  ;;  %v4013_v24 = vld [vmem:[#allocation12 + $0x118] sm:$0xff]  ;;  %v3979_v0 = vld [vmem:[#allocation12 + $0x8] sm:$0xff] }
 0x49c   :  { %7476 = vmatprep.subr.mxu0 %v4005_v11  ;;  %7554 = vmatprep.subr.mxu1 %v4038_v45  ;;  %v4028_v29 = vld [vmem:[#allocation12 + $0x190] sm:$0xff]  ;;  %v3994_v49 = vld [vmem:[#allocation12 + $0x80] sm:$0xff] }
 0x49d   :  { %7477 = vmatpush3.msra.mxu0 %v3989_v40  ;;  %7555 = vmatpush3.msra.mxu1 %v4022_v62  ;;  %v4012_v11 = vld [vmem:[#allocation12 + $0x110] sm:$0xff]  ;;  %v3978_v45 = vld [vmem:[#allocation12] sm:$0xff]  ;;  %v4027_v40 = vld [vmem:[#allocation12 + $0x188] sm:$0xff] }
 0x49e   :  { %7478 = vmatprep.subr.mxu0 %v4004_v46  ;;  %7556 = vmatprep.subr.mxu1 %v4037_v38  ;;  %v4073_v62 = vld [vmem:[#allocation12 + $0x2f8] sm:$0xff]  ;;  %v4011_v38 = vld [vmem:[#allocation12 + $0x108] sm:$0xff] }
 0x49f   :  { %7479 = vmatpush3.msra.mxu0 %v3988_v16  ;;  %7557 = vmatpush3.msra.mxu1 %v4021_v6  ;;  %v4057_v46 = vld [vmem:[#allocation12 + $0x278] sm:$0xff]  ;;  %v4026_v16 = vld [vmem:[#allocation12 + $0x180] sm:$0xff]  ;;  %v4072_v6 = vld [vmem:[#allocation12 + $0x2f0] sm:$0xff] }
 0x4a0   :  { %7480 = vmatprep.subr.mxu0 %v4003_v23  ;;  %7558 = vmatprep.subr.mxu1 %v4036_v1  ;;  %v4010_v23 = vld [vmem:[#allocation12 + $0x100] sm:$0xff]  ;;  %v4056_v1 = vld [vmem:[#allocation12 + $0x270] sm:$0xff] }
 0x4a1   :  { %7481 = vmatpush3.msra.mxu0 %v3987_v34  ;;  %7559 = vmatpush3.msra.mxu1 %v4020_v51  ;;  %v4071_v34 = vld [vmem:[#allocation12 + $0x2e8] sm:$0xff] }
 0x4a2   :  { %7482 = vmatprep.subr.mxu0 %v4002_v30  ;;  %7560 = vmatprep.subr.mxu1 %v4035_v22  ;;  %v4055_v51 = vld [vmem:[#allocation12 + $0x268] sm:$0xff]  ;;  %v4070_v30 = vld [vmem:[#allocation12 + $0x2e0] sm:$0xff] }
 0x4a3   :  { %7483 = vmatpush3.msra.mxu0 %v3986_v10  ;;  %7561 = vmatpush3.msra.mxu1 %v4019_v5  ;;  %v4054_v22 = vld [vmem:[#allocation12 + $0x260] sm:$0xff]  ;;  %v4069_v10 = vld [vmem:[#allocation12 + $0x2d8] sm:$0xff] }
 0x4a4   :  { %7484 = vmatprep.subr.mxu0 %v4001_v18  ;;  %7562 = vmatprep.subr.mxu1 %v4034_v58  ;;  %v4053_v5 = vld [vmem:[#allocation12 + $0x258] sm:$0xff]  ;;  %v4068_v18 = vld [vmem:[#allocation12 + $0x2d0] sm:$0xff] }
 0x4a5   :  { %7485 = vmatpush3.msra.mxu0 %v3985_v44  ;;  %7563 = vmatpush3.msra.mxu1 %v4018_v37  ;;  %v4105_v58 = vld [vmem:[#allocation12 + $0x3f8] sm:$0xff]  ;;  %v4052_v44 = vld [vmem:[#allocation12 + $0x250] sm:$0xff]  ;;  %v4067_v37 = vld [vmem:[#allocation12 + $0x2c8] sm:$0xff] }
 0x4a6   :  { %7486 = vmatprep.subr.mxu0 %v4000_v55  ;;  %7564 = vmatprep.subr.mxu1 %v4033_v4  ;;  %v4051_v55 = vld [vmem:[#allocation12 + $0x248] sm:$0xff]  ;;  %v4066_v4 = vld [vmem:[#allocation12 + $0x2c0] sm:$0xff] }
 0x4a7   :  { %7487 = vmatpush3.msra.mxu0 %v3984_v61  ;;  %7565 = vmatpush3.msra.mxu1 %v4017_v43  ;;  %v4050_v61 = vld [vmem:[#allocation12 + $0x240] sm:$0xff] }
 0x4a8   :  { %7488 = vmatprep.subr.mxu0 %v3999_v31  ;;  %7566 = vmatprep.subr.mxu1 %v4032_v12  ;;  %v11779_v43 = vld [vmem:[#allocation5 + $0xa1] sm:$0xff] }
 0x4a9   :  { %7489 = vmatpush3.msra.mxu0 %v3983_v41  ;;  %7567 = vmatpush3.msra.mxu1 %v4016_v53  ;;  %v4065_v31 = vld [vmem:[#allocation12 + $0x2b8] sm:$0xff] }
 0x4aa   :  { %7490 = vmatprep.subr.mxu0 %v3998_v20  ;;  %7568 = vmatprep.subr.mxu1 %v4031_v25  ;;  %v11781_v12 = vld [vmem:[#allocation5 + $0xa0] sm:$0xff]  ;;  %v4064_v20 = vld [vmem:[#allocation12 + $0x2b0] sm:$0xff] }
 0x4ab   :  { %7491 = vmatpush3.msra.mxu0 %v3982_v54  ;;  %7569 = vmatpush3.msra.mxu1 %v4015_v27  ;;  %v11783_v41 = vld [vmem:[#allocation5 + $0xa2] sm:$0xff]  ;;  %v4048_v25 = vld [vmem:[#allocation12 + $0x230] sm:$0xff]  ;;  %v4063_v54 = vld [vmem:[#allocation12 + $0x2a8] sm:$0xff] }
 0x4ac   :  { %7492 = vmatprep.subr.mxu0 %v3997_v26  ;;  %7570 = vmatprep.subr.mxu1 %v4030_v57  ;;  %v4049_v53 = vld [vmem:[#allocation12 + $0x238] sm:$0xff]  ;;  %5252 = vst [vmem:[#allocation5 + $0xa0] sm:$0xff] %v13291_v35  ;;  %5253 = vst [vmem:[#allocation5 + $0xa8] sm:$0x3] %v13291_v35  ;;  %v4047_v26 = vld [vmem:[#allocation12 + $0x228] sm:$0xff] }
 0x4ad   :  { %7493 = vmatpush3.msra.mxu0 %v3981_v13  ;;  %7571 = vmatpush3.msra.mxu1 %v4014_v7  ;;  %5268 = vst [vmem:[#allocation5 + $0xa0] sm:$0x1] %v13291_v35  ;;  %5288 = vst [vmem:[#allocation5 + $0xa9] sm:$0x1] %v13291_v35  ;;  %v4062_v27 = vld [vmem:[#allocation12 + $0x2a0] sm:$0xff]  ;;  %v4061_v57 = vld [vmem:[#allocation12 + $0x298] sm:$0xff] }
 0x4ae   :  { %7494 = vmatprep.subr.mxu0 %v3996_v2  ;;  %7572 = vmatprep.subr.mxu1 %v4029_v36  ;;  %v4046_v13 = vld [vmem:[#allocation12 + $0x220] sm:$0xff]  ;;  %v4045_v7 = vld [vmem:[#allocation12 + $0x218] sm:$0xff]  ;;  %v4059_v2 = vld [vmem:[#allocation12 + $0x288] sm:$0xff] }
 0x4af   :  { %7495 = vmatpush3.msra.mxu0 %v3980_v48  ;;  %4193 = vmatprep.mubr.f32.mxu0 %v3577_v50  ;;  %v4060_v50 = vld [vmem:[#allocation12 + $0x290] sm:$0xff]  ;;  %v4043_v36 = vld [vmem:[#allocation12 + $0x208] sm:$0xff]  ;;  %v4058_v48 = vld [vmem:[#allocation12 + $0x280] sm:$0xff] }
 0x4b0   :  { %7496 = vmatprep.subr.mxu0 %v3995_v33  ;;  %7573 = vmatpush3.msra.mxu1 %v4013_v24  ;;  %v4042_v33 = vld [vmem:[#allocation12 + $0x200] sm:$0xff]  ;;  %v11789_v24 = vld [vmem:[#allocation12 + $0x478] sm:$0xff] }
 0x4b1   :  { %7497 = vmatpush3.msra.mxu0 %v3979_v0  ;;  %7574 = vmatprep.subr.mxu1 %v4028_v29 }
 0x4b2   :  { %7498 = vmatprep.subr.mxu0 %v3994_v49  ;;  %7575 = vmatpush3.msra.mxu1 %v4012_v11 }
 0x4b3   :  { %7499 = vmatpush3.msra.mxu0 %v3978_v45  ;;  %7576 = vmatprep.subr.mxu1 %v4027_v40 }
 0x4b4   :  { %4194 = vmatmul.mubr.f32.vlgmr.msra.gmra.mxu0 %v3545_v59  ;;  %7628 = vmatprep.subr.mxu0 %v4073_v62  ;;  %v4044_v59 = vld [vmem:[#allocation12 + $0x210] sm:$0xff] }
 0x4b5   :  { %7629 = vmatpush3.msra.mxu0 %v4057_v46  ;;  %7577 = vmatpush3.msra.mxu1 %v4011_v38  ;;  %v13292_v46 = vld [vmem:[#allocation49_spill] sm:$0xff] }
 0x4b6   :  { %7578 = vmatprep.subr.mxu1 %v4026_v16  ;;  %7630 = vmatprep.subr.mxu0 %v4072_v6 }
 0x4b7   :  { %7579 = vmatpush3.msra.mxu1 %v4010_v23  ;;  %7631 = vmatpush3.msra.mxu0 %v4056_v1  ;;  %v13293_v1 = vld [vmem:[#allocation50_spill] sm:$0xff] }
 0x4b8   :  { %7632 = vmatprep.subr.mxu0 %v4071_v34  ;;  %7708 = vmatprep.subr.mxu1 %v4105_v58 }
 0x4b9   :  { %7633 = vmatpush3.msra.mxu0 %v4055_v51 }
 0x4ba   :  { %7634 = vmatprep.subr.mxu0 %v4070_v30 }
 0x4bb   :  { %7635 = vmatpush3.msra.mxu0 %v4054_v22 }
 0x4bc   :  { %7636 = vmatprep.subr.mxu0 %v4069_v10 }
 0x4bd   :  { %7637 = vmatpush3.msra.mxu0 %v4053_v5 }
 0x4be   :  { %7638 = vmatprep.subr.mxu0 %v4068_v18 }
 0x4bf   :  { %7639 = vmatpush3.msra.mxu0 %v4052_v44 }
 0x4c0   :  { %7640 = vmatprep.subr.mxu0 %v4067_v37 }
 0x4c1   :  { %7641 = vmatpush3.msra.mxu0 %v4051_v55 }
 0x4c2   :  { %7642 = vmatprep.subr.mxu0 %v4066_v4 }
 0x4c3   :  { %7643 = vmatpush3.msra.mxu0 %v4050_v61 }
 0x4c4   :  { %7644 = vmatprep.subr.mxu0 %v4065_v31 }
 0x4c5   :  { %7645 = vmatpush3.msra.mxu0 %v4049_v53 }
 0x4c6   :  { %7646 = vmatprep.subr.mxu0 %v4064_v20 }
 0x4c7   :  { %7647 = vmatpush3.msra.mxu0 %v4048_v25 }
 0x4c8   :  { %7648 = vmatprep.subr.mxu0 %v4063_v54 }
 0x4c9   :  { %7649 = vmatpush3.msra.mxu0 %v4047_v26 }
 0x4ca   :  { %7650 = vmatprep.subr.mxu0 %v4062_v27 }
 0x4cb   :  { %7651 = vmatpush3.msra.mxu0 %v4046_v13 }
 0x4cc   :  { %7652 = vmatprep.subr.mxu0 %v4061_v57 }
 0x4cd   :  { %7653 = vmatpush3.msra.mxu0 %v4045_v7 }
 0x4ce   :  { %7654 = vmatprep.subr.mxu0 %v4060_v50 }
 0x4cf   :  { %7655 = vmatpush3.msra.mxu0 %v4044_v59 }
 0x4d0   :  { %7656 = vmatprep.subr.mxu0 %v4059_v2 }
 0x4d1   :  { %7657 = vmatpush3.msra.mxu0 %v4043_v36 }
 0x4d2   :  { %7658 = vmatprep.subr.mxu0 %v4058_v48 }
 0x4d3   :  { %7659 = vmatpush3.msra.mxu0 %v4042_v33 }
 0x4d4   :  { %8494 = vmatprep.subr.mxu0 %v11789_v24 }
 0x554   :  { %v3253_v0 = vpop.f32.mrf.mxu0 }
 0x555   :  { %v3331_v29 = vmul.f32 %v3253_v0, %v3253_v0  ;;  %v3342_v38 = vrot.slane %v3253_v0, %v13292_v46 }
 0x556   :  { %v8458_v49 = vpop.f32.mrf.mxu0  ;;  %v3327_v11 = vpop.f32.mrf.mxu1 }
 0x557   :  { %v3332_v45 = vsub.f32 %v3327_v11, %v3331_v29  ;;  %v3343_v16 = vcombine.high %v3342_v38, %v3342_v38  ;;  %v3350_v6 = vrot.slane %v3342_v38, %v13292_v46 }
 0x558   :  { %v8493_v40 = vpop.f32.mrf.mxu1 }
 0x559   :  { %v3333_v62 = vadd.f32 1e-05, %v3332_v45  ;;  %v3357_v23 = vrot.slane %v3343_v16, %v13292_v46  ;;  %v3361_v34 = vrot.slane %v3350_v6, %v13293_v1 }
 0x55b   :  { %8759 = vrsqrt.f32 %v3333_v62  ;;  %v11797_v30 = vrot.slane %v3357_v23, %v13293_v1  ;;  %v3368_v10 = vsub.f32 %v11674_v56, %v3361_v34  ;;  %v3369_v5 = vsub.f32 %v11668_v28, %v3361_v34 }
 0x55c   :  { %v3370_v18 = vsub.f32 %v11676_v42, %v3361_v34  ;;  %v3371_v58 = vsub.f32 %v11683_v15, %v3361_v34  ;;  %v3372_v44 = vsub.f32 %v11693_v8, %v3361_v34  ;;  %v3373_v37 = vsub.f32 %v11700_v9, %v3361_v34 }
 0x55d   :  { %v3374_v61 = vsub.f32 %v11708_v17, %v3361_v34  ;;  %v3375_v31 = vsub.f32 %v11715_v47, %v3361_v34  ;;  %v3376_v56 = vsub.f32 %v11724_v60, %v11797_v30  ;;  %v3377_v28 = vsub.f32 %v11717_v39, %v11797_v30 }
 0x55e   :  { %v3378_v42 = vsub.f32 %v11726_v21, %v11797_v30  ;;  %v3379_v15 = vsub.f32 %v11734_v52, %v11797_v30  ;;  %v3380_v17 = vsub.f32 %v11746_v32, %v11797_v30  ;;  %v3381_v47 = vsub.f32 %v11751_v19, %v11797_v30  ;;  %v7155_v21 = vld [vmem:[%s13016_s9] ss:$0 sm:$0xff] }
 0x55f   :  { %v3382_v60 = vsub.f32 %v11760_v63, %v11797_v30  ;;  %v3383_v39 = vsub.f32 %v11766_v3, %v11797_v30  ;;  %v7156_v32 = vld [vmem:[%s13017_s10] ss:$0 sm:$0xff] }
 0x568   :  { %v8760_v51 = vpop.eup %8759 }
 0x569   :  { %v3391_v22 = vrot.slane %v8760_v51, %v13292_v46 }
 0x56b   :  { %v3392_v55 = vcombine.high %v3391_v22, %v3391_v22  ;;  %v3399_v4 = vrot.slane %v3391_v22, %v13292_v46 }
 0x56d   :  { %v3406_v8 = vrot.slane %v3392_v55, %v13292_v46  ;;  %v3410_v9 = vrot.slane %v3399_v4, %v13293_v1  ;;  %v12013_v46 = vld [vmem:[#allocation5 + $0x132] sm:$0xff] }
 0x56f   :  { %v3414_v52 = vrot.slane %v3406_v8, %v13293_v1  ;;  %v3417_v53 = vmul.f32 %v3410_v9, %v3368_v10  ;;  %v3418_v20 = vmul.f32 %v3410_v9, %v3369_v5  ;;  %v3419_v25 = vmul.f32 %v3410_v9, %v3370_v18  ;;  %v4089_v8 = vld [vmem:[#allocation12 + $0x378] sm:$0xff]  ;;  %v12011_v1 = vld [vmem:[#allocation5 + $0x130] sm:$0xff] }
 0x570   :  { %v3420_v19 = vmul.f32 %v3410_v9, %v3371_v58  ;;  %v3421_v54 = vmul.f32 %v3410_v9, %v3372_v44  ;;  %v3422_v26 = vmul.f32 %v3410_v9, %v3373_v37  ;;  %v3423_v63 = vmul.f32 %v3410_v9, %v3374_v61 }
 0x571   :  { %v3440_v27 = vmul.f32 %v7155_v21, %v3417_v53  ;;  %v3441_v13 = vmul.f32 %v7155_v21, %v3418_v20  ;;  %v3442_v3 = vmul.f32 %v7155_v21, %v3419_v25  ;;  %v3424_v57 = vmul.f32 %v3410_v9, %v3375_v31  ;;  %v4104_v9 = vld [vmem:[#allocation12 + $0x3f0] sm:$0xff] }
 0x572   :  { %v3443_v7 = vmul.f32 %v7155_v21, %v3420_v19  ;;  %v3444_v50 = vmul.f32 %v7155_v21, %v3421_v54  ;;  %v3445_v59 = vmul.f32 %v7155_v21, %v3422_v26  ;;  %v3446_v2 = vmul.f32 %v7155_v21, %v3423_v63  ;;  %v4103_v54 = vld [vmem:[#allocation12 + $0x3e8] sm:$0xff] }
 0x573   :  { %v11834_v36 = vadd.f32 %v7156_v32, %v3440_v27  ;;  %v11836_v48 = vadd.f32 %v7156_v32, %v3441_v13  ;;  %v11838_v33 = vadd.f32 %v7156_v32, %v3442_v3  ;;  %v3447_v0 = vmul.f32 %v7155_v21, %v3424_v57  ;;  %v4087_v57 = vld [vmem:[#allocation12 + $0x368] sm:$0xff] }
 0x574   :  { %v11840_v29 = vadd.f32 %v7156_v32, %v3443_v7  ;;  %v11842_v49 = vadd.f32 %v7156_v32, %v3444_v50  ;;  %v11844_v11 = vadd.f32 %v7156_v32, %v3445_v59  ;;  %v11846_v45 = vadd.f32 %v7156_v32, %v3446_v2  ;;  %v4102_v7 = vld [vmem:[#allocation12 + $0x3e0] sm:$0xff] }
 0x575   :  { %3529 = vst [vmem:[#allocation5 + $0x11] sm:$0xff] %v11834_v36  ;;  %4198 = vmatprep.mubr.f32.mxu0 %v11834_v36  ;;  %3530 = vst [vmem:[#allocation5 + $0x21] sm:$0xff] %v11836_v48  ;;  %v11852_v40 = vadd.f32 %v7156_v32, %v3447_v0  ;;  %v3425_v62 = vmul.f32 %v3414_v52, %v3376_v56  ;;  %v3426_v38 = vmul.f32 %v3414_v52, %v3377_v28 }
 0x576   :  { %3531 = vst [vmem:[#allocation5 + $0x31] sm:$0xff] %v11838_v33  ;;  %v3427_v16 = vmul.f32 %v3414_v52, %v3378_v42  ;;  %3532 = vst [vmem:[#allocation5 + $0x41] sm:$0xff] %v11840_v29  ;;  %v3428_v6 = vmul.f32 %v3414_v52, %v3379_v15  ;;  %v3429_v23 = vmul.f32 %v3414_v52, %v3380_v17 }
 0x577   :  { %3533 = vst [vmem:[#allocation5 + $0x51] sm:$0xff] %v11842_v49  ;;  %3534 = vst [vmem:[#allocation5 + $0x61] sm:$0xff] %v11844_v11  ;;  %v3430_v34 = vmul.f32 %v3414_v52, %v3381_v47  ;;  %v3431_v51 = vmul.f32 %v3414_v52, %v3382_v60  ;;  %v3448_v30 = vmul.f32 %v7155_v21, %v3425_v62  ;;  %v4086_v62 = vld [vmem:[#allocation12 + $0x360] sm:$0xff] }
 0x578   :  { %3535 = vst [vmem:[#allocation5 + $0x71] sm:$0xff] %v11846_v45  ;;  %3536 = vst [vmem:[#allocation5 + $0x81] sm:$0xff] %v11852_v40  ;;  %v3449_v22 = vmul.f32 %v7155_v21, %v3426_v38  ;;  %v3450_v10 = vmul.f32 %v7155_v21, %v3427_v16  ;;  %v3432_v5 = vmul.f32 %v3414_v52, %v3383_v39 }
 0x579   :  { %v3451_v18 = vmul.f32 %v7155_v21, %v3428_v6  ;;  %v3452_v58 = vmul.f32 %v7155_v21, %v3429_v23  ;;  %v3453_v44 = vmul.f32 %v7155_v21, %v3430_v34  ;;  %v3454_v37 = vmul.f32 %v7155_v21, %v3431_v51  ;;  %v4101_v6 = vld [vmem:[#allocation12 + $0x3d8] sm:$0xff] }
 0x57a   :  { %v11859_v55 = vadd.f32 %v7156_v32, %v3448_v30  ;;  %v11861_v4 = vadd.f32 %v7156_v32, %v3449_v22  ;;  %v11863_v61 = vadd.f32 %v7156_v32, %v3450_v10  ;;  %v3455_v31 = vmul.f32 %v7155_v21, %v3432_v5  ;;  %v4088_v21 = vld [vmem:[#allocation12 + $0x370] sm:$0xff]  ;;  %v4085_v34 = vld [vmem:[#allocation12 + $0x358] sm:$0xff] }
 0x57b   :  { %v11865_v56 = vadd.f32 %v7156_v32, %v3451_v18  ;;  %v11867_v28 = vadd.f32 %v7156_v32, %v3452_v58  ;;  %v11869_v42 = vadd.f32 %v7156_v32, %v3453_v44  ;;  %v11871_v15 = vadd.f32 %v7156_v32, %v3454_v37  ;;  %v11967_v58 = vld [vmem:[#allocation5 + $0x91] sm:$0xff] }
 0x57c   :  { %3537 = vst [vmem:[#allocation5 + $0xb1] sm:$0xff] %v11859_v55  ;;  %3538 = vst [vmem:[#allocation5 + $0xc1] sm:$0xff] %v11861_v4  ;;  %v11876_v17 = vadd.f32 %v7156_v32, %v3455_v31  ;;  %v3641_v47 = vld [vmem:[#allocation5 + $0x10] sm:$0xff]  ;;  %v11878_v60 = vld [vmem:[#allocation5 + $0x20] sm:$0xff] }
 0x57d   :  { %3539 = vst [vmem:[#allocation5 + $0xd1] sm:$0xff] %v11863_v61  ;;  %v11880_v39 = vld [vmem:[#allocation5 + $0x12] sm:$0xff]  ;;  %3540 = vst [vmem:[#allocation5 + $0xe1] sm:$0xff] %v11865_v56  ;;  %4338 = vmatprep.mubr.f32.mxu1 %v3641_v47  ;;  %4199 = vmatmul.mubr.f32.gmra.mxu0 %v3641_v47  ;;  %v11889_v53 = vld [vmem:[#allocation5 + $0x22] sm:$0xff] }
 0x57e   :  { %3541 = vst [vmem:[#allocation5 + $0xf1] sm:$0xff] %v11867_v28  ;;  %3542 = vst [vmem:[#allocation5 + $0x101] sm:$0xff] %v11869_v42  ;;  %v11887_v52 = vld [vmem:[#allocation5 + $0x30] sm:$0xff]  ;;  %v11891_v20 = vld [vmem:[#allocation5 + $0x40] sm:$0xff]  ;;  %4339 = vmatmul.mubr.f32.vlgmr.msra.gmra.mxu1 %v11773_v14  ;;  %4203 = vmatprep.mubr.f32.mxu0 %v11836_v48 }
 0x57f   :  { %3543 = vst [vmem:[#allocation5 + $0x111] sm:$0xff] %v11871_v15  ;;  %5259 = vst [vmem:[#allocation5 + $0x10] sm:$0x1] %v13291_v35  ;;  %v11898_v25 = vld [vmem:[#allocation5 + $0x32] sm:$0xff]  ;;  %v11902_v19 = vld [vmem:[#allocation5 + $0x42] sm:$0xff]  ;;  %4343 = vmatprep.mubr.f32.mxu1 %v11878_v60  ;;  %7709 = vmatpush3.msra.mxu1 %v4089_v8 }
 0x580   :  { %3544 = vst [vmem:[#allocation5 + $0x121] sm:$0xff] %v11876_v17  ;;  %5279 = vst [vmem:[#allocation5 + $0x19] sm:$0x1] %v13291_v35  ;;  %v11900_v32 = vld [vmem:[#allocation5 + $0x50] sm:$0xff]  ;;  %v11908_v26 = vld [vmem:[#allocation5 + $0x60] sm:$0xff]  ;;  %7710 = vmatprep.subr.mxu1 %v4104_v9 }
 0x581   :  { %5260 = vst [vmem:[#allocation5 + $0x20] sm:$0x1] %v13291_v35  ;;  %5261 = vst [vmem:[#allocation5 + $0x30] sm:$0x1] %v13291_v35  ;;  %v11910_v14 = vld [vmem:[#allocation5 + $0x52] sm:$0xff]  ;;  %v11917_v27 = vld [vmem:[#allocation5 + $0x62] sm:$0xff]  ;;  %4204 = vmatmul.mubr.f32.gmra.mxu0 %v11878_v60  ;;  %7711 = vmatpush3.msra.mxu1 %v4088_v21 }
 0x582   :  { %5262 = vst [vmem:[#allocation5 + $0x40] sm:$0x1] %v13291_v35  ;;  %5280 = vst [vmem:[#allocation5 + $0x29] sm:$0x1] %v13291_v35  ;;  %v11912_v63 = vld [vmem:[#allocation5 + $0x70] sm:$0xff]  ;;  %v11919_v13 = vld [vmem:[#allocation5 + $0x80] sm:$0xff]  ;;  %4344 = vmatmul.mubr.f32.gmra.mxu1 %v11880_v39  ;;  %4208 = vmatprep.mubr.f32.mxu0 %v11838_v33 }
 0x583   :  { %5263 = vst [vmem:[#allocation5 + $0x50] sm:$0x1] %v13291_v35  ;;  %5281 = vst [vmem:[#allocation5 + $0x39] sm:$0x1] %v13291_v35  ;;  %v11921_v3 = vld [vmem:[#allocation5 + $0x72] sm:$0xff]  ;;  %v11927_v50 = vld [vmem:[#allocation5 + $0x82] sm:$0xff]  ;;  %4348 = vmatprep.mubr.f32.mxu1 %v11887_v52  ;;  %7712 = vmatprep.subr.mxu1 %v4103_v54 }
 0x584   :  { %5282 = vst [vmem:[#allocation5 + $0x49] sm:$0x1] %v13291_v35  ;;  %5264 = vst [vmem:[#allocation5 + $0x60] sm:$0x1] %v13291_v35  ;;  %v11934_v59 = vld [vmem:[#allocation5 + $0xb0] sm:$0xff]  ;;  %v11936_v2 = vld [vmem:[#allocation5 + $0xc0] sm:$0xff]  ;;  %7713 = vmatpush3.msra.mxu1 %v4087_v57 }
 0x585   :  { %5265 = vst [vmem:[#allocation5 + $0x70] sm:$0x1] %v13291_v35  ;;  %5283 = vst [vmem:[#allocation5 + $0x59] sm:$0x1] %v13291_v35  ;;  %v11938_v0 = vld [vmem:[#allocation5 + $0xb2] sm:$0xff]  ;;  %v11945_v16 = vld [vmem:[#allocation5 + $0xc2] sm:$0xff]  ;;  %4209 = vmatmul.mubr.f32.gmra.mxu0 %v11887_v52  ;;  %7714 = vmatprep.subr.mxu1 %v4102_v7 }
 0x586   :  { %5266 = vst [vmem:[#allocation5 + $0x80] sm:$0x1] %v13291_v35  ;;  %5284 = vst [vmem:[#allocation5 + $0x69] sm:$0x1] %v13291_v35  ;;  %v11943_v38 = vld [vmem:[#allocation5 + $0xd0] sm:$0xff]  ;;  %v11947_v23 = vld [vmem:[#allocation5 + $0xe0] sm:$0xff]  ;;  %4349 = vmatmul.mubr.f32.gmra.mxu1 %v11889_v53  ;;  %4213 = vmatprep.mubr.f32.mxu0 %v11840_v29 }
 0x587   :  { %5285 = vst [vmem:[#allocation5 + $0x79] sm:$0x1] %v13291_v35  ;;  %5286 = vst [vmem:[#allocation5 + $0x89] sm:$0x1] %v13291_v35  ;;  %v11951_v51 = vld [vmem:[#allocation5 + $0xd2] sm:$0xff]  ;;  %v11955_v22 = vld [vmem:[#allocation5 + $0xe2] sm:$0xff]  ;;  %4353 = vmatprep.mubr.f32.mxu1 %v11891_v20  ;;  %7715 = vmatpush3.msra.mxu1 %v4086_v62 }
 0x588   :  { %5269 = vst [vmem:[#allocation5 + $0xb0] sm:$0x1] %v13291_v35  ;;  %5289 = vst [vmem:[#allocation5 + $0xb9] sm:$0x1] %v13291_v35  ;;  %v11953_v30 = vld [vmem:[#allocation5 + $0xf0] sm:$0xff]  ;;  %v11961_v10 = vld [vmem:[#allocation5 + $0x100] sm:$0xff]  ;;  %7716 = vmatprep.subr.mxu1 %v4101_v6 }
 0x589   :  { %5270 = vst [vmem:[#allocation5 + $0xc0] sm:$0x1] %v13291_v35  ;;  %5271 = vst [vmem:[#allocation5 + $0xd0] sm:$0x1] %v13291_v35  ;;  %v11963_v5 = vld [vmem:[#allocation5 + $0xf2] sm:$0xff]  ;;  %v11974_v44 = vld [vmem:[#allocation5 + $0x102] sm:$0xff]  ;;  %4214 = vmatmul.mubr.f32.gmra.mxu0 %v11891_v20  ;;  %7717 = vmatpush3.msra.mxu1 %v4085_v34 }
 0x58a   :  { %5272 = vst [vmem:[#allocation5 + $0xe0] sm:$0x1] %v13291_v35  ;;  %5290 = vst [vmem:[#allocation5 + $0xc9] sm:$0x1] %v13291_v35  ;;  %v11965_v18 = vld [vmem:[#allocation5 + $0x110] sm:$0xff]  ;;  %v11976_v37 = vld [vmem:[#allocation5 + $0x120] sm:$0xff]  ;;  %4354 = vmatmul.mubr.f32.gmra.mxu1 %v11898_v25  ;;  %4218 = vmatprep.mubr.f32.mxu0 %v11842_v49 }
 0x58b   :  { %5273 = vst [vmem:[#allocation5 + $0xf0] sm:$0x1] %v13291_v35  ;;  %5291 = vst [vmem:[#allocation5 + $0xd9] sm:$0x1] %v13291_v35  ;;  %v11978_v31 = vld [vmem:[#allocation5 + $0x112] sm:$0xff]  ;;  %v11986_v9 = vld [vmem:[#allocation5 + $0x122] sm:$0xff]  ;;  %4358 = vmatprep.mubr.f32.mxu1 %v11900_v32 }
 0x58c   :  { %5292 = vst [vmem:[#allocation5 + $0xe9] sm:$0x1] %v13291_v35  ;;  %5274 = vst [vmem:[#allocation5 + $0x100] sm:$0x1] %v13291_v35  ;;  %v11984_v8 = vld [vmem:[#allocation5 + $0x90] sm:$0xff]  ;;  %v4100_v21 = vld [vmem:[#allocation12 + $0x3d0] sm:$0xff] }
 0x58d   :  { %5275 = vst [vmem:[#allocation5 + $0x110] sm:$0x1] %v13291_v35  ;;  %5293 = vst [vmem:[#allocation5 + $0xf9] sm:$0x1] %v13291_v35  ;;  %v11989_v47 = vld [vmem:[#allocation5 + $0x92] sm:$0xff]  ;;  %7718 = vmatprep.subr.mxu1 %v4100_v21  ;;  %4219 = vmatmul.mubr.f32.gmra.mxu0 %v11900_v32  ;;  %v4098_v62 = vld [vmem:[#allocation12 + $0x3c0] sm:$0xff] }
 0x58e   :  { %5276 = vst [vmem:[#allocation5 + $0x120] sm:$0x1] %v13291_v35  ;;  %5294 = vst [vmem:[#allocation5 + $0x109] sm:$0x1] %v13291_v35  ;;  %v4084_v54 = vld [vmem:[#allocation12 + $0x350] sm:$0xff]  ;;  %v4099_v57 = vld [vmem:[#allocation12 + $0x3c8] sm:$0xff]  ;;  %4359 = vmatmul.mubr.f32.gmra.mxu1 %v11902_v19  ;;  %4223 = vmatprep.mubr.f32.mxu0 %v11844_v11 }
 0x58f   :  { %5295 = vst [vmem:[#allocation5 + $0x119] sm:$0x1] %v13291_v35  ;;  %5254 = vst [vmem:[#allocation5 + $0x90] sm:$0xff] %v13291_v35  ;;  %7719 = vmatpush3.msra.mxu1 %v4084_v54  ;;  %v4083_v7 = vld [vmem:[#allocation12 + $0x348] sm:$0xff]  ;;  %v4082_v6 = vld [vmem:[#allocation12 + $0x340] sm:$0xff]  ;;  %4363 = vmatprep.mubr.f32.mxu1 %v11908_v26 }
 0x590   :  { %5255 = vst [vmem:[#allocation5 + $0x98] sm:$0x3] %v13291_v35  ;;  %5296 = vst [vmem:[#allocation5 + $0x129] sm:$0x1] %v13291_v35  ;;  %7720 = vmatprep.subr.mxu1 %v4099_v57  ;;  %v4097_v34 = vld [vmem:[#allocation12 + $0x3b8] sm:$0xff]  ;;  %v4096_v54 = vld [vmem:[#allocation12 + $0x3b0] sm:$0xff] }
 0x591   :  { %5267 = vst [vmem:[#allocation5 + $0x90] sm:$0x1] %v13291_v35  ;;  %5287 = vst [vmem:[#allocation5 + $0x99] sm:$0x1] %v13291_v35  ;;  %7721 = vmatpush3.msra.mxu1 %v4083_v7  ;;  %4224 = vmatmul.mubr.f32.gmra.mxu0 %v11908_v26  ;;  %v4081_v21 = vld [vmem:[#allocation12 + $0x338] sm:$0xff]  ;;  %v12009_v57 = vld [vmem:[#allocation5 + $0x131] sm:$0xff] }
 0x592   :  { %7722 = vmatprep.subr.mxu1 %v4098_v62  ;;  %4364 = vmatmul.mubr.f32.gmra.mxu1 %v11910_v14  ;;  %5256 = vst [vmem:[#allocation5 + $0x130] sm:$0xff] %v13291_v35  ;;  %5257 = vst [vmem:[#allocation5 + $0x138] sm:$0x3] %v13291_v35  ;;  %v4080_v7 = vld [vmem:[#allocation12 + $0x330] sm:$0xff]  ;;  %v4095_v62 = vld [vmem:[#allocation12 + $0x3a8] sm:$0xff] }
 0x593   :  { %7723 = vmatpush3.msra.mxu1 %v4082_v6  ;;  %4228 = vmatprep.mubr.f32.mxu0 %v11846_v45  ;;  %5277 = vst [vmem:[#allocation5 + $0x130] sm:$0x1] %v13291_v35  ;;  %5297 = vst [vmem:[#allocation5 + $0x139] sm:$0x1] %v13291_v35  ;;  %v4079_v6 = vld [vmem:[#allocation12 + $0x328] sm:$0xff] }
 0x594   :  { %4368 = vmatprep.mubr.f32.mxu1 %v11912_v63  ;;  %7724 = vmatprep.subr.mxu1 %v4097_v34  ;;  %v4094_v34 = vld [vmem:[#allocation12 + $0x3a0] sm:$0xff] }
 0x595   :  { %7725 = vmatpush3.msra.mxu1 %v4081_v21  ;;  %4229 = vmatmul.mubr.f32.gmra.mxu0 %v11912_v63  ;;  %v4078_v21 = vld [vmem:[#allocation12 + $0x320] sm:$0xff] }
 0x596   :  { %7726 = vmatprep.subr.mxu1 %v4096_v54  ;;  %4369 = vmatmul.mubr.f32.gmra.mxu1 %v11917_v27  ;;  %v4093_v54 = vld [vmem:[#allocation12 + $0x398] sm:$0xff] }
 0x597   :  { %4233 = vmatprep.mubr.f32.mxu0 %v11779_v43  ;;  %4373 = vmatprep.mubr.f32.mxu1 %v11919_v13  ;;  %v4077_v43 = vld [vmem:[#allocation12 + $0x318] sm:$0xff] }
 0x598   :  { %7727 = vmatpush3.msra.mxu1 %v4080_v7  ;;  %v4092_v7 = vld [vmem:[#allocation12 + $0x390] sm:$0xff] }
 0x599   :  { %7728 = vmatprep.subr.mxu1 %v4095_v62  ;;  %4234 = vmatmul.mubr.f32.gmra.mxu0 %v11781_v12  ;;  %v4076_v12 = vld [vmem:[#allocation12 + $0x310] sm:$0xff]  ;;  %v4091_v62 = vld [vmem:[#allocation12 + $0x388] sm:$0xff] }
 0x59a   :  { %7729 = vmatpush3.msra.mxu1 %v4079_v6  ;;  %4238 = vmatprep.mubr.f32.mxu0 %v11859_v55  ;;  %v4075_v6 = vld [vmem:[#allocation12 + $0x308] sm:$0xff] }
 0x59b   :  { %4374 = vmatmul.mubr.f32.gmra.mxu1 %v11921_v3  ;;  %7730 = vmatprep.subr.mxu1 %v4094_v34  ;;  %v4120_v34 = vld [vmem:[#allocation12 + $0x470] sm:$0xff] }
 0x59c   :  { %4378 = vmatprep.mubr.f32.mxu1 %v11934_v59  ;;  %7731 = vmatpush3.msra.mxu1 %v4078_v21  ;;  %v4119_v21 = vld [vmem:[#allocation12 + $0x468] sm:$0xff] }
 0x59d   :  { %4239 = vmatmul.mubr.f32.gmra.mxu0 %v11934_v59  ;;  %7732 = vmatprep.subr.mxu1 %v4093_v54  ;;  %v4090_v59 = vld [vmem:[#allocation12 + $0x380] sm:$0xff] }
 0x59e   :  { %4243 = vmatprep.mubr.f32.mxu0 %v11861_v4  ;;  %7733 = vmatpush3.msra.mxu1 %v4077_v43 }
 0x59f   :  { %4379 = vmatmul.mubr.f32.gmra.mxu1 %v11783_v41  ;;  %7734 = vmatprep.subr.mxu1 %v4092_v7  ;;  %v4074_v41 = vld [vmem:[#allocation12 + $0x300] sm:$0xff] }
 0x5a0   :  { %4383 = vmatprep.mubr.f32.mxu1 %v11936_v2  ;;  %7735 = vmatpush3.msra.mxu1 %v4076_v12 }
 0x5a1   :  { %4244 = vmatmul.mubr.f32.gmra.mxu0 %v11936_v2  ;;  %7736 = vmatprep.subr.mxu1 %v4091_v62 }
 0x5a2   :  { %4248 = vmatprep.mubr.f32.mxu0 %v11863_v61  ;;  %7737 = vmatpush3.msra.mxu1 %v4075_v6 }
 0x5a3   :  { %4384 = vmatmul.mubr.f32.gmra.mxu1 %v11938_v0  ;;  %7738 = vmatprep.subr.mxu1 %v4090_v59 }
 0x5a4   :  { %4388 = vmatprep.mubr.f32.mxu1 %v11943_v38  ;;  %7739 = vmatpush3.msra.mxu1 %v4074_v41 }
 0x5a5   :  { %4249 = vmatmul.mubr.f32.gmra.mxu0 %v11943_v38  ;;  %8550 = vmatprep.subr.mxu1 %v13291_v35 }
 0x5a6   :  { %4253 = vmatprep.mubr.f32.mxu0 %v11865_v56 }
 0x5a7   :  { %4389 = vmatmul.mubr.f32.gmra.mxu1 %v11945_v16 }
 0x5a8   :  { %4393 = vmatprep.mubr.f32.mxu1 %v11947_v23 }
 0x5a9   :  { %4254 = vmatmul.mubr.f32.gmra.mxu0 %v11947_v23 }
 0x5aa   :  { %4258 = vmatprep.mubr.f32.mxu0 %v11867_v28 }
 0x5ab   :  { %4394 = vmatmul.mubr.f32.gmra.mxu1 %v11951_v51 }
 0x5ac   :  { %4398 = vmatprep.mubr.f32.mxu1 %v11953_v30 }
 0x5ad   :  { %4259 = vmatmul.mubr.f32.gmra.mxu0 %v11953_v30 }
 0x5ae   :  { %4263 = vmatprep.mubr.f32.mxu0 %v11869_v42 }
 0x5af   :  { %4399 = vmatmul.mubr.f32.gmra.mxu1 %v11955_v22 }
 0x5b0   :  { %4403 = vmatprep.mubr.f32.mxu1 %v11961_v10 }
 0x5b1   :  { %4264 = vmatmul.mubr.f32.gmra.mxu0 %v11961_v10 }
 0x5b2   :  { %4268 = vmatprep.mubr.f32.mxu0 %v11871_v15 }
 0x5b3   :  { %4404 = vmatmul.mubr.f32.gmra.mxu1 %v11963_v5 }
 0x5b4   :  { %4408 = vmatprep.mubr.f32.mxu1 %v11965_v18 }
 0x5b5   :  { %4269 = vmatmul.mubr.f32.gmra.mxu0 %v11965_v18 }
 0x5b6   :  { %4483 = vmatprep.mubr.f32.mxu0 %v11880_v39  ;;  %v12152_v39 = vld [vmem:[%s13019_s12] ss:$0 sm:$0xff] }
 0x5b7   :  { %4409 = vmatmul.mubr.f32.gmra.mxu1 %v11974_v44 }
 0x5b8   :  { %4413 = vmatprep.mubr.f32.mxu1 %v11976_v37 }
 0x5b9   :  { %4484 = vmatmul.mubr.f32.vlgmr.msra.gmra.mxu0 %v11834_v36  ;;  %v4118_v36 = vld [vmem:[#allocation12 + $0x460] sm:$0xff] }
 0x5ba   :  { %8495 = vmatpush3.msra.mxu0 %v11789_v24  ;;  %4488 = vmatprep.mubr.f32.mxu0 %v11889_v53  ;;  %v4117_v24 = vld [vmem:[#allocation12 + $0x458] sm:$0xff] }
 0x5bb   :  { %4414 = vmatmul.mubr.f32.gmra.mxu1 %v11978_v31  ;;  %8496 = vmatprep.subr.mxu0 %v4120_v34 }
 0x5bc   :  { %4628 = vmatprep.mubr.f32.mxu1 %v11836_v48  ;;  %8497 = vmatpush3.msra.mxu0 %v4120_v34 }
 0x5bd   :  { %4489 = vmatmul.mubr.f32.gmra.mxu0 %v11836_v48  ;;  %8498 = vmatprep.subr.mxu0 %v4119_v21  ;;  %v4116_v48 = vld [vmem:[#allocation12 + $0x450] sm:$0xff] }
 0x5be   :  { %4493 = vmatprep.mubr.f32.mxu0 %v11898_v25  ;;  %8499 = vmatpush3.msra.mxu0 %v4119_v21 }
 0x5bf   :  { %4629 = vmatmul.mubr.f32.vlgmr.msra.gmra.mxu1 %v11878_v60  ;;  %8500 = vmatprep.subr.mxu0 %v4118_v36 }
 0x5c0   :  { %4633 = vmatprep.mubr.f32.mxu1 %v11838_v33  ;;  %8501 = vmatpush3.msra.mxu0 %v4118_v36 }
 0x5c1   :  { %4494 = vmatmul.mubr.f32.gmra.mxu0 %v11838_v33  ;;  %8502 = vmatprep.subr.mxu0 %v4117_v24  ;;  %v4115_v33 = vld [vmem:[#allocation12 + $0x448] sm:$0xff] }
 0x5c2   :  { %4498 = vmatprep.mubr.f32.mxu0 %v11902_v19  ;;  %8503 = vmatpush3.msra.mxu0 %v4117_v24 }
 0x5c3   :  { %4634 = vmatmul.mubr.f32.gmra.mxu1 %v11887_v52  ;;  %8504 = vmatprep.subr.mxu0 %v4116_v48 }
 0x5c4   :  { %4638 = vmatprep.mubr.f32.mxu1 %v11840_v29  ;;  %8505 = vmatpush3.msra.mxu0 %v4116_v48 }
 0x5c5   :  { %4499 = vmatmul.mubr.f32.gmra.mxu0 %v11840_v29  ;;  %8506 = vmatprep.subr.mxu0 %v4115_v33  ;;  %v4114_v29 = vld [vmem:[#allocation12 + $0x440] sm:$0xff] }
 0x5c6   :  { %4503 = vmatprep.mubr.f32.mxu0 %v11910_v14  ;;  %8507 = vmatpush3.msra.mxu0 %v4115_v33 }
 0x5c7   :  { %4639 = vmatmul.mubr.f32.gmra.mxu1 %v11891_v20  ;;  %8508 = vmatprep.subr.mxu0 %v4114_v29 }
 0x5c8   :  { %4643 = vmatprep.mubr.f32.mxu1 %v11842_v49  ;;  %8509 = vmatpush3.msra.mxu0 %v4114_v29 }
 0x5c9   :  { %4504 = vmatmul.mubr.f32.gmra.mxu0 %v11842_v49  ;;  %v4113_v49 = vld [vmem:[#allocation12 + $0x438] sm:$0xff] }
 0x5ca   :  { %4508 = vmatprep.mubr.f32.mxu0 %v11917_v27  ;;  %8510 = vmatprep.subr.mxu0 %v4113_v49 }
 0x5cb   :  { %4644 = vmatmul.mubr.f32.gmra.mxu1 %v11900_v32  ;;  %8511 = vmatpush3.msra.mxu0 %v4113_v49 }
 0x5cc   :  { %4648 = vmatprep.mubr.f32.mxu1 %v11844_v11 }
 0x5cd   :  { %4509 = vmatmul.mubr.f32.gmra.mxu0 %v11844_v11  ;;  %v4112_v11 = vld [vmem:[#allocation12 + $0x430] sm:$0xff] }
 0x5ce   :  { %4513 = vmatprep.mubr.f32.mxu0 %v11921_v3  ;;  %8512 = vmatprep.subr.mxu0 %v4112_v11 }
 0x5cf   :  { %4649 = vmatmul.mubr.f32.gmra.mxu1 %v11908_v26  ;;  %8513 = vmatpush3.msra.mxu0 %v4112_v11 }
 0x5d0   :  { %4653 = vmatprep.mubr.f32.mxu1 %v11846_v45 }
 0x5d1   :  { %4514 = vmatmul.mubr.f32.gmra.mxu0 %v11846_v45  ;;  %v4111_v45 = vld [vmem:[#allocation12 + $0x428] sm:$0xff] }
 0x5d2   :  { %4518 = vmatprep.mubr.f32.mxu0 %v11927_v50  ;;  %8514 = vmatprep.subr.mxu0 %v4111_v45 }
 0x5d3   :  { %4654 = vmatmul.mubr.f32.gmra.mxu1 %v11912_v63  ;;  %8515 = vmatpush3.msra.mxu0 %v4111_v45 }
 0x5d4   :  { %4658 = vmatprep.mubr.f32.mxu1 %v11852_v40 }
 0x5d5   :  { %4519 = vmatmul.mubr.f32.gmra.mxu0 %v11852_v40  ;;  %v4110_v40 = vld [vmem:[#allocation12 + $0x420] sm:$0xff] }
 0x5d6   :  { %4523 = vmatprep.mubr.f32.mxu0 %v11938_v0  ;;  %8516 = vmatprep.subr.mxu0 %v4110_v40 }
 0x5d7   :  { %4659 = vmatmul.mubr.f32.gmra.mxu1 %v11919_v13  ;;  %8517 = vmatpush3.msra.mxu0 %v4110_v40 }
 0x5d8   :  { %4663 = vmatprep.mubr.f32.mxu1 %v11967_v58 }
 0x5d9   :  { %4524 = vmatmul.mubr.f32.gmra.mxu0 %v11859_v55  ;;  %v4109_v55 = vld [vmem:[#allocation12 + $0x418] sm:$0xff] }
 0x5da   :  { %4528 = vmatprep.mubr.f32.mxu0 %v11945_v16  ;;  %8518 = vmatprep.subr.mxu0 %v4109_v55 }
 0x5db   :  { %4664 = vmatmul.mubr.f32.gmra.mxu1 %v11984_v8  ;;  %8519 = vmatpush3.msra.mxu0 %v4109_v55 }
 0x5dc   :  { %4668 = vmatprep.mubr.f32.mxu1 %v11861_v4 }
 0x5dd   :  { %4529 = vmatmul.mubr.f32.gmra.mxu0 %v11861_v4  ;;  %v4108_v4 = vld [vmem:[#allocation12 + $0x410] sm:$0xff] }
 0x5de   :  { %4533 = vmatprep.mubr.f32.mxu0 %v11951_v51  ;;  %8520 = vmatprep.subr.mxu0 %v4108_v4 }
 0x5df   :  { %4669 = vmatmul.mubr.f32.gmra.mxu1 %v11936_v2  ;;  %8521 = vmatpush3.msra.mxu0 %v4108_v4 }
 0x5e0   :  { %4673 = vmatprep.mubr.f32.mxu1 %v11863_v61 }
 0x5e1   :  { %4534 = vmatmul.mubr.f32.gmra.mxu0 %v11863_v61  ;;  %v4107_v61 = vld [vmem:[#allocation12 + $0x408] sm:$0xff] }
 0x5e2   :  { %4538 = vmatprep.mubr.f32.mxu0 %v11955_v22  ;;  %8522 = vmatprep.subr.mxu0 %v4107_v61 }
 0x5e3   :  { %4674 = vmatmul.mubr.f32.gmra.mxu1 %v11943_v38  ;;  %8523 = vmatpush3.msra.mxu0 %v4107_v61 }
 0x5e4   :  { %4678 = vmatprep.mubr.f32.mxu1 %v11865_v56 }
 0x5e5   :  { %4539 = vmatmul.mubr.f32.gmra.mxu0 %v11865_v56  ;;  %v4106_v56 = vld [vmem:[#allocation12 + $0x400] sm:$0xff] }
 0x5e6   :  { %4543 = vmatprep.mubr.f32.mxu0 %v11963_v5  ;;  %8524 = vmatprep.subr.mxu0 %v4106_v56 }
 0x5e7   :  { %4679 = vmatmul.mubr.f32.gmra.mxu1 %v11947_v23  ;;  %8525 = vmatpush3.msra.mxu0 %v4106_v56 }
 0x5e8   :  { %4683 = vmatprep.mubr.f32.mxu1 %v11867_v28  ;;  %8585 = vmatprep.subr.mxu0 %v13291_v35 }
 0x5e9   :  { %4544 = vmatmul.mubr.f32.gmra.mxu0 %v11867_v28  ;;  %v4952_v28 = vld [vmem:[#allocation7 + $0x70] sm:$0xff] }
 0x5ea   :  { %4548 = vmatprep.mubr.f32.mxu0 %v11974_v44 }
 0x5eb   :  { %4684 = vmatmul.mubr.f32.gmra.mxu1 %v11953_v30 }
 0x5ec   :  { %4688 = vmatprep.mubr.f32.mxu1 %v11869_v42 }
 0x5ed   :  { %4549 = vmatmul.mubr.f32.gmra.mxu0 %v11869_v42  ;;  %v7500_v42 = vpop.f32.mrf.mxu0 }
 0x5ee   :  { %4553 = vmatprep.mubr.f32.mxu0 %v11978_v31 }
 0x5ef   :  { %4689 = vmatmul.mubr.f32.gmra.mxu1 %v11961_v10 }
 0x5f0   :  { %4693 = vmatprep.mubr.f32.mxu1 %v11871_v15 }
 0x5f1   :  { %4554 = vmatmul.mubr.f32.gmra.mxu0 %v11871_v15  ;;  %v4951_v15 = vld [vmem:[#allocation7 + $0x68] sm:$0xff] }
 0x5f2   :  { %4558 = vmatprep.mubr.f32.mxu0 %v11986_v9 }
 0x5f3   :  { %4694 = vmatmul.mubr.f32.gmra.mxu1 %v11965_v18 }
 0x5f4   :  { %4698 = vmatprep.mubr.f32.mxu1 %v11876_v17 }
 0x5f5   :  { %4559 = vmatmul.mubr.f32.gmra.mxu0 %v11876_v17 }
 0x5f6   :  { %8526 = vmatprep.mubr.f32.mxu0 %v11889_v53  ;;  %v4950_v53 = vld [vmem:[#allocation7 + $0x60] sm:$0xff] }
 0x5f7   :  { %4699 = vmatmul.mubr.f32.gmra.mxu1 %v11976_v37 }
 0x5f8   :  { %4703 = vmatprep.mubr.f32.mxu1 %v12009_v57 }
 0x5f9   :  { %8527 = vmatmul.mubr.f32.vlgmr.msra.gmra.mxu0 %v11898_v25 }
 0x5fa   :  { %8529 = vmatprep.mubr.f32.mxu0 %v11902_v19 }
 0x5fb   :  { %4704 = vmatmul.mubr.f32.gmra.mxu1 %v12011_v1  ;;  %v4953_v1 = vld [vmem:[#allocation7 + $0x78] sm:$0xff] }
 0x5fc   :  { %8582 = vmatprep.mubr.msk.f32.mxu1 %vm8880_vm4, %v13291_v35  ;;  %8551 = vmatpush3.msra.mxu1 %v4953_v1 }
 0x5fd   :  { %8530 = vmatmul.mubr.f32.gmra.mxu0 %v11910_v14  ;;  %8552 = vmatprep.subr.mxu1 %v13291_v35 }
 0x5fe   :  { %8532 = vmatprep.mubr.f32.mxu0 %v11917_v27  ;;  %8586 = vmatpush3.msra.mxu0 %v4953_v1  ;;  %v4949_v27 = vld [vmem:[#allocation7 + $0x58] sm:$0xff]  ;;  %v4946_v1 = vld [vmem:[#allocation7 + $0x40] sm:$0xff] }
 0x5ff   :  { %8587 = vmatprep.subr.mxu0 %v13291_v35  ;;  %8553 = vmatpush3.msra.mxu1 %v4952_v28 }
 0x600   :  { %8588 = vmatpush3.msra.mxu0 %v4952_v28  ;;  %8554 = vmatprep.subr.mxu1 %v13291_v35  ;;  %v4945_v28 = vld [vmem:[#allocation7 + $0x38] sm:$0xff] }
 0x601   :  { %8533 = vmatmul.mubr.f32.gmra.mxu0 %v11921_v3  ;;  %8589 = vmatprep.subr.mxu0 %v13291_v35 }
 0x602   :  { %8535 = vmatprep.mubr.f32.mxu0 %v11927_v50  ;;  %8555 = vmatpush3.msra.mxu1 %v4951_v15 }
 0x603   :  { %8590 = vmatpush3.msra.mxu0 %v4951_v15  ;;  %8556 = vmatprep.subr.mxu1 %v13291_v35 }
 0x604   :  { %8591 = vmatprep.subr.mxu0 %v13291_v35  ;;  %8557 = vmatpush3.msra.mxu1 %v4950_v53 }
 0x605   :  { %8536 = vmatmul.mubr.f32.gmra.mxu0 %v11989_v47  ;;  %8558 = vmatprep.subr.mxu1 %v13291_v35 }
 0x606   :  { %8538 = vmatprep.mubr.f32.mxu0 %v11945_v16  ;;  %8592 = vmatpush3.msra.mxu0 %v4950_v53 }
 0x607   :  { %8593 = vmatprep.subr.mxu0 %v13291_v35  ;;  %8559 = vmatpush3.msra.mxu1 %v4949_v27 }
 0x608   :  { %8594 = vmatpush3.msra.mxu0 %v4949_v27  ;;  %8560 = vmatprep.subr.mxu1 %v13291_v35 }
 0x609   :  { %8539 = vmatmul.mubr.f32.gmra.mxu0 %v11951_v51  ;;  %8595 = vmatprep.subr.mxu0 %v13291_v35  ;;  %v4948_v51 = vld [vmem:[#allocation7 + $0x50] sm:$0xff] }
 0x60a   :  { %8541 = vmatprep.mubr.f32.mxu0 %v11955_v22  ;;  %8561 = vmatpush3.msra.mxu1 %v4948_v51 }
 0x60b   :  { %8596 = vmatpush3.msra.mxu0 %v4948_v51  ;;  %8562 = vmatprep.subr.mxu1 %v13291_v35 }
 0x60c   :  { %8597 = vmatprep.subr.mxu0 %v13291_v35 }
 0x60d   :  { %8542 = vmatmul.mubr.f32.gmra.mxu0 %v11963_v5 }
 0x60e   :  { %8544 = vmatprep.mubr.f32.mxu0 %v11974_v44 }
 0x611   :  { %8545 = vmatmul.mubr.f32.gmra.mxu0 %v11978_v31 }
 0x612   :  { %8547 = vmatprep.mubr.f32.mxu0 %v11986_v9  ;;  %v4947_v9 = vld [vmem:[#allocation7 + $0x48] sm:$0xff] }
 0x613   :  { %8563 = vmatpush3.msra.mxu1 %v4947_v9  ;;  %8598 = vmatpush3.msra.mxu0 %v4947_v9 }
 0x614   :  { %8564 = vmatprep.subr.mxu1 %v13291_v35  ;;  %8599 = vmatprep.subr.mxu0 %v13291_v35 }
 0x615   :  { %8548 = vmatmul.mubr.f32.gmra.mxu0 %v12013_v46  ;;  %v7501_v46 = vpop.f32.mrf.mxu0  ;;  %8565 = vmatpush3.msra.mxu1 %v4946_v1 }
 0x616   :  { %8617 = vmatprep.mubr.msk.f32.mxu0 %vm8880_vm4, %v13291_v35  ;;  %v7502_v17 = vadd.f32 %v7501_v46, %v7500_v42  ;;  %8600 = vmatpush3.msra.mxu0 %v4946_v1 }
 0x617   :  { %8566 = vmatprep.subr.mxu1 %v13291_v35  ;;  %8601 = vmatprep.subr.mxu0 %v13291_v35 }
 0x618   :  { %v4196_v32 = vadd.f32 %v7502_v17, %v12152_v39  ;;  %8567 = vmatpush3.msra.mxu1 %v4945_v28  ;;  %8602 = vmatpush3.msra.mxu0 %v4945_v28 }
 0x619   :  { %8568 = vmatprep.subr.mxu1 %v13291_v35  ;;  %8603 = vmatprep.subr.mxu0 %v13291_v35 }
 0x63d   :  { %v7503_v60 = vpop.f32.mrf.mxu0 }
 0x63e   :  { %v7580_v52 = vpop.f32.mrf.mxu1 }
 0x63f   :  { %v7504_v20 = vpop.f32.mrf.mxu0 }
 0x640   :  { %v7581_v25 = vpop.f32.mrf.mxu1  ;;  %v7505_v19 = vadd.f32 %v7504_v20, %v7503_v60 }
 0x641   :  { %v7582_v26 = vadd.f32 %v7581_v25, %v7580_v52  ;;  %v7506_v14 = vpop.f32.mrf.mxu0  ;;  %v4944_v52 = vld [vmem:[#allocation7 + $0x30] sm:$0xff] }
 0x642   :  { %v7583_v63 = vpop.f32.mrf.mxu1  ;;  %v4201_v2 = vadd.f32 %v7505_v19, %v12152_v39  ;;  %8569 = vmatpush3.msra.mxu1 %v4944_v52  ;;  %8604 = vmatpush3.msra.mxu0 %v4944_v52 }
 0x643   :  { %v12157_v13 = vadd.f32 %v7582_v26, %v4196_v32  ;;  %v7507_v3 = vpop.f32.mrf.mxu0  ;;  %v4943_v32 = vld [vmem:[#allocation7 + $0x28] sm:$0xff]  ;;  %8570 = vmatprep.subr.mxu1 %v13291_v35  ;;  %8605 = vmatprep.subr.mxu0 %v13291_v35 }
 0x644   :  { %v7584_v50 = vpop.f32.mrf.mxu1  ;;  %v7508_v0 = vadd.f32 %v7507_v3, %v7506_v14  ;;  %8571 = vmatpush3.msra.mxu1 %v4943_v32  ;;  %8606 = vmatpush3.msra.mxu0 %v4943_v32 }
 0x645   :  { %v7585_v38 = vadd.f32 %v7584_v50, %v7583_v63  ;;  %v7509_v16 = vpop.f32.mrf.mxu0  ;;  %8572 = vmatprep.subr.mxu1 %v13291_v35  ;;  %8607 = vmatprep.subr.mxu0 %v13291_v35 }
 0x646   :  { %v7586_v23 = vpop.f32.mrf.mxu1  ;;  %v4206_v5 = vadd.f32 %v7508_v0, %v12152_v39 }
 0x647   :  { %v12162_v30 = vadd.f32 %v7585_v38, %v4201_v2  ;;  %v7510_v22 = vpop.f32.mrf.mxu0 }
 0x648   :  { %v7587_v10 = vpop.f32.mrf.mxu1  ;;  %v7511_v18 = vadd.f32 %v7510_v22, %v7509_v16 }
 0x649   :  { %v7588_v58 = vadd.f32 %v7587_v10, %v7586_v23  ;;  %v7512_v44 = vpop.f32.mrf.mxu0 }
 0x64a   :  { %v7589_v37 = vpop.f32.mrf.mxu1  ;;  %v4211_v57 = vadd.f32 %v7511_v18, %v12152_v39 }
 0x64b   :  { %v12167_v31 = vadd.f32 %v7588_v58, %v4206_v5  ;;  %v7513_v8 = vpop.f32.mrf.mxu0 }
 0x64c   :  { %v7590_v47 = vpop.f32.mrf.mxu1  ;;  %v7514_v54 = vadd.f32 %v7513_v8, %v7512_v44 }
 0x64d   :  { %v7591_v43 = vadd.f32 %v7590_v47, %v7589_v37  ;;  %v7515_v7 = vpop.f32.mrf.mxu0 }
 0x64e   :  { %v7592_v12 = vpop.f32.mrf.mxu1  ;;  %v4216_v41 = vadd.f32 %v7514_v54, %v12152_v39 }
 0x64f   :  { %v12172_v62 = vadd.f32 %v7591_v43, %v4211_v57  ;;  %v7516_v6 = vpop.f32.mrf.mxu0 }
 0x650   :  { %v7593_v59 = vpop.f32.mrf.mxu1  ;;  %v7517_v34 = vadd.f32 %v7516_v6, %v7515_v7  ;;  %v4942_v6 = vld [vmem:[#allocation7 + $0x20] sm:$0xff] }
 0x651   :  { %v7594_v21 = vadd.f32 %v7593_v59, %v7592_v12  ;;  %v7518_v36 = vpop.f32.mrf.mxu0  ;;  %v4941_v59 = vld [vmem:[#allocation7 + $0x18] sm:$0xff]  ;;  %8573 = vmatpush3.msra.mxu1 %v4942_v6  ;;  %8608 = vmatpush3.msra.mxu0 %v4942_v6 }
 0x652   :  { %v7595_v24 = vpop.f32.mrf.mxu1  ;;  %v4221_v49 = vadd.f32 %v7517_v34, %v12152_v39  ;;  %8574 = vmatprep.subr.mxu1 %v13291_v35  ;;  %8609 = vmatprep.subr.mxu0 %v13291_v35 }
 0x653   :  { %v12175_v48 = vadd.f32 %v7594_v21, %v4216_v41  ;;  %v7519_v33 = vpop.f32.mrf.mxu0  ;;  %8575 = vmatpush3.msra.mxu1 %v4941_v59  ;;  %8610 = vmatpush3.msra.mxu0 %v4941_v59 }
 0x654   :  { %v7596_v29 = vpop.f32.mrf.mxu1  ;;  %v7520_v11 = vadd.f32 %v7519_v33, %v7518_v36  ;;  %v4940_v36 = vld [vmem:[#allocation7 + $0x10] sm:$0xff]  ;;  %8576 = vmatprep.subr.mxu1 %v13291_v35  ;;  %8611 = vmatprep.subr.mxu0 %v13291_v35 }
 0x655   :  { %v7597_v45 = vadd.f32 %v7596_v29, %v7595_v24  ;;  %v7521_v40 = vpop.f32.mrf.mxu0  ;;  %8577 = vmatpush3.msra.mxu1 %v4940_v36  ;;  %8612 = vmatpush3.msra.mxu0 %v4940_v36 }
 0x656   :  { %v7598_v55 = vpop.f32.mrf.mxu1  ;;  %v4226_v42 = vadd.f32 %v7520_v11, %v12152_v39  ;;  %8578 = vmatprep.subr.mxu1 %v13291_v35  ;;  %8613 = vmatprep.subr.mxu0 %v13291_v35 }
 0x657   :  { %v12178_v4 = vadd.f32 %v7597_v45, %v4221_v49  ;;  %v7522_v61 = vpop.f32.mrf.mxu0  ;;  %v4939_v45 = vld [vmem:[#allocation7 + $0x8] sm:$0xff] }
 0x658   :  { %v7599_v56 = vpop.f32.mrf.mxu1  ;;  %v7523_v15 = vadd.f32 %v7522_v61, %v7521_v40  ;;  %8579 = vmatpush3.msra.mxu1 %v4939_v45  ;;  %8614 = vmatpush3.msra.mxu0 %v4939_v45 }
 0x659   :  { %v7600_v46 = vadd.f32 %v7599_v56, %v7598_v55  ;;  %v7524_v17 = vpop.f32.mrf.mxu0  ;;  %v4938_v56 = vld [vmem:[#allocation7] sm:$0xff]  ;;  %8580 = vmatprep.subr.mxu1 %v13291_v35  ;;  %8615 = vmatprep.subr.mxu0 %v13291_v35 }
 0x65a   :  { %v4231_v19 = vadd.f32 %v7523_v15, %v12152_v39  ;;  %8581 = vmatpush3.msra.mxu1 %v4938_v56  ;;  %8616 = vmatpush3.msra.mxu0 %v4938_v56 }
 0x65b   :  { %v7601_v60 = vpop.f32.mrf.mxu1  ;;  %v12183_v53 = vadd.f32 %v7600_v46, %v4226_v42  ;;  %v7525_v20 = vpop.f32.mrf.mxu0 }
 0x65c   :  { %v7526_v26 = vadd.f32 %v7525_v20, %v7524_v17 }
 0x65d   :  { %v7602_v25 = vpop.f32.mrf.mxu1  ;;  %v7527_v63 = vpop.f32.mrf.mxu0 }
 0x65e   :  { %v7603_v14 = vadd.f32 %v7602_v25, %v7601_v60  ;;  %v4236_v0 = vadd.f32 %v7526_v26, %v12152_v39 }
 0x65f   :  { %v7604_v27 = vpop.f32.mrf.mxu1  ;;  %v7528_v50 = vpop.f32.mrf.mxu0 }
 0x660   :  { %v12190_v3 = vadd.f32 %v7603_v14, %v4231_v19  ;;  %v7529_v38 = vadd.f32 %v7528_v50, %v7527_v63 }
 0x661   :  { %v7605_v2 = vpop.f32.mrf.mxu1  ;;  %v7530_v23 = vpop.f32.mrf.mxu0 }
 0x662   :  { %v7606_v16 = vadd.f32 %v7605_v2, %v7604_v27  ;;  %v4241_v18 = vadd.f32 %v7529_v38, %v12152_v39 }
 0x663   :  { %v7607_v51 = vpop.f32.mrf.mxu1  ;;  %v7531_v10 = vpop.f32.mrf.mxu0 }
 0x664   :  { %v12195_v22 = vadd.f32 %v7606_v16, %v4236_v0  ;;  %v7532_v58 = vadd.f32 %v7531_v10, %v7530_v23 }
 0x665   :  { %v7608_v5 = vpop.f32.mrf.mxu1  ;;  %v7533_v37 = vpop.f32.mrf.mxu0 }
 0x666   :  { %v7609_v44 = vadd.f32 %v7608_v5, %v7607_v51  ;;  %v4246_v54 = vadd.f32 %v7532_v58, %v12152_v39 }
 0x667   :  { %v7610_v8 = vpop.f32.mrf.mxu1  ;;  %v7534_v47 = vpop.f32.mrf.mxu0 }
 0x668   :  { %v12198_v9 = vadd.f32 %v7609_v44, %v4241_v18  ;;  %v7535_v43 = vadd.f32 %v7534_v47, %v7533_v37 }
 0x669   :  { %v7611_v57 = vpop.f32.mrf.mxu1  ;;  %v7536_v12 = vpop.f32.mrf.mxu0 }
 0x66a   :  { %v7612_v7 = vadd.f32 %v7611_v57, %v7610_v8  ;;  %v4251_v33 = vadd.f32 %v7535_v43, %v12152_v39 }
 0x66b   :  { %v7613_v41 = vpop.f32.mrf.mxu1  ;;  %v7537_v21 = vpop.f32.mrf.mxu0 }
 0x66c   :  { %v12201_v34 = vadd.f32 %v7612_v7, %v4246_v54  ;;  %v7538_v29 = vadd.f32 %v7537_v21, %v7536_v12 }
 0x66d   :  { %v7614_v24 = vpop.f32.mrf.mxu1  ;;  %v7539_v11 = vpop.f32.mrf.mxu0 }
 0x66e   :  { %v7615_v49 = vadd.f32 %v7614_v24, %v7613_v41  ;;  %v4256_v28 = vadd.f32 %v7538_v29, %v12152_v39 }
 0x66f   :  { %v7616_v40 = vpop.f32.mrf.mxu1  ;;  %v7540_v61 = vpop.f32.mrf.mxu0 }
 0x670   :  { %v12208_v55 = vadd.f32 %v7615_v49, %v4251_v33  ;;  %v7541_v42 = vadd.f32 %v7540_v61, %v7539_v11 }
 0x671   :  { %v7617_v1 = vpop.f32.mrf.mxu1  ;;  %v7542_v46 = vpop.f32.mrf.mxu0 }
 0x672   :  { %v7618_v15 = vadd.f32 %v7617_v1, %v7616_v40  ;;  %v4261_v25 = vadd.f32 %v7541_v42, %v12152_v39 }
 0x673   :  { %v7619_v17 = vpop.f32.mrf.mxu1  ;;  %v7543_v52 = vpop.f32.mrf.mxu0 }
 0x674   :  { %v12215_v60 = vadd.f32 %v7618_v15, %v4256_v28  ;;  %v7544_v32 = vadd.f32 %v7543_v52, %v7542_v46 }
 0x675   :  { %v7620_v20 = vpop.f32.mrf.mxu1  ;;  %v12218_v26 = vpop.f32.mrf.mxu0 }
 0x676   :  { %13294 = vst [vmem:[#allocation41_spill] sm:$0xff] %v12215_v60  ;;  %v7621_v19 = vadd.f32 %v7620_v20, %v7619_v17  ;;  %v4266_v2 = vadd.f32 %v7544_v32, %v12152_v39 }
 0x677   :  { %v7622_v14 = vpop.f32.mrf.mxu1  ;;  %v12222_v27 = vpop.f32.mrf.mxu0 }
 0x678   :  { %v12220_v63 = vadd.f32 %v7621_v19, %v4261_v25 }
 0x679   :  { %v7623_v50 = vpop.f32.mrf.mxu1  ;;  %v7660_v38 = vpop.f32.mrf.mxu0 }
 0x67a   :  { %13295 = vst [vmem:[#allocation40_spill] sm:$0xff] %v12220_v63  ;;  %v7624_v0 = vadd.f32 %v7623_v50, %v7622_v14 }
 0x67b   :  { %v12225_v16 = vpop.f32.mrf.mxu1  ;;  %v7661_v51 = vpop.f32.mrf.mxu0 }
 0x67c   :  { %v12227_v23 = vadd.f32 %v7624_v0, %v4266_v2  ;;  %v7662_v5 = vadd.f32 %v7661_v51, %v7660_v38 }
 0x67d   :  { %v12229_v10 = vpop.f32.mrf.mxu1  ;;  %v7663_v18 = vpop.f32.mrf.mxu0 }
 0x67e   :  { %13296 = vst [vmem:[#allocation43_spill] sm:$0xff] %v12227_v23  ;;  %v12232_v58 = vadd.f32 %v7662_v5, %v12157_v13 }
 0x67f   :  { %v12234_v44 = vpop.f32.mrf.mxu1  ;;  %v7664_v37 = vpop.f32.mrf.mxu0 }
 0x680   :  { %v7665_v8 = vadd.f32 %v7664_v37, %v7663_v18 }
 0x681   :  { %v12236_v47 = vpop.f32.mrf.mxu1  ;;  %v7666_v57 = vpop.f32.mrf.mxu0 }
 0x682   :  { %v12239_v54 = vadd.f32 %v7665_v8, %v12162_v30  ;;  %v7742_v35 = vadd.f32 %v12236_v47, %v12234_v44 }
 0x683   :  { %v7743_v43 = vpop.f32.mrf.mxu1  ;;  %v7667_v7 = vpop.f32.mrf.mxu0 }
 0x684   :  { %v7668_v12 = vadd.f32 %v7667_v7, %v7666_v57 }
 0x685   :  { %v7744_v6 = vpop.f32.mrf.mxu1  ;;  %v7669_v59 = vpop.f32.mrf.mxu0 }
 0x686   :  { %v12242_v41 = vadd.f32 %v7668_v12, %v12167_v31 }
 0x687   :  { %v7746_v13 = vpop.f32.mrf.mxu1  ;;  %v7670_v21 = vpop.f32.mrf.mxu0 }
 0x688   :  { %v7671_v36 = vadd.f32 %v7670_v21, %v7669_v59 }
 0x689   :  { %v7747_v24 = vpop.f32.mrf.mxu1  ;;  %v7672_v33 = vpop.f32.mrf.mxu0 }
 0x68a   :  { %v12245_v29 = vadd.f32 %v7671_v36, %v12172_v62 }
 0x68b   :  { %v7749_v49 = vpop.f32.mrf.mxu1  ;;  %v7673_v11 = vpop.f32.mrf.mxu0 }
 0x68c   :  { %v7674_v30 = vadd.f32 %v7673_v11, %v7672_v33 }
 0x68d   :  { %v7750_v45 = vpop.f32.mrf.mxu1  ;;  %v7675_v40 = vpop.f32.mrf.mxu0 }
 0x68e   :  { %v12248_v61 = vadd.f32 %v7674_v30, %v12175_v48  ;;  %v7751_v60 = vadd.f32 %v7750_v45, %v7749_v49 }
 0x68f   :  { %v7752_v56 = vpop.f32.mrf.mxu1  ;;  %v7676_v1 = vpop.f32.mrf.mxu0 }
 0x690   :  { %v7677_v31 = vadd.f32 %v7676_v1, %v7675_v40  ;;  %v4646_v47 = vadd.f32 %v7751_v60, %v12245_v29  ;;  %v7627_v60 = vadd.f32 %v12229_v10, %v12225_v16 }
 0x691   :  { %v7753_v28 = vpop.f32.mrf.mxu1  ;;  %v7678_v42 = vpop.f32.mrf.mxu0 }
 0x692   :  { %v12251_v15 = vadd.f32 %v7677_v31, %v12178_v4 }
 0x693   :  { %v7755_v46 = vpop.f32.mrf.mxu1  ;;  %v7679_v17 = vpop.f32.mrf.mxu0 }
 0x694   :  { %v7680_v62 = vadd.f32 %v7679_v17, %v7678_v42  ;;  %v7745_v17 = vadd.f32 %v7744_v6, %v7743_v43  ;;  %v7547_v43 = vadd.f32 %v12222_v27, %v12218_v26 }
 0x695   :  { %v7756_v52 = vpop.f32.mrf.mxu1  ;;  %v7681_v20 = vpop.f32.mrf.mxu0 }
 0x696   :  { %v12254_v25 = vadd.f32 %v7680_v62, %v12183_v53  ;;  %v4271_v26 = vadd.f32 %v7547_v43, %v12152_v39 }
 0x697   :  { %v7758_v32 = vpop.f32.mrf.mxu1  ;;  %v7682_v19 = vpop.f32.mrf.mxu0 }
 0x699   :  { %v7759_v48 = vpop.f32.mrf.mxu1  ;;  %v7684_v14 = vpop.f32.mrf.mxu0 }
 0x69a   :  { %v7760_v49 = vadd.f32 %v7759_v48, %v7758_v32 }
 0x69b   :  { %v7761_v50 = vpop.f32.mrf.mxu1  ;;  %v7685_v2 = vpop.f32.mrf.mxu0 }
 0x69c   :  { %v7686_v27 = vadd.f32 %v7685_v2, %v7684_v14  ;;  %v4661_v39 = vadd.f32 %v7760_v49, %v12254_v25 }
 0x69d   :  { %v7762_v0 = vpop.f32.mrf.mxu1  ;;  %v7687_v38 = vpop.f32.mrf.mxu0 }
 0x69f   :  { %v12256_v51 = vpop.f32.mrf.mxu1  ;;  %v7688_v4 = vpop.f32.mrf.mxu0 }
 0x6a1   :  { %v12258_v5 = vpop.f32.mrf.mxu1  ;;  %v12260_v18 = vpop.f32.mrf.mxu0 }
 0x6a3   :  { %v7767_v37 = vpop.f32.mrf.mxu1  ;;  %v12262_v8 = vpop.f32.mrf.mxu0 }
 0x6a5   :  { %v7768_v53 = vpop.f32.mrf.mxu1  ;;  %v12264_v57 = vpop.f32.mrf.mxu0 }
 0x6a7   :  { %v12266_v7 = vpop.f32.mrf.mxu1  ;;  %v12268_v12 = vpop.f32.mrf.mxu0 }
 0x6a9   :  { %v12270_v59 = vpop.f32.mrf.mxu1  ;;  %v12272_v21 = vpop.f32.mrf.mxu0 }
 0x6ab   :  { %v12274_v36 = vpop.f32.mrf.mxu1  ;;  %v12276_v33 = vpop.f32.mrf.mxu0 }
 0x6ac   :  { %13297 = vst [vmem:[#allocation42_spill] sm:$0xff] %v12276_v33  ;;  %v7748_v33 = vadd.f32 %v7747_v24, %v7746_v13 }
 0x6ad   :  { %v12278_v11 = vpop.f32.mrf.mxu0  ;;  %v12280_v30 = vpop.f32.mrf.mxu1 }
 0x6ae   :  { %13298 = vst [vmem:[#allocation21_spill] sm:$0xff] %v12278_v11  ;;  %v4636_v11 = vadd.f32 %v7745_v17, %v12239_v54 }
 0x6af   :  { %v12282_v40 = vpop.f32.mrf.mxu0  ;;  %v12286_v31 = vpop.f32.mrf.mxu1 }
 0x6b0   :  { %13299 = vst [vmem:[#allocation20_spill] sm:$0xff] %v12282_v40  ;;  %13301 = vst [vmem:[#allocation22_spill] sm:$0xff] %v12286_v31 }
 0x6b1   :  { %v12284_v1 = vpop.f32.mrf.mxu0  ;;  %v12294_v23 = vpop.f32.mrf.mxu1 }
 0x6b2   :  { %13300 = vst [vmem:[#allocation23_spill] sm:$0xff] %v12284_v1  ;;  %13304 = vst [vmem:[#allocation27_spill] sm:$0xff] %v12294_v23  ;;  %v7757_v23 = vadd.f32 %v7756_v52, %v7755_v46 }
 0x6b3   :  { %v12288_v42 = vpop.f32.mrf.mxu0  ;;  %v12299_v1 = vpop.f32.mrf.mxu1 }
 0x6b4   :  { %13302 = vst [vmem:[#allocation25_spill] sm:$0xff] %v12288_v42  ;;  %v4631_v42 = vadd.f32 %v7742_v35, %v12232_v58  ;;  %v4641_v35 = vadd.f32 %v7748_v33, %v12242_v41  ;;  %v7763_v58 = vadd.f32 %v7762_v0, %v7761_v50  ;;  %v4656_v32 = vadd.f32 %v7757_v23, %v12251_v15 }
 0x6b5   :  { %v12290_v62 = vpop.f32.mrf.mxu0  ;;  %v12305_v54 = vpop.f32.mrf.mxu1  ;;  %v7692_v33 = vadd.f32 %v12262_v8, %v12260_v18 }
 0x6b6   :  { %13303 = vst [vmem:[#allocation24_spill] sm:$0xff] %v12290_v62  ;;  %v7754_v62 = vadd.f32 %v7753_v28, %v7752_v56 }
 0x6b7   :  { %v12296_v63 = vpop.f32.mrf.mxu0 }
 0x6b8   :  { %13305 = vst [vmem:[#allocation33_spill] sm:$0xff] %v12296_v63  ;;  %v7683_v63 = vadd.f32 %v7682_v19, %v7681_v20  ;;  %v4651_v46 = vadd.f32 %v7754_v62, %v12248_v61  ;;  %v7689_v20 = vadd.f32 %v7688_v4, %v7687_v38  ;;  %v12321_v19 = vpop.f32.mrf.mxu1  ;;  %v7766_v4 = vadd.f32 %v12258_v5, %v12256_v51 }
 0x6b9   :  { %v8528_v40 = vpop.f32.mrf.mxu0  ;;  %v7775_v51 = vadd.f32 %v12280_v30, %v12274_v36  ;;  %v13308_v36 = vld [vmem:[#allocation20_spill] sm:$0xff] }
 0x6ba   :  { %v4781_v31 = vadd.f32 %v8528_v40, %v4636_v11  ;;  %v4521_v52 = vadd.f32 %v7683_v63, %v12190_v3  ;;  %v4526_v3 = vadd.f32 %v7686_v27, %v12195_v22  ;;  %v7769_v63 = vadd.f32 %v7768_v53, %v7767_v37  ;;  %v7783_v53 = vpop.f32.mrf.mxu1 }
 0x6bb   :  { %v4775_v6 = vpop.f32.mrf.mxu0  ;;  %v4531_v38 = vadd.f32 %v7689_v20, %v12198_v9  ;;  %v7695_v22 = vadd.f32 %v12268_v12, %v12264_v57  ;;  %v7772_v9 = vadd.f32 %v12270_v59, %v12266_v7  ;;  %v13306_v7 = vld [vmem:[#allocation42_spill] sm:$0xff]  ;;  %v7781_v20 = vadd.f32 %v12305_v54, %v12299_v1  ;;  %v13314_v1 = vld [vmem:[#allocation25_spill] sm:$0xff] }
 0x6bc   :  { %v4776_v44 = vadd.f32 %v4775_v6, %v4631_v42  ;;  %v12307_v13 = vmax.f32 %v4781_v31, 0.0  ;;  %v4666_v15 = vadd.f32 %v7763_v58, %v4521_v52  ;;  %v4536_v6 = vadd.f32 %v7692_v33, %v12201_v34 }
 0x6bd   :  { %v8531_v45 = vpop.f32.mrf.mxu0  ;;  %v4676_v8 = vadd.f32 %v7769_v63, %v4531_v38  ;;  %v7698_v59 = vadd.f32 %v13306_v7, %v12272_v21  ;;  %v13310_v21 = vld [vmem:[#allocation27_spill] sm:$0xff]  ;;  %v13311_v63 = vld [vmem:[#allocation41_spill] sm:$0xff] }
 0x6be   :  { %v12309_v24 = vmax.f32 %v4776_v44, 0.0  ;;  %v4791_v11 = vadd.f32 %v8531_v45, %v4646_v47  ;;  %v4897_v48 = vmul.f32 %v12307_v13, %v12307_v13  ;;  %v4541_v44 = vadd.f32 %v7695_v22, %v12208_v55  ;;  %v13307_v47 = vld [vmem:[#allocation21_spill] sm:$0xff]  ;;  %v7785_v45 = vpop.f32.mrf.mxu1 }
 0x6bf   :  { %v4785_v56 = vpop.f32.mrf.mxu0  ;;  %v7701_v30 = vadd.f32 %v13308_v36, %v13307_v47  ;;  %v4671_v55 = vadd.f32 %v7766_v4, %v4526_v3  ;;  %v13312_v3 = vld [vmem:[#allocation40_spill] sm:$0xff]  ;;  %v13316_v38 = vld [vmem:[#allocation33_spill] sm:$0xff] }
 0x6c0   :  { %v4896_v29 = vmul.f32 %v12309_v24, %v12309_v24  ;;  %v4786_v28 = vadd.f32 %v4785_v56, %v4641_v35  ;;  %v4870_v16 = vadd.f32 %v12307_v13, %v12309_v24  ;;  %v12327_v10 = vmax.f32 %v4791_v11, 0.0 }
 0x6c1   :  { %v8534_v41 = vpop.f32.mrf.mxu0  ;;  %v4416_v56 = vadd.f32 %v7627_v60, %v4271_v26 }
 0x6c2   :  { %v12329_v14 = vmax.f32 %v4786_v28, 0.0  ;;  %v4801_v61 = vadd.f32 %v8534_v41, %v4656_v32  ;;  %v4912_v50 = vadd.f32 %v4897_v48, %v4896_v29  ;;  %v4899_v40 = vmul.f32 %v12327_v10, %v12327_v10 }
 0x6c3   :  { %v4795_v23 = vpop.f32.mrf.mxu0  ;;  %v4686_v32 = vadd.f32 %v7775_v51, %v4541_v44  ;;  %v4681_v41 = vadd.f32 %v7772_v9, %v4536_v6 }
 0x6c4   :  { %v4871_v25 = vadd.f32 %v4870_v16, %v12329_v14  ;;  %v4898_v2 = vmul.f32 %v12329_v14, %v12329_v14  ;;  %v4796_v0 = vadd.f32 %v4795_v23, %v4651_v46  ;;  %v12351_v5 = vmax.f32 %v4801_v61, 0.0  ;;  %v13309_v46 = vld [vmem:[#allocation22_spill] sm:$0xff] }
 0x6c5   :  { %v8537_v37 = vpop.f32.mrf.mxu0  ;;  %v7778_v52 = vadd.f32 %v13310_v21, %v13309_v46  ;;  %v4546_v61 = vadd.f32 %v7698_v59, %v13311_v63  ;;  %v4551_v23 = vadd.f32 %v7701_v30, %v13312_v3 }
 0x6c6   :  { %v4913_v31 = vadd.f32 %v4912_v50, %v4898_v2  ;;  %v12344_v42 = vmax.f32 %v4796_v0, 0.0  ;;  %v4872_v17 = vadd.f32 %v4871_v25, %v12327_v10  ;;  %v4901_v34 = vmul.f32 %v12351_v5, %v12351_v5  ;;  %v13313_v2 = vld [vmem:[#allocation23_spill] sm:$0xff]  ;;  %v13315_v0 = vld [vmem:[#allocation24_spill] sm:$0xff] }
 0x6c7   :  { %v4805_v18 = vpop.f32.mrf.mxu0  ;;  %v4811_v29 = vadd.f32 %v8537_v37, %v4666_v15  ;;  %v7786_v15 = vpop.f32.mrf.mxu1  ;;  %v7704_v54 = vadd.f32 %v13314_v1, %v13313_v2  ;;  %v7707_v4 = vadd.f32 %v13316_v38, %v13315_v0  ;;  %v4691_v9 = vadd.f32 %v7778_v52, %v4546_v61 }
 0x6c8   :  { %v4873_v57 = vadd.f32 %v4872_v17, %v12344_v42  ;;  %v4900_v12 = vmul.f32 %v12344_v42, %v12344_v42  ;;  %v4914_v62 = vadd.f32 %v4913_v31, %v4899_v40  ;;  %v4806_v43 = vadd.f32 %v4805_v18, %v4661_v39 }
 0x6c9   :  { %v8540_v49 = vpop.f32.mrf.mxu0  ;;  %v12382_v33 = vmax.f32 %v4811_v29, 0.0  ;;  %v7784_v40 = vadd.f32 %v7783_v53, %v12321_v19  ;;  %v4696_v17 = vadd.f32 %v7781_v20, %v4551_v23  ;;  %v7787_v51 = vadd.f32 %v7786_v15, %v7785_v45  ;;  %v13317_v53 = vld [vmem:[#allocation43_spill] sm:$0xff] }
 0x6ca   :  { %v4915_v11 = vadd.f32 %v4914_v62, %v4900_v12  ;;  %v12362_v35 = vmax.f32 %v4806_v43, 0.0  ;;  %v4874_v27 = vadd.f32 %v4873_v57, %v12351_v5  ;;  %v4821_v58 = vadd.f32 %v8540_v49, %v4676_v8 }
 0x6cb   :  { %v4815_v28 = vpop.f32.mrf.mxu0  ;;  %v4556_v44 = vadd.f32 %v7704_v54, %v13317_v53  ;;  %v4561_v7 = vadd.f32 %v7707_v4, %v4416_v56  ;;  %v4903_v59 = vmul.f32 %v12382_v33, %v12382_v33 }
 0x6cc   :  { %v4875_v39 = vadd.f32 %v4874_v27, %v12362_v35  ;;  %v4902_v48 = vmul.f32 %v12362_v35, %v12362_v35  ;;  %v4916_v26 = vadd.f32 %v4915_v11, %v4901_v34  ;;  %v4816_v60 = vadd.f32 %v4815_v28, %v4671_v55 }
 0x6cd   :  { %v8543_v16 = vpop.f32.mrf.mxu0  ;;  %v12376_v50 = vmax.f32 %v4821_v58, 0.0  ;;  %v4706_v58 = vadd.f32 %v7787_v51, %v4561_v7  ;;  %v4701_v29 = vadd.f32 %v7784_v40, %v4556_v44 }
 0x6ce   :  { %v4831_v25 = vadd.f32 %v8543_v16, %v4686_v32  ;;  %v12384_v22 = vmax.f32 %v4816_v60, 0.0  ;;  %v4876_v18 = vadd.f32 %v4875_v39, %v12382_v33  ;;  %v4917_v8 = vadd.f32 %v4916_v26, %v4902_v48 }
 0x6cf   :  { %v4825_v37 = vpop.f32.mrf.mxu0  ;;  %v4905_v62 = vmul.f32 %v12376_v50, %v12376_v50 }
 0x6d0   :  { %v4826_v31 = vadd.f32 %v4825_v37, %v4681_v41  ;;  %v4904_v57 = vmul.f32 %v12384_v22, %v12384_v22  ;;  %v4883_v43 = vadd.f32 %v12376_v50, %v12384_v22  ;;  %v12394_v6 = vmax.f32 %v4831_v25, 0.0 }
 0x6d1   :  { %v8546_v12 = vpop.f32.mrf.mxu0  ;;  %v4918_v11 = vadd.f32 %v4917_v8, %v4903_v59  ;;  %v4877_v55 = vrot.slane %v4876_v18, 4 }
 0x6d2   :  { %v12396_v19 = vmax.f32 %v4826_v31, 0.0  ;;  %v4841_v47 = vadd.f32 %v8546_v12, %v4696_v17  ;;  %v4925_v30 = vadd.f32 %v4905_v62, %v4904_v57  ;;  %v4907_v56 = vmul.f32 %v12394_v6, %v12394_v6 }
 0x6d3   :  { %v4835_v36 = vpop.f32.mrf.mxu0  ;;  %v4919_v48 = vrot.slane %v4918_v11, 4  ;;  %v4878_v16 = vadd.f32 %v4877_v55, %v4876_v18  ;;  %v5760_v55 = vld [vmem:[#allocation13 + $0x70] sm:$0xff] }
 0x6d4   :  { %v4884_v49 = vadd.f32 %v4883_v43, %v12396_v19  ;;  %v4906_v45 = vmul.f32 %v12396_v19, %v12396_v19  ;;  %v4836_v27 = vadd.f32 %v4835_v36, %v4691_v9  ;;  %v12407_v21 = vmax.f32 %v4841_v47, 0.0 }
 0x6d5   :  { %v8549_v34 = vpop.f32.mrf.mxu0  ;;  %v4920_v2 = vadd.f32 %v4919_v48, %v4918_v11  ;;  %v4879_v0 = vrot.slane %v4878_v16, 2  ;;  %v5808_v48 = vld [vmem:[#allocation13 + $0x1f0] sm:$0xff] }
 0x6d6   :  { %v4926_v28 = vadd.f32 %v4925_v30, %v4906_v45  ;;  %v4885_v46 = vadd.f32 %v4884_v49, %v12394_v6  ;;  %v12409_v52 = vmax.f32 %v4836_v27, 0.0  ;;  %v4851_v20 = vadd.f32 %v8549_v34, %v4706_v58  ;;  %v5777_v58 = vld [vmem:[#allocation13 + $0xf8] sm:$0xff] }
 0x6d7   :  { %v4845_v32 = vpop.f32.mrf.mxu0  ;;  %v4909_v61 = vmul.f32 %v12407_v21, %v12407_v21  ;;  %v4921_v40 = vrot.slane %v4920_v2, 2  ;;  %v4880_v9 = vadd.f32 %v4879_v0, %v4878_v16  ;;  %7854 = vmatprep.subr.mxu1 %v5777_v58  ;;  %v5761_v34 = vld [vmem:[#allocation13 + $0x78] sm:$0xff]  ;;  %v5772_v16 = vld [vmem:[#allocation13 + $0xd0] sm:$0xff]  ;;  %v5770_v0 = vld [vmem:[#allocation13 + $0xc0] sm:$0xff] }
 0x6d8   :  { %v4927_v41 = vadd.f32 %v4926_v28, %v4907_v56  ;;  %v4846_v39 = vadd.f32 %v4845_v32, %v4701_v29  ;;  %v4886_v26 = vadd.f32 %v4885_v46, %v12409_v52  ;;  %v4908_v60 = vmul.f32 %v12409_v52, %v12409_v52  ;;  %v5776_v29 = vld [vmem:[#allocation13 + $0xf0] sm:$0xff]  ;;  %v5775_v56 = vld [vmem:[#allocation13 + $0xe8] sm:$0xff]  ;;  %v5774_v46 = vld [vmem:[#allocation13 + $0xe0] sm:$0xff] }
 0x6d9   :  { %v12418_v23 = vmax.f32 %v4851_v20, 0.0  ;;  %v4922_v8 = vadd.f32 %v4921_v40, %v4920_v2  ;;  %v4881_v62 = vrot.slane %v4880_v9, 1  ;;  %v5759_v28 = vld [vmem:[#allocation13 + $0x68] sm:$0xff]  ;;  %v5809_v20 = vld [vmem:[#allocation13 + $0x1f8] sm:$0xff]  ;;  %v5758_v32 = vld [vmem:[#allocation13 + $0x60] sm:$0xff] }
 0x6da   :  { %v12414_v63 = vmax.f32 %v4846_v39, 0.0  ;;  %v4928_v3 = vadd.f32 %v4927_v41, %v4908_v60  ;;  %v4887_v15 = vadd.f32 %v4886_v26, %v12407_v21  ;;  %v5793_v41 = vld [vmem:[#allocation13 + $0x178] sm:$0xff]  ;;  %7934 = vmatprep.subr.mxu0 %v5809_v20  ;;  %v5792_v60 = vld [vmem:[#allocation13 + $0x170] sm:$0xff]  ;;  %v5806_v2 = vld [vmem:[#allocation13 + $0x1e0] sm:$0xff] }
 0x6db   :  { %v4911_v38 = vmul.f32 %v12418_v23, %v12418_v23  ;;  %v4923_v59 = vrot.slane %v4922_v8, 1  ;;  %v4882_v47 = vadd.f32 %v4881_v62, %v4880_v9  ;;  %v5773_v39 = vld [vmem:[#allocation13 + $0xd8] sm:$0xff]  ;;  %v5788_v9 = vld [vmem:[#allocation13 + $0x150] sm:$0xff]  ;;  %v5802_v62 = vld [vmem:[#allocation13 + $0x1c0] sm:$0xff] }
 0x6dc   :  { %v4910_v25 = vmul.f32 %v12414_v63, %v12414_v63  ;;  %v4888_v1 = vadd.f32 %v4887_v15, %v12414_v63  ;;  %v4929_v54 = vadd.f32 %v4928_v3, %v4909_v61  ;;  %v5757_v26 = vld [vmem:[#allocation13 + $0x58] sm:$0xff]  ;;  %v5807_v61 = vld [vmem:[#allocation13 + $0x1e8] sm:$0xff]  ;;  %v5756_v3 = vld [vmem:[#allocation13 + $0x50] sm:$0xff] }
 0x6dd   :  { %v4924_v45 = vadd.f32 %v4923_v59, %v4922_v8  ;;  %v5791_v15 = vld [vmem:[#allocation13 + $0x168] sm:$0xff]  ;;  %v5769_v40 = vld [vmem:[#allocation13 + $0xb8] sm:$0xff]  ;;  %v5752_v8 = vld [vmem:[#allocation13 + $0x30] sm:$0xff] }
 0x6de   :  { %v4889_v4 = vadd.f32 %v4888_v1, %v12418_v23  ;;  %v4930_v37 = vadd.f32 %v4929_v54, %v4910_v25  ;;  %v5771_v25 = vld [vmem:[#allocation13 + $0xc8] sm:$0xff]  ;;  %v5790_v54 = vld [vmem:[#allocation13 + $0x160] sm:$0xff]  ;;  %v5748_v58 = vld [vmem:[#allocation13 + $0x10] sm:$0xff] }
 0x6df   :  { %v5755_v1 = vld [vmem:[#allocation13 + $0x48] sm:$0xff]  ;;  %v5750_v59 = vld [vmem:[#allocation13 + $0x20] sm:$0xff]  ;;  %v5797_v20 = vld [vmem:[#allocation13 + $0x198] sm:$0xff] }
 0x6e0   :  { %v4890_v31 = vrot.slane %v4889_v4, 4  ;;  %v4931_v17 = vadd.f32 %v4930_v37, %v4911_v38  ;;  %v5805_v38 = vld [vmem:[#allocation13 + $0x1d8] sm:$0xff] }
 0x6e1   :  { %v5789_v37 = vld [vmem:[#allocation13 + $0x158] sm:$0xff] }
 0x6e2   :  { %v4891_v51 = vadd.f32 %v4890_v31, %v4889_v4  ;;  %v4932_v18 = vrot.slane %v4931_v17, 4  ;;  %v5754_v4 = vld [vmem:[#allocation13 + $0x40] sm:$0xff]  ;;  %v5804_v31 = vld [vmem:[#allocation13 + $0x1d0] sm:$0xff] }
 0x6e4   :  { %v4892_v57 = vrot.slane %v4891_v51, 2  ;;  %v4933_v12 = vadd.f32 %v4932_v18, %v4931_v17  ;;  %v5753_v17 = vld [vmem:[#allocation13 + $0x38] sm:$0xff]  ;;  %v5803_v18 = vld [vmem:[#allocation13 + $0x1c8] sm:$0xff] }
 0x6e6   :  { %v4893_v43 = vadd.f32 %v4892_v57, %v4891_v51  ;;  %v4934_v53 = vrot.slane %v4933_v12, 2  ;;  %v5768_v51 = vld [vmem:[#allocation13 + $0xb0] sm:$0xff]  ;;  %v5787_v57 = vld [vmem:[#allocation13 + $0x148] sm:$0xff] }
 0x6e8   :  { %v4894_v44 = vrot.slane %v4893_v43, 1  ;;  %v4935_v7 = vadd.f32 %v4934_v53, %v4933_v12  ;;  %v5767_v12 = vld [vmem:[#allocation13 + $0xa8] sm:$0xff]  ;;  %v5786_v53 = vld [vmem:[#allocation13 + $0x140] sm:$0xff] }
 0x6ea   :  { %v4895_v36 = vadd.f32 %v4894_v44, %v4893_v43  ;;  %v4936_v30 = vrot.slane %v4935_v7, 1  ;;  %v5751_v43 = vld [vmem:[#allocation13 + $0x28] sm:$0xff]  ;;  %v5766_v44 = vld [vmem:[#allocation13 + $0xa0] sm:$0xff] }
 0x6ec   :  { %v4956_v49 = vsel %vm1191_vm5, %v4895_v36, %v4882_v47  ;;  %v4937_v11 = vadd.f32 %v4936_v30, %v4935_v7  ;;  %v5801_v7 = vld [vmem:[#allocation13 + $0x1b8] sm:$0xff]  ;;  %v5800_v30 = vld [vmem:[#allocation13 + $0x1b0] sm:$0xff] }
 0x6ed   :  { %8583 = vmatmul.mubr.f32.vlgmr.msra.gmra.mxu1 %v4956_v49  ;;  %v5785_v47 = vld [vmem:[#allocation13 + $0x138] sm:$0xff] }
 0x6ee   :  { %v5030_v27 = vsel %vm1191_vm5, %v4937_v11, %v4924_v45  ;;  %7855 = vmatpush3.msra.mxu1 %v5761_v34  ;;  %v5765_v36 = vld [vmem:[#allocation13 + $0x98] sm:$0xff]  ;;  %v5784_v45 = vld [vmem:[#allocation13 + $0x130] sm:$0xff]  ;;  %v5783_v34 = vld [vmem:[#allocation13 + $0x128] sm:$0xff] }
 0x6ef   :  { %8618 = vmatmul.mubr.f32.vlgmr.msra.gmra.mxu0 %v5030_v27  ;;  %7856 = vmatprep.subr.mxu1 %v5776_v29  ;;  %v5749_v49 = vld [vmem:[#allocation13 + $0x18] sm:$0xff]  ;;  %v5764_v11 = vld [vmem:[#allocation13 + $0x90] sm:$0xff]  ;;  %v5799_v27 = vld [vmem:[#allocation13 + $0x1a8] sm:$0xff] }
 0x6f0   :  { %7857 = vmatpush3.msra.mxu1 %v5760_v55  ;;  %7935 = vmatpush3.msra.mxu0 %v5793_v41  ;;  %v5763_v29 = vld [vmem:[#allocation13 + $0x88] sm:$0xff]  ;;  %v5798_v55 = vld [vmem:[#allocation13 + $0x1a0] sm:$0xff] }
 0x6f1   :  { %7858 = vmatprep.subr.mxu1 %v5775_v56  ;;  %7936 = vmatprep.subr.mxu0 %v5808_v48  ;;  %v5747_v56 = vld [vmem:[#allocation13 + $0x8] sm:$0xff]  ;;  %v5346_v41 = vld [vmem:[#allocation5 + $0x1] sm:$0xff] }
 0x6f2   :  { %7859 = vmatpush3.msra.mxu1 %v5759_v28  ;;  %7937 = vmatpush3.msra.mxu0 %v5792_v60  ;;  %v5782_v28 = vld [vmem:[#allocation13 + $0x120] sm:$0xff]  ;;  %v5314_v48 = vld [vmem:[#allocation5] sm:$0xff]  ;;  %v5780_v60 = vld [vmem:[#allocation13 + $0x110] sm:$0xff] }
 0x6f3   :  { %7860 = vmatprep.subr.mxu1 %v5774_v46  ;;  %7938 = vmatprep.subr.mxu0 %v5807_v61  ;;  %v5762_v46 = vld [vmem:[#allocation13 + $0x80] sm:$0xff]  ;;  %v5795_v61 = vld [vmem:[#allocation13 + $0x188] sm:$0xff] }
 0x6f4   :  { %7861 = vmatpush3.msra.mxu1 %v5758_v32  ;;  %7939 = vmatpush3.msra.mxu0 %v5791_v15  ;;  %v5746_v32 = vld [vmem:[#allocation13] sm:$0xff]  ;;  %v5779_v15 = vld [vmem:[#allocation13 + $0x108] sm:$0xff] }
 0x6f5   :  { %7862 = vmatprep.subr.mxu1 %v5773_v39  ;;  %7940 = vmatprep.subr.mxu0 %v5806_v2  ;;  %v5781_v39 = vld [vmem:[#allocation13 + $0x118] sm:$0xff]  ;;  %v5794_v2 = vld [vmem:[#allocation13 + $0x180] sm:$0xff] }
 0x6f6   :  { %7863 = vmatpush3.msra.mxu1 %v5757_v26  ;;  %7941 = vmatpush3.msra.mxu0 %v5790_v54  ;;  %v5796_v26 = vld [vmem:[#allocation13 + $0x190] sm:$0xff]  ;;  %v5778_v54 = vld [vmem:[#allocation13 + $0x100] sm:$0xff] }
 0x6f7   :  { %7864 = vmatprep.subr.mxu1 %v5772_v16  ;;  %7942 = vmatprep.subr.mxu0 %v5805_v38  ;;  %v5841_v16 = vld [vmem:[#allocation13 + $0x2f8] sm:$0xff]  ;;  %v5823_v38 = vld [vmem:[#allocation13 + $0x268] sm:$0xff] }
 0x6f8   :  { %7865 = vmatpush3.msra.mxu1 %v5756_v3  ;;  %7943 = vmatpush3.msra.mxu0 %v5789_v37  ;;  %v5825_v3 = vld [vmem:[#allocation13 + $0x278] sm:$0xff]  ;;  %v5838_v37 = vld [vmem:[#allocation13 + $0x2e0] sm:$0xff] }
 0x6f9   :  { %7866 = vmatprep.subr.mxu1 %v5771_v25  ;;  %7944 = vmatprep.subr.mxu0 %v5804_v31  ;;  %v5840_v25 = vld [vmem:[#allocation13 + $0x2f0] sm:$0xff]  ;;  %v5837_v31 = vld [vmem:[#allocation13 + $0x2d8] sm:$0xff] }
 0x6fa   :  { %7867 = vmatpush3.msra.mxu1 %v5755_v1  ;;  %7945 = vmatpush3.msra.mxu0 %v5788_v9  ;;  %v5824_v1 = vld [vmem:[#allocation13 + $0x270] sm:$0xff] }
 0x6fb   :  { %7868 = vmatprep.subr.mxu1 %v5770_v0  ;;  %7946 = vmatprep.subr.mxu0 %v5803_v18  ;;  %v5839_v0 = vld [vmem:[#allocation13 + $0x2e8] sm:$0xff]  ;;  %v5836_v9 = vld [vmem:[#allocation13 + $0x2d0] sm:$0xff] }
 0x6fc   :  { %7869 = vmatpush3.msra.mxu1 %v5754_v4  ;;  %7947 = vmatpush3.msra.mxu0 %v5787_v57  ;;  %v5873_v4 = vld [vmem:[#allocation13 + $0x3f8] sm:$0xff]  ;;  %v5835_v18 = vld [vmem:[#allocation13 + $0x2c8] sm:$0xff]  ;;  %v5834_v57 = vld [vmem:[#allocation13 + $0x2c0] sm:$0xff] }
 0x6fd   :  { %7870 = vmatprep.subr.mxu1 %v5769_v40  ;;  %7948 = vmatprep.subr.mxu0 %v5802_v62  ;;  %v5822_v40 = vld [vmem:[#allocation13 + $0x260] sm:$0xff]  ;;  %v5833_v62 = vld [vmem:[#allocation13 + $0x2b8] sm:$0xff] }
 0x6fe   :  { %7871 = vmatpush3.msra.mxu1 %v5753_v17  ;;  %7949 = vmatpush3.msra.mxu0 %v5786_v53  ;;  %v5821_v17 = vld [vmem:[#allocation13 + $0x258] sm:$0xff]  ;;  %v5832_v53 = vld [vmem:[#allocation13 + $0x2b0] sm:$0xff] }
 0x6ff   :  { %7872 = vmatprep.subr.mxu1 %v5768_v51  ;;  %7950 = vmatprep.subr.mxu0 %v5801_v7  ;;  %v5820_v51 = vld [vmem:[#allocation13 + $0x250] sm:$0xff]  ;;  %v5831_v7 = vld [vmem:[#allocation13 + $0x2a8] sm:$0xff] }
 0x700   :  { %7873 = vmatpush3.msra.mxu1 %v5752_v8  ;;  %7951 = vmatpush3.msra.mxu0 %v5785_v47  ;;  %v5819_v8 = vld [vmem:[#allocation13 + $0x248] sm:$0xff]  ;;  %v5830_v47 = vld [vmem:[#allocation13 + $0x2a0] sm:$0xff] }
 0x701   :  { %7874 = vmatprep.subr.mxu1 %v5767_v12  ;;  %7952 = vmatprep.subr.mxu0 %v5800_v30  ;;  %v5818_v12 = vld [vmem:[#allocation13 + $0x240] sm:$0xff]  ;;  %v5829_v30 = vld [vmem:[#allocation13 + $0x298] sm:$0xff] }
 0x702   :  { %7875 = vmatpush3.msra.mxu1 %v5751_v43  ;;  %7953 = vmatpush3.msra.mxu0 %v5784_v45  ;;  %v5817_v43 = vld [vmem:[#allocation13 + $0x238] sm:$0xff]  ;;  %v5828_v45 = vld [vmem:[#allocation13 + $0x290] sm:$0xff] }
 0x703   :  { %7876 = vmatprep.subr.mxu1 %v5766_v44  ;;  %7954 = vmatprep.subr.mxu0 %v5799_v27  ;;  %v5816_v44 = vld [vmem:[#allocation13 + $0x230] sm:$0xff]  ;;  %v5827_v27 = vld [vmem:[#allocation13 + $0x288] sm:$0xff] }
 0x704   :  { %7877 = vmatpush3.msra.mxu1 %v5750_v59  ;;  %7955 = vmatpush3.msra.mxu0 %v5783_v34  ;;  %v5815_v59 = vld [vmem:[#allocation13 + $0x228] sm:$0xff]  ;;  %v5826_v34 = vld [vmem:[#allocation13 + $0x280] sm:$0xff] }
 0x705   :  { %7878 = vmatprep.subr.mxu1 %v5765_v36  ;;  %7956 = vmatprep.subr.mxu0 %v5798_v55  ;;  %v5814_v36 = vld [vmem:[#allocation13 + $0x220] sm:$0xff]  ;;  %v12429_v55 = vld [vmem:[#allocation13 + $0x478] sm:$0xff] }
 0x706   :  { %7879 = vmatpush3.msra.mxu1 %v5749_v49  ;;  %7957 = vmatpush3.msra.mxu0 %v5782_v28  ;;  %v5813_v49 = vld [vmem:[#allocation13 + $0x218] sm:$0xff] }
 0x707   :  { %7880 = vmatprep.subr.mxu1 %v5764_v11  ;;  %7958 = vmatprep.subr.mxu0 %v5797_v20  ;;  %v5812_v11 = vld [vmem:[#allocation13 + $0x210] sm:$0xff] }
 0x708   :  { %7881 = vmatpush3.msra.mxu1 %v5748_v58  ;;  %5961 = vmatprep.mubr.f32.mxu1 %v5346_v41  ;;  %v5811_v58 = vld [vmem:[#allocation13 + $0x208] sm:$0xff] }
 0x709   :  { %7882 = vmatprep.subr.mxu1 %v5763_v29  ;;  %7959 = vmatpush3.msra.mxu0 %v5781_v39  ;;  %v5810_v29 = vld [vmem:[#allocation13 + $0x200] sm:$0xff] }
 0x70a   :  { %7883 = vmatpush3.msra.mxu1 %v5747_v56  ;;  %7960 = vmatprep.subr.mxu0 %v5796_v26 }
 0x70b   :  { %7884 = vmatprep.subr.mxu1 %v5762_v46  ;;  %7961 = vmatpush3.msra.mxu0 %v5780_v60 }
 0x70c   :  { %7885 = vmatpush3.msra.mxu1 %v5746_v32  ;;  %7962 = vmatprep.subr.mxu0 %v5795_v61 }
 0x70d   :  { %5962 = vmatmul.mubr.f32.vlgmr.msra.gmra.mxu1 %v5314_v48  ;;  %8014 = vmatprep.subr.mxu1 %v5841_v16  ;;  %v13318_v48 = vld [vmem:[#allocation49_spill] sm:$0xff] }
 0x70e   :  { %8015 = vmatpush3.msra.mxu1 %v5825_v3  ;;  %7963 = vmatpush3.msra.mxu0 %v5779_v15  ;;  %v13319_v3 = vld [vmem:[#allocation50_spill] sm:$0xff] }
 0x70f   :  { %8016 = vmatprep.subr.mxu1 %v5840_v25  ;;  %7964 = vmatprep.subr.mxu0 %v5794_v2 }
 0x710   :  { %8017 = vmatpush3.msra.mxu1 %v5824_v1  ;;  %7965 = vmatpush3.msra.mxu0 %v5778_v54 }
 0x711   :  { %8018 = vmatprep.subr.mxu1 %v5839_v0  ;;  %8094 = vmatprep.subr.mxu0 %v5873_v4 }
 0x712   :  { %8019 = vmatpush3.msra.mxu1 %v5823_v38 }
 0x713   :  { %8020 = vmatprep.subr.mxu1 %v5838_v37 }
 0x714   :  { %8021 = vmatpush3.msra.mxu1 %v5822_v40 }
 0x715   :  { %8022 = vmatprep.subr.mxu1 %v5837_v31 }
 0x716   :  { %8023 = vmatpush3.msra.mxu1 %v5821_v17 }
 0x717   :  { %8024 = vmatprep.subr.mxu1 %v5836_v9 }
 0x718   :  { %8025 = vmatpush3.msra.mxu1 %v5820_v51 }
 0x719   :  { %8026 = vmatprep.subr.mxu1 %v5835_v18 }
 0x71a   :  { %8027 = vmatpush3.msra.mxu1 %v5819_v8 }
 0x71b   :  { %8028 = vmatprep.subr.mxu1 %v5834_v57 }
 0x71c   :  { %8029 = vmatpush3.msra.mxu1 %v5818_v12 }
 0x71d   :  { %8030 = vmatprep.subr.mxu1 %v5833_v62 }
 0x71e   :  { %8031 = vmatpush3.msra.mxu1 %v5817_v43 }
 0x71f   :  { %8032 = vmatprep.subr.mxu1 %v5832_v53  ;;  %v7158_v53 = vld [vmem:[%s13020_s13] ss:$0 sm:$0xff] }
 0x720   :  { %8033 = vmatpush3.msra.mxu1 %v5816_v44 }
 0x721   :  { %8034 = vmatprep.subr.mxu1 %v5831_v7 }
 0x722   :  { %8035 = vmatpush3.msra.mxu1 %v5815_v59 }
 0x723   :  { %8036 = vmatprep.subr.mxu1 %v5830_v47 }
 0x724   :  { %8037 = vmatpush3.msra.mxu1 %v5814_v36 }
 0x725   :  { %8038 = vmatprep.subr.mxu1 %v5829_v30 }
 0x726   :  { %8039 = vmatpush3.msra.mxu1 %v5813_v49 }
 0x727   :  { %8040 = vmatprep.subr.mxu1 %v5828_v45 }
 0x728   :  { %8041 = vmatpush3.msra.mxu1 %v5812_v11 }
 0x729   :  { %8042 = vmatprep.subr.mxu1 %v5827_v27 }
 0x72a   :  { %8043 = vmatpush3.msra.mxu1 %v5811_v58 }
 0x72b   :  { %8044 = vmatprep.subr.mxu1 %v5826_v34 }
 0x72c   :  { %8045 = vmatpush3.msra.mxu1 %v5810_v29  ;;  %v7159_v29 = vld [vmem:[%s13021_s14] ss:$0 sm:$0xff] }
 0x72d   :  { %8620 = vmatprep.subr.mxu1 %v12429_v55 }
 0x7ad   :  { %v5024_v56 = vpop.f32.mrf.mxu1 }
 0x7ae   :  { %v5102_v28 = vmul.f32 %v5024_v56, %v5024_v56  ;;  %v5113_v26 = vrot.slane %v5024_v56, %v13318_v48 }
 0x7af   :  { %v8584_v46 = vpop.f32.mrf.mxu1  ;;  %v5098_v20 = vpop.f32.mrf.mxu0 }
 0x7b0   :  { %v5103_v32 = vsub.f32 %v5098_v20, %v5102_v28  ;;  %v5114_v60 = vcombine.high %v5113_v26, %v5113_v26  ;;  %v5121_v16 = vrot.slane %v5113_v26, %v13318_v48 }
 0x7b1   :  { %v8619_v41 = vpop.f32.mrf.mxu0 }
 0x7b2   :  { %v5104_v39 = vadd.f32 1e-05, %v5103_v32  ;;  %v5128_v61 = vrot.slane %v5114_v60, %v13318_v48  ;;  %v5132_v15 = vrot.slane %v5121_v16, %v13319_v3 }
 0x7b4   :  { %8761 = vrsqrt.f32 %v5104_v39  ;;  %v5136_v2 = vrot.slane %v5128_v61, %v13319_v3  ;;  %v5139_v54 = vsub.f32 %v12309_v24, %v5132_v15  ;;  %v5140_v0 = vsub.f32 %v12307_v13, %v5132_v15 }
 0x7b5   :  { %v5141_v38 = vsub.f32 %v12329_v14, %v5132_v15  ;;  %v5142_v4 = vsub.f32 %v12327_v10, %v5132_v15  ;;  %v5143_v37 = vsub.f32 %v12344_v42, %v5132_v15  ;;  %v5144_v40 = vsub.f32 %v12351_v5, %v5132_v15 }
 0x7b6   :  { %v5145_v9 = vsub.f32 %v12362_v35, %v5132_v15  ;;  %v5146_v51 = vsub.f32 %v12382_v33, %v5132_v15  ;;  %v5147_v18 = vsub.f32 %v12384_v22, %v5136_v2  ;;  %v5148_v24 = vsub.f32 %v12376_v50, %v5136_v2 }
 0x7b7   :  { %v5149_v13 = vsub.f32 %v12396_v19, %v5136_v2  ;;  %v5150_v14 = vsub.f32 %v12394_v6, %v5136_v2  ;;  %v5151_v5 = vsub.f32 %v12409_v52, %v5136_v2  ;;  %v5152_v8 = vsub.f32 %v12407_v21, %v5136_v2 }
 0x7b8   :  { %v5153_v35 = vsub.f32 %v12414_v63, %v5136_v2  ;;  %v5154_v33 = vsub.f32 %v12418_v23, %v5136_v2 }
 0x7c1   :  { %v8762_v25 = vpop.eup %8761 }
 0x7c2   :  { %v5162_v1 = vrot.slane %v8762_v25, %v13318_v48 }
 0x7c4   :  { %v5163_v31 = vcombine.high %v5162_v1, %v5162_v1  ;;  %v5170_v17 = vrot.slane %v5162_v1, %v13318_v48 }
 0x7c6   :  { %v5177_v10 = vrot.slane %v5163_v31, %v13318_v48  ;;  %v5181_v42 = vrot.slane %v5170_v17, %v13319_v3 }
 0x7c8   :  { %v5185_v22 = vrot.slane %v5177_v10, %v13319_v3  ;;  %v5188_v57 = vmul.f32 %v5181_v42, %v5139_v54  ;;  %v5189_v50 = vmul.f32 %v5181_v42, %v5140_v0  ;;  %v5190_v12 = vmul.f32 %v5181_v42, %v5141_v38 }
 0x7c9   :  { %v5191_v19 = vmul.f32 %v5181_v42, %v5142_v4  ;;  %v5192_v62 = vmul.f32 %v5181_v42, %v5143_v37  ;;  %v5193_v6 = vmul.f32 %v5181_v42, %v5144_v40  ;;  %v5194_v43 = vmul.f32 %v5181_v42, %v5145_v9 }
 0x7ca   :  { %v5195_v52 = vmul.f32 %v5181_v42, %v5146_v51  ;;  %v5196_v44 = vmul.f32 %v5185_v22, %v5147_v18  ;;  %v5197_v21 = vmul.f32 %v5185_v22, %v5148_v24  ;;  %v5198_v7 = vmul.f32 %v5185_v22, %v5149_v13  ;;  %v5378_v18 = vld [vmem:[#allocation5 + $0x2] sm:$0xff]  ;;  %v5856_v42 = vld [vmem:[#allocation13 + $0x370] sm:$0xff] }
 0x7cb   :  { %v5199_v63 = vmul.f32 %v5185_v22, %v5150_v14  ;;  %v5200_v59 = vmul.f32 %v5185_v22, %v5151_v5  ;;  %v5201_v23 = vmul.f32 %v5185_v22, %v5152_v8  ;;  %v5202_v47 = vmul.f32 %v5185_v22, %v5153_v35  ;;  %v5857_v13 = vld [vmem:[#allocation13 + $0x378] sm:$0xff]  ;;  %v5872_v14 = vld [vmem:[#allocation13 + $0x3f0] sm:$0xff]  ;;  %v5871_v5 = vld [vmem:[#allocation13 + $0x3e8] sm:$0xff] }
 0x7cc   :  { %v5203_v36 = vmul.f32 %v5185_v22, %v5154_v33  ;;  %v5211_v30 = vmul.f32 %v7158_v53, %v5188_v57  ;;  %v5212_v49 = vmul.f32 %v7158_v53, %v5189_v50  ;;  %v5213_v45 = vmul.f32 %v7158_v53, %v5190_v12  ;;  %v5855_v35 = vld [vmem:[#allocation13 + $0x368] sm:$0xff]  ;;  %v5870_v22 = vld [vmem:[#allocation13 + $0x3e0] sm:$0xff]  ;;  %v5869_v12 = vld [vmem:[#allocation13 + $0x3d8] sm:$0xff] }
 0x7cd   :  { %v5214_v11 = vmul.f32 %v7158_v53, %v5191_v19  ;;  %v5215_v27 = vmul.f32 %v7158_v53, %v5192_v62  ;;  %v5216_v58 = vmul.f32 %v7158_v53, %v5193_v6  ;;  %v5217_v34 = vmul.f32 %v7158_v53, %v5194_v43  ;;  %v5854_v57 = vld [vmem:[#allocation13 + $0x360] sm:$0xff]  ;;  %v5853_v62 = vld [vmem:[#allocation13 + $0x358] sm:$0xff]  ;;  %v5868_v6 = vld [vmem:[#allocation13 + $0x3d0] sm:$0xff] }
 0x7ce   :  { %v5218_v56 = vmul.f32 %v7158_v53, %v5195_v52  ;;  %v5219_v28 = vmul.f32 %v7158_v53, %v5196_v44  ;;  %v5220_v46 = vmul.f32 %v7158_v53, %v5197_v21  ;;  %v5221_v20 = vmul.f32 %v7158_v53, %v5198_v7  ;;  %v5867_v44 = vld [vmem:[#allocation13 + $0x3c8] sm:$0xff] }
 0x7cf   :  { %v5222_v32 = vmul.f32 %v7158_v53, %v5199_v63  ;;  %v5223_v41 = vmul.f32 %v7158_v53, %v5200_v59  ;;  %v5224_v39 = vmul.f32 %v7158_v53, %v5201_v23  ;;  %v5225_v26 = vmul.f32 %v7158_v53, %v5202_v47  ;;  %v5851_v21 = vld [vmem:[#allocation13 + $0x348] sm:$0xff]  ;;  %v5866_v63 = vld [vmem:[#allocation13 + $0x3c0] sm:$0xff]  ;;  %v5865_v47 = vld [vmem:[#allocation13 + $0x3b8] sm:$0xff] }
 0x7d0   :  { %v5226_v60 = vmul.f32 %v7158_v53, %v5203_v36  ;;  %v12464_v16 = vadd.f32 %v7159_v29, %v5211_v30  ;;  %v12466_v61 = vadd.f32 %v7159_v29, %v5212_v49  ;;  %v12468_v15 = vadd.f32 %v7159_v29, %v5213_v45  ;;  %v5852_v53 = vld [vmem:[#allocation13 + $0x350] sm:$0xff]  ;;  %v5850_v23 = vld [vmem:[#allocation13 + $0x340] sm:$0xff]  ;;  %v5849_v30 = vld [vmem:[#allocation13 + $0x338] sm:$0xff] }
 0x7d1   :  { %v12470_v25 = vadd.f32 %v7159_v29, %v5214_v11  ;;  %v12472_v2 = vadd.f32 %v7159_v29, %v5215_v27  ;;  %v12474_v1 = vadd.f32 %v7159_v29, %v5216_v58  ;;  %v12476_v54 = vadd.f32 %v7159_v29, %v5217_v34  ;;  %v5864_v45 = vld [vmem:[#allocation13 + $0x3b0] sm:$0xff]  ;;  %v5354_v11 = vld [vmem:[#allocation5 + $0xa1] sm:$0xff]  ;;  %v5863_v34 = vld [vmem:[#allocation13 + $0x3a8] sm:$0xff] }
 0x7d2   :  { %v12478_v0 = vadd.f32 %v7159_v29, %v5218_v56  ;;  %v12480_v38 = vadd.f32 %v7159_v29, %v5219_v28  ;;  %v12482_v4 = vadd.f32 %v7159_v29, %v5220_v46  ;;  %v12484_v37 = vadd.f32 %v7159_v29, %v5221_v20  ;;  %5298 = vst [vmem:[#allocation5 + $0x11] sm:$0xff] %v12464_v16  ;;  %v5848_v27 = vld [vmem:[#allocation13 + $0x330] sm:$0xff]  ;;  %v5322_v56 = vld [vmem:[#allocation5 + $0xa0] sm:$0xff]  ;;  %v5847_v28 = vld [vmem:[#allocation13 + $0x328] sm:$0xff] }
 0x7d3   :  { %5299 = vst [vmem:[#allocation5 + $0x21] sm:$0xff] %v12466_v61  ;;  %5300 = vst [vmem:[#allocation5 + $0x31] sm:$0xff] %v12468_v15  ;;  %5966 = vmatprep.mubr.f32.mxu1 %v12464_v16  ;;  %v12490_v40 = vadd.f32 %v7159_v29, %v5222_v32  ;;  %v12492_v31 = vadd.f32 %v7159_v29, %v5223_v41  ;;  %v12494_v17 = vadd.f32 %v7159_v29, %v5224_v39  ;;  %v5862_v46 = vld [vmem:[#allocation13 + $0x3a0] sm:$0xff]  ;;  %v5861_v39 = vld [vmem:[#allocation13 + $0x398] sm:$0xff] }
 0x7d4   :  { %v12496_v9 = vadd.f32 %v7159_v29, %v5225_v26  ;;  %5301 = vst [vmem:[#allocation5 + $0x41] sm:$0xff] %v12470_v25  ;;  %5302 = vst [vmem:[#allocation5 + $0x51] sm:$0xff] %v12472_v2  ;;  %v5249_v51 = vadd.f32 %v7159_v29, %v5226_v60  ;;  %v5846_v32 = vld [vmem:[#allocation13 + $0x320] sm:$0xff]  ;;  %v5845_v60 = vld [vmem:[#allocation13 + $0x318] sm:$0xff] }
 0x7d5   :  { %5303 = vst [vmem:[#allocation5 + $0x61] sm:$0xff] %v12474_v1  ;;  %5304 = vst [vmem:[#allocation5 + $0x71] sm:$0xff] %v12476_v54  ;;  %v5386_v26 = vld [vmem:[#allocation5 + $0xa2] sm:$0xff] }
 0x7d6   :  { %5305 = vst [vmem:[#allocation5 + $0x81] sm:$0xff] %v12478_v0  ;;  %5306 = vst [vmem:[#allocation5 + $0xb1] sm:$0xff] %v12480_v38 }
 0x7d7   :  { %5307 = vst [vmem:[#allocation5 + $0xc1] sm:$0xff] %v12482_v4  ;;  %5308 = vst [vmem:[#allocation5 + $0xd1] sm:$0xff] %v12484_v37 }
 0x7d8   :  { %5309 = vst [vmem:[#allocation5 + $0xe1] sm:$0xff] %v12490_v40  ;;  %5310 = vst [vmem:[#allocation5 + $0xf1] sm:$0xff] %v12492_v31 }
 0x7d9   :  { %5311 = vst [vmem:[#allocation5 + $0x101] sm:$0xff] %v12494_v17  ;;  %5312 = vst [vmem:[#allocation5 + $0x111] sm:$0xff] %v12496_v9  ;;  %v5410_v24 = vld [vmem:[#allocation5 + $0x10] sm:$0xff] }
 0x7da   :  { %5313 = vst [vmem:[#allocation5 + $0x121] sm:$0xff] %v5249_v51  ;;  %6106 = vmatprep.mubr.f32.mxu0 %v5410_v24  ;;  %5967 = vmatmul.mubr.f32.gmra.mxu1 %v5410_v24  ;;  %v12511_v10 = vld [vmem:[#allocation5 + $0x20] sm:$0xff]  ;;  %v12515_v8 = vld [vmem:[#allocation5 + $0x12] sm:$0xff] }
 0x7db   :  { %6107 = vmatmul.mubr.f32.vlgmr.msra.gmra.mxu0 %v5378_v18  ;;  %5971 = vmatprep.mubr.f32.mxu1 %v12466_v61  ;;  %v12519_v33 = vld [vmem:[#allocation5 + $0x30] sm:$0xff]  ;;  %v12523_v50 = vld [vmem:[#allocation5 + $0x22] sm:$0xff]  ;;  %v5860_v51 = vld [vmem:[#allocation13 + $0x390] sm:$0xff] }
 0x7dc   :  { %6111 = vmatprep.mubr.f32.mxu0 %v12511_v10  ;;  %8095 = vmatpush3.msra.mxu0 %v5857_v13  ;;  %v12527_v19 = vld [vmem:[#allocation5 + $0x40] sm:$0xff]  ;;  %v12531_v43 = vld [vmem:[#allocation5 + $0x32] sm:$0xff] }
 0x7dd   :  { %8096 = vmatprep.subr.mxu0 %v5872_v14  ;;  %v12535_v52 = vld [vmem:[#allocation5 + $0x50] sm:$0xff]  ;;  %v12539_v7 = vld [vmem:[#allocation5 + $0x42] sm:$0xff]  ;;  %v5844_v24 = vld [vmem:[#allocation13 + $0x310] sm:$0xff] }
 0x7de   :  { %5972 = vmatmul.mubr.f32.gmra.mxu1 %v12511_v10  ;;  %8097 = vmatpush3.msra.mxu0 %v5856_v42  ;;  %v12543_v59 = vld [vmem:[#allocation5 + $0x60] sm:$0xff]  ;;  %v12547_v36 = vld [vmem:[#allocation5 + $0x52] sm:$0xff] }
 0x7df   :  { %6112 = vmatmul.mubr.f32.gmra.mxu0 %v12515_v8  ;;  %5976 = vmatprep.mubr.f32.mxu1 %v12468_v15  ;;  %v12551_v49 = vld [vmem:[#allocation5 + $0x70] sm:$0xff]  ;;  %v12555_v58 = vld [vmem:[#allocation5 + $0x62] sm:$0xff] }
 0x7e0   :  { %6116 = vmatprep.mubr.f32.mxu0 %v12519_v33  ;;  %8098 = vmatprep.subr.mxu0 %v5871_v5  ;;  %v12558_v29 = vld [vmem:[#allocation5 + $0x80] sm:$0xff]  ;;  %v12561_v20 = vld [vmem:[#allocation5 + $0x72] sm:$0xff] }
 0x7e1   :  { %8099 = vmatpush3.msra.mxu0 %v5855_v35  ;;  %v5418_v41 = vld [vmem:[#allocation5 + $0xb0] sm:$0xff]  ;;  %v12566_v18 = vld [vmem:[#allocation5 + $0xc0] sm:$0xff]  ;;  %v5858_v35 = vld [vmem:[#allocation13 + $0x380] sm:$0xff] }
 0x7e2   :  { %5977 = vmatmul.mubr.f32.gmra.mxu1 %v12519_v33  ;;  %8100 = vmatprep.subr.mxu0 %v5870_v22  ;;  %v5859_v13 = vld [vmem:[#allocation13 + $0x388] sm:$0xff]  ;;  %v5842_v22 = vld [vmem:[#allocation13 + $0x300] sm:$0xff] }
 0x7e3   :  { %6117 = vmatmul.mubr.f32.gmra.mxu0 %v12523_v50  ;;  %5981 = vmatprep.mubr.f32.mxu1 %v12470_v25  ;;  %v12570_v14 = vld [vmem:[#allocation5 + $0xb2] sm:$0xff] }
 0x7e4   :  { %6121 = vmatprep.mubr.f32.mxu0 %v12527_v19  ;;  %8101 = vmatpush3.msra.mxu0 %v5854_v57  ;;  %v5843_v42 = vld [vmem:[#allocation13 + $0x308] sm:$0xff]  ;;  %v12578_v57 = vld [vmem:[#allocation5 + $0xc2] sm:$0xff] }
 0x7e5   :  { %8102 = vmatprep.subr.mxu0 %v5869_v12  ;;  %v12574_v5 = vld [vmem:[#allocation5 + $0xd0] sm:$0xff]  ;;  %v12582_v12 = vld [vmem:[#allocation5 + $0xe0] sm:$0xff] }
 0x7e6   :  { %5982 = vmatmul.mubr.f32.gmra.mxu1 %v12527_v19  ;;  %8103 = vmatpush3.msra.mxu0 %v5853_v62  ;;  %v13320_v62 = vmov 0.0  }
 0x7e7   :  { %6122 = vmatmul.mubr.f32.gmra.mxu0 %v12531_v43  ;;  %5986 = vmatprep.mubr.f32.mxu1 %v12472_v2 }
 0x7e8   :  { %6126 = vmatprep.mubr.f32.mxu0 %v12535_v52  ;;  %8104 = vmatprep.subr.mxu0 %v5868_v6  ;;  %v12587_v6 = vld [vmem:[#allocation5 + $0xd2] sm:$0xff] }
 0x7e9   :  { %8105 = vmatpush3.msra.mxu0 %v5852_v53  ;;  %v12591_v53 = vld [vmem:[#allocation5 + $0xf0] sm:$0xff] }
 0x7ea   :  { %5987 = vmatmul.mubr.f32.gmra.mxu1 %v12535_v52  ;;  %8106 = vmatprep.subr.mxu0 %v5867_v44  ;;  %v12595_v44 = vld [vmem:[#allocation5 + $0xe2] sm:$0xff] }
 0x7eb   :  { %6127 = vmatmul.mubr.f32.gmra.mxu0 %v12539_v7  ;;  %5991 = vmatprep.mubr.f32.mxu1 %v12474_v1 }
 0x7ec   :  { %6131 = vmatprep.mubr.f32.mxu0 %v12543_v59  ;;  %8107 = vmatpush3.msra.mxu0 %v5851_v21  ;;  %v12599_v21 = vld [vmem:[#allocation5 + $0x100] sm:$0xff] }
 0x7ed   :  { %8108 = vmatprep.subr.mxu0 %v5866_v63  ;;  %v12603_v63 = vld [vmem:[#allocation5 + $0xf2] sm:$0xff] }
 0x7ee   :  { %5992 = vmatmul.mubr.f32.gmra.mxu1 %v12543_v59  ;;  %8109 = vmatpush3.msra.mxu0 %v5850_v23  ;;  %v12611_v23 = vld [vmem:[#allocation5 + $0x102] sm:$0xff] }
 0x7ef   :  { %6132 = vmatmul.mubr.f32.gmra.mxu0 %v12547_v36  ;;  %5996 = vmatprep.mubr.f32.mxu1 %v12476_v54 }
 0x7f0   :  { %6136 = vmatprep.mubr.f32.mxu0 %v12551_v49  ;;  %8110 = vmatprep.subr.mxu0 %v5865_v47  ;;  %v12618_v47 = vld [vmem:[#allocation5 + $0x112] sm:$0xff] }
 0x7f1   :  { %8111 = vmatpush3.msra.mxu0 %v5849_v30  ;;  %v5887_v30 = vld [vmem:[#allocation13 + $0x468] sm:$0xff] }
 0x7f2   :  { %5997 = vmatmul.mubr.f32.gmra.mxu1 %v12551_v49  ;;  %8112 = vmatprep.subr.mxu0 %v5864_v45  ;;  %v5489_v45 = vld [vmem:[#allocation5 + $0x122] sm:$0xff] }
 0x7f3   :  { %6137 = vmatmul.mubr.f32.gmra.mxu0 %v12555_v58  ;;  %6001 = vmatprep.mubr.f32.mxu1 %v5354_v11  ;;  %v5552_v11 = vld [vmem:[#allocation5 + $0x121] sm:$0xff] }
 0x7f4   :  { %6141 = vmatprep.mubr.f32.mxu0 %v12558_v29  ;;  %8113 = vmatpush3.msra.mxu0 %v5848_v27  ;;  %v5553_v27 = vld [vmem:[#allocation5 + $0x131] sm:$0xff] }
 0x7f5   :  { %8114 = vmatprep.subr.mxu0 %v5863_v34  ;;  %v5521_v34 = vld [vmem:[#allocation5 + $0x130] sm:$0xff] }
 0x7f6   :  { %6002 = vmatmul.mubr.f32.gmra.mxu1 %v5322_v56  ;;  %8115 = vmatpush3.msra.mxu0 %v5847_v28 }
 0x7f7   :  { %6142 = vmatmul.mubr.f32.gmra.mxu0 %v12561_v20  ;;  %6006 = vmatprep.mubr.f32.mxu1 %v12480_v38 }
 0x7f8   :  { %6146 = vmatprep.mubr.f32.mxu0 %v5418_v41  ;;  %8116 = vmatprep.subr.mxu0 %v5862_v46 }
 0x7f9   :  { %8117 = vmatpush3.msra.mxu0 %v5846_v32 }
 0x7fa   :  { %6007 = vmatmul.mubr.f32.gmra.mxu1 %v5418_v41  ;;  %8118 = vmatprep.subr.mxu0 %v5861_v39  ;;  %v6718_v41 = vld [vmem:[#allocation7 + $0x60] sm:$0xff] }
 0x7fb   :  { %6147 = vmatmul.mubr.f32.gmra.mxu0 %v5386_v26  ;;  %6011 = vmatprep.mubr.f32.mxu1 %v12482_v4 }
 0x7fc   :  { %6151 = vmatprep.mubr.f32.mxu0 %v12566_v18  ;;  %8119 = vmatpush3.msra.mxu0 %v5845_v60 }
 0x7fd   :  { %8120 = vmatprep.subr.mxu0 %v5860_v51 }
 0x7fe   :  { %6012 = vmatmul.mubr.f32.gmra.mxu1 %v12566_v18  ;;  %8121 = vmatpush3.msra.mxu0 %v5844_v24 }
 0x7ff   :  { %6152 = vmatmul.mubr.f32.gmra.mxu0 %v12570_v14  ;;  %6016 = vmatprep.mubr.f32.mxu1 %v12484_v37 }
 0x800   :  { %6156 = vmatprep.mubr.f32.mxu0 %v12574_v5  ;;  %8122 = vmatprep.subr.mxu0 %v5859_v13 }
 0x801   :  { %8123 = vmatpush3.msra.mxu0 %v5843_v42 }
 0x802   :  { %6017 = vmatmul.mubr.f32.gmra.mxu1 %v12574_v5  ;;  %8124 = vmatprep.subr.mxu0 %v5858_v35 }
 0x803   :  { %6157 = vmatmul.mubr.f32.gmra.mxu0 %v12578_v57  ;;  %6021 = vmatprep.mubr.f32.mxu1 %v12490_v40 }
 0x804   :  { %6161 = vmatprep.mubr.f32.mxu0 %v12582_v12  ;;  %8125 = vmatpush3.msra.mxu0 %v5842_v22 }
 0x805   :  { %8676 = vmatprep.subr.mxu0 %v13320_v62 }
 0x806   :  { %6022 = vmatmul.mubr.f32.gmra.mxu1 %v12582_v12 }
 0x807   :  { %6162 = vmatmul.mubr.f32.gmra.mxu0 %v12587_v6  ;;  %6026 = vmatprep.mubr.f32.mxu1 %v12492_v31  ;;  %v12607_v31 = vld [vmem:[#allocation5 + $0x110] sm:$0xff] }
 0x808   :  { %6166 = vmatprep.mubr.f32.mxu0 %v12591_v53 }
 0x80a   :  { %6027 = vmatmul.mubr.f32.gmra.mxu1 %v12591_v53 }
 0x80b   :  { %6167 = vmatmul.mubr.f32.gmra.mxu0 %v12595_v44  ;;  %6031 = vmatprep.mubr.f32.mxu1 %v12494_v17  ;;  %v12614_v17 = vld [vmem:[#allocation5 + $0x120] sm:$0xff] }
 0x80c   :  { %6171 = vmatprep.mubr.f32.mxu0 %v12599_v21 }
 0x80e   :  { %6032 = vmatmul.mubr.f32.gmra.mxu1 %v12599_v21 }
 0x80f   :  { %6172 = vmatmul.mubr.f32.gmra.mxu0 %v12603_v63  ;;  %6036 = vmatprep.mubr.f32.mxu1 %v12496_v9  ;;  %v5888_v9 = vld [vmem:[#allocation13 + $0x470] sm:$0xff] }
 0x810   :  { %6176 = vmatprep.mubr.f32.mxu0 %v12607_v31 }
 0x812   :  { %6037 = vmatmul.mubr.f32.gmra.mxu1 %v12607_v31 }
 0x813   :  { %6177 = vmatmul.mubr.f32.gmra.mxu0 %v12611_v23  ;;  %6251 = vmatprep.mubr.f32.mxu1 %v12515_v8  ;;  %v5880_v8 = vld [vmem:[#allocation13 + $0x430] sm:$0xff] }
 0x814   :  { %6181 = vmatprep.mubr.f32.mxu0 %v12614_v17 }
 0x816   :  { %6252 = vmatmul.mubr.f32.vlgmr.msra.gmra.mxu1 %v12464_v16  ;;  %v5886_v16 = vld [vmem:[#allocation13 + $0x460] sm:$0xff] }
 0x817   :  { %6182 = vmatmul.mubr.f32.gmra.mxu0 %v12618_v47  ;;  %8621 = vmatpush3.msra.mxu1 %v12429_v55  ;;  %v5885_v55 = vld [vmem:[#allocation13 + $0x458] sm:$0xff] }
 0x818   :  { %6256 = vmatprep.mubr.f32.mxu1 %v12523_v50  ;;  %6396 = vmatprep.mubr.f32.mxu0 %v12466_v61 }
 0x819   :  { %8622 = vmatprep.subr.mxu1 %v5888_v9 }
 0x81a   :  { %6257 = vmatmul.mubr.f32.gmra.mxu1 %v12466_v61  ;;  %v5884_v61 = vld [vmem:[#allocation13 + $0x450] sm:$0xff] }
 0x81b   :  { %6397 = vmatmul.mubr.f32.vlgmr.msra.gmra.mxu0 %v12511_v10  ;;  %8623 = vmatpush3.msra.mxu1 %v5888_v9  ;;  %v5881_v10 = vld [vmem:[#allocation13 + $0x438] sm:$0xff] }
 0x81c   :  { %6261 = vmatprep.mubr.f32.mxu1 %v12531_v43  ;;  %6401 = vmatprep.mubr.f32.mxu0 %v12468_v15 }
 0x81d   :  { %8624 = vmatprep.subr.mxu1 %v5887_v30 }
 0x81e   :  { %6262 = vmatmul.mubr.f32.gmra.mxu1 %v12468_v15  ;;  %v5883_v15 = vld [vmem:[#allocation13 + $0x448] sm:$0xff] }
 0x81f   :  { %6402 = vmatmul.mubr.f32.gmra.mxu0 %v12519_v33  ;;  %8625 = vmatpush3.msra.mxu1 %v5887_v30  ;;  %v5877_v33 = vld [vmem:[#allocation13 + $0x418] sm:$0xff] }
 0x820   :  { %6266 = vmatprep.mubr.f32.mxu1 %v12539_v7  ;;  %6406 = vmatprep.mubr.f32.mxu0 %v12470_v25 }
 0x821   :  { %8626 = vmatprep.subr.mxu1 %v5886_v16 }
 0x822   :  { %6267 = vmatmul.mubr.f32.gmra.mxu1 %v12470_v25  ;;  %v5882_v25 = vld [vmem:[#allocation13 + $0x440] sm:$0xff] }
 0x823   :  { %6407 = vmatmul.mubr.f32.gmra.mxu0 %v12527_v19  ;;  %8627 = vmatpush3.msra.mxu1 %v5886_v16  ;;  %v5549_v19 = vld [vmem:[#allocation5 + $0xf1] sm:$0xff] }
 0x824   :  { %6271 = vmatprep.mubr.f32.mxu1 %v12547_v36  ;;  %6411 = vmatprep.mubr.f32.mxu0 %v12472_v2 }
 0x825   :  { %8628 = vmatprep.subr.mxu1 %v5885_v55 }
 0x826   :  { %6272 = vmatmul.mubr.f32.gmra.mxu1 %v12472_v2  ;;  %v12647_v2 = vld [vmem:[#allocation5 + $0x82] sm:$0xff] }
 0x827   :  { %6412 = vmatmul.mubr.f32.gmra.mxu0 %v12535_v52  ;;  %8629 = vmatpush3.msra.mxu1 %v5885_v55  ;;  %v5550_v52 = vld [vmem:[#allocation5 + $0x101] sm:$0xff] }
 0x828   :  { %6276 = vmatprep.mubr.f32.mxu1 %v12555_v58  ;;  %6416 = vmatprep.mubr.f32.mxu0 %v12474_v1 }
 0x829   :  { %8630 = vmatprep.subr.mxu1 %v5884_v61 }
 0x82a   :  { %6277 = vmatmul.mubr.f32.gmra.mxu1 %v12474_v1  ;;  %v5545_v1 = vld [vmem:[#allocation5 + $0x91] sm:$0xff] }
 0x82b   :  { %6417 = vmatmul.mubr.f32.gmra.mxu0 %v12543_v59  ;;  %8631 = vmatpush3.msra.mxu1 %v5884_v61  ;;  %v5551_v59 = vld [vmem:[#allocation5 + $0x111] sm:$0xff]  ;;  %v6715_v61 = vld [vmem:[#allocation7 + $0x48] sm:$0xff] }
 0x82c   :  { %6281 = vmatprep.mubr.f32.mxu1 %v12561_v20  ;;  %6421 = vmatprep.mubr.f32.mxu0 %v12476_v54 }
 0x82d   :  { %8632 = vmatprep.subr.mxu1 %v5883_v15 }
 0x82e   :  { %6282 = vmatmul.mubr.f32.gmra.mxu1 %v12476_v54  ;;  %v5513_v54 = vld [vmem:[#allocation5 + $0x90] sm:$0xff] }
 0x82f   :  { %6422 = vmatmul.mubr.f32.gmra.mxu0 %v12551_v49  ;;  %8633 = vmatpush3.msra.mxu1 %v5883_v15  ;;  %v5874_v49 = vld [vmem:[#allocation13 + $0x400] sm:$0xff] }
 0x830   :  { %6286 = vmatprep.mubr.f32.mxu1 %v12647_v2  ;;  %6426 = vmatprep.mubr.f32.mxu0 %v12478_v0 }
 0x831   :  { %8634 = vmatprep.subr.mxu1 %v5882_v25 }
 0x832   :  { %6287 = vmatmul.mubr.f32.gmra.mxu1 %v12478_v0  ;;  %v5879_v0 = vld [vmem:[#allocation13 + $0x428] sm:$0xff] }
 0x833   :  { %6427 = vmatmul.mubr.f32.gmra.mxu0 %v12558_v29  ;;  %8635 = vmatpush3.msra.mxu1 %v5882_v25  ;;  %v6719_v29 = vld [vmem:[#allocation7 + $0x68] sm:$0xff] }
 0x834   :  { %6291 = vmatprep.mubr.f32.mxu1 %v12570_v14  ;;  %6431 = vmatprep.mubr.f32.mxu0 %v5545_v1  ;;  %v6717_v14 = vld [vmem:[#allocation7 + $0x58] sm:$0xff] }
 0x835   :  { %8636 = vmatprep.subr.mxu1 %v5881_v10 }
 0x836   :  { %6292 = vmatmul.mubr.f32.gmra.mxu1 %v12480_v38  ;;  %v5878_v38 = vld [vmem:[#allocation13 + $0x420] sm:$0xff] }
 0x837   :  { %6432 = vmatmul.mubr.f32.gmra.mxu0 %v5513_v54  ;;  %8637 = vmatpush3.msra.mxu1 %v5881_v10 }
 0x838   :  { %6296 = vmatprep.mubr.f32.mxu1 %v12578_v57  ;;  %6436 = vmatprep.mubr.f32.mxu0 %v12482_v4 }
 0x839   :  { %8638 = vmatprep.subr.mxu1 %v5880_v8 }
 0x83a   :  { %6297 = vmatmul.mubr.f32.gmra.mxu1 %v12482_v4  ;;  %v5453_v4 = vld [vmem:[#allocation5 + $0xe1] sm:$0xff] }
 0x83b   :  { %6437 = vmatmul.mubr.f32.gmra.mxu0 %v12566_v18  ;;  %8639 = vmatpush3.msra.mxu1 %v5880_v8 }
 0x83c   :  { %6301 = vmatprep.mubr.f32.mxu1 %v12587_v6  ;;  %6441 = vmatprep.mubr.f32.mxu0 %v12484_v37 }
 0x83d   :  { %8640 = vmatprep.subr.mxu1 %v5879_v0 }
 0x83e   :  { %6302 = vmatmul.mubr.f32.gmra.mxu1 %v12484_v37  ;;  %v5876_v37 = vld [vmem:[#allocation13 + $0x410] sm:$0xff] }
 0x83f   :  { %6442 = vmatmul.mubr.f32.gmra.mxu0 %v12574_v5  ;;  %8641 = vmatpush3.msra.mxu1 %v5879_v0 }
 0x840   :  { %6306 = vmatprep.mubr.f32.mxu1 %v12595_v44  ;;  %6446 = vmatprep.mubr.f32.mxu0 %v12490_v40  ;;  %v5875_v40 = vld [vmem:[#allocation13 + $0x408] sm:$0xff] }
 0x841   :  { %8642 = vmatprep.subr.mxu1 %v5878_v38 }
 0x842   :  { %6307 = vmatmul.mubr.f32.gmra.mxu1 %v5453_v4 }
 0x843   :  { %6447 = vmatmul.mubr.f32.gmra.mxu0 %v12582_v12  ;;  %8643 = vmatpush3.msra.mxu1 %v5878_v38 }
 0x844   :  { %6311 = vmatprep.mubr.f32.mxu1 %v12603_v63  ;;  %6451 = vmatprep.mubr.f32.mxu0 %v5549_v19 }
 0x845   :  { %8644 = vmatprep.subr.mxu1 %v5877_v33 }
 0x846   :  { %6312 = vmatmul.mubr.f32.gmra.mxu1 %v5549_v19 }
 0x847   :  { %6452 = vmatmul.mubr.f32.gmra.mxu0 %v12591_v53  ;;  %8645 = vmatpush3.msra.mxu1 %v5877_v33 }
 0x848   :  { %6316 = vmatprep.mubr.f32.mxu1 %v12611_v23  ;;  %6456 = vmatprep.mubr.f32.mxu0 %v5550_v52 }
 0x849   :  { %8646 = vmatprep.subr.mxu1 %v5876_v37 }
 0x84a   :  { %6317 = vmatmul.mubr.f32.gmra.mxu1 %v5550_v52 }
 0x84b   :  { %6457 = vmatmul.mubr.f32.gmra.mxu0 %v12599_v21  ;;  %8647 = vmatpush3.msra.mxu1 %v5876_v37 }
 0x84c   :  { %6321 = vmatprep.mubr.f32.mxu1 %v12618_v47  ;;  %6461 = vmatprep.mubr.f32.mxu0 %v5551_v59 }
 0x84d   :  { %8648 = vmatprep.subr.mxu1 %v5875_v40 }
 0x84e   :  { %6322 = vmatmul.mubr.f32.gmra.mxu1 %v5551_v59 }
 0x84f   :  { %6462 = vmatmul.mubr.f32.gmra.mxu0 %v12607_v31  ;;  %8649 = vmatpush3.msra.mxu1 %v5875_v40 }
 0x850   :  { %6326 = vmatprep.mubr.f32.mxu1 %v5489_v45  ;;  %6466 = vmatprep.mubr.f32.mxu0 %v5552_v11 }
 0x851   :  { %8650 = vmatprep.subr.mxu1 %v5874_v49 }
 0x852   :  { %6327 = vmatmul.mubr.f32.gmra.mxu1 %v5552_v11 }
 0x853   :  { %6467 = vmatmul.mubr.f32.gmra.mxu0 %v12614_v17  ;;  %8651 = vmatpush3.msra.mxu1 %v5874_v49 }
 0x854   :  { %8652 = vmatprep.mubr.f32.mxu1 %v12523_v50  ;;  %6471 = vmatprep.mubr.f32.mxu0 %v5553_v27  ;;  %v5577_v50 = vld [vmem:[#allocation5 + $0x92] sm:$0xff] }
 0x855   :  { %8711 = vmatprep.subr.mxu1 %v13320_v62 }
 0x856   :  { %8653 = vmatmul.mubr.f32.vlgmr.msra.gmra.mxu1 %v12531_v43  ;;  %v5585_v43 = vld [vmem:[#allocation5 + $0x132] sm:$0xff] }
 0x857   :  { %6472 = vmatmul.mubr.f32.gmra.mxu0 %v5521_v34  ;;  %8655 = vmatprep.mubr.f32.mxu1 %v12539_v7  ;;  %v6721_v7 = vld [vmem:[#allocation7 + $0x78] sm:$0xff] }
 0x858   :  { %8708 = vmatprep.mubr.msk.f32.mxu0 %vm8880_vm4, %v13320_v62  ;;  %8677 = vmatpush3.msra.mxu0 %v6721_v7 }
 0x859   :  { %8712 = vmatpush3.msra.mxu1 %v6721_v7  ;;  %8678 = vmatprep.subr.mxu0 %v13320_v62 }
 0x85a   :  { %8656 = vmatmul.mubr.f32.gmra.mxu1 %v12547_v36  ;;  %8713 = vmatprep.subr.mxu1 %v13320_v62  ;;  %v6720_v36 = vld [vmem:[#allocation7 + $0x70] sm:$0xff] }
 0x85b   :  { %8658 = vmatprep.mubr.f32.mxu1 %v12555_v58  ;;  %8679 = vmatpush3.msra.mxu0 %v6720_v36  ;;  %v7886_v58 = vpop.f32.mrf.mxu1 }
 0x85c   :  { %8714 = vmatpush3.msra.mxu1 %v6720_v36  ;;  %8680 = vmatprep.subr.mxu0 %v13320_v62 }
 0x85d   :  { %8715 = vmatprep.subr.mxu1 %v13320_v62  ;;  %8681 = vmatpush3.msra.mxu0 %v6719_v29  ;;  %v7887_v56 = vpop.f32.mrf.mxu1 }
 0x85e   :  { %8659 = vmatmul.mubr.f32.gmra.mxu1 %v12561_v20  ;;  %8682 = vmatprep.subr.mxu0 %v13320_v62  ;;  %v7888_v28 = vadd.f32 %v7887_v56, %v7886_v58  ;;  %v12700_v20 = vld [vmem:[%s13023_s16] ss:$0 sm:$0xff]  ;;  %v6713_v56 = vld [vmem:[#allocation7 + $0x38] sm:$0xff] }
 0x85f   :  { %8661 = vmatprep.mubr.f32.mxu1 %v12647_v2  ;;  %8716 = vmatpush3.msra.mxu1 %v6719_v29  ;;  %v6714_v29 = vld [vmem:[#allocation7 + $0x40] sm:$0xff] }
 0x860   :  { %8717 = vmatprep.subr.mxu1 %v13320_v62  ;;  %8683 = vmatpush3.msra.mxu0 %v6718_v41  ;;  %v5964_v51 = vadd.f32 %v7888_v28, %v12700_v20 }
 0x861   :  { %8718 = vmatpush3.msra.mxu1 %v6718_v41  ;;  %8684 = vmatprep.subr.mxu0 %v13320_v62 }
 0x862   :  { %8662 = vmatmul.mubr.f32.gmra.mxu1 %v5577_v50  ;;  %8719 = vmatprep.subr.mxu1 %v13320_v62 }
 0x863   :  { %8664 = vmatprep.mubr.f32.mxu1 %v12578_v57  ;;  %8685 = vmatpush3.msra.mxu0 %v6717_v14 }
 0x864   :  { %8720 = vmatpush3.msra.mxu1 %v6717_v14  ;;  %8686 = vmatprep.subr.mxu0 %v13320_v62 }
 0x865   :  { %8721 = vmatprep.subr.mxu1 %v13320_v62 }
 0x866   :  { %8665 = vmatmul.mubr.f32.gmra.mxu1 %v12587_v6 }
 0x867   :  { %8667 = vmatprep.mubr.f32.mxu1 %v12595_v44  ;;  %v6716_v44 = vld [vmem:[#allocation7 + $0x50] sm:$0xff] }
 0x868   :  { %8687 = vmatpush3.msra.mxu0 %v6716_v44  ;;  %8722 = vmatpush3.msra.mxu1 %v6716_v44 }
 0x869   :  { %8688 = vmatprep.subr.mxu0 %v13320_v62  ;;  %8723 = vmatprep.subr.mxu1 %v13320_v62 }
 0x86a   :  { %8668 = vmatmul.mubr.f32.gmra.mxu1 %v12603_v63  ;;  %8689 = vmatpush3.msra.mxu0 %v6715_v61 }
 0x86b   :  { %8670 = vmatprep.mubr.f32.mxu1 %v12611_v23  ;;  %8724 = vmatpush3.msra.mxu1 %v6715_v61 }
 0x86c   :  { %8690 = vmatprep.subr.mxu0 %v13320_v62  ;;  %8725 = vmatprep.subr.mxu1 %v13320_v62 }
 0x86d   :  { %8691 = vmatpush3.msra.mxu0 %v6714_v29  ;;  %8726 = vmatpush3.msra.mxu1 %v6714_v29  ;;  %v6706_v29 = vld [vmem:[#allocation7] sm:$0xff] }
 0x86e   :  { %8671 = vmatmul.mubr.f32.gmra.mxu1 %v12618_v47  ;;  %8692 = vmatprep.subr.mxu0 %v13320_v62 }
 0x86f   :  { %8673 = vmatprep.mubr.f32.mxu1 %v5489_v45  ;;  %8727 = vmatprep.subr.mxu1 %v13320_v62 }
 0x870   :  { %8693 = vmatpush3.msra.mxu0 %v6713_v56  ;;  %8728 = vmatpush3.msra.mxu1 %v6713_v56 }
 0x871   :  { %8694 = vmatprep.subr.mxu0 %v13320_v62  ;;  %8729 = vmatprep.subr.mxu1 %v13320_v62 }
 0x872   :  { %8674 = vmatmul.mubr.f32.gmra.mxu1 %v5585_v43 }
 0x873   :  { %8743 = vmatprep.mubr.msk.f32.mxu1 %vm8880_vm4, %v13320_v62 }
 0x89a   :  { %v7889_v46 = vpop.f32.mrf.mxu1 }
 0x89b   :  { %v7966_v32 = vpop.f32.mrf.mxu0 }
 0x89c   :  { %v7890_v39 = vpop.f32.mrf.mxu1 }
 0x89d   :  { %v7891_v26 = vadd.f32 %v7890_v39, %v7889_v46  ;;  %v7967_v60 = vpop.f32.mrf.mxu0  ;;  %v6712_v39 = vld [vmem:[#allocation7 + $0x30] sm:$0xff] }
 0x89e   :  { %v7968_v18 = vadd.f32 %v7967_v60, %v7966_v32  ;;  %v7892_v24 = vpop.f32.mrf.mxu1  ;;  %8695 = vmatpush3.msra.mxu0 %v6712_v39  ;;  %8730 = vmatpush3.msra.mxu1 %v6712_v39 }
 0x89f   :  { %v7969_v13 = vpop.f32.mrf.mxu0  ;;  %v5969_v57 = vadd.f32 %v7891_v26, %v12700_v20  ;;  %8696 = vmatprep.subr.mxu0 %v13320_v62  ;;  %8731 = vmatprep.subr.mxu1 %v13320_v62 }
 0x8a0   :  { %v12705_v42 = vadd.f32 %v7968_v18, %v5964_v51  ;;  %v7893_v5 = vpop.f32.mrf.mxu1 }
 0x8a1   :  { %v7894_v35 = vadd.f32 %v7893_v5, %v7892_v24  ;;  %v7970_v22 = vpop.f32.mrf.mxu0  ;;  %v6711_v24 = vld [vmem:[#allocation7 + $0x28] sm:$0xff] }
 0x8a2   :  { %v7971_v12 = vadd.f32 %v7970_v22, %v7969_v13  ;;  %v7895_v6 = vpop.f32.mrf.mxu1  ;;  %8697 = vmatpush3.msra.mxu0 %v6711_v24  ;;  %8732 = vmatpush3.msra.mxu1 %v6711_v24 }
 0x8a3   :  { %v7972_v53 = vpop.f32.mrf.mxu0  ;;  %v5974_v17 = vadd.f32 %v7894_v35, %v12700_v20  ;;  %8698 = vmatprep.subr.mxu0 %v13320_v62  ;;  %8733 = vmatprep.subr.mxu1 %v13320_v62 }
 0x8a4   :  { %v12710_v21 = vadd.f32 %v7971_v12, %v5969_v57  ;;  %v7896_v63 = vpop.f32.mrf.mxu1 }
 0x8a5   :  { %v7897_v31 = vadd.f32 %v7896_v63, %v7895_v6  ;;  %v7973_v23 = vpop.f32.mrf.mxu0 }
 0x8a6   :  { %v7974_v47 = vadd.f32 %v7973_v23, %v7972_v53  ;;  %v7898_v9 = vpop.f32.mrf.mxu1 }
 0x8a7   :  { %v7975_v30 = vpop.f32.mrf.mxu0  ;;  %v5979_v2 = vadd.f32 %v7897_v31, %v12700_v20 }
 0x8a8   :  { %v12715_v16 = vadd.f32 %v7974_v47, %v5974_v17  ;;  %v7899_v55 = vpop.f32.mrf.mxu1 }
 0x8a9   :  { %v7900_v15 = vadd.f32 %v7899_v55, %v7898_v9  ;;  %v7976_v25 = vpop.f32.mrf.mxu0 }
 0x8aa   :  { %v7977_v1 = vadd.f32 %v7976_v25, %v7975_v30  ;;  %v7901_v10 = vpop.f32.mrf.mxu1 }
 0x8ab   :  { %v7978_v54 = vpop.f32.mrf.mxu0  ;;  %v5984_v33 = vadd.f32 %v7900_v15, %v12700_v20 }
 0x8ac   :  { %v12720_v8 = vadd.f32 %v7977_v1, %v5979_v2  ;;  %v7902_v0 = vpop.f32.mrf.mxu1 }
 0x8ad   :  { %v7903_v38 = vadd.f32 %v7902_v0, %v7901_v10  ;;  %v7979_v4 = vpop.f32.mrf.mxu0 }
 0x8ae   :  { %v7980_v19 = vadd.f32 %v7979_v4, %v7978_v54  ;;  %v7904_v37 = vpop.f32.mrf.mxu1  ;;  %v6710_v4 = vld [vmem:[#allocation7 + $0x20] sm:$0xff] }
 0x8af   :  { %v7981_v52 = vpop.f32.mrf.mxu0  ;;  %v5989_v11 = vadd.f32 %v7903_v38, %v12700_v20  ;;  %8699 = vmatpush3.msra.mxu0 %v6710_v4  ;;  %8734 = vmatpush3.msra.mxu1 %v6710_v4 }
 0x8b0   :  { %v12723_v40 = vadd.f32 %v7980_v19, %v5984_v33  ;;  %v7905_v59 = vpop.f32.mrf.mxu1  ;;  %v6709_v33 = vld [vmem:[#allocation7 + $0x18] sm:$0xff]  ;;  %8700 = vmatprep.subr.mxu0 %v13320_v62  ;;  %8735 = vmatprep.subr.mxu1 %v13320_v62 }
 0x8b1   :  { %v7906_v49 = vadd.f32 %v7905_v59, %v7904_v37  ;;  %v7982_v45 = vpop.f32.mrf.mxu0  ;;  %v6708_v59 = vld [vmem:[#allocation7 + $0x10] sm:$0xff]  ;;  %8701 = vmatpush3.msra.mxu0 %v6709_v33  ;;  %8736 = vmatpush3.msra.mxu1 %v6709_v33 }
 0x8b2   :  { %v7983_v27 = vadd.f32 %v7982_v45, %v7981_v52  ;;  %v7907_v34 = vpop.f32.mrf.mxu1  ;;  %8702 = vmatprep.subr.mxu0 %v13320_v62  ;;  %8737 = vmatprep.subr.mxu1 %v13320_v62 }
 0x8b3   :  { %v7984_v50 = vpop.f32.mrf.mxu0  ;;  %v5994_v28 = vadd.f32 %v7906_v49, %v12700_v20  ;;  %8703 = vmatpush3.msra.mxu0 %v6708_v59  ;;  %8738 = vmatpush3.msra.mxu1 %v6708_v59 }
 0x8b4   :  { %v12726_v43 = vadd.f32 %v7983_v27, %v5989_v11  ;;  %v7908_v7 = vpop.f32.mrf.mxu1  ;;  %8704 = vmatprep.subr.mxu0 %v13320_v62  ;;  %8739 = vmatprep.subr.mxu1 %v13320_v62 }
 0x8b5   :  { %v7909_v36 = vadd.f32 %v7908_v7, %v7907_v34  ;;  %v7985_v58 = vpop.f32.mrf.mxu0 }
 0x8b6   :  { %v7986_v46 = vadd.f32 %v7985_v58, %v7984_v50  ;;  %v7910_v32 = vpop.f32.mrf.mxu1  ;;  %v6707_v50 = vld [vmem:[#allocation7 + $0x8] sm:$0xff] }
 0x8b7   :  { %v7987_v41 = vpop.f32.mrf.mxu0  ;;  %v5999_v13 = vadd.f32 %v7909_v36, %v12700_v20  ;;  %8705 = vmatpush3.msra.mxu0 %v6707_v50  ;;  %8740 = vmatpush3.msra.mxu1 %v6707_v50 }
 0x8b8   :  { %v12731_v26 = vadd.f32 %v7986_v46, %v5994_v28  ;;  %v7911_v60 = vpop.f32.mrf.mxu1  ;;  %8706 = vmatprep.subr.mxu0 %v13320_v62  ;;  %8741 = vmatprep.subr.mxu1 %v13320_v62 }
 0x8b9   :  { %v7912_v51 = vadd.f32 %v7911_v60, %v7910_v32  ;;  %v7988_v18 = vpop.f32.mrf.mxu0  ;;  %8707 = vmatpush3.msra.mxu0 %v6706_v29  ;;  %8742 = vmatpush3.msra.mxu1 %v6706_v29 }
 0x8ba   :  { %v7989_v14 = vadd.f32 %v7988_v18, %v7987_v41  ;;  %v7913_v5 = vpop.f32.mrf.mxu1 }
 0x8bb   :  { %v7990_v35 = vpop.f32.mrf.mxu0  ;;  %v6004_v53 = vadd.f32 %v7912_v51, %v12700_v20 }
 0x8bc   :  { %v12738_v22 = vadd.f32 %v7989_v14, %v5999_v13  ;;  %v7914_v57 = vpop.f32.mrf.mxu1 }
 0x8bd   :  { %v7915_v12 = vadd.f32 %v7914_v57, %v7913_v5  ;;  %v7991_v6 = vpop.f32.mrf.mxu0 }
 0x8be   :  { %v7992_v44 = vadd.f32 %v7991_v6, %v7990_v35  ;;  %v7916_v63 = vpop.f32.mrf.mxu1 }
 0x8bf   :  { %v7993_v31 = vpop.f32.mrf.mxu0  ;;  %v6009_v30 = vadd.f32 %v7915_v12, %v12700_v20 }
 0x8c0   :  { %v12743_v23 = vadd.f32 %v7992_v44, %v6004_v53  ;;  %v7917_v17 = vpop.f32.mrf.mxu1 }
 0x8c1   :  { %v7918_v47 = vadd.f32 %v7917_v17, %v7916_v63  ;;  %v7994_v9 = vpop.f32.mrf.mxu0 }
 0x8c2   :  { %v7995_v55 = vadd.f32 %v7994_v9, %v7993_v31  ;;  %v7919_v61 = vpop.f32.mrf.mxu1 }
 0x8c3   :  { %v7996_v15 = vpop.f32.mrf.mxu0  ;;  %v6014_v54 = vadd.f32 %v7918_v47, %v12700_v20 }
 0x8c4   :  { %v12746_v25 = vadd.f32 %v7995_v55, %v6009_v30  ;;  %v7920_v2 = vpop.f32.mrf.mxu1 }
 0x8c5   :  { %v7921_v1 = vadd.f32 %v7920_v2, %v7919_v61  ;;  %v7997_v10 = vpop.f32.mrf.mxu0 }
 0x8c6   :  { %v7998_v0 = vadd.f32 %v7997_v10, %v7996_v15  ;;  %v7922_v38 = vpop.f32.mrf.mxu1 }
 0x8c7   :  { %v7999_v19 = vpop.f32.mrf.mxu0  ;;  %v6019_v11 = vadd.f32 %v7921_v1, %v12700_v20 }
 0x8c8   :  { %v12749_v37 = vadd.f32 %v7998_v0, %v6014_v54  ;;  %v7923_v52 = vpop.f32.mrf.mxu1 }
 0x8c9   :  { %v7924_v49 = vadd.f32 %v7923_v52, %v7922_v38  ;;  %v8000_v45 = vpop.f32.mrf.mxu0 }
 0x8ca   :  { %v8001_v27 = vadd.f32 %v8000_v45, %v7999_v19  ;;  %v7925_v34 = vpop.f32.mrf.mxu1 }
 0x8cb   :  { %v8002_v7 = vpop.f32.mrf.mxu0  ;;  %v6024_v46 = vadd.f32 %v7924_v49, %v12700_v20 }
 0x8cc   :  { %v12756_v36 = vadd.f32 %v8001_v27, %v6019_v11  ;;  %v7926_v58 = vpop.f32.mrf.mxu1 }
 0x8cd   :  { %v7927_v56 = vadd.f32 %v7926_v58, %v7925_v34  ;;  %v8003_v28 = vpop.f32.mrf.mxu0 }
 0x8ce   :  { %13321 = vst [vmem:[#allocation35_spill] sm:$0xff] %v12756_v36  ;;  %v8004_v32 = vadd.f32 %v8003_v28, %v8002_v7  ;;  %v7928_v41 = vpop.f32.mrf.mxu1 }
 0x8cf   :  { %v8005_v39 = vpop.f32.mrf.mxu0  ;;  %v6029_v13 = vadd.f32 %v7927_v56, %v12700_v20 }
 0x8d0   :  { %v12763_v60 = vadd.f32 %v8004_v32, %v6024_v46  ;;  %v7929_v51 = vpop.f32.mrf.mxu1 }
 0x8d1   :  { %v7930_v18 = vadd.f32 %v7929_v51, %v7928_v41  ;;  %v8006_v24 = vpop.f32.mrf.mxu0 }
 0x8d2   :  { %13322 = vst [vmem:[#allocation36_spill] sm:$0xff] %v12763_v60  ;;  %v8007_v14 = vadd.f32 %v8006_v24, %v8005_v39  ;;  %v7931_v5 = vpop.f32.mrf.mxu1 }
 0x8d3   :  { %v8008_v35 = vpop.f32.mrf.mxu0  ;;  %v6034_v62 = vadd.f32 %v7930_v18, %v12700_v20 }
 0x8d4   :  { %v12766_v57 = vadd.f32 %v8007_v14, %v6029_v13  ;;  %v7932_v12 = vpop.f32.mrf.mxu1 }
 0x8d5   :  { %v12768_v6 = vadd.f32 %v7932_v12, %v7931_v5  ;;  %v8009_v53 = vpop.f32.mrf.mxu0 }
 0x8d6   :  { %13323 = vst [vmem:[#allocation44_spill] sm:$0xff] %v12766_v57  ;;  %v8010_v44 = vadd.f32 %v8009_v53, %v8008_v35  ;;  %v8046_v63 = vpop.f32.mrf.mxu1 }
 0x8d7   :  { %v12771_v31 = vpop.f32.mrf.mxu0 }
 0x8d8   :  { %v12773_v17 = vadd.f32 %v8010_v44, %v6034_v62  ;;  %v8047_v47 = vpop.f32.mrf.mxu1 }
 0x8d9   :  { %v12775_v9 = vpop.f32.mrf.mxu0  ;;  %v8048_v30 = vadd.f32 %v8047_v47, %v8046_v63 }
 0x8da   :  { %13324 = vst [vmem:[#allocation46_spill] sm:$0xff] %v12773_v17  ;;  %v8049_v55 = vpop.f32.mrf.mxu1 }
 0x8db   :  { %v12778_v61 = vadd.f32 %v8048_v30, %v12705_v42  ;;  %v12780_v15 = vpop.f32.mrf.mxu0 }
 0x8dc   :  { %v8050_v2 = vpop.f32.mrf.mxu1 }
 0x8dd   :  { %v8051_v1 = vadd.f32 %v8050_v2, %v8049_v55  ;;  %v12782_v10 = vpop.f32.mrf.mxu0 }
 0x8de   :  { %v8052_v54 = vpop.f32.mrf.mxu1  ;;  %v8128_v3 = vadd.f32 %v12782_v10, %v12780_v15 }
 0x8df   :  { %v12785_v0 = vadd.f32 %v8051_v1, %v12710_v21  ;;  %v8129_v38 = vpop.f32.mrf.mxu0 }
 0x8e0   :  { %v8053_v4 = vpop.f32.mrf.mxu1 }
 0x8e1   :  { %v8054_v33 = vadd.f32 %v8053_v4, %v8052_v54  ;;  %v8130_v19 = vpop.f32.mrf.mxu0 }
 0x8e2   :  { %v8055_v52 = vpop.f32.mrf.mxu1 }
 0x8e3   :  { %v12788_v59 = vadd.f32 %v8054_v33, %v12715_v16  ;;  %v8132_v42 = vpop.f32.mrf.mxu0 }
 0x8e4   :  { %v8056_v49 = vpop.f32.mrf.mxu1 }
 0x8e5   :  { %v8057_v45 = vadd.f32 %v8056_v49, %v8055_v52  ;;  %v8133_v11 = vpop.f32.mrf.mxu0 }
 0x8e6   :  { %v8058_v27 = vpop.f32.mrf.mxu1 }
 0x8e7   :  { %v6269_v34 = vadd.f32 %v8057_v45, %v12720_v8  ;;  %v8135_v50 = vpop.f32.mrf.mxu0 }
 0x8e8   :  { %v8059_v7 = vpop.f32.mrf.mxu1 }
 0x8e9   :  { %v8060_v58 = vadd.f32 %v8059_v7, %v8058_v27  ;;  %v8136_v21 = vpop.f32.mrf.mxu0 }
 0x8ea   :  { %v8061_v29 = vpop.f32.mrf.mxu1  ;;  %v8137_v57 = vadd.f32 %v8136_v21, %v8135_v50 }
 0x8eb   :  { %v12792_v56 = vadd.f32 %v8060_v58, %v12723_v40  ;;  %v8138_v28 = vpop.f32.mrf.mxu0 }
 0x8ec   :  { %v8062_v46 = vpop.f32.mrf.mxu1 }
 0x8ed   :  { %v8063_v32 = vadd.f32 %v8062_v46, %v8061_v29  ;;  %v8139_v16 = vpop.f32.mrf.mxu0 }
 0x8ee   :  { %v8064_v41 = vpop.f32.mrf.mxu1 }
 0x8ef   :  { %v12795_v39 = vadd.f32 %v8063_v32, %v12726_v43  ;;  %v8141_v51 = vpop.f32.mrf.mxu0 }
 0x8f0   :  { %v8065_v18 = vpop.f32.mrf.mxu1 }
 0x8f1   :  { %v8066_v24 = vadd.f32 %v8065_v18, %v8064_v41  ;;  %v8142_v8 = vpop.f32.mrf.mxu0  ;;  %v8131_v18 = vadd.f32 %v8130_v19, %v8129_v38  ;;  %v8140_v19 = vadd.f32 %v8139_v16, %v8138_v28 }
 0x8f2   :  { %v8067_v13 = vpop.f32.mrf.mxu1 }
 0x8f3   :  { %v12798_v14 = vadd.f32 %v8066_v24, %v12731_v26  ;;  %v8144_v5 = vpop.f32.mrf.mxu0  ;;  %v6404_v60 = vadd.f32 %v8131_v18, %v12785_v0  ;;  %v6419_v16 = vadd.f32 %v8140_v19, %v12792_v56 }
 0x8f4   :  { %v8068_v35 = vpop.f32.mrf.mxu1 }
 0x8f5   :  { %v8145_v40 = vpop.f32.mrf.mxu0  ;;  %v8069_v15 = vadd.f32 %v8068_v35, %v8067_v13 }
 0x8f6   :  { %v8070_v12 = vpop.f32.mrf.mxu1  ;;  %v8146_v10 = vadd.f32 %v8145_v40, %v8144_v5 }
 0x8f7   :  { %v8147_v53 = vpop.f32.mrf.mxu0 }
 0x8f8   :  { %v8071_v62 = vpop.f32.mrf.mxu1 }
 0x8f9   :  { %v8148_v44 = vpop.f32.mrf.mxu0 }
 0x8fa   :  { %v8073_v63 = vpop.f32.mrf.mxu1 }
 0x8fb   :  { %v12800_v47 = vpop.f32.mrf.mxu0 }
 0x8fc   :  { %v8074_v43 = vpop.f32.mrf.mxu1 }
 0x8fd   :  { %v12802_v30 = vpop.f32.mrf.mxu0 }
 0x8fe   :  { %v12804_v55 = vpop.f32.mrf.mxu1 }
 0x8ff   :  { %v8153_v2 = vpop.f32.mrf.mxu0 }
 0x900   :  { %v12806_v1 = vpop.f32.mrf.mxu1 }
 0x901   :  { %v8154_v26 = vpop.f32.mrf.mxu0 }
 0x902   :  { %v12808_v54 = vpop.f32.mrf.mxu1  ;;  %v8155_v56 = vadd.f32 %v8154_v26, %v8153_v2 }
 0x903   :  { %v12810_v4 = vpop.f32.mrf.mxu0 }
 0x904   :  { %v12812_v33 = vpop.f32.mrf.mxu1 }
 0x905   :  { %v12814_v52 = vpop.f32.mrf.mxu0 }
 0x906   :  { %v12816_v49 = vpop.f32.mrf.mxu1 }
 0x907   :  { %13325 = vst [vmem:[#allocation45_spill] sm:$0xff] %v12816_v49  ;;  %v12818_v45 = vpop.f32.mrf.mxu0  ;;  %v8143_v49 = vadd.f32 %v8142_v8, %v8141_v51  ;;  %v6289_v51 = vadd.f32 %v8069_v15, %v12738_v22 }
 0x908   :  { %v12820_v27 = vpop.f32.mrf.mxu1 }
 0x909   :  { %13326 = vst [vmem:[#allocation48_spill] sm:$0xff] %v12820_v27  ;;  %v12824_v58 = vpop.f32.mrf.mxu0  ;;  %v6414_v27 = vadd.f32 %v8137_v57, %v6269_v34  ;;  %v8013_v57 = vadd.f32 %v12775_v9, %v12771_v31 }
 0x90a   :  { %v12822_v7 = vpop.f32.mrf.mxu1 }
 0x90b   :  { %13327 = vst [vmem:[#allocation47_spill] sm:$0xff] %v12822_v7  ;;  %v12830_v32 = vpop.f32.mrf.mxu0  ;;  %v8134_v7 = vadd.f32 %v8133_v11, %v8132_v42 }
 0x90c   :  { %v12826_v29 = vpop.f32.mrf.mxu1  ;;  %13330 = vst [vmem:[#allocation28_spill] sm:$0xff] %v12830_v32 }
 0x90d   :  { %13328 = vst [vmem:[#allocation26_spill] sm:$0xff] %v12826_v29  ;;  %v12838_v48 = vpop.f32.mrf.mxu0  ;;  %v6409_v11 = vadd.f32 %v8134_v7, %v12788_v59  ;;  %v6424_v59 = vadd.f32 %v8143_v49, %v12795_v39 }
 0x90e   :  { %v12828_v46 = vpop.f32.mrf.mxu1  ;;  %13333 = vst [vmem:[#allocation32_spill] sm:$0xff] %v12838_v48  ;;  %v13335_v19 = vld [vmem:[#allocation45_spill] sm:$0xff] }
 0x90f   :  { %13329 = vst [vmem:[#allocation29_spill] sm:$0xff] %v12828_v46  ;;  %v12843_v46 = vpop.f32.mrf.mxu0 }
 0x910   :  { %v12832_v41 = vpop.f32.mrf.mxu1 }
 0x911   :  { %13331 = vst [vmem:[#allocation31_spill] sm:$0xff] %v12832_v41  ;;  %v6399_v41 = vadd.f32 %v8128_v3, %v12778_v61  ;;  %v12846_v36 = vpop.f32.mrf.mxu0  ;;  %v6039_v3 = vadd.f32 %v12768_v6, %v12700_v20  ;;  %v8149_v61 = vadd.f32 %v8148_v44, %v8147_v53  ;;  %v6429_v20 = vadd.f32 %v8146_v10, %v12798_v14 }
 0x912   :  { %v12834_v24 = vpop.f32.mrf.mxu1  ;;  %v13337_v15 = vld [vmem:[#allocation47_spill] sm:$0xff] }
 0x913   :  { %13332 = vst [vmem:[#allocation30_spill] sm:$0xff] %v12834_v24  ;;  %v12863_v6 = vpop.f32.mrf.mxu0  ;;  %v6434_v40 = vadd.f32 %v8149_v61, %v6289_v51 }
 0x914   :  { %v12840_v17 = vpop.f32.mrf.mxu1 }
 0x915   :  { %v8169_v26 = vpop.f32.mrf.mxu0 }
 0x916   :  { %v8654_v29 = vpop.f32.mrf.mxu1 }
 0x917   :  { %v6549_v32 = vadd.f32 %v8654_v29, %v6404_v60  ;;  %v8072_v60 = vadd.f32 %v8071_v62, %v8070_v12 }
 0x918   :  { %v6543_v38 = vpop.f32.mrf.mxu1 }
 0x919   :  { %v6544_v24 = vadd.f32 %v6543_v38, %v6399_v41  ;;  %v12848_v50 = vmax.f32 %v6549_v32, 0.0  ;;  %v6294_v22 = vadd.f32 %v8072_v60, %v12743_v23  ;;  %v8081_v23 = vadd.f32 %v12812_v33, %v12808_v54 }
 0x91a   :  { %v8657_v48 = vpop.f32.mrf.mxu1 }
 0x91b   :  { %v12850_v0 = vmax.f32 %v6544_v24, 0.0  ;;  %v6559_v42 = vadd.f32 %v8657_v48, %v6414_v27  ;;  %v8075_v48 = vadd.f32 %v8074_v43, %v8073_v63  ;;  %v6665_v13 = vmul.f32 %v12848_v50, %v12848_v50  ;;  %v13334_v24 = vld [vmem:[#allocation35_spill] sm:$0xff] }
 0x91c   :  { %v6553_v21 = vpop.f32.mrf.mxu1  ;;  %v8152_v63 = vadd.f32 %v12802_v30, %v12800_v47  ;;  %v8078_v43 = vadd.f32 %v12806_v1, %v12804_v55  ;;  %v8161_v47 = vadd.f32 %v12824_v58, %v12818_v45  ;;  %v6309_v38 = vadd.f32 %v8081_v23, %v13334_v24  ;;  %v13338_v45 = vld [vmem:[#allocation26_spill] sm:$0xff] }
 0x91d   :  { %v6664_v34 = vmul.f32 %v12850_v0, %v12850_v0  ;;  %v6554_v28 = vadd.f32 %v6553_v21, %v6409_v11  ;;  %v6638_v31 = vadd.f32 %v12848_v50, %v12850_v0  ;;  %v12869_v9 = vmax.f32 %v6559_v42, 0.0  ;;  %v8171_v42 = vpop.f32.mrf.mxu0 }
 0x91e   :  { %v8660_v8 = vpop.f32.mrf.mxu1  ;;  %v6299_v44 = vadd.f32 %v8075_v48, %v12746_v25  ;;  %v8158_v25 = vadd.f32 %v12814_v52, %v12810_v4  ;;  %v6304_v18 = vadd.f32 %v8078_v43, %v12749_v37  ;;  %v13336_v4 = vld [vmem:[#allocation48_spill] sm:$0xff]  ;;  %v8087_v58 = vadd.f32 %v13338_v45, %v13337_v15  ;;  %v13345_v43 = vld [vmem:[#allocation30_spill] sm:$0xff] }
 0x91f   :  { %v12871_v5 = vmax.f32 %v6554_v28, 0.0  ;;  %v6569_v35 = vadd.f32 %v8660_v8, %v6424_v59  ;;  %v6680_v12 = vadd.f32 %v6665_v13, %v6664_v34  ;;  %v6667_v49 = vmul.f32 %v12869_v9, %v12869_v9  ;;  %v13339_v48 = vld [vmem:[#allocation28_spill] sm:$0xff] }
 0x920   :  { %v6563_v39 = vpop.f32.mrf.mxu1  ;;  %v6444_v1 = vadd.f32 %v8155_v56, %v6299_v44  ;;  %v8084_v52 = vadd.f32 %v13336_v4, %v13335_v19  ;;  %v6184_v34 = vadd.f32 %v8013_v57, %v6039_v3  ;;  %v13340_v59 = vld [vmem:[#allocation32_spill] sm:$0xff]  ;;  %v6454_v13 = vadd.f32 %v8161_v47, %v6309_v38 }
 0x921   :  { %v6639_v14 = vadd.f32 %v6638_v31, %v12871_v5  ;;  %v6666_v53 = vmul.f32 %v12871_v5, %v12871_v5  ;;  %v6564_v62 = vadd.f32 %v6563_v39, %v6419_v16  ;;  %v12893_v30 = vmax.f32 %v6569_v35, 0.0 }
 0x922   :  { %v8663_v2 = vpop.f32.mrf.mxu1  ;;  %v6439_v16 = vadd.f32 %v8152_v63, %v6294_v22  ;;  %v8164_v8 = vadd.f32 %v13340_v59, %v13339_v48  ;;  %v6449_v31 = vadd.f32 %v8158_v25, %v6304_v18  ;;  %v13342_v22 = vld [vmem:[#allocation44_spill] sm:$0xff]  ;;  %v13343_v63 = vld [vmem:[#allocation29_spill] sm:$0xff]  ;;  %v8093_v23 = vadd.f32 %v12840_v17, %v13345_v43 }
 0x923   :  { %v6681_v27 = vadd.f32 %v6680_v12, %v6666_v53  ;;  %v12886_v7 = vmax.f32 %v6564_v62, 0.0  ;;  %v6640_v29 = vadd.f32 %v6639_v14, %v12869_v9  ;;  %v6669_v37 = vmul.f32 %v12893_v30, %v12893_v30  ;;  %v13341_v12 = vld [vmem:[#allocation36_spill] sm:$0xff]  ;;  %v8172_v53 = vpop.f32.mrf.mxu0 }
 0x924   :  { %v6573_v55 = vpop.f32.mrf.mxu1  ;;  %v6579_v28 = vadd.f32 %v8663_v2, %v6434_v40  ;;  %v6314_v40 = vadd.f32 %v8084_v52, %v13341_v12  ;;  %v6319_v14 = vadd.f32 %v8087_v58, %v13342_v22  ;;  %v6329_v19 = vadd.f32 %v8093_v23, %v6184_v34 }
 0x925   :  { %v6641_v54 = vadd.f32 %v6640_v29, %v12886_v7  ;;  %v6668_v33 = vmul.f32 %v12886_v7, %v12886_v7  ;;  %v6682_v32 = vadd.f32 %v6681_v27, %v6667_v49  ;;  %v6574_v41 = vadd.f32 %v6573_v55, %v6429_v20 }
 0x926   :  { %v8666_v10 = vpop.f32.mrf.mxu1  ;;  %v8167_v20 = vadd.f32 %v12846_v36, %v12843_v46  ;;  %v13344_v36 = vld [vmem:[#allocation31_spill] sm:$0xff]  ;;  %v12924_v2 = vmax.f32 %v6579_v28, 0.0  ;;  %v8170_v29 = vadd.f32 %v8169_v26, %v12863_v6  ;;  %v6459_v55 = vadd.f32 %v8164_v8, %v6314_v40  ;;  %v13346_v26 = vld [vmem:[#allocation46_spill] sm:$0xff] }
 0x927   :  { %v6683_v11 = vadd.f32 %v6682_v32, %v6668_v33  ;;  %v12904_v60 = vmax.f32 %v6574_v41, 0.0  ;;  %v6642_v61 = vadd.f32 %v6641_v54, %v12893_v30  ;;  %v6589_v21 = vadd.f32 %v8666_v10, %v6444_v1 }
 0x928   :  { %v6583_v51 = vpop.f32.mrf.mxu1  ;;  %v8090_v46 = vadd.f32 %v13344_v36, %v13343_v63  ;;  %v6464_v47 = vadd.f32 %v8167_v20, %v6319_v14  ;;  %v8173_v1 = vadd.f32 %v8172_v53, %v8171_v42  ;;  %v6671_v4 = vmul.f32 %v12924_v2, %v12924_v2 }
 0x929   :  { %v6643_v56 = vadd.f32 %v6642_v61, %v12904_v60  ;;  %v6670_v35 = vmul.f32 %v12904_v60, %v12904_v60  ;;  %v6684_v3 = vadd.f32 %v6683_v11, %v6669_v37  ;;  %v6584_v57 = vadd.f32 %v6583_v51, %v6439_v16 }
 0x92a   :  { %v8669_v39 = vpop.f32.mrf.mxu1  ;;  %v12918_v62 = vmax.f32 %v6589_v21, 0.0  ;;  %v6324_v38 = vadd.f32 %v8090_v46, %v13346_v26  ;;  %v6474_v61 = vadd.f32 %v8173_v1, %v6329_v19 }
 0x92b   :  { %v6599_v44 = vadd.f32 %v8669_v39, %v6454_v13  ;;  %v12926_v49 = vmax.f32 %v6584_v57, 0.0  ;;  %v6644_v54 = vadd.f32 %v6643_v56, %v12924_v2  ;;  %v6685_v33 = vadd.f32 %v6684_v3, %v6670_v35 }
 0x92c   :  { %v6593_v27 = vpop.f32.mrf.mxu1  ;;  %v6673_v17 = vmul.f32 %v12918_v62, %v12918_v62  ;;  %v6469_v37 = vadd.f32 %v8170_v29, %v6324_v38 }
 0x92d   :  { %v6594_v25 = vadd.f32 %v6593_v27, %v6449_v31  ;;  %v6672_v32 = vmul.f32 %v12926_v49, %v12926_v49  ;;  %v6651_v18 = vadd.f32 %v12918_v62, %v12926_v49  ;;  %v12936_v24 = vmax.f32 %v6599_v44, 0.0 }
 0x92e   :  { %v8672_v41 = vpop.f32.mrf.mxu1  ;;  %v6686_v42 = vadd.f32 %v6685_v33, %v6671_v4  ;;  %v6645_v28 = vrot.slane %v6644_v54, 4 }
 0x92f   :  { %v12938_v6 = vmax.f32 %v6594_v25, 0.0  ;;  %v6609_v52 = vadd.f32 %v8672_v41, %v6464_v47  ;;  %v6693_v45 = vadd.f32 %v6673_v17, %v6672_v32  ;;  %v6675_v34 = vmul.f32 %v12936_v24, %v12936_v24 }
 0x930   :  { %v6603_v15 = vpop.f32.mrf.mxu1  ;;  %v6687_v56 = vrot.slane %v6686_v42, 4  ;;  %v6646_v57 = vadd.f32 %v6645_v28, %v6644_v54 }
 0x931   :  { %v6652_v58 = vadd.f32 %v6651_v18, %v12938_v6  ;;  %v6674_v10 = vmul.f32 %v12938_v6, %v12938_v6  ;;  %v6604_v11 = vadd.f32 %v6603_v15, %v6459_v55  ;;  %v12949_v48 = vmax.f32 %v6609_v52, 0.0 }
 0x932   :  { %v8675_v21 = vpop.f32.mrf.mxu1  ;;  %v6688_v44 = vadd.f32 %v6687_v56, %v6686_v42  ;;  %v6647_v46 = vrot.slane %v6646_v57, 2 }
 0x933   :  { %v6694_v16 = vadd.f32 %v6693_v45, %v6674_v10  ;;  %v6653_v51 = vadd.f32 %v6652_v58, %v12936_v24  ;;  %v12951_v59 = vmax.f32 %v6604_v11, 0.0  ;;  %v6619_v8 = vadd.f32 %v8675_v21, %v6474_v61 }
 0x934   :  { %v6613_v20 = vpop.f32.mrf.mxu1  ;;  %v6677_v12 = vmul.f32 %v12949_v48, %v12949_v48  ;;  %v6689_v29 = vrot.slane %v6688_v44, 2  ;;  %v6648_v55 = vadd.f32 %v6647_v46, %v6646_v57 }
 0x935   :  { %v6695_v13 = vadd.f32 %v6694_v16, %v6675_v34  ;;  %v6614_v31 = vadd.f32 %v6613_v20, %v6469_v37  ;;  %v6654_v35 = vadd.f32 %v6653_v51, %v12951_v59  ;;  %v6676_v3 = vmul.f32 %v12951_v59, %v12951_v59 }
 0x936   :  { %v12960_v22 = vmax.f32 %v6619_v8, 0.0  ;;  %v6690_v33 = vadd.f32 %v6689_v29, %v6688_v44  ;;  %v6649_v17 = vrot.slane %v6648_v55, 1  ;;  %v13347_v8 = vld [vmem:[#allocation49_spill] sm:$0xff] }
 0x937   :  { %v12956_v39 = vmax.f32 %v6614_v31, 0.0  ;;  %v6696_v40 = vadd.f32 %v6695_v13, %v6676_v3  ;;  %v6655_v14 = vadd.f32 %v6654_v35, %v12949_v48  ;;  %v13348_v3 = vld [vmem:[#allocation50_spill] sm:$0xff] }
 0x938   :  { %v6679_v43 = vmul.f32 %v12960_v22, %v12960_v22  ;;  %v6691_v4 = vrot.slane %v6690_v33, 1  ;;  %v6650_v52 = vadd.f32 %v6649_v17, %v6648_v55 }
 0x939   :  { %v6678_v53 = vmul.f32 %v12956_v39, %v12956_v39  ;;  %v6656_v63 = vadd.f32 %v6655_v14, %v12956_v39  ;;  %v6697_v36 = vadd.f32 %v6696_v40, %v6677_v12 }
 0x93a   :  { %v6692_v10 = vadd.f32 %v6691_v4, %v6690_v33 }
 0x93b   :  { %v6657_v23 = vadd.f32 %v6656_v63, %v12960_v22  ;;  %v6698_v27 = vadd.f32 %v6697_v36, %v6678_v53 }
 0x93d   :  { %v6658_v25 = vrot.slane %v6657_v23, 4  ;;  %v6699_v47 = vadd.f32 %v6698_v27, %v6679_v43 }
 0x93f   :  { %v6659_v1 = vadd.f32 %v6658_v25, %v6657_v23  ;;  %v6700_v54 = vrot.slane %v6699_v47, 4 }
 0x941   :  { %v6660_v32 = vrot.slane %v6659_v1, 2  ;;  %v6701_v41 = vadd.f32 %v6700_v54, %v6699_v47  ;;  %v7161_v47 = vld [vmem:[%s13024_s17] ss:$0 sm:$0xff] }
 0x943   :  { %v6661_v18 = vadd.f32 %v6660_v32, %v6659_v1  ;;  %v6702_v26 = vrot.slane %v6701_v41, 2 }
 0x945   :  { %v6662_v38 = vrot.slane %v6661_v18, 1  ;;  %v6703_v19 = vadd.f32 %v6702_v26, %v6701_v41 }
 0x947   :  { %v6663_v15 = vadd.f32 %v6662_v38, %v6661_v18  ;;  %v6704_v45 = vrot.slane %v6703_v19, 1 }
 0x949   :  { %v6724_v58 = vsel %vm1191_vm5, %v6663_v15, %v6650_v52  ;;  %v6705_v42 = vadd.f32 %v6704_v45, %v6703_v19 }
 0x94a   :  { %8709 = vmatmul.mubr.f32.vlgmr.msra.gmra.mxu0 %v6724_v58 }
 0x94b   :  { %v6798_v11 = vsel %vm1191_vm5, %v6705_v42, %v6692_v10 }
 0x94c   :  { %8744 = vmatmul.mubr.f32.vlgmr.msra.gmra.mxu1 %v6798_v11 }
 0xa0a   :  { %v6792_v61 = vpop.f32.mrf.mxu0 }
 0xa0b   :  { %v6870_v21 = vmul.f32 %v6792_v61, %v6792_v61  ;;  %v6881_v20 = vrot.slane %v6792_v61, %v13347_v8 }
 0xa0c   :  { %v8710_v37 = vpop.f32.mrf.mxu0  ;;  %v6866_v28 = vpop.f32.mrf.mxu1 }
 0xa0d   :  { %v6871_v34 = vsub.f32 %v6866_v28, %v6870_v21  ;;  %v6882_v13 = vcombine.high %v6881_v20, %v6881_v20  ;;  %v6889_v31 = vrot.slane %v6881_v20, %v13347_v8 }
 0xa0e   :  { %v8745_v16 = vpop.f32.mrf.mxu1 }
 0xa0f   :  { %v6872_v51 = vadd.f32 1e-05, %v6871_v34  ;;  %v6896_v56 = vrot.slane %v6882_v13, %v13347_v8  ;;  %v6900_v57 = vrot.slane %v6889_v31, %v13348_v3 }
 0xa11   :  { %8763 = vrsqrt.f32 %v6872_v51  ;;  %v6904_v40 = vrot.slane %v6896_v56, %v13348_v3  ;;  %v6907_v36 = vsub.f32 %v12850_v0, %v6900_v57  ;;  %v6908_v46 = vsub.f32 %v12848_v50, %v6900_v57 }
 0xa12   :  { %v6909_v55 = vsub.f32 %v12871_v5, %v6900_v57  ;;  %v6910_v50 = vsub.f32 %v12869_v9, %v6900_v57  ;;  %v6911_v17 = vsub.f32 %v12886_v7, %v6900_v57  ;;  %v6912_v18 = vsub.f32 %v12893_v30, %v6900_v57 }
 0xa13   :  { %v6915_v43 = vsub.f32 %v12926_v49, %v6904_v40  ;;  %v6916_v27 = vsub.f32 %v12918_v62, %v6904_v40  ;;  %v6917_v1 = vsub.f32 %v12938_v6, %v6904_v40  ;;  %v6918_v49 = vsub.f32 %v12936_v24, %v6904_v40  ;;  %v7162_v6 = vld [vmem:[%s13025_s18] ss:$0 sm:$0xff]  ;;  %s8883_s18 = smov [#allocation15]  }
 0xa14   :  { %v6913_v26 = vsub.f32 %v12904_v60, %v6900_v57  ;;  %v6919_v5 = vsub.f32 %v12951_v59, %v6904_v40  ;;  %v6914_v4 = vsub.f32 %v12924_v2, %v6900_v57  ;;  %v6920_v52 = vsub.f32 %v12949_v48, %v6904_v40  ;;  %s7057_s28 = sshll.u32 %s8883_s18, 4  ;;  %s7058_s28 = int_to_ptr.vmem [resolvable:$true] %s7057_s28 }
 0xa15   :  { %v6921_v59 = vsub.f32 %v12956_v39, %v6904_v40  ;;  %v6922_v10 = vsub.f32 %v12960_v22, %v6904_v40  ;;  %s8845_s6 = scalar_lea.vmem %s7058_s28, 32  ;;  %p8850_p7 = scmp.lt.s32.totalorder %s7058_s28, %s7058_s28 }
 0xa16   :  { %p8846_p6 = scmp.ne.s32.totalorder %s7058_s28, %s8845_s6  ;;  %p8851_p8 = scmp.lt.s32.totalorder %s8845_s6, %s8845_s6 }
 0xa18   :  { %p8852_p9 = por %p8851_p8, %p8850_p7 }
 0xa1a   :  { %p8853_p10 = pnand %p8852_p9, %p8846_p6 }
 0xa1e   :  { %v8764_v35 = vpop.eup %8763 }
 0xa1f   :  { %v6930_v12 = vrot.slane %v8764_v35, %v13347_v8 }
 0xa21   :  { %v6931_v14 = vcombine.high %v6930_v12, %v6930_v12  ;;  %v6938_v53 = vrot.slane %v6930_v12, %v13347_v8 }
 0xa23   :  { %v6945_v44 = vrot.slane %v6931_v14, %v13347_v8  ;;  %v6949_v63 = vrot.slane %v6938_v53, %v13348_v3 }
 0xa25   :  { %v6953_v23 = vrot.slane %v6945_v44, %v13348_v3  ;;  %v6956_v29 = vmul.f32 %v6949_v63, %v6907_v36  ;;  %v6957_v25 = vmul.f32 %v6949_v63, %v6908_v46  ;;  %v6958_v33 = vmul.f32 %v6949_v63, %v6909_v55 }
 0xa26   :  { %v6959_v38 = vmul.f32 %v6949_v63, %v6910_v50  ;;  %v6960_v15 = vmul.f32 %v6949_v63, %v6911_v17  ;;  %v6961_v42 = vmul.f32 %v6949_v63, %v6912_v18  ;;  %v6962_v34 = vmul.f32 %v6949_v63, %v6913_v26 }
 0xa27   :  { %v6964_v54 = vmul.f32 %v6953_v23, %v6915_v43  ;;  %v6965_v0 = vmul.f32 %v6953_v23, %v6916_v27  ;;  %v6966_v32 = vmul.f32 %v6953_v23, %v6917_v1  ;;  %v6979_v41 = vmul.f32 %v7161_v47, %v6956_v29 }
 0xa28   :  { %v6980_v62 = vmul.f32 %v7161_v47, %v6957_v25  ;;  %v6967_v9 = vmul.f32 %v6953_v23, %v6918_v49  ;;  %v6968_v7 = vmul.f32 %v6953_v23, %v6919_v5  ;;  %v6981_v45 = vmul.f32 %v7161_v47, %v6958_v33 }
 0xa29   :  { %v6987_v19 = vmul.f32 %v7161_v47, %v6964_v54  ;;  %v6988_v24 = vmul.f32 %v7161_v47, %v6965_v0  ;;  %v6989_v30 = vmul.f32 %v7161_v47, %v6966_v32  ;;  %v7002_v58 = vadd.f32 %v7162_v6, %v6979_v41 }
 0xa2a   :  { %v7003_v60 = vadd.f32 %v7162_v6, %v6980_v62  ;;  %v6969_v11 = vmul.f32 %v6953_v23, %v6920_v52  ;;  %v6982_v61 = vmul.f32 %v7161_v47, %v6959_v38  ;;  %v6990_v21 = vmul.f32 %v7161_v47, %v6967_v9 }
 0xa2b   :  { %v7010_v37 = vadd.f32 %v7162_v6, %v6987_v19  ;;  %v7011_v28 = vadd.f32 %v7162_v6, %v6988_v24  ;;  %v6970_v2 = vmul.f32 %v6953_v23, %v6921_v59  ;;  %v6983_v16 = vmul.f32 %v7161_v47, %v6960_v15 }
 0xa2c   :  { %v6991_v48 = vmul.f32 %v7161_v47, %v6968_v7  ;;  %v7004_v51 = vadd.f32 %v7162_v6, %v6981_v45  ;;  %v7012_v8 = vadd.f32 %v7162_v6, %v6989_v30  ;;  %v7018_v20 = vadd.f32 %v7003_v60, %v7002_v58 }
 0xa2d   :  { %v7031_v13 = vadd.f32 %v7011_v28, %v7010_v37  ;;  %v6963_v31 = vmul.f32 %v6949_v63, %v6914_v4  ;;  %v6971_v56 = vmul.f32 %v6953_v23, %v6922_v10  ;;  %v6984_v35 = vmul.f32 %v7161_v47, %v6961_v42 }
 0xa2e   :  { %v6992_v39 = vmul.f32 %v7161_v47, %v6969_v11  ;;  %v7005_v3 = vadd.f32 %v7162_v6, %v6982_v61  ;;  %v7013_v22 = vadd.f32 %v7162_v6, %v6990_v21  ;;  %v7019_v57 = vadd.f32 %v7018_v20, %v7004_v51 }
 0xa2f   :  { %v7032_v12 = vadd.f32 %v7031_v13, %v7012_v8  ;;  %v6985_v40 = vmul.f32 %v7161_v47, %v6962_v34  ;;  %v6993_v14 = vmul.f32 %v7161_v47, %v6970_v2  ;;  %v7006_v53 = vadd.f32 %v7162_v6, %v6983_v16 }
 0xa30   :  { %v7014_v44 = vadd.f32 %v7162_v6, %v6991_v48  ;;  %v7020_v36 = vadd.f32 %v7019_v57, %v7005_v3  ;;  %v6986_v43 = vmul.f32 %v7161_v47, %v6963_v31  ;;  %v6994_v27 = vmul.f32 %v7161_v47, %v6971_v56 }
 0xa31   :  { %v7033_v46 = vadd.f32 %v7032_v12, %v7013_v22  ;;  %v7007_v29 = vadd.f32 %v7162_v6, %v6984_v35  ;;  %v7015_v25 = vadd.f32 %v7162_v6, %v6992_v39  ;;  %v7008_v63 = vadd.f32 %v7162_v6, %v6985_v40 }
 0xa32   :  { %v7021_v55 = vadd.f32 %v7020_v36, %v7006_v53  ;;  %v7016_v23 = vadd.f32 %v7162_v6, %v6993_v14  ;;  %v7009_v50 = vadd.f32 %v7162_v6, %v6986_v43  ;;  %v7017_v49 = vadd.f32 %v7162_v6, %v6994_v27 }
 0xa33   :  { %v7034_v1 = vadd.f32 %v7033_v46, %v7014_v44 }
 0xa34   :  { %v7022_v54 = vadd.f32 %v7021_v55, %v7007_v29 }
 0xa35   :  { %v7035_v0 = vadd.f32 %v7034_v1, %v7015_v25 }
 0xa36   :  { %v7023_v33 = vadd.f32 %v7022_v54, %v7008_v63 }
 0xa37   :  { %v7036_v32 = vadd.f32 %v7035_v0, %v7016_v23 }
 0xa38   :  { %v7024_v41 = vadd.f32 %v7023_v33, %v7009_v50 }
 0xa39   :  { %v7037_v62 = vadd.f32 %v7036_v32, %v7017_v49 }
 0xa3a   :  { %v7025_v17 = vrot.slane %v7024_v41, 4 }
 0xa3b   :  { %v7038_v18 = vrot.slane %v7037_v62, 4 }
 0xa3c   :  { %v7026_v26 = vadd.f32 %v7025_v17, %v7024_v41 }
 0xa3d   :  { %v7039_v5 = vadd.f32 %v7038_v18, %v7037_v62 }
 0xa3e   :  { %v7027_v38 = vrot.slane %v7026_v26, 2 }
 0xa3f   :  { %v7040_v47 = vrot.slane %v7039_v5, 2 }
 0xa40   :  { %v7028_v9 = vadd.f32 %v7027_v38, %v7026_v26 }
 0xa41   :  { %v7041_v19 = vadd.f32 %v7040_v47, %v7039_v5 }
 0xa42   :  { %v7029_v24 = vrot.slane %v7028_v9, 1 }
 0xa43   :  { %v7042_v4 = vrot.slane %v7041_v19, 1 }
 0xa44   :  { %v7030_v52 = vadd.f32 %v7029_v24, %v7028_v9 }
 0xa45   :  { %v7043_v15 = vadd.f32 %v7042_v4, %v7041_v19 }
 0xa46   :  { %v7044_v7 = vmul.f32 0.015625, %v7030_v52 }
 0xa47   :  { %v7045_v6 = vmul.f32 0.015625, %v7043_v15 }
 0xa49   :  { %v7048_v45 = vsel %vm1191_vm5, %v7045_v6, %v7044_v7 }
 0xa4a   :  { %7050 = vst [vmem:[#allocation15] sm:$0x3] %v7048_v45 }
 0xa4b   :  { %8856 = shalt.err (!%p8853_p10)
}
 0xa4c   :  { %7060 = dma.vmem_to_hbm [thread:$0]  %s7058_s28, 32, %s13026_s19, [#allocation9]  }
 0xa4d   :  { %8871 = dma.done.wait [#allocation9], 32  }
 0xa4e   :  { %8872 = vsyncadd [#allocation9], 4294967264 }
 0xa4f   :  { %7064 = vsyncpa [#allocation8], 1 }
 0xa50   :  { %7065 = vsyncpa [#allocation11], 1 }
 0xa51   :  { %7066 = vsyncpa [#allocation14], 1 }
 0xa52   :  { %7067 = vsyncpa [#allocation9], 1 }

</bundles_post_ra>
